<compile_context>
chip_gen: v5e
topology: v5e:2x2
jax: 0.10.0
libtpu: 0.0.40
codegen_flags: <defaults>
</compile_context>

<pallas_src>
import math
from functools import partial

import jax
import jax.numpy as jnp
from jax import lax
from jax.experimental import pallas as pl
from jax.experimental.pallas import tpu as pltpu


def _cattention_kernel(*refs, num_heads, inv_sqrt_d, b_blk, n_win_blk,
                       has_mask, fast_bf16):
    # refs: q_ref, k_ref, v_ref, [mask_ref], o_ref
    #   q/k/v/o refs: (b_blk, N, C) VMEM tiles (b_blk batch elements per step)
    #   mask_ref    : (n_win_blk, N, N) additive mask tile in its storage dtype
    if has_mask:
        q_ref, k_ref, v_ref, mask_ref, o_ref = refs
    else:
        q_ref, k_ref, v_ref, o_ref = refs
        mask_ref = None

    C = q_ref.shape[-1]
    D = C // num_heads
    f32 = jnp.float32

    in_dtype = q_ref.dtype
    # Opt-in: run the MXU with bf16 operands when the inputs are f32.
    mm_dtype = jnp.bfloat16 if (fast_bf16 and in_dtype == f32) else in_dtype
    prec = lax.Precision.HIGHEST if mm_dtype == f32 else lax.Precision.DEFAULT

    for j in range(b_blk):                      # static unroll over batch elems
        if has_mask:
            # Batch element j of this block has window index j % n_win_blk
            # (block starts are multiples of nW on the resident-mask path;
            #  n_win_blk == 1 on the streamed / per-window path).
            m = mask_ref[j % n_win_blk].astype(f32)     # hoisted above head loop

        q_j = q_ref[j].astype(mm_dtype)          # (N, C)
        k_j = k_ref[j].astype(mm_dtype)
        v_j = v_ref[j].astype(mm_dtype)

        for h in range(num_heads):               # static unroll over heads
            lo = h * D
            qh = q_j[:, lo:lo + D]
            kh = k_j[:, lo:lo + D]
            vh = v_j[:, lo:lo + D]

            # scores: contract the last (D) dims -> no k^T materialization
            s = lax.dot_general(qh, kh, (((1,), (1,)), ((), ())),
                                preferred_element_type=f32, precision=prec)
            if has_mask:
                s = s + m
            s = s * inv_sqrt_d                   # scale AFTER mask add (torch order)

            # numerically-stable softmax along keys
            s_max = jnp.max(s, axis=-1, keepdims=True)
            if fast_bf16:
                p = jnp.exp((s - s_max).astype(jnp.bfloat16))   # bf16 EUP exp
                denom = jnp.sum(p.astype(f32), axis=-1, keepdims=True)
                inv_denom = pl.reciprocal(denom, approx=True)
            else:
                p = jnp.exp(s - s_max)
                denom = jnp.sum(p, axis=-1, keepdims=True)
                inv_denom = 1.0 / denom                          # exact

            # P @ V with f32 accumulation; normalize after the matmul.
            oh = jnp.dot(p.astype(mm_dtype), vh,
                         preferred_element_type=f32, precision=prec)
            oh = oh * inv_denom

            # per-head store (no H-wide concatenate; bounds live ranges)
            o_ref[j, :, lo:lo + D] = oh.astype(o_ref.dtype)


def cattention_forward(q, k, v, num_heads, mask=None, dimensions=None, *,
                       fast_bf16=False,
                       tile_bytes_target=1 << 20,
                       max_batch_block=32,
                       max_resident_mask_bytes=8 << 20):
    """JAX/Pallas equivalent of CAttention.forward (`dimensions` is unused there)."""
    del dimensions
    B_, N, C = q.shape
    assert C % num_heads == 0
    D = C // num_heads
    inv_sqrt_d = 1.0 / math.sqrt(D)

    per_batch_bytes = N * C * q.dtype.itemsize

    def _divisor_at_most(total, cap):
        g = max(1, min(total, cap))
        while total % g:
            g -= 1
        return g

    args = [q, k, v]

    if mask is None:
        b_blk = _divisor_at_most(
            B_, min(max_batch_block,
                    max(1, tile_bytes_target // max(per_batch_bytes, 1))))
        grid = (B_ // b_blk,)
        qkv_spec = pl.BlockSpec((b_blk, N, C), lambda i: (i, 0, 0))
        in_specs = [qkv_spec, qkv_spec, qkv_spec]
        out_spec = pl.BlockSpec((b_blk, N, C), lambda i: (i, 0, 0))
        dims = ("parallel",)
        n_win_blk = 1
        mask_block_bytes = 0
    else:
        nW = mask.shape[0]
        assert B_ % nW == 0
        b_per_w = B_ // nW
        mask_bytes = nW * N * N * mask.dtype.itemsize
        args.append(mask)

        if mask_bytes <= max_resident_mask_bytes:
            # Resident-mask path: contiguous batch blocks of g*nW elements; the
            # full (nW,N,N) mask block has a constant index_map, so Pallas
            # fetches it once and reuses it for every grid step.
            g_cap = min(max(1, max_batch_block // nW),
                        max(1, tile_bytes_target // max(nW * per_batch_bytes, 1)))
            g = _divisor_at_most(b_per_w, g_cap)
            b_blk = g * nW
            grid = (B_ // b_blk,)
            qkv_spec = pl.BlockSpec((b_blk, N, C), lambda i: (i, 0, 0))
            in_specs = [qkv_spec, qkv_spec, qkv_spec,
                        pl.BlockSpec((nW, N, N), lambda i: (0, 0, 0))]
            out_spec = pl.BlockSpec((b_blk, N, C), lambda i: (i, 0, 0))
            dims = ("parallel",)
            n_win_blk = nW
            mask_block_bytes = mask_bytes
        else:
            # Streamed path: 2-D grid (nW, B_/nW); the mask block index depends
            # only on the outer (window) axis, so it is DMA'd once per window
            # and reused across all inner (batch) steps.
            b_blk = 1
            grid = (nW, b_per_w)
            qkv_spec = pl.BlockSpec((1, N, C), lambda w, i: (i * nW + w, 0, 0))
            in_specs = [qkv_spec, qkv_spec, qkv_spec,
                        pl.BlockSpec((1, N, N), lambda w, i: (w, 0, 0))]
            out_spec = pl.BlockSpec((1, N, C), lambda w, i: (i * nW + w, 0, 0))
            dims = ("parallel", "parallel")
            n_win_blk = 1
            mask_block_bytes = 2 * N * N * mask.dtype.itemsize

    # Explicit VMEM budget: double-buffered q/k/v/out blocks + mask block +
    # headroom for the per-head f32 score/prob tiles and compiler scratch.
    block_bytes = b_blk * N * C * q.dtype.itemsize
    est = 2 * 4 * block_bytes + 2 * mask_block_bytes + 6 * N * N * 4 + (2 << 20)
    vmem_limit = int(max(32 << 20, min(2 * est, 56 << 20)))

    kernel = partial(_cattention_kernel, num_heads=num_heads,
                     inv_sqrt_d=inv_sqrt_d, b_blk=b_blk, n_win_blk=n_win_blk,
                     has_mask=mask is not None, fast_bf16=fast_bf16)

    return pl.pallas_call(
        kernel,
        out_shape=jax.ShapeDtypeStruct((B_, N, C), q.dtype),
        grid_spec=pltpu.PrefetchScalarGridSpec(
            num_scalar_prefetch=0,
            grid=grid,
            in_specs=in_specs,
            out_specs=out_spec),
        compiler_params=pltpu.CompilerParams(
            dimension_semantics=dims,
            vmem_limit_bytes=vmem_limit),
    )(*args)


def _reference_forward(q, k, v, num_heads, mask=None):
    """Pure-JAX reference mirroring the PyTorch forward exactly."""
    B_, N, C = q.shape
    D = C // num_heads

    def sep(x):
        return x.reshape(B_, N, num_heads, D).transpose(0, 2, 1, 3)

    qh, kh, vh = sep(q), sep(k), sep(v)
    attn = jnp.einsum("bhnd,bhmd->bhnm", qh, kh, precision="highest")
    if mask is not None:
        nW = mask.shape[0]
        attn = (attn.reshape(B_ // nW, nW, num_heads, N, N)
                + mask[None, :, None].astype(attn.dtype))
        attn = attn.reshape(B_, num_heads, N, N)
    attn = attn / math.sqrt(D)
    attn = jax.nn.softmax(attn, axis=-1)
    out = jnp.einsum("bhnm,bhmd->bhnd", attn, vh, precision="highest")
    return out.transpose(0, 2, 1, 3).reshape(B_, N, C)


if __name__ == "__main__":
    # Small deterministic example: batch=2, windows nW=2 -> B_=4, tokens N=8,
    # embedding C=32, heads=8 (c_per_head=4), matching CAttention(32, 8).
    num_heads = 8
    B, nW, N, C = 2, 2, 8, 32
    B_ = B * nW

    key = jax.random.PRNGKey(0)
    kq, kk, kv, km = jax.random.split(key, 4)
    q = jax.random.normal(kq, (B_, N, C), dtype=jnp.float32)
    k = jax.random.normal(kk, (B_, N, C), dtype=jnp.float32)
    v = jax.random.normal(kv, (B_, N, C), dtype=jnp.float32)
    mask = jax.random.normal(km, (nW, N, N), dtype=jnp.float32)

    ref = _reference_forward(q, k, v, num_heads, mask=mask)

    # masked path, resident-mask variant (mask DMA'd once for the whole kernel)
    out = jax.block_until_ready(cattention_forward(q, k, v, num_heads, mask=mask))
    assert out.shape == (B_, N, C)
    assert jnp.allclose(out, ref, atol=5e-3, rtol=5e-3), "mismatch (masked, resident)"

    # masked path, per-window streamed variant (forced by a zero residency budget)
    out_w = jax.block_until_ready(
        cattention_forward(q, k, v, num_heads, mask=mask,
                           max_resident_mask_bytes=0))
    assert jnp.allclose(out_w, ref, atol=5e-3, rtol=5e-3), "mismatch (masked, streamed)"

    # mask-free path (no mask DMA / add at all)
    out_nm = jax.block_until_ready(cattention_forward(q, k, v, num_heads, mask=None))
    ref_nm = _reference_forward(q, k, v, num_heads, mask=None)
    assert jnp.allclose(out_nm, ref_nm, atol=5e-3, rtol=5e-3), "mismatch (no mask)"

    print("KERNEL_OK")
</pallas_src>

<mosaic_0001>
module attributes {stable_mosaic.version = 11 : i64} {
  func.func @_cattention_kernel(%arg0: i32, %arg1: memref<4x8x32xf32, #tpu.memory_space<vmem>>, %arg2: memref<4x8x32xf32, #tpu.memory_space<vmem>>, %arg3: memref<4x8x32xf32, #tpu.memory_space<vmem>>, %arg4: memref<2x8x8xf32, #tpu.memory_space<vmem>>, %arg5: memref<4x8x32xf32, #tpu.memory_space<vmem>>) attributes {dimension_semantics = [#tpu.dimension_semantics<parallel>], iteration_bounds = array<i64: 1>, scalar_prefetch = 0 : i64, scratch_operands = 0 : i64, tpu.core_type = #tpu.core_type<tc>, window_params = [{transform_indices = @transform_0, window_bounds = array<i64: 4, 8, 32>}, {transform_indices = @transform_1, window_bounds = array<i64: 4, 8, 32>}, {transform_indices = @transform_2, window_bounds = array<i64: 4, 8, 32>}, {pipeline_mode = #tpu.pipeline_mode<synchronous>, transform_indices = @transform_3, window_bounds = array<i64: 2, 8, 8>}, {transform_indices = @transform_4, window_bounds = array<i64: 4, 8, 32>}]} {
    %c0 = arith.constant 0 : index
    %c0_0 = arith.constant 0 : index
    %c0_1 = arith.constant 0 : index
    %0 = vector.load %arg4[%c0, %c0_0, %c0_1] : memref<2x8x8xf32, #tpu.memory_space<vmem>>, vector<1x8x8xf32>
    %1 = vector.shape_cast %0 : vector<1x8x8xf32> to vector<8x8xf32>
    %c0_2 = arith.constant 0 : index
    %c0_3 = arith.constant 0 : index
    %c0_4 = arith.constant 0 : index
    %2 = vector.load %arg1[%c0_2, %c0_3, %c0_4] : memref<4x8x32xf32, #tpu.memory_space<vmem>>, vector<1x8x32xf32>
    %3 = vector.shape_cast %2 : vector<1x8x32xf32> to vector<8x32xf32>
    %c0_5 = arith.constant 0 : index
    %c0_6 = arith.constant 0 : index
    %c0_7 = arith.constant 0 : index
    %4 = vector.load %arg2[%c0_5, %c0_6, %c0_7] : memref<4x8x32xf32, #tpu.memory_space<vmem>>, vector<1x8x32xf32>
    %5 = vector.shape_cast %4 : vector<1x8x32xf32> to vector<8x32xf32>
    %c0_8 = arith.constant 0 : index
    %c0_9 = arith.constant 0 : index
    %c0_10 = arith.constant 0 : index
    %6 = vector.load %arg3[%c0_8, %c0_9, %c0_10] : memref<4x8x32xf32, #tpu.memory_space<vmem>>, vector<1x8x32xf32>
    %7 = vector.shape_cast %6 : vector<1x8x32xf32> to vector<8x32xf32>
    %8 = vector.extract_strided_slice %3 {offsets = [0, 0], sizes = [8, 4], strides = [1, 1]} : vector<8x32xf32> to vector<8x4xf32>
    %9 = vector.extract_strided_slice %5 {offsets = [0, 0], sizes = [8, 4], strides = [1, 1]} : vector<8x32xf32> to vector<8x4xf32>
    %10 = vector.extract_strided_slice %7 {offsets = [0, 0], sizes = [8, 4], strides = [1, 1]} : vector<8x32xf32> to vector<8x4xf32>
    %cst = arith.constant dense<0.000000e+00> : vector<8x8xf32>
    %11 = tpu.matmul %8, %9, %cst {dimension_numbers = #tpu.dot_dimension_numbers<[1], [1], [0], [0], [0, 0, 1, 0], [], []>, precision = #tpu.contract_precision<fp32>} : vector<8x4xf32>, vector<8x4xf32>, vector<8x8xf32> -> vector<8x8xf32>
    %12 = arith.addf %11, %1 : vector<8x8xf32>
    %cst_11 = arith.constant 5.000000e-01 : f32
    %13 = vector.broadcast %cst_11 : f32 to vector<8x8xf32>
    %14 = arith.mulf %12, %13 : vector<8x8xf32>
    %cst_12 = arith.constant dense<0xFF800000> : vector<8xf32>
    %15 = vector.multi_reduction <maximumf>, %14, %cst_12 [1] : vector<8x8xf32> to vector<8xf32>
    %16 = vector.shape_cast %15 : vector<8xf32> to vector<8x1xf32>
    %17 = vector.broadcast %16 : vector<8x1xf32> to vector<8x8xf32>
    %18 = arith.subf %14, %17 : vector<8x8xf32>
    %19 = math.exp %18 : vector<8x8xf32>
    %cst_13 = arith.constant dense<0.000000e+00> : vector<8xf32>
    %20 = vector.multi_reduction <add>, %19, %cst_13 [1] : vector<8x8xf32> to vector<8xf32>
    %21 = vector.shape_cast %20 : vector<8xf32> to vector<8x1xf32>
    %cst_14 = arith.constant 1.000000e+00 : f32
    %22 = vector.broadcast %cst_14 : f32 to vector<8x1xf32>
    %23 = arith.divf %22, %21 : vector<8x1xf32>
    %cst_15 = arith.constant dense<0.000000e+00> : vector<8x4xf32>
    %24 = tpu.matmul %19, %10, %cst_15 {dimension_numbers = #tpu.dot_dimension_numbers<[1], [0], [0], [1], [0, 0, 1, 1], [], []>, precision = #tpu.contract_precision<fp32>} : vector<8x8xf32>, vector<8x4xf32>, vector<8x4xf32> -> vector<8x4xf32>
    %25 = vector.broadcast %23 : vector<8x1xf32> to vector<8x4xf32>
    %26 = arith.mulf %24, %25 : vector<8x4xf32>
    %c0_16 = arith.constant 0 : index
    %c0_17 = arith.constant 0 : index
    %c0_18 = arith.constant 0 : index
    %27 = vector.load %arg5[%c0_16, %c0_17, %c0_18] : memref<4x8x32xf32, #tpu.memory_space<vmem>>, vector<1x8x4xf32>
    %28 = vector.shape_cast %27 : vector<1x8x4xf32> to vector<8x4xf32>
    %29 = vector.shape_cast %26 : vector<8x4xf32> to vector<1x8x4xf32>
    tpu.vector_store %arg5[%c0_16, %c0_17, %c0_18], %29 {strides = array<i32>} : memref<4x8x32xf32, #tpu.memory_space<vmem>>, vector<1x8x4xf32>,
    %30 = vector.extract_strided_slice %3 {offsets = [0, 4], sizes = [8, 4], strides = [1, 1]} : vector<8x32xf32> to vector<8x4xf32>
    %31 = vector.extract_strided_slice %5 {offsets = [0, 4], sizes = [8, 4], strides = [1, 1]} : vector<8x32xf32> to vector<8x4xf32>
    %32 = vector.extract_strided_slice %7 {offsets = [0, 4], sizes = [8, 4], strides = [1, 1]} : vector<8x32xf32> to vector<8x4xf32>
    %cst_19 = arith.constant dense<0.000000e+00> : vector<8x8xf32>
    %33 = tpu.matmul %30, %31, %cst_19 {dimension_numbers = #tpu.dot_dimension_numbers<[1], [1], [0], [0], [0, 0, 1, 0], [], []>, precision = #tpu.contract_precision<fp32>} : vector<8x4xf32>, vector<8x4xf32>, vector<8x8xf32> -> vector<8x8xf32>
    %34 = arith.addf %33, %1 : vector<8x8xf32>
    %cst_20 = arith.constant 5.000000e-01 : f32
    %35 = vector.broadcast %cst_20 : f32 to vector<8x8xf32>
    %36 = arith.mulf %34, %35 : vector<8x8xf32>
    %cst_21 = arith.constant dense<0xFF800000> : vector<8xf32>
    %37 = vector.multi_reduction <maximumf>, %36, %cst_21 [1] : vector<8x8xf32> to vector<8xf32>
    %38 = vector.shape_cast %37 : vector<8xf32> to vector<8x1xf32>
    %39 = vector.broadcast %38 : vector<8x1xf32> to vector<8x8xf32>
    %40 = arith.subf %36, %39 : vector<8x8xf32>
    %41 = math.exp %40 : vector<8x8xf32>
    %cst_22 = arith.constant dense<0.000000e+00> : vector<8xf32>
    %42 = vector.multi_reduction <add>, %41, %cst_22 [1] : vector<8x8xf32> to vector<8xf32>
    %43 = vector.shape_cast %42 : vector<8xf32> to vector<8x1xf32>
    %cst_23 = arith.constant 1.000000e+00 : f32
    %44 = vector.broadcast %cst_23 : f32 to vector<8x1xf32>
    %45 = arith.divf %44, %43 : vector<8x1xf32>
    %cst_24 = arith.constant dense<0.000000e+00> : vector<8x4xf32>
    %46 = tpu.matmul %41, %32, %cst_24 {dimension_numbers = #tpu.dot_dimension_numbers<[1], [0], [0], [1], [0, 0, 1, 1], [], []>, precision = #tpu.contract_precision<fp32>} : vector<8x8xf32>, vector<8x4xf32>, vector<8x4xf32> -> vector<8x4xf32>
    %47 = vector.broadcast %45 : vector<8x1xf32> to vector<8x4xf32>
    %48 = arith.mulf %46, %47 : vector<8x4xf32>
    %c0_25 = arith.constant 0 : index
    %c0_26 = arith.constant 0 : index
    %c4 = arith.constant 4 : index
    %49 = vector.load %arg5[%c0_25, %c0_26, %c4] : memref<4x8x32xf32, #tpu.memory_space<vmem>>, vector<1x8x4xf32>
    %50 = vector.shape_cast %49 : vector<1x8x4xf32> to vector<8x4xf32>
    %51 = vector.shape_cast %48 : vector<8x4xf32> to vector<1x8x4xf32>
    tpu.vector_store %arg5[%c0_25, %c0_26, %c4], %51 {strides = array<i32>} : memref<4x8x32xf32, #tpu.memory_space<vmem>>, vector<1x8x4xf32>,
    %52 = vector.extract_strided_slice %3 {offsets = [0, 8], sizes = [8, 4], strides = [1, 1]} : vector<8x32xf32> to vector<8x4xf32>
    %53 = vector.extract_strided_slice %5 {offsets = [0, 8], sizes = [8, 4], strides = [1, 1]} : vector<8x32xf32> to vector<8x4xf32>
    %54 = vector.extract_strided_slice %7 {offsets = [0, 8], sizes = [8, 4], strides = [1, 1]} : vector<8x32xf32> to vector<8x4xf32>
    %cst_27 = arith.constant dense<0.000000e+00> : vector<8x8xf32>
    %55 = tpu.matmul %52, %53, %cst_27 {dimension_numbers = #tpu.dot_dimension_numbers<[1], [1], [0], [0], [0, 0, 1, 0], [], []>, precision = #tpu.contract_precision<fp32>} : vector<8x4xf32>, vector<8x4xf32>, vector<8x8xf32> -> vector<8x8xf32>
    %56 = arith.addf %55, %1 : vector<8x8xf32>
    %cst_28 = arith.constant 5.000000e-01 : f32
    %57 = vector.broadcast %cst_28 : f32 to vector<8x8xf32>
    %58 = arith.mulf %56, %57 : vector<8x8xf32>
    %cst_29 = arith.constant dense<0xFF800000> : vector<8xf32>
    %59 = vector.multi_reduction <maximumf>, %58, %cst_29 [1] : vector<8x8xf32> to vector<8xf32>
    %60 = vector.shape_cast %59 : vector<8xf32> to vector<8x1xf32>
    %61 = vector.broadcast %60 : vector<8x1xf32> to vector<8x8xf32>
    %62 = arith.subf %58, %61 : vector<8x8xf32>
    %63 = math.exp %62 : vector<8x8xf32>
    %cst_30 = arith.constant dense<0.000000e+00> : vector<8xf32>
    %64 = vector.multi_reduction <add>, %63, %cst_30 [1] : vector<8x8xf32> to vector<8xf32>
    %65 = vector.shape_cast %64 : vector<8xf32> to vector<8x1xf32>
    %cst_31 = arith.constant 1.000000e+00 : f32
    %66 = vector.broadcast %cst_31 : f32 to vector<8x1xf32>
    %67 = arith.divf %66, %65 : vector<8x1xf32>
    %cst_32 = arith.constant dense<0.000000e+00> : vector<8x4xf32>
    %68 = tpu.matmul %63, %54, %cst_32 {dimension_numbers = #tpu.dot_dimension_numbers<[1], [0], [0], [1], [0, 0, 1, 1], [], []>, precision = #tpu.contract_precision<fp32>} : vector<8x8xf32>, vector<8x4xf32>, vector<8x4xf32> -> vector<8x4xf32>
    %69 = vector.broadcast %67 : vector<8x1xf32> to vector<8x4xf32>
    %70 = arith.mulf %68, %69 : vector<8x4xf32>
    %c0_33 = arith.constant 0 : index
    %c0_34 = arith.constant 0 : index
    %c8 = arith.constant 8 : index
    %71 = vector.load %arg5[%c0_33, %c0_34, %c8] : memref<4x8x32xf32, #tpu.memory_space<vmem>>, vector<1x8x4xf32>
    %72 = vector.shape_cast %71 : vector<1x8x4xf32> to vector<8x4xf32>
    %73 = vector.shape_cast %70 : vector<8x4xf32> to vector<1x8x4xf32>
    tpu.vector_store %arg5[%c0_33, %c0_34, %c8], %73 {strides = array<i32>} : memref<4x8x32xf32, #tpu.memory_space<vmem>>, vector<1x8x4xf32>,
    %74 = vector.extract_strided_slice %3 {offsets = [0, 12], sizes = [8, 4], strides = [1, 1]} : vector<8x32xf32> to vector<8x4xf32>
    %75 = vector.extract_strided_slice %5 {offsets = [0, 12], sizes = [8, 4], strides = [1, 1]} : vector<8x32xf32> to vector<8x4xf32>
    %76 = vector.extract_strided_slice %7 {offsets = [0, 12], sizes = [8, 4], strides = [1, 1]} : vector<8x32xf32> to vector<8x4xf32>
    %cst_35 = arith.constant dense<0.000000e+00> : vector<8x8xf32>
    %77 = tpu.matmul %74, %75, %cst_35 {dimension_numbers = #tpu.dot_dimension_numbers<[1], [1], [0], [0], [0, 0, 1, 0], [], []>, precision = #tpu.contract_precision<fp32>} : vector<8x4xf32>, vector<8x4xf32>, vector<8x8xf32> -> vector<8x8xf32>
    %78 = arith.addf %77, %1 : vector<8x8xf32>
    %cst_36 = arith.constant 5.000000e-01 : f32
    %79 = vector.broadcast %cst_36 : f32 to vector<8x8xf32>
    %80 = arith.mulf %78, %79 : vector<8x8xf32>
    %cst_37 = arith.constant dense<0xFF800000> : vector<8xf32>
    %81 = vector.multi_reduction <maximumf>, %80, %cst_37 [1] : vector<8x8xf32> to vector<8xf32>
    %82 = vector.shape_cast %81 : vector<8xf32> to vector<8x1xf32>
    %83 = vector.broadcast %82 : vector<8x1xf32> to vector<8x8xf32>
    %84 = arith.subf %80, %83 : vector<8x8xf32>
    %85 = math.exp %84 : vector<8x8xf32>
    %cst_38 = arith.constant dense<0.000000e+00> : vector<8xf32>
    %86 = vector.multi_reduction <add>, %85, %cst_38 [1] : vector<8x8xf32> to vector<8xf32>
    %87 = vector.shape_cast %86 : vector<8xf32> to vector<8x1xf32>
    %cst_39 = arith.constant 1.000000e+00 : f32
    %88 = vector.broadcast %cst_39 : f32 to vector<8x1xf32>
    %89 = arith.divf %88, %87 : vector<8x1xf32>
    %cst_40 = arith.constant dense<0.000000e+00> : vector<8x4xf32>
    %90 = tpu.matmul %85, %76, %cst_40 {dimension_numbers = #tpu.dot_dimension_numbers<[1], [0], [0], [1], [0, 0, 1, 1], [], []>, precision = #tpu.contract_precision<fp32>} : vector<8x8xf32>, vector<8x4xf32>, vector<8x4xf32> -> vector<8x4xf32>
    %91 = vector.broadcast %89 : vector<8x1xf32> to vector<8x4xf32>
    %92 = arith.mulf %90, %91 : vector<8x4xf32>
    %c0_41 = arith.constant 0 : index
    %c0_42 = arith.constant 0 : index
    %c12 = arith.constant 12 : index
    %93 = vector.load %arg5[%c0_41, %c0_42, %c12] : memref<4x8x32xf32, #tpu.memory_space<vmem>>, vector<1x8x4xf32>
    %94 = vector.shape_cast %93 : vector<1x8x4xf32> to vector<8x4xf32>
    %95 = vector.shape_cast %92 : vector<8x4xf32> to vector<1x8x4xf32>
    tpu.vector_store %arg5[%c0_41, %c0_42, %c12], %95 {strides = array<i32>} : memref<4x8x32xf32, #tpu.memory_space<vmem>>, vector<1x8x4xf32>,
    %96 = vector.extract_strided_slice %3 {offsets = [0, 16], sizes = [8, 4], strides = [1, 1]} : vector<8x32xf32> to vector<8x4xf32>
    %97 = vector.extract_strided_slice %5 {offsets = [0, 16], sizes = [8, 4], strides = [1, 1]} : vector<8x32xf32> to vector<8x4xf32>
    %98 = vector.extract_strided_slice %7 {offsets = [0, 16], sizes = [8, 4], strides = [1, 1]} : vector<8x32xf32> to vector<8x4xf32>
    %cst_43 = arith.constant dense<0.000000e+00> : vector<8x8xf32>
    %99 = tpu.matmul %96, %97, %cst_43 {dimension_numbers = #tpu.dot_dimension_numbers<[1], [1], [0], [0], [0, 0, 1, 0], [], []>, precision = #tpu.contract_precision<fp32>} : vector<8x4xf32>, vector<8x4xf32>, vector<8x8xf32> -> vector<8x8xf32>
    %100 = arith.addf %99, %1 : vector<8x8xf32>
    %cst_44 = arith.constant 5.000000e-01 : f32
    %101 = vector.broadcast %cst_44 : f32 to vector<8x8xf32>
    %102 = arith.mulf %100, %101 : vector<8x8xf32>
    %cst_45 = arith.constant dense<0xFF800000> : vector<8xf32>
    %103 = vector.multi_reduction <maximumf>, %102, %cst_45 [1] : vector<8x8xf32> to vector<8xf32>
    %104 = vector.shape_cast %103 : vector<8xf32> to vector<8x1xf32>
    %105 = vector.broadcast %104 : vector<8x1xf32> to vector<8x8xf32>
    %106 = arith.subf %102, %105 : vector<8x8xf32>
    %107 = math.exp %106 : vector<8x8xf32>
    %cst_46 = arith.constant dense<0.000000e+00> : vector<8xf32>
    %108 = vector.multi_reduction <add>, %107, %cst_46 [1] : vector<8x8xf32> to vector<8xf32>
    %109 = vector.shape_cast %108 : vector<8xf32> to vector<8x1xf32>
    %cst_47 = arith.constant 1.000000e+00 : f32
    %110 = vector.broadcast %cst_47 : f32 to vector<8x1xf32>
    %111 = arith.divf %110, %109 : vector<8x1xf32>
    %cst_48 = arith.constant dense<0.000000e+00> : vector<8x4xf32>
    %112 = tpu.matmul %107, %98, %cst_48 {dimension_numbers = #tpu.dot_dimension_numbers<[1], [0], [0], [1], [0, 0, 1, 1], [], []>, precision = #tpu.contract_precision<fp32>} : vector<8x8xf32>, vector<8x4xf32>, vector<8x4xf32> -> vector<8x4xf32>
    %113 = vector.broadcast %111 : vector<8x1xf32> to vector<8x4xf32>
    %114 = arith.mulf %112, %113 : vector<8x4xf32>
    %c0_49 = arith.constant 0 : index
    %c0_50 = arith.constant 0 : index
    %c16 = arith.constant 16 : index
    %115 = vector.load %arg5[%c0_49, %c0_50, %c16] : memref<4x8x32xf32, #tpu.memory_space<vmem>>, vector<1x8x4xf32>
    %116 = vector.shape_cast %115 : vector<1x8x4xf32> to vector<8x4xf32>
    %117 = vector.shape_cast %114 : vector<8x4xf32> to vector<1x8x4xf32>
    tpu.vector_store %arg5[%c0_49, %c0_50, %c16], %117 {strides = array<i32>} : memref<4x8x32xf32, #tpu.memory_space<vmem>>, vector<1x8x4xf32>,
    %118 = vector.extract_strided_slice %3 {offsets = [0, 20], sizes = [8, 4], strides = [1, 1]} : vector<8x32xf32> to vector<8x4xf32>
    %119 = vector.extract_strided_slice %5 {offsets = [0, 20], sizes = [8, 4], strides = [1, 1]} : vector<8x32xf32> to vector<8x4xf32>
    %120 = vector.extract_strided_slice %7 {offsets = [0, 20], sizes = [8, 4], strides = [1, 1]} : vector<8x32xf32> to vector<8x4xf32>
    %cst_51 = arith.constant dense<0.000000e+00> : vector<8x8xf32>
    %121 = tpu.matmul %118, %119, %cst_51 {dimension_numbers = #tpu.dot_dimension_numbers<[1], [1], [0], [0], [0, 0, 1, 0], [], []>, precision = #tpu.contract_precision<fp32>} : vector<8x4xf32>, vector<8x4xf32>, vector<8x8xf32> -> vector<8x8xf32>
    %122 = arith.addf %121, %1 : vector<8x8xf32>
    %cst_52 = arith.constant 5.000000e-01 : f32
    %123 = vector.broadcast %cst_52 : f32 to vector<8x8xf32>
    %124 = arith.mulf %122, %123 : vector<8x8xf32>
    %cst_53 = arith.constant dense<0xFF800000> : vector<8xf32>
    %125 = vector.multi_reduction <maximumf>, %124, %cst_53 [1] : vector<8x8xf32> to vector<8xf32>
    %126 = vector.shape_cast %125 : vector<8xf32> to vector<8x1xf32>
    %127 = vector.broadcast %126 : vector<8x1xf32> to vector<8x8xf32>
    %128 = arith.subf %124, %127 : vector<8x8xf32>
    %129 = math.exp %128 : vector<8x8xf32>
    %cst_54 = arith.constant dense<0.000000e+00> : vector<8xf32>
    %130 = vector.multi_reduction <add>, %129, %cst_54 [1] : vector<8x8xf32> to vector<8xf32>
    %131 = vector.shape_cast %130 : vector<8xf32> to vector<8x1xf32>
    %cst_55 = arith.constant 1.000000e+00 : f32
    %132 = vector.broadcast %cst_55 : f32 to vector<8x1xf32>
    %133 = arith.divf %132, %131 : vector<8x1xf32>
    %cst_56 = arith.constant dense<0.000000e+00> : vector<8x4xf32>
    %134 = tpu.matmul %129, %120, %cst_56 {dimension_numbers = #tpu.dot_dimension_numbers<[1], [0], [0], [1], [0, 0, 1, 1], [], []>, precision = #tpu.contract_precision<fp32>} : vector<8x8xf32>, vector<8x4xf32>, vector<8x4xf32> -> vector<8x4xf32>
    %135 = vector.broadcast %133 : vector<8x1xf32> to vector<8x4xf32>
    %136 = arith.mulf %134, %135 : vector<8x4xf32>
    %c0_57 = arith.constant 0 : index
    %c0_58 = arith.constant 0 : index
    %c20 = arith.constant 20 : index
    %137 = vector.load %arg5[%c0_57, %c0_58, %c20] : memref<4x8x32xf32, #tpu.memory_space<vmem>>, vector<1x8x4xf32>
    %138 = vector.shape_cast %137 : vector<1x8x4xf32> to vector<8x4xf32>
    %139 = vector.shape_cast %136 : vector<8x4xf32> to vector<1x8x4xf32>
    tpu.vector_store %arg5[%c0_57, %c0_58, %c20], %139 {strides = array<i32>} : memref<4x8x32xf32, #tpu.memory_space<vmem>>, vector<1x8x4xf32>,
    %140 = vector.extract_strided_slice %3 {offsets = [0, 24], sizes = [8, 4], strides = [1, 1]} : vector<8x32xf32> to vector<8x4xf32>
    %141 = vector.extract_strided_slice %5 {offsets = [0, 24], sizes = [8, 4], strides = [1, 1]} : vector<8x32xf32> to vector<8x4xf32>
    %142 = vector.extract_strided_slice %7 {offsets = [0, 24], sizes = [8, 4], strides = [1, 1]} : vector<8x32xf32> to vector<8x4xf32>
    %cst_59 = arith.constant dense<0.000000e+00> : vector<8x8xf32>
    %143 = tpu.matmul %140, %141, %cst_59 {dimension_numbers = #tpu.dot_dimension_numbers<[1], [1], [0], [0], [0, 0, 1, 0], [], []>, precision = #tpu.contract_precision<fp32>} : vector<8x4xf32>, vector<8x4xf32>, vector<8x8xf32> -> vector<8x8xf32>
    %144 = arith.addf %143, %1 : vector<8x8xf32>
    %cst_60 = arith.constant 5.000000e-01 : f32
    %145 = vector.broadcast %cst_60 : f32 to vector<8x8xf32>
    %146 = arith.mulf %144, %145 : vector<8x8xf32>
    %cst_61 = arith.constant dense<0xFF800000> : vector<8xf32>
    %147 = vector.multi_reduction <maximumf>, %146, %cst_61 [1] : vector<8x8xf32> to vector<8xf32>
    %148 = vector.shape_cast %147 : vector<8xf32> to vector<8x1xf32>
    %149 = vector.broadcast %148 : vector<8x1xf32> to vector<8x8xf32>
    %150 = arith.subf %146, %149 : vector<8x8xf32>
    %151 = math.exp %150 : vector<8x8xf32>
    %cst_62 = arith.constant dense<0.000000e+00> : vector<8xf32>
    %152 = vector.multi_reduction <add>, %151, %cst_62 [1] : vector<8x8xf32> to vector<8xf32>
    %153 = vector.shape_cast %152 : vector<8xf32> to vector<8x1xf32>
    %cst_63 = arith.constant 1.000000e+00 : f32
    %154 = vector.broadcast %cst_63 : f32 to vector<8x1xf32>
    %155 = arith.divf %154, %153 : vector<8x1xf32>
    %cst_64 = arith.constant dense<0.000000e+00> : vector<8x4xf32>
    %156 = tpu.matmul %151, %142, %cst_64 {dimension_numbers = #tpu.dot_dimension_numbers<[1], [0], [0], [1], [0, 0, 1, 1], [], []>, precision = #tpu.contract_precision<fp32>} : vector<8x8xf32>, vector<8x4xf32>, vector<8x4xf32> -> vector<8x4xf32>
    %157 = vector.broadcast %155 : vector<8x1xf32> to vector<8x4xf32>
    %158 = arith.mulf %156, %157 : vector<8x4xf32>
    %c0_65 = arith.constant 0 : index
    %c0_66 = arith.constant 0 : index
    %c24 = arith.constant 24 : index
    %159 = vector.load %arg5[%c0_65, %c0_66, %c24] : memref<4x8x32xf32, #tpu.memory_space<vmem>>, vector<1x8x4xf32>
    %160 = vector.shape_cast %159 : vector<1x8x4xf32> to vector<8x4xf32>
    %161 = vector.shape_cast %158 : vector<8x4xf32> to vector<1x8x4xf32>
    tpu.vector_store %arg5[%c0_65, %c0_66, %c24], %161 {strides = array<i32>} : memref<4x8x32xf32, #tpu.memory_space<vmem>>, vector<1x8x4xf32>,
    %162 = vector.extract_strided_slice %3 {offsets = [0, 28], sizes = [8, 4], strides = [1, 1]} : vector<8x32xf32> to vector<8x4xf32>
    %163 = vector.extract_strided_slice %5 {offsets = [0, 28], sizes = [8, 4], strides = [1, 1]} : vector<8x32xf32> to vector<8x4xf32>
    %164 = vector.extract_strided_slice %7 {offsets = [0, 28], sizes = [8, 4], strides = [1, 1]} : vector<8x32xf32> to vector<8x4xf32>
    %cst_67 = arith.constant dense<0.000000e+00> : vector<8x8xf32>
    %165 = tpu.matmul %162, %163, %cst_67 {dimension_numbers = #tpu.dot_dimension_numbers<[1], [1], [0], [0], [0, 0, 1, 0], [], []>, precision = #tpu.contract_precision<fp32>} : vector<8x4xf32>, vector<8x4xf32>, vector<8x8xf32> -> vector<8x8xf32>
    %166 = arith.addf %165, %1 : vector<8x8xf32>
    %cst_68 = arith.constant 5.000000e-01 : f32
    %167 = vector.broadcast %cst_68 : f32 to vector<8x8xf32>
    %168 = arith.mulf %166, %167 : vector<8x8xf32>
    %cst_69 = arith.constant dense<0xFF800000> : vector<8xf32>
    %169 = vector.multi_reduction <maximumf>, %168, %cst_69 [1] : vector<8x8xf32> to vector<8xf32>
    %170 = vector.shape_cast %169 : vector<8xf32> to vector<8x1xf32>
    %171 = vector.broadcast %170 : vector<8x1xf32> to vector<8x8xf32>
    %172 = arith.subf %168, %171 : vector<8x8xf32>
    %173 = math.exp %172 : vector<8x8xf32>
    %cst_70 = arith.constant dense<0.000000e+00> : vector<8xf32>
    %174 = vector.multi_reduction <add>, %173, %cst_70 [1] : vector<8x8xf32> to vector<8xf32>
    %175 = vector.shape_cast %174 : vector<8xf32> to vector<8x1xf32>
    %cst_71 = arith.constant 1.000000e+00 : f32
    %176 = vector.broadcast %cst_71 : f32 to vector<8x1xf32>
    %177 = arith.divf %176, %175 : vector<8x1xf32>
    %cst_72 = arith.constant dense<0.000000e+00> : vector<8x4xf32>
    %178 = tpu.matmul %173, %164, %cst_72 {dimension_numbers = #tpu.dot_dimension_numbers<[1], [0], [0], [1], [0, 0, 1, 1], [], []>, precision = #tpu.contract_precision<fp32>} : vector<8x8xf32>, vector<8x4xf32>, vector<8x4xf32> -> vector<8x4xf32>
    %179 = vector.broadcast %177 : vector<8x1xf32> to vector<8x4xf32>
    %180 = arith.mulf %178, %179 : vector<8x4xf32>
    %c0_73 = arith.constant 0 : index
    %c0_74 = arith.constant 0 : index
    %c28 = arith.constant 28 : index
    %181 = vector.load %arg5[%c0_73, %c0_74, %c28] : memref<4x8x32xf32, #tpu.memory_space<vmem>>, vector<1x8x4xf32>
    %182 = vector.shape_cast %181 : vector<1x8x4xf32> to vector<8x4xf32>
    %183 = vector.shape_cast %180 : vector<8x4xf32> to vector<1x8x4xf32>
    tpu.vector_store %arg5[%c0_73, %c0_74, %c28], %183 {strides = array<i32>} : memref<4x8x32xf32, #tpu.memory_space<vmem>>, vector<1x8x4xf32>,
    %c1 = arith.constant 1 : index
    %c0_75 = arith.constant 0 : index
    %c0_76 = arith.constant 0 : index
    %184 = vector.load %arg4[%c1, %c0_75, %c0_76] : memref<2x8x8xf32, #tpu.memory_space<vmem>>, vector<1x8x8xf32>
    %185 = vector.shape_cast %184 : vector<1x8x8xf32> to vector<8x8xf32>
    %c1_77 = arith.constant 1 : index
    %c0_78 = arith.constant 0 : index
    %c0_79 = arith.constant 0 : index
    %186 = vector.load %arg1[%c1_77, %c0_78, %c0_79] : memref<4x8x32xf32, #tpu.memory_space<vmem>>, vector<1x8x32xf32>
    %187 = vector.shape_cast %186 : vector<1x8x32xf32> to vector<8x32xf32>
    %c1_80 = arith.constant 1 : index
    %c0_81 = arith.constant 0 : index
    %c0_82 = arith.constant 0 : index
    %188 = vector.load %arg2[%c1_80, %c0_81, %c0_82] : memref<4x8x32xf32, #tpu.memory_space<vmem>>, vector<1x8x32xf32>
    %189 = vector.shape_cast %188 : vector<1x8x32xf32> to vector<8x32xf32>
    %c1_83 = arith.constant 1 : index
    %c0_84 = arith.constant 0 : index
    %c0_85 = arith.constant 0 : index
    %190 = vector.load %arg3[%c1_83, %c0_84, %c0_85] : memref<4x8x32xf32, #tpu.memory_space<vmem>>, vector<1x8x32xf32>
    %191 = vector.shape_cast %190 : vector<1x8x32xf32> to vector<8x32xf32>
    %192 = vector.extract_strided_slice %187 {offsets = [0, 0], sizes = [8, 4], strides = [1, 1]} : vector<8x32xf32> to vector<8x4xf32>
    %193 = vector.extract_strided_slice %189 {offsets = [0, 0], sizes = [8, 4], strides = [1, 1]} : vector<8x32xf32> to vector<8x4xf32>
    %194 = vector.extract_strided_slice %191 {offsets = [0, 0], sizes = [8, 4], strides = [1, 1]} : vector<8x32xf32> to vector<8x4xf32>
    %cst_86 = arith.constant dense<0.000000e+00> : vector<8x8xf32>
    %195 = tpu.matmul %192, %193, %cst_86 {dimension_numbers = #tpu.dot_dimension_numbers<[1], [1], [0], [0], [0, 0, 1, 0], [], []>, precision = #tpu.contract_precision<fp32>} : vector<8x4xf32>, vector<8x4xf32>, vector<8x8xf32> -> vector<8x8xf32>
    %196 = arith.addf %195, %185 : vector<8x8xf32>
    %cst_87 = arith.constant 5.000000e-01 : f32
    %197 = vector.broadcast %cst_87 : f32 to vector<8x8xf32>
    %198 = arith.mulf %196, %197 : vector<8x8xf32>
    %cst_88 = arith.constant dense<0xFF800000> : vector<8xf32>
    %199 = vector.multi_reduction <maximumf>, %198, %cst_88 [1] : vector<8x8xf32> to vector<8xf32>
    %200 = vector.shape_cast %199 : vector<8xf32> to vector<8x1xf32>
    %201 = vector.broadcast %200 : vector<8x1xf32> to vector<8x8xf32>
    %202 = arith.subf %198, %201 : vector<8x8xf32>
    %203 = math.exp %202 : vector<8x8xf32>
    %cst_89 = arith.constant dense<0.000000e+00> : vector<8xf32>
    %204 = vector.multi_reduction <add>, %203, %cst_89 [1] : vector<8x8xf32> to vector<8xf32>
    %205 = vector.shape_cast %204 : vector<8xf32> to vector<8x1xf32>
    %cst_90 = arith.constant 1.000000e+00 : f32
    %206 = vector.broadcast %cst_90 : f32 to vector<8x1xf32>
    %207 = arith.divf %206, %205 : vector<8x1xf32>
    %cst_91 = arith.constant dense<0.000000e+00> : vector<8x4xf32>
    %208 = tpu.matmul %203, %194, %cst_91 {dimension_numbers = #tpu.dot_dimension_numbers<[1], [0], [0], [1], [0, 0, 1, 1], [], []>, precision = #tpu.contract_precision<fp32>} : vector<8x8xf32>, vector<8x4xf32>, vector<8x4xf32> -> vector<8x4xf32>
    %209 = vector.broadcast %207 : vector<8x1xf32> to vector<8x4xf32>
    %210 = arith.mulf %208, %209 : vector<8x4xf32>
    %c1_92 = arith.constant 1 : index
    %c0_93 = arith.constant 0 : index
    %c0_94 = arith.constant 0 : index
    %211 = vector.load %arg5[%c1_92, %c0_93, %c0_94] : memref<4x8x32xf32, #tpu.memory_space<vmem>>, vector<1x8x4xf32>
    %212 = vector.shape_cast %211 : vector<1x8x4xf32> to vector<8x4xf32>
    %213 = vector.shape_cast %210 : vector<8x4xf32> to vector<1x8x4xf32>
    tpu.vector_store %arg5[%c1_92, %c0_93, %c0_94], %213 {strides = array<i32>} : memref<4x8x32xf32, #tpu.memory_space<vmem>>, vector<1x8x4xf32>,
    %214 = vector.extract_strided_slice %187 {offsets = [0, 4], sizes = [8, 4], strides = [1, 1]} : vector<8x32xf32> to vector<8x4xf32>
    %215 = vector.extract_strided_slice %189 {offsets = [0, 4], sizes = [8, 4], strides = [1, 1]} : vector<8x32xf32> to vector<8x4xf32>
    %216 = vector.extract_strided_slice %191 {offsets = [0, 4], sizes = [8, 4], strides = [1, 1]} : vector<8x32xf32> to vector<8x4xf32>
    %cst_95 = arith.constant dense<0.000000e+00> : vector<8x8xf32>
    %217 = tpu.matmul %214, %215, %cst_95 {dimension_numbers = #tpu.dot_dimension_numbers<[1], [1], [0], [0], [0, 0, 1, 0], [], []>, precision = #tpu.contract_precision<fp32>} : vector<8x4xf32>, vector<8x4xf32>, vector<8x8xf32> -> vector<8x8xf32>
    %218 = arith.addf %217, %185 : vector<8x8xf32>
    %cst_96 = arith.constant 5.000000e-01 : f32
    %219 = vector.broadcast %cst_96 : f32 to vector<8x8xf32>
    %220 = arith.mulf %218, %219 : vector<8x8xf32>
    %cst_97 = arith.constant dense<0xFF800000> : vector<8xf32>
    %221 = vector.multi_reduction <maximumf>, %220, %cst_97 [1] : vector<8x8xf32> to vector<8xf32>
    %222 = vector.shape_cast %221 : vector<8xf32> to vector<8x1xf32>
    %223 = vector.broadcast %222 : vector<8x1xf32> to vector<8x8xf32>
    %224 = arith.subf %220, %223 : vector<8x8xf32>
    %225 = math.exp %224 : vector<8x8xf32>
    %cst_98 = arith.constant dense<0.000000e+00> : vector<8xf32>
    %226 = vector.multi_reduction <add>, %225, %cst_98 [1] : vector<8x8xf32> to vector<8xf32>
    %227 = vector.shape_cast %226 : vector<8xf32> to vector<8x1xf32>
    %cst_99 = arith.constant 1.000000e+00 : f32
    %228 = vector.broadcast %cst_99 : f32 to vector<8x1xf32>
    %229 = arith.divf %228, %227 : vector<8x1xf32>
    %cst_100 = arith.constant dense<0.000000e+00> : vector<8x4xf32>
    %230 = tpu.matmul %225, %216, %cst_100 {dimension_numbers = #tpu.dot_dimension_numbers<[1], [0], [0], [1], [0, 0, 1, 1], [], []>, precision = #tpu.contract_precision<fp32>} : vector<8x8xf32>, vector<8x4xf32>, vector<8x4xf32> -> vector<8x4xf32>
    %231 = vector.broadcast %229 : vector<8x1xf32> to vector<8x4xf32>
    %232 = arith.mulf %230, %231 : vector<8x4xf32>
    %c1_101 = arith.constant 1 : index
    %c0_102 = arith.constant 0 : index
    %c4_103 = arith.constant 4 : index
    %233 = vector.load %arg5[%c1_101, %c0_102, %c4_103] : memref<4x8x32xf32, #tpu.memory_space<vmem>>, vector<1x8x4xf32>
    %234 = vector.shape_cast %233 : vector<1x8x4xf32> to vector<8x4xf32>
    %235 = vector.shape_cast %232 : vector<8x4xf32> to vector<1x8x4xf32>
    tpu.vector_store %arg5[%c1_101, %c0_102, %c4_103], %235 {strides = array<i32>} : memref<4x8x32xf32, #tpu.memory_space<vmem>>, vector<1x8x4xf32>,
    %236 = vector.extract_strided_slice %187 {offsets = [0, 8], sizes = [8, 4], strides = [1, 1]} : vector<8x32xf32> to vector<8x4xf32>
    %237 = vector.extract_strided_slice %189 {offsets = [0, 8], sizes = [8, 4], strides = [1, 1]} : vector<8x32xf32> to vector<8x4xf32>
    %238 = vector.extract_strided_slice %191 {offsets = [0, 8], sizes = [8, 4], strides = [1, 1]} : vector<8x32xf32> to vector<8x4xf32>
    %cst_104 = arith.constant dense<0.000000e+00> : vector<8x8xf32>
    %239 = tpu.matmul %236, %237, %cst_104 {dimension_numbers = #tpu.dot_dimension_numbers<[1], [1], [0], [0], [0, 0, 1, 0], [], []>, precision = #tpu.contract_precision<fp32>} : vector<8x4xf32>, vector<8x4xf32>, vector<8x8xf32> -> vector<8x8xf32>
    %240 = arith.addf %239, %185 : vector<8x8xf32>
    %cst_105 = arith.constant 5.000000e-01 : f32
    %241 = vector.broadcast %cst_105 : f32 to vector<8x8xf32>
    %242 = arith.mulf %240, %241 : vector<8x8xf32>
    %cst_106 = arith.constant dense<0xFF800000> : vector<8xf32>
    %243 = vector.multi_reduction <maximumf>, %242, %cst_106 [1] : vector<8x8xf32> to vector<8xf32>
    %244 = vector.shape_cast %243 : vector<8xf32> to vector<8x1xf32>
    %245 = vector.broadcast %244 : vector<8x1xf32> to vector<8x8xf32>
    %246 = arith.subf %242, %245 : vector<8x8xf32>
    %247 = math.exp %246 : vector<8x8xf32>
    %cst_107 = arith.constant dense<0.000000e+00> : vector<8xf32>
    %248 = vector.multi_reduction <add>, %247, %cst_107 [1] : vector<8x8xf32> to vector<8xf32>
    %249 = vector.shape_cast %248 : vector<8xf32> to vector<8x1xf32>
    %cst_108 = arith.constant 1.000000e+00 : f32
    %250 = vector.broadcast %cst_108 : f32 to vector<8x1xf32>
    %251 = arith.divf %250, %249 : vector<8x1xf32>
    %cst_109 = arith.constant dense<0.000000e+00> : vector<8x4xf32>
    %252 = tpu.matmul %247, %238, %cst_109 {dimension_numbers = #tpu.dot_dimension_numbers<[1], [0], [0], [1], [0, 0, 1, 1], [], []>, precision = #tpu.contract_precision<fp32>} : vector<8x8xf32>, vector<8x4xf32>, vector<8x4xf32> -> vector<8x4xf32>
    %253 = vector.broadcast %251 : vector<8x1xf32> to vector<8x4xf32>
    %254 = arith.mulf %252, %253 : vector<8x4xf32>
    %c1_110 = arith.constant 1 : index
    %c0_111 = arith.constant 0 : index
    %c8_112 = arith.constant 8 : index
    %255 = vector.load %arg5[%c1_110, %c0_111, %c8_112] : memref<4x8x32xf32, #tpu.memory_space<vmem>>, vector<1x8x4xf32>
    %256 = vector.shape_cast %255 : vector<1x8x4xf32> to vector<8x4xf32>
    %257 = vector.shape_cast %254 : vector<8x4xf32> to vector<1x8x4xf32>
    tpu.vector_store %arg5[%c1_110, %c0_111, %c8_112], %257 {strides = array<i32>} : memref<4x8x32xf32, #tpu.memory_space<vmem>>, vector<1x8x4xf32>,
    %258 = vector.extract_strided_slice %187 {offsets = [0, 12], sizes = [8, 4], strides = [1, 1]} : vector<8x32xf32> to vector<8x4xf32>
    %259 = vector.extract_strided_slice %189 {offsets = [0, 12], sizes = [8, 4], strides = [1, 1]} : vector<8x32xf32> to vector<8x4xf32>
    %260 = vector.extract_strided_slice %191 {offsets = [0, 12], sizes = [8, 4], strides = [1, 1]} : vector<8x32xf32> to vector<8x4xf32>
    %cst_113 = arith.constant dense<0.000000e+00> : vector<8x8xf32>
    %261 = tpu.matmul %258, %259, %cst_113 {dimension_numbers = #tpu.dot_dimension_numbers<[1], [1], [0], [0], [0, 0, 1, 0], [], []>, precision = #tpu.contract_precision<fp32>} : vector<8x4xf32>, vector<8x4xf32>, vector<8x8xf32> -> vector<8x8xf32>
    %262 = arith.addf %261, %185 : vector<8x8xf32>
    %cst_114 = arith.constant 5.000000e-01 : f32
    %263 = vector.broadcast %cst_114 : f32 to vector<8x8xf32>
    %264 = arith.mulf %262, %263 : vector<8x8xf32>
    %cst_115 = arith.constant dense<0xFF800000> : vector<8xf32>
    %265 = vector.multi_reduction <maximumf>, %264, %cst_115 [1] : vector<8x8xf32> to vector<8xf32>
    %266 = vector.shape_cast %265 : vector<8xf32> to vector<8x1xf32>
    %267 = vector.broadcast %266 : vector<8x1xf32> to vector<8x8xf32>
    %268 = arith.subf %264, %267 : vector<8x8xf32>
    %269 = math.exp %268 : vector<8x8xf32>
    %cst_116 = arith.constant dense<0.000000e+00> : vector<8xf32>
    %270 = vector.multi_reduction <add>, %269, %cst_116 [1] : vector<8x8xf32> to vector<8xf32>
    %271 = vector.shape_cast %270 : vector<8xf32> to vector<8x1xf32>
    %cst_117 = arith.constant 1.000000e+00 : f32
    %272 = vector.broadcast %cst_117 : f32 to vector<8x1xf32>
    %273 = arith.divf %272, %271 : vector<8x1xf32>
    %cst_118 = arith.constant dense<0.000000e+00> : vector<8x4xf32>
    %274 = tpu.matmul %269, %260, %cst_118 {dimension_numbers = #tpu.dot_dimension_numbers<[1], [0], [0], [1], [0, 0, 1, 1], [], []>, precision = #tpu.contract_precision<fp32>} : vector<8x8xf32>, vector<8x4xf32>, vector<8x4xf32> -> vector<8x4xf32>
    %275 = vector.broadcast %273 : vector<8x1xf32> to vector<8x4xf32>
    %276 = arith.mulf %274, %275 : vector<8x4xf32>
    %c1_119 = arith.constant 1 : index
    %c0_120 = arith.constant 0 : index
    %c12_121 = arith.constant 12 : index
    %277 = vector.load %arg5[%c1_119, %c0_120, %c12_121] : memref<4x8x32xf32, #tpu.memory_space<vmem>>, vector<1x8x4xf32>
    %278 = vector.shape_cast %277 : vector<1x8x4xf32> to vector<8x4xf32>
    %279 = vector.shape_cast %276 : vector<8x4xf32> to vector<1x8x4xf32>
    tpu.vector_store %arg5[%c1_119, %c0_120, %c12_121], %279 {strides = array<i32>} : memref<4x8x32xf32, #tpu.memory_space<vmem>>, vector<1x8x4xf32>,
    %280 = vector.extract_strided_slice %187 {offsets = [0, 16], sizes = [8, 4], strides = [1, 1]} : vector<8x32xf32> to vector<8x4xf32>
    %281 = vector.extract_strided_slice %189 {offsets = [0, 16], sizes = [8, 4], strides = [1, 1]} : vector<8x32xf32> to vector<8x4xf32>
    %282 = vector.extract_strided_slice %191 {offsets = [0, 16], sizes = [8, 4], strides = [1, 1]} : vector<8x32xf32> to vector<8x4xf32>
    %cst_122 = arith.constant dense<0.000000e+00> : vector<8x8xf32>
    %283 = tpu.matmul %280, %281, %cst_122 {dimension_numbers = #tpu.dot_dimension_numbers<[1], [1], [0], [0], [0, 0, 1, 0], [], []>, precision = #tpu.contract_precision<fp32>} : vector<8x4xf32>, vector<8x4xf32>, vector<8x8xf32> -> vector<8x8xf32>
    %284 = arith.addf %283, %185 : vector<8x8xf32>
    %cst_123 = arith.constant 5.000000e-01 : f32
    %285 = vector.broadcast %cst_123 : f32 to vector<8x8xf32>
    %286 = arith.mulf %284, %285 : vector<8x8xf32>
    %cst_124 = arith.constant dense<0xFF800000> : vector<8xf32>
    %287 = vector.multi_reduction <maximumf>, %286, %cst_124 [1] : vector<8x8xf32> to vector<8xf32>
    %288 = vector.shape_cast %287 : vector<8xf32> to vector<8x1xf32>
    %289 = vector.broadcast %288 : vector<8x1xf32> to vector<8x8xf32>
    %290 = arith.subf %286, %289 : vector<8x8xf32>
    %291 = math.exp %290 : vector<8x8xf32>
    %cst_125 = arith.constant dense<0.000000e+00> : vector<8xf32>
    %292 = vector.multi_reduction <add>, %291, %cst_125 [1] : vector<8x8xf32> to vector<8xf32>
    %293 = vector.shape_cast %292 : vector<8xf32> to vector<8x1xf32>
    %cst_126 = arith.constant 1.000000e+00 : f32
    %294 = vector.broadcast %cst_126 : f32 to vector<8x1xf32>
    %295 = arith.divf %294, %293 : vector<8x1xf32>
    %cst_127 = arith.constant dense<0.000000e+00> : vector<8x4xf32>
    %296 = tpu.matmul %291, %282, %cst_127 {dimension_numbers = #tpu.dot_dimension_numbers<[1], [0], [0], [1], [0, 0, 1, 1], [], []>, precision = #tpu.contract_precision<fp32>} : vector<8x8xf32>, vector<8x4xf32>, vector<8x4xf32> -> vector<8x4xf32>
    %297 = vector.broadcast %295 : vector<8x1xf32> to vector<8x4xf32>
    %298 = arith.mulf %296, %297 : vector<8x4xf32>
    %c1_128 = arith.constant 1 : index
    %c0_129 = arith.constant 0 : index
    %c16_130 = arith.constant 16 : index
    %299 = vector.load %arg5[%c1_128, %c0_129, %c16_130] : memref<4x8x32xf32, #tpu.memory_space<vmem>>, vector<1x8x4xf32>
    %300 = vector.shape_cast %299 : vector<1x8x4xf32> to vector<8x4xf32>
    %301 = vector.shape_cast %298 : vector<8x4xf32> to vector<1x8x4xf32>
    tpu.vector_store %arg5[%c1_128, %c0_129, %c16_130], %301 {strides = array<i32>} : memref<4x8x32xf32, #tpu.memory_space<vmem>>, vector<1x8x4xf32>,
    %302 = vector.extract_strided_slice %187 {offsets = [0, 20], sizes = [8, 4], strides = [1, 1]} : vector<8x32xf32> to vector<8x4xf32>
    %303 = vector.extract_strided_slice %189 {offsets = [0, 20], sizes = [8, 4], strides = [1, 1]} : vector<8x32xf32> to vector<8x4xf32>
    %304 = vector.extract_strided_slice %191 {offsets = [0, 20], sizes = [8, 4], strides = [1, 1]} : vector<8x32xf32> to vector<8x4xf32>
    %cst_131 = arith.constant dense<0.000000e+00> : vector<8x8xf32>
    %305 = tpu.matmul %302, %303, %cst_131 {dimension_numbers = #tpu.dot_dimension_numbers<[1], [1], [0], [0], [0, 0, 1, 0], [], []>, precision = #tpu.contract_precision<fp32>} : vector<8x4xf32>, vector<8x4xf32>, vector<8x8xf32> -> vector<8x8xf32>
    %306 = arith.addf %305, %185 : vector<8x8xf32>
    %cst_132 = arith.constant 5.000000e-01 : f32
    %307 = vector.broadcast %cst_132 : f32 to vector<8x8xf32>
    %308 = arith.mulf %306, %307 : vector<8x8xf32>
    %cst_133 = arith.constant dense<0xFF800000> : vector<8xf32>
    %309 = vector.multi_reduction <maximumf>, %308, %cst_133 [1] : vector<8x8xf32> to vector<8xf32>
    %310 = vector.shape_cast %309 : vector<8xf32> to vector<8x1xf32>
    %311 = vector.broadcast %310 : vector<8x1xf32> to vector<8x8xf32>
    %312 = arith.subf %308, %311 : vector<8x8xf32>
    %313 = math.exp %312 : vector<8x8xf32>
    %cst_134 = arith.constant dense<0.000000e+00> : vector<8xf32>
    %314 = vector.multi_reduction <add>, %313, %cst_134 [1] : vector<8x8xf32> to vector<8xf32>
    %315 = vector.shape_cast %314 : vector<8xf32> to vector<8x1xf32>
    %cst_135 = arith.constant 1.000000e+00 : f32
    %316 = vector.broadcast %cst_135 : f32 to vector<8x1xf32>
    %317 = arith.divf %316, %315 : vector<8x1xf32>
    %cst_136 = arith.constant dense<0.000000e+00> : vector<8x4xf32>
    %318 = tpu.matmul %313, %304, %cst_136 {dimension_numbers = #tpu.dot_dimension_numbers<[1], [0], [0], [1], [0, 0, 1, 1], [], []>, precision = #tpu.contract_precision<fp32>} : vector<8x8xf32>, vector<8x4xf32>, vector<8x4xf32> -> vector<8x4xf32>
    %319 = vector.broadcast %317 : vector<8x1xf32> to vector<8x4xf32>
    %320 = arith.mulf %318, %319 : vector<8x4xf32>
    %c1_137 = arith.constant 1 : index
    %c0_138 = arith.constant 0 : index
    %c20_139 = arith.constant 20 : index
    %321 = vector.load %arg5[%c1_137, %c0_138, %c20_139] : memref<4x8x32xf32, #tpu.memory_space<vmem>>, vector<1x8x4xf32>
    %322 = vector.shape_cast %321 : vector<1x8x4xf32> to vector<8x4xf32>
    %323 = vector.shape_cast %320 : vector<8x4xf32> to vector<1x8x4xf32>
    tpu.vector_store %arg5[%c1_137, %c0_138, %c20_139], %323 {strides = array<i32>} : memref<4x8x32xf32, #tpu.memory_space<vmem>>, vector<1x8x4xf32>,
    %324 = vector.extract_strided_slice %187 {offsets = [0, 24], sizes = [8, 4], strides = [1, 1]} : vector<8x32xf32> to vector<8x4xf32>
    %325 = vector.extract_strided_slice %189 {offsets = [0, 24], sizes = [8, 4], strides = [1, 1]} : vector<8x32xf32> to vector<8x4xf32>
    %326 = vector.extract_strided_slice %191 {offsets = [0, 24], sizes = [8, 4], strides = [1, 1]} : vector<8x32xf32> to vector<8x4xf32>
    %cst_140 = arith.constant dense<0.000000e+00> : vector<8x8xf32>
    %327 = tpu.matmul %324, %325, %cst_140 {dimension_numbers = #tpu.dot_dimension_numbers<[1], [1], [0], [0], [0, 0, 1, 0], [], []>, precision = #tpu.contract_precision<fp32>} : vector<8x4xf32>, vector<8x4xf32>, vector<8x8xf32> -> vector<8x8xf32>
    %328 = arith.addf %327, %185 : vector<8x8xf32>
    %cst_141 = arith.constant 5.000000e-01 : f32
    %329 = vector.broadcast %cst_141 : f32 to vector<8x8xf32>
    %330 = arith.mulf %328, %329 : vector<8x8xf32>
    %cst_142 = arith.constant dense<0xFF800000> : vector<8xf32>
    %331 = vector.multi_reduction <maximumf>, %330, %cst_142 [1] : vector<8x8xf32> to vector<8xf32>
    %332 = vector.shape_cast %331 : vector<8xf32> to vector<8x1xf32>
    %333 = vector.broadcast %332 : vector<8x1xf32> to vector<8x8xf32>
    %334 = arith.subf %330, %333 : vector<8x8xf32>
    %335 = math.exp %334 : vector<8x8xf32>
    %cst_143 = arith.constant dense<0.000000e+00> : vector<8xf32>
    %336 = vector.multi_reduction <add>, %335, %cst_143 [1] : vector<8x8xf32> to vector<8xf32>
    %337 = vector.shape_cast %336 : vector<8xf32> to vector<8x1xf32>
    %cst_144 = arith.constant 1.000000e+00 : f32
    %338 = vector.broadcast %cst_144 : f32 to vector<8x1xf32>
    %339 = arith.divf %338, %337 : vector<8x1xf32>
    %cst_145 = arith.constant dense<0.000000e+00> : vector<8x4xf32>
    %340 = tpu.matmul %335, %326, %cst_145 {dimension_numbers = #tpu.dot_dimension_numbers<[1], [0], [0], [1], [0, 0, 1, 1], [], []>, precision = #tpu.contract_precision<fp32>} : vector<8x8xf32>, vector<8x4xf32>, vector<8x4xf32> -> vector<8x4xf32>
    %341 = vector.broadcast %339 : vector<8x1xf32> to vector<8x4xf32>
    %342 = arith.mulf %340, %341 : vector<8x4xf32>
    %c1_146 = arith.constant 1 : index
    %c0_147 = arith.constant 0 : index
    %c24_148 = arith.constant 24 : index
    %343 = vector.load %arg5[%c1_146, %c0_147, %c24_148] : memref<4x8x32xf32, #tpu.memory_space<vmem>>, vector<1x8x4xf32>
    %344 = vector.shape_cast %343 : vector<1x8x4xf32> to vector<8x4xf32>
    %345 = vector.shape_cast %342 : vector<8x4xf32> to vector<1x8x4xf32>
    tpu.vector_store %arg5[%c1_146, %c0_147, %c24_148], %345 {strides = array<i32>} : memref<4x8x32xf32, #tpu.memory_space<vmem>>, vector<1x8x4xf32>,
    %346 = vector.extract_strided_slice %187 {offsets = [0, 28], sizes = [8, 4], strides = [1, 1]} : vector<8x32xf32> to vector<8x4xf32>
    %347 = vector.extract_strided_slice %189 {offsets = [0, 28], sizes = [8, 4], strides = [1, 1]} : vector<8x32xf32> to vector<8x4xf32>
    %348 = vector.extract_strided_slice %191 {offsets = [0, 28], sizes = [8, 4], strides = [1, 1]} : vector<8x32xf32> to vector<8x4xf32>
    %cst_149 = arith.constant dense<0.000000e+00> : vector<8x8xf32>
    %349 = tpu.matmul %346, %347, %cst_149 {dimension_numbers = #tpu.dot_dimension_numbers<[1], [1], [0], [0], [0, 0, 1, 0], [], []>, precision = #tpu.contract_precision<fp32>} : vector<8x4xf32>, vector<8x4xf32>, vector<8x8xf32> -> vector<8x8xf32>
    %350 = arith.addf %349, %185 : vector<8x8xf32>
    %cst_150 = arith.constant 5.000000e-01 : f32
    %351 = vector.broadcast %cst_150 : f32 to vector<8x8xf32>
    %352 = arith.mulf %350, %351 : vector<8x8xf32>
    %cst_151 = arith.constant dense<0xFF800000> : vector<8xf32>
    %353 = vector.multi_reduction <maximumf>, %352, %cst_151 [1] : vector<8x8xf32> to vector<8xf32>
    %354 = vector.shape_cast %353 : vector<8xf32> to vector<8x1xf32>
    %355 = vector.broadcast %354 : vector<8x1xf32> to vector<8x8xf32>
    %356 = arith.subf %352, %355 : vector<8x8xf32>
    %357 = math.exp %356 : vector<8x8xf32>
    %cst_152 = arith.constant dense<0.000000e+00> : vector<8xf32>
    %358 = vector.multi_reduction <add>, %357, %cst_152 [1] : vector<8x8xf32> to vector<8xf32>
    %359 = vector.shape_cast %358 : vector<8xf32> to vector<8x1xf32>
    %cst_153 = arith.constant 1.000000e+00 : f32
    %360 = vector.broadcast %cst_153 : f32 to vector<8x1xf32>
    %361 = arith.divf %360, %359 : vector<8x1xf32>
    %cst_154 = arith.constant dense<0.000000e+00> : vector<8x4xf32>
    %362 = tpu.matmul %357, %348, %cst_154 {dimension_numbers = #tpu.dot_dimension_numbers<[1], [0], [0], [1], [0, 0, 1, 1], [], []>, precision = #tpu.contract_precision<fp32>} : vector<8x8xf32>, vector<8x4xf32>, vector<8x4xf32> -> vector<8x4xf32>
    %363 = vector.broadcast %361 : vector<8x1xf32> to vector<8x4xf32>
    %364 = arith.mulf %362, %363 : vector<8x4xf32>
    %c1_155 = arith.constant 1 : index
    %c0_156 = arith.constant 0 : index
    %c28_157 = arith.constant 28 : index
    %365 = vector.load %arg5[%c1_155, %c0_156, %c28_157] : memref<4x8x32xf32, #tpu.memory_space<vmem>>, vector<1x8x4xf32>
    %366 = vector.shape_cast %365 : vector<1x8x4xf32> to vector<8x4xf32>
    %367 = vector.shape_cast %364 : vector<8x4xf32> to vector<1x8x4xf32>
    tpu.vector_store %arg5[%c1_155, %c0_156, %c28_157], %367 {strides = array<i32>} : memref<4x8x32xf32, #tpu.memory_space<vmem>>, vector<1x8x4xf32>,
    %c0_158 = arith.constant 0 : index
    %c0_159 = arith.constant 0 : index
    %c0_160 = arith.constant 0 : index
    %368 = vector.load %arg4[%c0_158, %c0_159, %c0_160] : memref<2x8x8xf32, #tpu.memory_space<vmem>>, vector<1x8x8xf32>
    %369 = vector.shape_cast %368 : vector<1x8x8xf32> to vector<8x8xf32>
    %c2 = arith.constant 2 : index
    %c0_161 = arith.constant 0 : index
    %c0_162 = arith.constant 0 : index
    %370 = vector.load %arg1[%c2, %c0_161, %c0_162] : memref<4x8x32xf32, #tpu.memory_space<vmem>>, vector<1x8x32xf32>
    %371 = vector.shape_cast %370 : vector<1x8x32xf32> to vector<8x32xf32>
    %c2_163 = arith.constant 2 : index
    %c0_164 = arith.constant 0 : index
    %c0_165 = arith.constant 0 : index
    %372 = vector.load %arg2[%c2_163, %c0_164, %c0_165] : memref<4x8x32xf32, #tpu.memory_space<vmem>>, vector<1x8x32xf32>
    %373 = vector.shape_cast %372 : vector<1x8x32xf32> to vector<8x32xf32>
    %c2_166 = arith.constant 2 : index
    %c0_167 = arith.constant 0 : index
    %c0_168 = arith.constant 0 : index
    %374 = vector.load %arg3[%c2_166, %c0_167, %c0_168] : memref<4x8x32xf32, #tpu.memory_space<vmem>>, vector<1x8x32xf32>
    %375 = vector.shape_cast %374 : vector<1x8x32xf32> to vector<8x32xf32>
    %376 = vector.extract_strided_slice %371 {offsets = [0, 0], sizes = [8, 4], strides = [1, 1]} : vector<8x32xf32> to vector<8x4xf32>
    %377 = vector.extract_strided_slice %373 {offsets = [0, 0], sizes = [8, 4], strides = [1, 1]} : vector<8x32xf32> to vector<8x4xf32>
    %378 = vector.extract_strided_slice %375 {offsets = [0, 0], sizes = [8, 4], strides = [1, 1]} : vector<8x32xf32> to vector<8x4xf32>
    %cst_169 = arith.constant dense<0.000000e+00> : vector<8x8xf32>
    %379 = tpu.matmul %376, %377, %cst_169 {dimension_numbers = #tpu.dot_dimension_numbers<[1], [1], [0], [0], [0, 0, 1, 0], [], []>, precision = #tpu.contract_precision<fp32>} : vector<8x4xf32>, vector<8x4xf32>, vector<8x8xf32> -> vector<8x8xf32>
    %380 = arith.addf %379, %369 : vector<8x8xf32>
    %cst_170 = arith.constant 5.000000e-01 : f32
    %381 = vector.broadcast %cst_170 : f32 to vector<8x8xf32>
    %382 = arith.mulf %380, %381 : vector<8x8xf32>
    %cst_171 = arith.constant dense<0xFF800000> : vector<8xf32>
    %383 = vector.multi_reduction <maximumf>, %382, %cst_171 [1] : vector<8x8xf32> to vector<8xf32>
    %384 = vector.shape_cast %383 : vector<8xf32> to vector<8x1xf32>
    %385 = vector.broadcast %384 : vector<8x1xf32> to vector<8x8xf32>
    %386 = arith.subf %382, %385 : vector<8x8xf32>
    %387 = math.exp %386 : vector<8x8xf32>
    %cst_172 = arith.constant dense<0.000000e+00> : vector<8xf32>
    %388 = vector.multi_reduction <add>, %387, %cst_172 [1] : vector<8x8xf32> to vector<8xf32>
    %389 = vector.shape_cast %388 : vector<8xf32> to vector<8x1xf32>
    %cst_173 = arith.constant 1.000000e+00 : f32
    %390 = vector.broadcast %cst_173 : f32 to vector<8x1xf32>
    %391 = arith.divf %390, %389 : vector<8x1xf32>
    %cst_174 = arith.constant dense<0.000000e+00> : vector<8x4xf32>
    %392 = tpu.matmul %387, %378, %cst_174 {dimension_numbers = #tpu.dot_dimension_numbers<[1], [0], [0], [1], [0, 0, 1, 1], [], []>, precision = #tpu.contract_precision<fp32>} : vector<8x8xf32>, vector<8x4xf32>, vector<8x4xf32> -> vector<8x4xf32>
    %393 = vector.broadcast %391 : vector<8x1xf32> to vector<8x4xf32>
    %394 = arith.mulf %392, %393 : vector<8x4xf32>
    %c2_175 = arith.constant 2 : index
    %c0_176 = arith.constant 0 : index
    %c0_177 = arith.constant 0 : index
    %395 = vector.load %arg5[%c2_175, %c0_176, %c0_177] : memref<4x8x32xf32, #tpu.memory_space<vmem>>, vector<1x8x4xf32>
    %396 = vector.shape_cast %395 : vector<1x8x4xf32> to vector<8x4xf32>
    %397 = vector.shape_cast %394 : vector<8x4xf32> to vector<1x8x4xf32>
    tpu.vector_store %arg5[%c2_175, %c0_176, %c0_177], %397 {strides = array<i32>} : memref<4x8x32xf32, #tpu.memory_space<vmem>>, vector<1x8x4xf32>,
    %398 = vector.extract_strided_slice %371 {offsets = [0, 4], sizes = [8, 4], strides = [1, 1]} : vector<8x32xf32> to vector<8x4xf32>
    %399 = vector.extract_strided_slice %373 {offsets = [0, 4], sizes = [8, 4], strides = [1, 1]} : vector<8x32xf32> to vector<8x4xf32>
    %400 = vector.extract_strided_slice %375 {offsets = [0, 4], sizes = [8, 4], strides = [1, 1]} : vector<8x32xf32> to vector<8x4xf32>
    %cst_178 = arith.constant dense<0.000000e+00> : vector<8x8xf32>
    %401 = tpu.matmul %398, %399, %cst_178 {dimension_numbers = #tpu.dot_dimension_numbers<[1], [1], [0], [0], [0, 0, 1, 0], [], []>, precision = #tpu.contract_precision<fp32>} : vector<8x4xf32>, vector<8x4xf32>, vector<8x8xf32> -> vector<8x8xf32>
    %402 = arith.addf %401, %369 : vector<8x8xf32>
    %cst_179 = arith.constant 5.000000e-01 : f32
    %403 = vector.broadcast %cst_179 : f32 to vector<8x8xf32>
    %404 = arith.mulf %402, %403 : vector<8x8xf32>
    %cst_180 = arith.constant dense<0xFF800000> : vector<8xf32>
    %405 = vector.multi_reduction <maximumf>, %404, %cst_180 [1] : vector<8x8xf32> to vector<8xf32>
    %406 = vector.shape_cast %405 : vector<8xf32> to vector<8x1xf32>
    %407 = vector.broadcast %406 : vector<8x1xf32> to vector<8x8xf32>
    %408 = arith.subf %404, %407 : vector<8x8xf32>
    %409 = math.exp %408 : vector<8x8xf32>
    %cst_181 = arith.constant dense<0.000000e+00> : vector<8xf32>
    %410 = vector.multi_reduction <add>, %409, %cst_181 [1] : vector<8x8xf32> to vector<8xf32>
    %411 = vector.shape_cast %410 : vector<8xf32> to vector<8x1xf32>
    %cst_182 = arith.constant 1.000000e+00 : f32
    %412 = vector.broadcast %cst_182 : f32 to vector<8x1xf32>
    %413 = arith.divf %412, %411 : vector<8x1xf32>
    %cst_183 = arith.constant dense<0.000000e+00> : vector<8x4xf32>
    %414 = tpu.matmul %409, %400, %cst_183 {dimension_numbers = #tpu.dot_dimension_numbers<[1], [0], [0], [1], [0, 0, 1, 1], [], []>, precision = #tpu.contract_precision<fp32>} : vector<8x8xf32>, vector<8x4xf32>, vector<8x4xf32> -> vector<8x4xf32>
    %415 = vector.broadcast %413 : vector<8x1xf32> to vector<8x4xf32>
    %416 = arith.mulf %414, %415 : vector<8x4xf32>
    %c2_184 = arith.constant 2 : index
    %c0_185 = arith.constant 0 : index
    %c4_186 = arith.constant 4 : index
    %417 = vector.load %arg5[%c2_184, %c0_185, %c4_186] : memref<4x8x32xf32, #tpu.memory_space<vmem>>, vector<1x8x4xf32>
    %418 = vector.shape_cast %417 : vector<1x8x4xf32> to vector<8x4xf32>
    %419 = vector.shape_cast %416 : vector<8x4xf32> to vector<1x8x4xf32>
    tpu.vector_store %arg5[%c2_184, %c0_185, %c4_186], %419 {strides = array<i32>} : memref<4x8x32xf32, #tpu.memory_space<vmem>>, vector<1x8x4xf32>,
    %420 = vector.extract_strided_slice %371 {offsets = [0, 8], sizes = [8, 4], strides = [1, 1]} : vector<8x32xf32> to vector<8x4xf32>
    %421 = vector.extract_strided_slice %373 {offsets = [0, 8], sizes = [8, 4], strides = [1, 1]} : vector<8x32xf32> to vector<8x4xf32>
    %422 = vector.extract_strided_slice %375 {offsets = [0, 8], sizes = [8, 4], strides = [1, 1]} : vector<8x32xf32> to vector<8x4xf32>
    %cst_187 = arith.constant dense<0.000000e+00> : vector<8x8xf32>
    %423 = tpu.matmul %420, %421, %cst_187 {dimension_numbers = #tpu.dot_dimension_numbers<[1], [1], [0], [0], [0, 0, 1, 0], [], []>, precision = #tpu.contract_precision<fp32>} : vector<8x4xf32>, vector<8x4xf32>, vector<8x8xf32> -> vector<8x8xf32>
    %424 = arith.addf %423, %369 : vector<8x8xf32>
    %cst_188 = arith.constant 5.000000e-01 : f32
    %425 = vector.broadcast %cst_188 : f32 to vector<8x8xf32>
    %426 = arith.mulf %424, %425 : vector<8x8xf32>
    %cst_189 = arith.constant dense<0xFF800000> : vector<8xf32>
    %427 = vector.multi_reduction <maximumf>, %426, %cst_189 [1] : vector<8x8xf32> to vector<8xf32>
    %428 = vector.shape_cast %427 : vector<8xf32> to vector<8x1xf32>
    %429 = vector.broadcast %428 : vector<8x1xf32> to vector<8x8xf32>
    %430 = arith.subf %426, %429 : vector<8x8xf32>
    %431 = math.exp %430 : vector<8x8xf32>
    %cst_190 = arith.constant dense<0.000000e+00> : vector<8xf32>
    %432 = vector.multi_reduction <add>, %431, %cst_190 [1] : vector<8x8xf32> to vector<8xf32>
    %433 = vector.shape_cast %432 : vector<8xf32> to vector<8x1xf32>
    %cst_191 = arith.constant 1.000000e+00 : f32
    %434 = vector.broadcast %cst_191 : f32 to vector<8x1xf32>
    %435 = arith.divf %434, %433 : vector<8x1xf32>
    %cst_192 = arith.constant dense<0.000000e+00> : vector<8x4xf32>
    %436 = tpu.matmul %431, %422, %cst_192 {dimension_numbers = #tpu.dot_dimension_numbers<[1], [0], [0], [1], [0, 0, 1, 1], [], []>, precision = #tpu.contract_precision<fp32>} : vector<8x8xf32>, vector<8x4xf32>, vector<8x4xf32> -> vector<8x4xf32>
    %437 = vector.broadcast %435 : vector<8x1xf32> to vector<8x4xf32>
    %438 = arith.mulf %436, %437 : vector<8x4xf32>
    %c2_193 = arith.constant 2 : index
    %c0_194 = arith.constant 0 : index
    %c8_195 = arith.constant 8 : index
    %439 = vector.load %arg5[%c2_193, %c0_194, %c8_195] : memref<4x8x32xf32, #tpu.memory_space<vmem>>, vector<1x8x4xf32>
    %440 = vector.shape_cast %439 : vector<1x8x4xf32> to vector<8x4xf32>
    %441 = vector.shape_cast %438 : vector<8x4xf32> to vector<1x8x4xf32>
    tpu.vector_store %arg5[%c2_193, %c0_194, %c8_195], %441 {strides = array<i32>} : memref<4x8x32xf32, #tpu.memory_space<vmem>>, vector<1x8x4xf32>,
    %442 = vector.extract_strided_slice %371 {offsets = [0, 12], sizes = [8, 4], strides = [1, 1]} : vector<8x32xf32> to vector<8x4xf32>
    %443 = vector.extract_strided_slice %373 {offsets = [0, 12], sizes = [8, 4], strides = [1, 1]} : vector<8x32xf32> to vector<8x4xf32>
    %444 = vector.extract_strided_slice %375 {offsets = [0, 12], sizes = [8, 4], strides = [1, 1]} : vector<8x32xf32> to vector<8x4xf32>
    %cst_196 = arith.constant dense<0.000000e+00> : vector<8x8xf32>
    %445 = tpu.matmul %442, %443, %cst_196 {dimension_numbers = #tpu.dot_dimension_numbers<[1], [1], [0], [0], [0, 0, 1, 0], [], []>, precision = #tpu.contract_precision<fp32>} : vector<8x4xf32>, vector<8x4xf32>, vector<8x8xf32> -> vector<8x8xf32>
    %446 = arith.addf %445, %369 : vector<8x8xf32>
    %cst_197 = arith.constant 5.000000e-01 : f32
    %447 = vector.broadcast %cst_197 : f32 to vector<8x8xf32>
    %448 = arith.mulf %446, %447 : vector<8x8xf32>
    %cst_198 = arith.constant dense<0xFF800000> : vector<8xf32>
    %449 = vector.multi_reduction <maximumf>, %448, %cst_198 [1] : vector<8x8xf32> to vector<8xf32>
    %450 = vector.shape_cast %449 : vector<8xf32> to vector<8x1xf32>
    %451 = vector.broadcast %450 : vector<8x1xf32> to vector<8x8xf32>
    %452 = arith.subf %448, %451 : vector<8x8xf32>
    %453 = math.exp %452 : vector<8x8xf32>
    %cst_199 = arith.constant dense<0.000000e+00> : vector<8xf32>
    %454 = vector.multi_reduction <add>, %453, %cst_199 [1] : vector<8x8xf32> to vector<8xf32>
    %455 = vector.shape_cast %454 : vector<8xf32> to vector<8x1xf32>
    %cst_200 = arith.constant 1.000000e+00 : f32
    %456 = vector.broadcast %cst_200 : f32 to vector<8x1xf32>
    %457 = arith.divf %456, %455 : vector<8x1xf32>
    %cst_201 = arith.constant dense<0.000000e+00> : vector<8x4xf32>
    %458 = tpu.matmul %453, %444, %cst_201 {dimension_numbers = #tpu.dot_dimension_numbers<[1], [0], [0], [1], [0, 0, 1, 1], [], []>, precision = #tpu.contract_precision<fp32>} : vector<8x8xf32>, vector<8x4xf32>, vector<8x4xf32> -> vector<8x4xf32>
    %459 = vector.broadcast %457 : vector<8x1xf32> to vector<8x4xf32>
    %460 = arith.mulf %458, %459 : vector<8x4xf32>
    %c2_202 = arith.constant 2 : index
    %c0_203 = arith.constant 0 : index
    %c12_204 = arith.constant 12 : index
    %461 = vector.load %arg5[%c2_202, %c0_203, %c12_204] : memref<4x8x32xf32, #tpu.memory_space<vmem>>, vector<1x8x4xf32>
    %462 = vector.shape_cast %461 : vector<1x8x4xf32> to vector<8x4xf32>
    %463 = vector.shape_cast %460 : vector<8x4xf32> to vector<1x8x4xf32>
    tpu.vector_store %arg5[%c2_202, %c0_203, %c12_204], %463 {strides = array<i32>} : memref<4x8x32xf32, #tpu.memory_space<vmem>>, vector<1x8x4xf32>,
    %464 = vector.extract_strided_slice %371 {offsets = [0, 16], sizes = [8, 4], strides = [1, 1]} : vector<8x32xf32> to vector<8x4xf32>
    %465 = vector.extract_strided_slice %373 {offsets = [0, 16], sizes = [8, 4], strides = [1, 1]} : vector<8x32xf32> to vector<8x4xf32>
    %466 = vector.extract_strided_slice %375 {offsets = [0, 16], sizes = [8, 4], strides = [1, 1]} : vector<8x32xf32> to vector<8x4xf32>
    %cst_205 = arith.constant dense<0.000000e+00> : vector<8x8xf32>
    %467 = tpu.matmul %464, %465, %cst_205 {dimension_numbers = #tpu.dot_dimension_numbers<[1], [1], [0], [0], [0, 0, 1, 0], [], []>, precision = #tpu.contract_precision<fp32>} : vector<8x4xf32>, vector<8x4xf32>, vector<8x8xf32> -> vector<8x8xf32>
    %468 = arith.addf %467, %369 : vector<8x8xf32>
    %cst_206 = arith.constant 5.000000e-01 : f32
    %469 = vector.broadcast %cst_206 : f32 to vector<8x8xf32>
    %470 = arith.mulf %468, %469 : vector<8x8xf32>
    %cst_207 = arith.constant dense<0xFF800000> : vector<8xf32>
    %471 = vector.multi_reduction <maximumf>, %470, %cst_207 [1] : vector<8x8xf32> to vector<8xf32>
    %472 = vector.shape_cast %471 : vector<8xf32> to vector<8x1xf32>
    %473 = vector.broadcast %472 : vector<8x1xf32> to vector<8x8xf32>
    %474 = arith.subf %470, %473 : vector<8x8xf32>
    %475 = math.exp %474 : vector<8x8xf32>
    %cst_208 = arith.constant dense<0.000000e+00> : vector<8xf32>
    %476 = vector.multi_reduction <add>, %475, %cst_208 [1] : vector<8x8xf32> to vector<8xf32>
    %477 = vector.shape_cast %476 : vector<8xf32> to vector<8x1xf32>
    %cst_209 = arith.constant 1.000000e+00 : f32
    %478 = vector.broadcast %cst_209 : f32 to vector<8x1xf32>
    %479 = arith.divf %478, %477 : vector<8x1xf32>
    %cst_210 = arith.constant dense<0.000000e+00> : vector<8x4xf32>
    %480 = tpu.matmul %475, %466, %cst_210 {dimension_numbers = #tpu.dot_dimension_numbers<[1], [0], [0], [1], [0, 0, 1, 1], [], []>, precision = #tpu.contract_precision<fp32>} : vector<8x8xf32>, vector<8x4xf32>, vector<8x4xf32> -> vector<8x4xf32>
    %481 = vector.broadcast %479 : vector<8x1xf32> to vector<8x4xf32>
    %482 = arith.mulf %480, %481 : vector<8x4xf32>
    %c2_211 = arith.constant 2 : index
    %c0_212 = arith.constant 0 : index
    %c16_213 = arith.constant 16 : index
    %483 = vector.load %arg5[%c2_211, %c0_212, %c16_213] : memref<4x8x32xf32, #tpu.memory_space<vmem>>, vector<1x8x4xf32>
    %484 = vector.shape_cast %483 : vector<1x8x4xf32> to vector<8x4xf32>
    %485 = vector.shape_cast %482 : vector<8x4xf32> to vector<1x8x4xf32>
    tpu.vector_store %arg5[%c2_211, %c0_212, %c16_213], %485 {strides = array<i32>} : memref<4x8x32xf32, #tpu.memory_space<vmem>>, vector<1x8x4xf32>,
    %486 = vector.extract_strided_slice %371 {offsets = [0, 20], sizes = [8, 4], strides = [1, 1]} : vector<8x32xf32> to vector<8x4xf32>
    %487 = vector.extract_strided_slice %373 {offsets = [0, 20], sizes = [8, 4], strides = [1, 1]} : vector<8x32xf32> to vector<8x4xf32>
    %488 = vector.extract_strided_slice %375 {offsets = [0, 20], sizes = [8, 4], strides = [1, 1]} : vector<8x32xf32> to vector<8x4xf32>
    %cst_214 = arith.constant dense<0.000000e+00> : vector<8x8xf32>
    %489 = tpu.matmul %486, %487, %cst_214 {dimension_numbers = #tpu.dot_dimension_numbers<[1], [1], [0], [0], [0, 0, 1, 0], [], []>, precision = #tpu.contract_precision<fp32>} : vector<8x4xf32>, vector<8x4xf32>, vector<8x8xf32> -> vector<8x8xf32>
    %490 = arith.addf %489, %369 : vector<8x8xf32>
    %cst_215 = arith.constant 5.000000e-01 : f32
    %491 = vector.broadcast %cst_215 : f32 to vector<8x8xf32>
    %492 = arith.mulf %490, %491 : vector<8x8xf32>
    %cst_216 = arith.constant dense<0xFF800000> : vector<8xf32>
    %493 = vector.multi_reduction <maximumf>, %492, %cst_216 [1] : vector<8x8xf32> to vector<8xf32>
    %494 = vector.shape_cast %493 : vector<8xf32> to vector<8x1xf32>
    %495 = vector.broadcast %494 : vector<8x1xf32> to vector<8x8xf32>
    %496 = arith.subf %492, %495 : vector<8x8xf32>
    %497 = math.exp %496 : vector<8x8xf32>
    %cst_217 = arith.constant dense<0.000000e+00> : vector<8xf32>
    %498 = vector.multi_reduction <add>, %497, %cst_217 [1] : vector<8x8xf32> to vector<8xf32>
    %499 = vector.shape_cast %498 : vector<8xf32> to vector<8x1xf32>
    %cst_218 = arith.constant 1.000000e+00 : f32
    %500 = vector.broadcast %cst_218 : f32 to vector<8x1xf32>
    %501 = arith.divf %500, %499 : vector<8x1xf32>
    %cst_219 = arith.constant dense<0.000000e+00> : vector<8x4xf32>
    %502 = tpu.matmul %497, %488, %cst_219 {dimension_numbers = #tpu.dot_dimension_numbers<[1], [0], [0], [1], [0, 0, 1, 1], [], []>, precision = #tpu.contract_precision<fp32>} : vector<8x8xf32>, vector<8x4xf32>, vector<8x4xf32> -> vector<8x4xf32>
    %503 = vector.broadcast %501 : vector<8x1xf32> to vector<8x4xf32>
    %504 = arith.mulf %502, %503 : vector<8x4xf32>
    %c2_220 = arith.constant 2 : index
    %c0_221 = arith.constant 0 : index
    %c20_222 = arith.constant 20 : index
    %505 = vector.load %arg5[%c2_220, %c0_221, %c20_222] : memref<4x8x32xf32, #tpu.memory_space<vmem>>, vector<1x8x4xf32>
    %506 = vector.shape_cast %505 : vector<1x8x4xf32> to vector<8x4xf32>
    %507 = vector.shape_cast %504 : vector<8x4xf32> to vector<1x8x4xf32>
    tpu.vector_store %arg5[%c2_220, %c0_221, %c20_222], %507 {strides = array<i32>} : memref<4x8x32xf32, #tpu.memory_space<vmem>>, vector<1x8x4xf32>,
    %508 = vector.extract_strided_slice %371 {offsets = [0, 24], sizes = [8, 4], strides = [1, 1]} : vector<8x32xf32> to vector<8x4xf32>
    %509 = vector.extract_strided_slice %373 {offsets = [0, 24], sizes = [8, 4], strides = [1, 1]} : vector<8x32xf32> to vector<8x4xf32>
    %510 = vector.extract_strided_slice %375 {offsets = [0, 24], sizes = [8, 4], strides = [1, 1]} : vector<8x32xf32> to vector<8x4xf32>
    %cst_223 = arith.constant dense<0.000000e+00> : vector<8x8xf32>
    %511 = tpu.matmul %508, %509, %cst_223 {dimension_numbers = #tpu.dot_dimension_numbers<[1], [1], [0], [0], [0, 0, 1, 0], [], []>, precision = #tpu.contract_precision<fp32>} : vector<8x4xf32>, vector<8x4xf32>, vector<8x8xf32> -> vector<8x8xf32>
    %512 = arith.addf %511, %369 : vector<8x8xf32>
    %cst_224 = arith.constant 5.000000e-01 : f32
    %513 = vector.broadcast %cst_224 : f32 to vector<8x8xf32>
    %514 = arith.mulf %512, %513 : vector<8x8xf32>
    %cst_225 = arith.constant dense<0xFF800000> : vector<8xf32>
    %515 = vector.multi_reduction <maximumf>, %514, %cst_225 [1] : vector<8x8xf32> to vector<8xf32>
    %516 = vector.shape_cast %515 : vector<8xf32> to vector<8x1xf32>
    %517 = vector.broadcast %516 : vector<8x1xf32> to vector<8x8xf32>
    %518 = arith.subf %514, %517 : vector<8x8xf32>
    %519 = math.exp %518 : vector<8x8xf32>
    %cst_226 = arith.constant dense<0.000000e+00> : vector<8xf32>
    %520 = vector.multi_reduction <add>, %519, %cst_226 [1] : vector<8x8xf32> to vector<8xf32>
    %521 = vector.shape_cast %520 : vector<8xf32> to vector<8x1xf32>
    %cst_227 = arith.constant 1.000000e+00 : f32
    %522 = vector.broadcast %cst_227 : f32 to vector<8x1xf32>
    %523 = arith.divf %522, %521 : vector<8x1xf32>
    %cst_228 = arith.constant dense<0.000000e+00> : vector<8x4xf32>
    %524 = tpu.matmul %519, %510, %cst_228 {dimension_numbers = #tpu.dot_dimension_numbers<[1], [0], [0], [1], [0, 0, 1, 1], [], []>, precision = #tpu.contract_precision<fp32>} : vector<8x8xf32>, vector<8x4xf32>, vector<8x4xf32> -> vector<8x4xf32>
    %525 = vector.broadcast %523 : vector<8x1xf32> to vector<8x4xf32>
    %526 = arith.mulf %524, %525 : vector<8x4xf32>
    %c2_229 = arith.constant 2 : index
    %c0_230 = arith.constant 0 : index
    %c24_231 = arith.constant 24 : index
    %527 = vector.load %arg5[%c2_229, %c0_230, %c24_231] : memref<4x8x32xf32, #tpu.memory_space<vmem>>, vector<1x8x4xf32>
    %528 = vector.shape_cast %527 : vector<1x8x4xf32> to vector<8x4xf32>
    %529 = vector.shape_cast %526 : vector<8x4xf32> to vector<1x8x4xf32>
    tpu.vector_store %arg5[%c2_229, %c0_230, %c24_231], %529 {strides = array<i32>} : memref<4x8x32xf32, #tpu.memory_space<vmem>>, vector<1x8x4xf32>,
    %530 = vector.extract_strided_slice %371 {offsets = [0, 28], sizes = [8, 4], strides = [1, 1]} : vector<8x32xf32> to vector<8x4xf32>
    %531 = vector.extract_strided_slice %373 {offsets = [0, 28], sizes = [8, 4], strides = [1, 1]} : vector<8x32xf32> to vector<8x4xf32>
    %532 = vector.extract_strided_slice %375 {offsets = [0, 28], sizes = [8, 4], strides = [1, 1]} : vector<8x32xf32> to vector<8x4xf32>
    %cst_232 = arith.constant dense<0.000000e+00> : vector<8x8xf32>
    %533 = tpu.matmul %530, %531, %cst_232 {dimension_numbers = #tpu.dot_dimension_numbers<[1], [1], [0], [0], [0, 0, 1, 0], [], []>, precision = #tpu.contract_precision<fp32>} : vector<8x4xf32>, vector<8x4xf32>, vector<8x8xf32> -> vector<8x8xf32>
    %534 = arith.addf %533, %369 : vector<8x8xf32>
    %cst_233 = arith.constant 5.000000e-01 : f32
    %535 = vector.broadcast %cst_233 : f32 to vector<8x8xf32>
    %536 = arith.mulf %534, %535 : vector<8x8xf32>
    %cst_234 = arith.constant dense<0xFF800000> : vector<8xf32>
    %537 = vector.multi_reduction <maximumf>, %536, %cst_234 [1] : vector<8x8xf32> to vector<8xf32>
    %538 = vector.shape_cast %537 : vector<8xf32> to vector<8x1xf32>
    %539 = vector.broadcast %538 : vector<8x1xf32> to vector<8x8xf32>
    %540 = arith.subf %536, %539 : vector<8x8xf32>
    %541 = math.exp %540 : vector<8x8xf32>
    %cst_235 = arith.constant dense<0.000000e+00> : vector<8xf32>
    %542 = vector.multi_reduction <add>, %541, %cst_235 [1] : vector<8x8xf32> to vector<8xf32>
    %543 = vector.shape_cast %542 : vector<8xf32> to vector<8x1xf32>
    %cst_236 = arith.constant 1.000000e+00 : f32
    %544 = vector.broadcast %cst_236 : f32 to vector<8x1xf32>
    %545 = arith.divf %544, %543 : vector<8x1xf32>
    %cst_237 = arith.constant dense<0.000000e+00> : vector<8x4xf32>
    %546 = tpu.matmul %541, %532, %cst_237 {dimension_numbers = #tpu.dot_dimension_numbers<[1], [0], [0], [1], [0, 0, 1, 1], [], []>, precision = #tpu.contract_precision<fp32>} : vector<8x8xf32>, vector<8x4xf32>, vector<8x4xf32> -> vector<8x4xf32>
    %547 = vector.broadcast %545 : vector<8x1xf32> to vector<8x4xf32>
    %548 = arith.mulf %546, %547 : vector<8x4xf32>
    %c2_238 = arith.constant 2 : index
    %c0_239 = arith.constant 0 : index
    %c28_240 = arith.constant 28 : index
    %549 = vector.load %arg5[%c2_238, %c0_239, %c28_240] : memref<4x8x32xf32, #tpu.memory_space<vmem>>, vector<1x8x4xf32>
    %550 = vector.shape_cast %549 : vector<1x8x4xf32> to vector<8x4xf32>
    %551 = vector.shape_cast %548 : vector<8x4xf32> to vector<1x8x4xf32>
    tpu.vector_store %arg5[%c2_238, %c0_239, %c28_240], %551 {strides = array<i32>} : memref<4x8x32xf32, #tpu.memory_space<vmem>>, vector<1x8x4xf32>,
    %c1_241 = arith.constant 1 : index
    %c0_242 = arith.constant 0 : index
    %c0_243 = arith.constant 0 : index
    %552 = vector.load %arg4[%c1_241, %c0_242, %c0_243] : memref<2x8x8xf32, #tpu.memory_space<vmem>>, vector<1x8x8xf32>
    %553 = vector.shape_cast %552 : vector<1x8x8xf32> to vector<8x8xf32>
    %c3 = arith.constant 3 : index
    %c0_244 = arith.constant 0 : index
    %c0_245 = arith.constant 0 : index
    %554 = vector.load %arg1[%c3, %c0_244, %c0_245] : memref<4x8x32xf32, #tpu.memory_space<vmem>>, vector<1x8x32xf32>
    %555 = vector.shape_cast %554 : vector<1x8x32xf32> to vector<8x32xf32>
    %c3_246 = arith.constant 3 : index
    %c0_247 = arith.constant 0 : index
    %c0_248 = arith.constant 0 : index
    %556 = vector.load %arg2[%c3_246, %c0_247, %c0_248] : memref<4x8x32xf32, #tpu.memory_space<vmem>>, vector<1x8x32xf32>
    %557 = vector.shape_cast %556 : vector<1x8x32xf32> to vector<8x32xf32>
    %c3_249 = arith.constant 3 : index
    %c0_250 = arith.constant 0 : index
    %c0_251 = arith.constant 0 : index
    %558 = vector.load %arg3[%c3_249, %c0_250, %c0_251] : memref<4x8x32xf32, #tpu.memory_space<vmem>>, vector<1x8x32xf32>
    %559 = vector.shape_cast %558 : vector<1x8x32xf32> to vector<8x32xf32>
    %560 = vector.extract_strided_slice %555 {offsets = [0, 0], sizes = [8, 4], strides = [1, 1]} : vector<8x32xf32> to vector<8x4xf32>
    %561 = vector.extract_strided_slice %557 {offsets = [0, 0], sizes = [8, 4], strides = [1, 1]} : vector<8x32xf32> to vector<8x4xf32>
    %562 = vector.extract_strided_slice %559 {offsets = [0, 0], sizes = [8, 4], strides = [1, 1]} : vector<8x32xf32> to vector<8x4xf32>
    %cst_252 = arith.constant dense<0.000000e+00> : vector<8x8xf32>
    %563 = tpu.matmul %560, %561, %cst_252 {dimension_numbers = #tpu.dot_dimension_numbers<[1], [1], [0], [0], [0, 0, 1, 0], [], []>, precision = #tpu.contract_precision<fp32>} : vector<8x4xf32>, vector<8x4xf32>, vector<8x8xf32> -> vector<8x8xf32>
    %564 = arith.addf %563, %553 : vector<8x8xf32>
    %cst_253 = arith.constant 5.000000e-01 : f32
    %565 = vector.broadcast %cst_253 : f32 to vector<8x8xf32>
    %566 = arith.mulf %564, %565 : vector<8x8xf32>
    %cst_254 = arith.constant dense<0xFF800000> : vector<8xf32>
    %567 = vector.multi_reduction <maximumf>, %566, %cst_254 [1] : vector<8x8xf32> to vector<8xf32>
    %568 = vector.shape_cast %567 : vector<8xf32> to vector<8x1xf32>
    %569 = vector.broadcast %568 : vector<8x1xf32> to vector<8x8xf32>
    %570 = arith.subf %566, %569 : vector<8x8xf32>
    %571 = math.exp %570 : vector<8x8xf32>
    %cst_255 = arith.constant dense<0.000000e+00> : vector<8xf32>
    %572 = vector.multi_reduction <add>, %571, %cst_255 [1] : vector<8x8xf32> to vector<8xf32>
    %573 = vector.shape_cast %572 : vector<8xf32> to vector<8x1xf32>
    %cst_256 = arith.constant 1.000000e+00 : f32
    %574 = vector.broadcast %cst_256 : f32 to vector<8x1xf32>
    %575 = arith.divf %574, %573 : vector<8x1xf32>
    %cst_257 = arith.constant dense<0.000000e+00> : vector<8x4xf32>
    %576 = tpu.matmul %571, %562, %cst_257 {dimension_numbers = #tpu.dot_dimension_numbers<[1], [0], [0], [1], [0, 0, 1, 1], [], []>, precision = #tpu.contract_precision<fp32>} : vector<8x8xf32>, vector<8x4xf32>, vector<8x4xf32> -> vector<8x4xf32>
    %577 = vector.broadcast %575 : vector<8x1xf32> to vector<8x4xf32>
    %578 = arith.mulf %576, %577 : vector<8x4xf32>
    %c3_258 = arith.constant 3 : index
    %c0_259 = arith.constant 0 : index
    %c0_260 = arith.constant 0 : index
    %579 = vector.load %arg5[%c3_258, %c0_259, %c0_260] : memref<4x8x32xf32, #tpu.memory_space<vmem>>, vector<1x8x4xf32>
    %580 = vector.shape_cast %579 : vector<1x8x4xf32> to vector<8x4xf32>
    %581 = vector.shape_cast %578 : vector<8x4xf32> to vector<1x8x4xf32>
    tpu.vector_store %arg5[%c3_258, %c0_259, %c0_260], %581 {strides = array<i32>} : memref<4x8x32xf32, #tpu.memory_space<vmem>>, vector<1x8x4xf32>,
    %582 = vector.extract_strided_slice %555 {offsets = [0, 4], sizes = [8, 4], strides = [1, 1]} : vector<8x32xf32> to vector<8x4xf32>
    %583 = vector.extract_strided_slice %557 {offsets = [0, 4], sizes = [8, 4], strides = [1, 1]} : vector<8x32xf32> to vector<8x4xf32>
    %584 = vector.extract_strided_slice %559 {offsets = [0, 4], sizes = [8, 4], strides = [1, 1]} : vector<8x32xf32> to vector<8x4xf32>
    %cst_261 = arith.constant dense<0.000000e+00> : vector<8x8xf32>
    %585 = tpu.matmul %582, %583, %cst_261 {dimension_numbers = #tpu.dot_dimension_numbers<[1], [1], [0], [0], [0, 0, 1, 0], [], []>, precision = #tpu.contract_precision<fp32>} : vector<8x4xf32>, vector<8x4xf32>, vector<8x8xf32> -> vector<8x8xf32>
    %586 = arith.addf %585, %553 : vector<8x8xf32>
    %cst_262 = arith.constant 5.000000e-01 : f32
    %587 = vector.broadcast %cst_262 : f32 to vector<8x8xf32>
    %588 = arith.mulf %586, %587 : vector<8x8xf32>
    %cst_263 = arith.constant dense<0xFF800000> : vector<8xf32>
    %589 = vector.multi_reduction <maximumf>, %588, %cst_263 [1] : vector<8x8xf32> to vector<8xf32>
    %590 = vector.shape_cast %589 : vector<8xf32> to vector<8x1xf32>
    %591 = vector.broadcast %590 : vector<8x1xf32> to vector<8x8xf32>
    %592 = arith.subf %588, %591 : vector<8x8xf32>
    %593 = math.exp %592 : vector<8x8xf32>
    %cst_264 = arith.constant dense<0.000000e+00> : vector<8xf32>
    %594 = vector.multi_reduction <add>, %593, %cst_264 [1] : vector<8x8xf32> to vector<8xf32>
    %595 = vector.shape_cast %594 : vector<8xf32> to vector<8x1xf32>
    %cst_265 = arith.constant 1.000000e+00 : f32
    %596 = vector.broadcast %cst_265 : f32 to vector<8x1xf32>
    %597 = arith.divf %596, %595 : vector<8x1xf32>
    %cst_266 = arith.constant dense<0.000000e+00> : vector<8x4xf32>
    %598 = tpu.matmul %593, %584, %cst_266 {dimension_numbers = #tpu.dot_dimension_numbers<[1], [0], [0], [1], [0, 0, 1, 1], [], []>, precision = #tpu.contract_precision<fp32>} : vector<8x8xf32>, vector<8x4xf32>, vector<8x4xf32> -> vector<8x4xf32>
    %599 = vector.broadcast %597 : vector<8x1xf32> to vector<8x4xf32>
    %600 = arith.mulf %598, %599 : vector<8x4xf32>
    %c3_267 = arith.constant 3 : index
    %c0_268 = arith.constant 0 : index
    %c4_269 = arith.constant 4 : index
    %601 = vector.load %arg5[%c3_267, %c0_268, %c4_269] : memref<4x8x32xf32, #tpu.memory_space<vmem>>, vector<1x8x4xf32>
    %602 = vector.shape_cast %601 : vector<1x8x4xf32> to vector<8x4xf32>
    %603 = vector.shape_cast %600 : vector<8x4xf32> to vector<1x8x4xf32>
    tpu.vector_store %arg5[%c3_267, %c0_268, %c4_269], %603 {strides = array<i32>} : memref<4x8x32xf32, #tpu.memory_space<vmem>>, vector<1x8x4xf32>,
    %604 = vector.extract_strided_slice %555 {offsets = [0, 8], sizes = [8, 4], strides = [1, 1]} : vector<8x32xf32> to vector<8x4xf32>
    %605 = vector.extract_strided_slice %557 {offsets = [0, 8], sizes = [8, 4], strides = [1, 1]} : vector<8x32xf32> to vector<8x4xf32>
    %606 = vector.extract_strided_slice %559 {offsets = [0, 8], sizes = [8, 4], strides = [1, 1]} : vector<8x32xf32> to vector<8x4xf32>
    %cst_270 = arith.constant dense<0.000000e+00> : vector<8x8xf32>
    %607 = tpu.matmul %604, %605, %cst_270 {dimension_numbers = #tpu.dot_dimension_numbers<[1], [1], [0], [0], [0, 0, 1, 0], [], []>, precision = #tpu.contract_precision<fp32>} : vector<8x4xf32>, vector<8x4xf32>, vector<8x8xf32> -> vector<8x8xf32>
    %608 = arith.addf %607, %553 : vector<8x8xf32>
    %cst_271 = arith.constant 5.000000e-01 : f32
    %609 = vector.broadcast %cst_271 : f32 to vector<8x8xf32>
    %610 = arith.mulf %608, %609 : vector<8x8xf32>
    %cst_272 = arith.constant dense<0xFF800000> : vector<8xf32>
    %611 = vector.multi_reduction <maximumf>, %610, %cst_272 [1] : vector<8x8xf32> to vector<8xf32>
    %612 = vector.shape_cast %611 : vector<8xf32> to vector<8x1xf32>
    %613 = vector.broadcast %612 : vector<8x1xf32> to vector<8x8xf32>
    %614 = arith.subf %610, %613 : vector<8x8xf32>
    %615 = math.exp %614 : vector<8x8xf32>
    %cst_273 = arith.constant dense<0.000000e+00> : vector<8xf32>
    %616 = vector.multi_reduction <add>, %615, %cst_273 [1] : vector<8x8xf32> to vector<8xf32>
    %617 = vector.shape_cast %616 : vector<8xf32> to vector<8x1xf32>
    %cst_274 = arith.constant 1.000000e+00 : f32
    %618 = vector.broadcast %cst_274 : f32 to vector<8x1xf32>
    %619 = arith.divf %618, %617 : vector<8x1xf32>
    %cst_275 = arith.constant dense<0.000000e+00> : vector<8x4xf32>
    %620 = tpu.matmul %615, %606, %cst_275 {dimension_numbers = #tpu.dot_dimension_numbers<[1], [0], [0], [1], [0, 0, 1, 1], [], []>, precision = #tpu.contract_precision<fp32>} : vector<8x8xf32>, vector<8x4xf32>, vector<8x4xf32> -> vector<8x4xf32>
    %621 = vector.broadcast %619 : vector<8x1xf32> to vector<8x4xf32>
    %622 = arith.mulf %620, %621 : vector<8x4xf32>
    %c3_276 = arith.constant 3 : index
    %c0_277 = arith.constant 0 : index
    %c8_278 = arith.constant 8 : index
    %623 = vector.load %arg5[%c3_276, %c0_277, %c8_278] : memref<4x8x32xf32, #tpu.memory_space<vmem>>, vector<1x8x4xf32>
    %624 = vector.shape_cast %623 : vector<1x8x4xf32> to vector<8x4xf32>
    %625 = vector.shape_cast %622 : vector<8x4xf32> to vector<1x8x4xf32>
    tpu.vector_store %arg5[%c3_276, %c0_277, %c8_278], %625 {strides = array<i32>} : memref<4x8x32xf32, #tpu.memory_space<vmem>>, vector<1x8x4xf32>,
    %626 = vector.extract_strided_slice %555 {offsets = [0, 12], sizes = [8, 4], strides = [1, 1]} : vector<8x32xf32> to vector<8x4xf32>
    %627 = vector.extract_strided_slice %557 {offsets = [0, 12], sizes = [8, 4], strides = [1, 1]} : vector<8x32xf32> to vector<8x4xf32>
    %628 = vector.extract_strided_slice %559 {offsets = [0, 12], sizes = [8, 4], strides = [1, 1]} : vector<8x32xf32> to vector<8x4xf32>
    %cst_279 = arith.constant dense<0.000000e+00> : vector<8x8xf32>
    %629 = tpu.matmul %626, %627, %cst_279 {dimension_numbers = #tpu.dot_dimension_numbers<[1], [1], [0], [0], [0, 0, 1, 0], [], []>, precision = #tpu.contract_precision<fp32>} : vector<8x4xf32>, vector<8x4xf32>, vector<8x8xf32> -> vector<8x8xf32>
    %630 = arith.addf %629, %553 : vector<8x8xf32>
    %cst_280 = arith.constant 5.000000e-01 : f32
    %631 = vector.broadcast %cst_280 : f32 to vector<8x8xf32>
    %632 = arith.mulf %630, %631 : vector<8x8xf32>
    %cst_281 = arith.constant dense<0xFF800000> : vector<8xf32>
    %633 = vector.multi_reduction <maximumf>, %632, %cst_281 [1] : vector<8x8xf32> to vector<8xf32>
    %634 = vector.shape_cast %633 : vector<8xf32> to vector<8x1xf32>
    %635 = vector.broadcast %634 : vector<8x1xf32> to vector<8x8xf32>
    %636 = arith.subf %632, %635 : vector<8x8xf32>
    %637 = math.exp %636 : vector<8x8xf32>
    %cst_282 = arith.constant dense<0.000000e+00> : vector<8xf32>
    %638 = vector.multi_reduction <add>, %637, %cst_282 [1] : vector<8x8xf32> to vector<8xf32>
    %639 = vector.shape_cast %638 : vector<8xf32> to vector<8x1xf32>
    %cst_283 = arith.constant 1.000000e+00 : f32
    %640 = vector.broadcast %cst_283 : f32 to vector<8x1xf32>
    %641 = arith.divf %640, %639 : vector<8x1xf32>
    %cst_284 = arith.constant dense<0.000000e+00> : vector<8x4xf32>
    %642 = tpu.matmul %637, %628, %cst_284 {dimension_numbers = #tpu.dot_dimension_numbers<[1], [0], [0], [1], [0, 0, 1, 1], [], []>, precision = #tpu.contract_precision<fp32>} : vector<8x8xf32>, vector<8x4xf32>, vector<8x4xf32> -> vector<8x4xf32>
    %643 = vector.broadcast %641 : vector<8x1xf32> to vector<8x4xf32>
    %644 = arith.mulf %642, %643 : vector<8x4xf32>
    %c3_285 = arith.constant 3 : index
    %c0_286 = arith.constant 0 : index
    %c12_287 = arith.constant 12 : index
    %645 = vector.load %arg5[%c3_285, %c0_286, %c12_287] : memref<4x8x32xf32, #tpu.memory_space<vmem>>, vector<1x8x4xf32>
    %646 = vector.shape_cast %645 : vector<1x8x4xf32> to vector<8x4xf32>
    %647 = vector.shape_cast %644 : vector<8x4xf32> to vector<1x8x4xf32>
    tpu.vector_store %arg5[%c3_285, %c0_286, %c12_287], %647 {strides = array<i32>} : memref<4x8x32xf32, #tpu.memory_space<vmem>>, vector<1x8x4xf32>,
    %648 = vector.extract_strided_slice %555 {offsets = [0, 16], sizes = [8, 4], strides = [1, 1]} : vector<8x32xf32> to vector<8x4xf32>
    %649 = vector.extract_strided_slice %557 {offsets = [0, 16], sizes = [8, 4], strides = [1, 1]} : vector<8x32xf32> to vector<8x4xf32>
    %650 = vector.extract_strided_slice %559 {offsets = [0, 16], sizes = [8, 4], strides = [1, 1]} : vector<8x32xf32> to vector<8x4xf32>
    %cst_288 = arith.constant dense<0.000000e+00> : vector<8x8xf32>
    %651 = tpu.matmul %648, %649, %cst_288 {dimension_numbers = #tpu.dot_dimension_numbers<[1], [1], [0], [0], [0, 0, 1, 0], [], []>, precision = #tpu.contract_precision<fp32>} : vector<8x4xf32>, vector<8x4xf32>, vector<8x8xf32> -> vector<8x8xf32>
    %652 = arith.addf %651, %553 : vector<8x8xf32>
    %cst_289 = arith.constant 5.000000e-01 : f32
    %653 = vector.broadcast %cst_289 : f32 to vector<8x8xf32>
    %654 = arith.mulf %652, %653 : vector<8x8xf32>
    %cst_290 = arith.constant dense<0xFF800000> : vector<8xf32>
    %655 = vector.multi_reduction <maximumf>, %654, %cst_290 [1] : vector<8x8xf32> to vector<8xf32>
    %656 = vector.shape_cast %655 : vector<8xf32> to vector<8x1xf32>
    %657 = vector.broadcast %656 : vector<8x1xf32> to vector<8x8xf32>
    %658 = arith.subf %654, %657 : vector<8x8xf32>
    %659 = math.exp %658 : vector<8x8xf32>
    %cst_291 = arith.constant dense<0.000000e+00> : vector<8xf32>
    %660 = vector.multi_reduction <add>, %659, %cst_291 [1] : vector<8x8xf32> to vector<8xf32>
    %661 = vector.shape_cast %660 : vector<8xf32> to vector<8x1xf32>
    %cst_292 = arith.constant 1.000000e+00 : f32
    %662 = vector.broadcast %cst_292 : f32 to vector<8x1xf32>
    %663 = arith.divf %662, %661 : vector<8x1xf32>
    %cst_293 = arith.constant dense<0.000000e+00> : vector<8x4xf32>
    %664 = tpu.matmul %659, %650, %cst_293 {dimension_numbers = #tpu.dot_dimension_numbers<[1], [0], [0], [1], [0, 0, 1, 1], [], []>, precision = #tpu.contract_precision<fp32>} : vector<8x8xf32>, vector<8x4xf32>, vector<8x4xf32> -> vector<8x4xf32>
    %665 = vector.broadcast %663 : vector<8x1xf32> to vector<8x4xf32>
    %666 = arith.mulf %664, %665 : vector<8x4xf32>
    %c3_294 = arith.constant 3 : index
    %c0_295 = arith.constant 0 : index
    %c16_296 = arith.constant 16 : index
    %667 = vector.load %arg5[%c3_294, %c0_295, %c16_296] : memref<4x8x32xf32, #tpu.memory_space<vmem>>, vector<1x8x4xf32>
    %668 = vector.shape_cast %667 : vector<1x8x4xf32> to vector<8x4xf32>
    %669 = vector.shape_cast %666 : vector<8x4xf32> to vector<1x8x4xf32>
    tpu.vector_store %arg5[%c3_294, %c0_295, %c16_296], %669 {strides = array<i32>} : memref<4x8x32xf32, #tpu.memory_space<vmem>>, vector<1x8x4xf32>,
    %670 = vector.extract_strided_slice %555 {offsets = [0, 20], sizes = [8, 4], strides = [1, 1]} : vector<8x32xf32> to vector<8x4xf32>
    %671 = vector.extract_strided_slice %557 {offsets = [0, 20], sizes = [8, 4], strides = [1, 1]} : vector<8x32xf32> to vector<8x4xf32>
    %672 = vector.extract_strided_slice %559 {offsets = [0, 20], sizes = [8, 4], strides = [1, 1]} : vector<8x32xf32> to vector<8x4xf32>
    %cst_297 = arith.constant dense<0.000000e+00> : vector<8x8xf32>
    %673 = tpu.matmul %670, %671, %cst_297 {dimension_numbers = #tpu.dot_dimension_numbers<[1], [1], [0], [0], [0, 0, 1, 0], [], []>, precision = #tpu.contract_precision<fp32>} : vector<8x4xf32>, vector<8x4xf32>, vector<8x8xf32> -> vector<8x8xf32>
    %674 = arith.addf %673, %553 : vector<8x8xf32>
    %cst_298 = arith.constant 5.000000e-01 : f32
    %675 = vector.broadcast %cst_298 : f32 to vector<8x8xf32>
    %676 = arith.mulf %674, %675 : vector<8x8xf32>
    %cst_299 = arith.constant dense<0xFF800000> : vector<8xf32>
    %677 = vector.multi_reduction <maximumf>, %676, %cst_299 [1] : vector<8x8xf32> to vector<8xf32>
    %678 = vector.shape_cast %677 : vector<8xf32> to vector<8x1xf32>
    %679 = vector.broadcast %678 : vector<8x1xf32> to vector<8x8xf32>
    %680 = arith.subf %676, %679 : vector<8x8xf32>
    %681 = math.exp %680 : vector<8x8xf32>
    %cst_300 = arith.constant dense<0.000000e+00> : vector<8xf32>
    %682 = vector.multi_reduction <add>, %681, %cst_300 [1] : vector<8x8xf32> to vector<8xf32>
    %683 = vector.shape_cast %682 : vector<8xf32> to vector<8x1xf32>
    %cst_301 = arith.constant 1.000000e+00 : f32
    %684 = vector.broadcast %cst_301 : f32 to vector<8x1xf32>
    %685 = arith.divf %684, %683 : vector<8x1xf32>
    %cst_302 = arith.constant dense<0.000000e+00> : vector<8x4xf32>
    %686 = tpu.matmul %681, %672, %cst_302 {dimension_numbers = #tpu.dot_dimension_numbers<[1], [0], [0], [1], [0, 0, 1, 1], [], []>, precision = #tpu.contract_precision<fp32>} : vector<8x8xf32>, vector<8x4xf32>, vector<8x4xf32> -> vector<8x4xf32>
    %687 = vector.broadcast %685 : vector<8x1xf32> to vector<8x4xf32>
    %688 = arith.mulf %686, %687 : vector<8x4xf32>
    %c3_303 = arith.constant 3 : index
    %c0_304 = arith.constant 0 : index
    %c20_305 = arith.constant 20 : index
    %689 = vector.load %arg5[%c3_303, %c0_304, %c20_305] : memref<4x8x32xf32, #tpu.memory_space<vmem>>, vector<1x8x4xf32>
    %690 = vector.shape_cast %689 : vector<1x8x4xf32> to vector<8x4xf32>
    %691 = vector.shape_cast %688 : vector<8x4xf32> to vector<1x8x4xf32>
    tpu.vector_store %arg5[%c3_303, %c0_304, %c20_305], %691 {strides = array<i32>} : memref<4x8x32xf32, #tpu.memory_space<vmem>>, vector<1x8x4xf32>,
    %692 = vector.extract_strided_slice %555 {offsets = [0, 24], sizes = [8, 4], strides = [1, 1]} : vector<8x32xf32> to vector<8x4xf32>
    %693 = vector.extract_strided_slice %557 {offsets = [0, 24], sizes = [8, 4], strides = [1, 1]} : vector<8x32xf32> to vector<8x4xf32>
    %694 = vector.extract_strided_slice %559 {offsets = [0, 24], sizes = [8, 4], strides = [1, 1]} : vector<8x32xf32> to vector<8x4xf32>
    %cst_306 = arith.constant dense<0.000000e+00> : vector<8x8xf32>
    %695 = tpu.matmul %692, %693, %cst_306 {dimension_numbers = #tpu.dot_dimension_numbers<[1], [1], [0], [0], [0, 0, 1, 0], [], []>, precision = #tpu.contract_precision<fp32>} : vector<8x4xf32>, vector<8x4xf32>, vector<8x8xf32> -> vector<8x8xf32>
    %696 = arith.addf %695, %553 : vector<8x8xf32>
    %cst_307 = arith.constant 5.000000e-01 : f32
    %697 = vector.broadcast %cst_307 : f32 to vector<8x8xf32>
    %698 = arith.mulf %696, %697 : vector<8x8xf32>
    %cst_308 = arith.constant dense<0xFF800000> : vector<8xf32>
    %699 = vector.multi_reduction <maximumf>, %698, %cst_308 [1] : vector<8x8xf32> to vector<8xf32>
    %700 = vector.shape_cast %699 : vector<8xf32> to vector<8x1xf32>
    %701 = vector.broadcast %700 : vector<8x1xf32> to vector<8x8xf32>
    %702 = arith.subf %698, %701 : vector<8x8xf32>
    %703 = math.exp %702 : vector<8x8xf32>
    %cst_309 = arith.constant dense<0.000000e+00> : vector<8xf32>
    %704 = vector.multi_reduction <add>, %703, %cst_309 [1] : vector<8x8xf32> to vector<8xf32>
    %705 = vector.shape_cast %704 : vector<8xf32> to vector<8x1xf32>
    %cst_310 = arith.constant 1.000000e+00 : f32
    %706 = vector.broadcast %cst_310 : f32 to vector<8x1xf32>
    %707 = arith.divf %706, %705 : vector<8x1xf32>
    %cst_311 = arith.constant dense<0.000000e+00> : vector<8x4xf32>
    %708 = tpu.matmul %703, %694, %cst_311 {dimension_numbers = #tpu.dot_dimension_numbers<[1], [0], [0], [1], [0, 0, 1, 1], [], []>, precision = #tpu.contract_precision<fp32>} : vector<8x8xf32>, vector<8x4xf32>, vector<8x4xf32> -> vector<8x4xf32>
    %709 = vector.broadcast %707 : vector<8x1xf32> to vector<8x4xf32>
    %710 = arith.mulf %708, %709 : vector<8x4xf32>
    %c3_312 = arith.constant 3 : index
    %c0_313 = arith.constant 0 : index
    %c24_314 = arith.constant 24 : index
    %711 = vector.load %arg5[%c3_312, %c0_313, %c24_314] : memref<4x8x32xf32, #tpu.memory_space<vmem>>, vector<1x8x4xf32>
    %712 = vector.shape_cast %711 : vector<1x8x4xf32> to vector<8x4xf32>
    %713 = vector.shape_cast %710 : vector<8x4xf32> to vector<1x8x4xf32>
    tpu.vector_store %arg5[%c3_312, %c0_313, %c24_314], %713 {strides = array<i32>} : memref<4x8x32xf32, #tpu.memory_space<vmem>>, vector<1x8x4xf32>,
    %714 = vector.extract_strided_slice %555 {offsets = [0, 28], sizes = [8, 4], strides = [1, 1]} : vector<8x32xf32> to vector<8x4xf32>
    %715 = vector.extract_strided_slice %557 {offsets = [0, 28], sizes = [8, 4], strides = [1, 1]} : vector<8x32xf32> to vector<8x4xf32>
    %716 = vector.extract_strided_slice %559 {offsets = [0, 28], sizes = [8, 4], strides = [1, 1]} : vector<8x32xf32> to vector<8x4xf32>
    %cst_315 = arith.constant dense<0.000000e+00> : vector<8x8xf32>
    %717 = tpu.matmul %714, %715, %cst_315 {dimension_numbers = #tpu.dot_dimension_numbers<[1], [1], [0], [0], [0, 0, 1, 0], [], []>, precision = #tpu.contract_precision<fp32>} : vector<8x4xf32>, vector<8x4xf32>, vector<8x8xf32> -> vector<8x8xf32>
    %718 = arith.addf %717, %553 : vector<8x8xf32>
    %cst_316 = arith.constant 5.000000e-01 : f32
    %719 = vector.broadcast %cst_316 : f32 to vector<8x8xf32>
    %720 = arith.mulf %718, %719 : vector<8x8xf32>
    %cst_317 = arith.constant dense<0xFF800000> : vector<8xf32>
    %721 = vector.multi_reduction <maximumf>, %720, %cst_317 [1] : vector<8x8xf32> to vector<8xf32>
    %722 = vector.shape_cast %721 : vector<8xf32> to vector<8x1xf32>
    %723 = vector.broadcast %722 : vector<8x1xf32> to vector<8x8xf32>
    %724 = arith.subf %720, %723 : vector<8x8xf32>
    %725 = math.exp %724 : vector<8x8xf32>
    %cst_318 = arith.constant dense<0.000000e+00> : vector<8xf32>
    %726 = vector.multi_reduction <add>, %725, %cst_318 [1] : vector<8x8xf32> to vector<8xf32>
    %727 = vector.shape_cast %726 : vector<8xf32> to vector<8x1xf32>
    %cst_319 = arith.constant 1.000000e+00 : f32
    %728 = vector.broadcast %cst_319 : f32 to vector<8x1xf32>
    %729 = arith.divf %728, %727 : vector<8x1xf32>
    %cst_320 = arith.constant dense<0.000000e+00> : vector<8x4xf32>
    %730 = tpu.matmul %725, %716, %cst_320 {dimension_numbers = #tpu.dot_dimension_numbers<[1], [0], [0], [1], [0, 0, 1, 1], [], []>, precision = #tpu.contract_precision<fp32>} : vector<8x8xf32>, vector<8x4xf32>, vector<8x4xf32> -> vector<8x4xf32>
    %731 = vector.broadcast %729 : vector<8x1xf32> to vector<8x4xf32>
    %732 = arith.mulf %730, %731 : vector<8x4xf32>
    %c3_321 = arith.constant 3 : index
    %c0_322 = arith.constant 0 : index
    %c28_323 = arith.constant 28 : index
    %733 = vector.load %arg5[%c3_321, %c0_322, %c28_323] : memref<4x8x32xf32, #tpu.memory_space<vmem>>, vector<1x8x4xf32>
    %734 = vector.shape_cast %733 : vector<1x8x4xf32> to vector<8x4xf32>
    %735 = vector.shape_cast %732 : vector<8x4xf32> to vector<1x8x4xf32>
    tpu.vector_store %arg5[%c3_321, %c0_322, %c28_323], %735 {strides = array<i32>} : memref<4x8x32xf32, #tpu.memory_space<vmem>>, vector<1x8x4xf32>,
    return
  }
  func.func @transform_0(%arg0: i32) -> (i32, i32, i32) {
    %c0_i32 = arith.constant 0 : i32
    %c0_i32_0 = arith.constant 0 : i32
    %c0_i32_1 = arith.constant 0 : i32
    return %arg0, %c0_i32, %c0_i32_0 : i32, i32, i32
  }
  func.func @transform_1(%arg0: i32) -> (i32, i32, i32) {
    %c0_i32 = arith.constant 0 : i32
    %c0_i32_0 = arith.constant 0 : i32
    %c0_i32_1 = arith.constant 0 : i32
    return %arg0, %c0_i32, %c0_i32_0 : i32, i32, i32
  }
  func.func @transform_2(%arg0: i32) -> (i32, i32, i32) {
    %c0_i32 = arith.constant 0 : i32
    %c0_i32_0 = arith.constant 0 : i32
    %c0_i32_1 = arith.constant 0 : i32
    return %arg0, %c0_i32, %c0_i32_0 : i32, i32, i32
  }
  func.func @transform_3(%arg0: i32) -> (i32, i32, i32) {
    %c0_i32 = arith.constant 0 : i32
    %c0_i32_0 = arith.constant 0 : i32
    %c0_i32_1 = arith.constant 0 : i32
    %c0_i32_2 = arith.constant 0 : i32
    return %c0_i32, %c0_i32_0, %c0_i32_1 : i32, i32, i32
  }
  func.func @transform_4(%arg0: i32) -> (i32, i32, i32) {
    %c0_i32 = arith.constant 0 : i32
    %c0_i32_0 = arith.constant 0 : i32
    %c0_i32_1 = arith.constant 0 : i32
    return %arg0, %c0_i32, %c0_i32_0 : i32, i32, i32
  }
}

</mosaic_0001>

<bundles_post_ra>
// kernel: tpu_custom_call.1
= control target key start
LH: loop header
LB: loop body
LE: loop exit
PB: predicated region body
PF: predicated region fallthrough
CT: control target
= control target key end

     0   :  { %9 = vsyncpa [#allocation3], 0  ;;  %s12706_s0 = inlined_call_operand.hbm [shape: f32[4,8,32], index: 0, kind: input, shape index: {}]   ;;  %s12707_s1 = inlined_call_operand.hbm [shape: f32[4,8,32], index: 1, kind: input, shape index: {}]   ;;  %s12708_s2 = inlined_call_operand.hbm [shape: f32[4,8,32], index: 2, kind: input, shape index: {}]   ;;  %s12709_s3 = inlined_call_operand.hbm [shape: f32[2,8,8], index: 3, kind: input, shape index: {}]   ;;  %s12710_s4 = inlined_call_operand.hbm [shape: f32[4,8,32], index: 4, kind: output, shape index: {}]  }
   0x1   :  { %10 = vsyncpa [#allocation6], 0 }
   0x2   :  { %11 = vsyncpa [#allocation9], 0 }
   0x3   :  { %12 = vsyncpa [#allocation4], 0  ;;  %s30_s17 = sshll.u32 %s12707_s1, 4  ;;  %s11172_s18 = smov [#allocation5]   ;;  %s31_s17 = int_to_ptr.hbm [resolvable:$true] %s30_s17 }
   0x4   :  { %s32_s19 = sshll.u32 %s11172_s18, 4  ;;  %s17_s22 = sshll.u32 %s12706_s0, 4  ;;  %s33_s19 = int_to_ptr.vmem [resolvable:$true] %s32_s19  ;;  %s18_s22 = int_to_ptr.hbm [resolvable:$true] %s17_s22 }
   0x5   :  { %s11173_s23 = smov 128   ;;  %s11174_s24 = smov 8  }
   0x6   :  { %38 = dma.hbm_to_vmem [thread:$0]  %s31_s17, 512, %s33_s19, [#allocation6], %s11173_s23, %s11173_s23, %s11174_s24  }
   0x7   :  { %s11175_s25 = smov [#allocation2]   ;;  %s43_s1 = sshll.u32 %s12708_s2, 4  ;;  %s44_s1 = int_to_ptr.hbm [resolvable:$true] %s43_s1 }
   0x8   :  { %s19_s26 = sshll.u32 %s11175_s25, 4  ;;  %s56_s30 = sshll.u32 %s12709_s3, 4  ;;  %s20_s26 = int_to_ptr.vmem [resolvable:$true] %s19_s26  ;;  %s57_s30 = int_to_ptr.hbm [resolvable:$true] %s56_s30 }
   0x9   :  { %25 = dma.hbm_to_vmem [thread:$0]  %s18_s22, 512, %s20_s26, [#allocation3], %s11173_s23, %s11173_s23, %s11174_s24  }
   0xa   :  { %s11176_s5 = smov [#allocation7]   ;;  %s11177_s7 = smov [#allocation8]  }
   0xb   :  { %s45_s6 = sshll.u32 %s11176_s5, 4  ;;  %s58_s2 = sshll.u32 %s11177_s7, 4  ;;  %s46_s6 = int_to_ptr.vmem [resolvable:$true] %s45_s6  ;;  %s59_s2 = int_to_ptr.vmem [resolvable:$true] %s58_s2 }
   0xc   :  { %51 = dma.hbm_to_vmem [thread:$0]  %s44_s1, 512, %s46_s6, [#allocation6], %s11173_s23, %s11173_s23, %s11174_s24  }
   0xd   :  { %64 = dma.hbm_to_vmem [thread:$0]  %s57_s30, 256, %s59_s2, [#allocation9], %s11173_s23, %s11173_s23, %s11174_s24  }
   0xe   :  { %11164 = dma.done.wait [#allocation3], 512  }
   0xf   :  { %11165 = vsyncadd [#allocation3], 4294966784 }
  0x10   :  { %11166 = dma.done.wait [#allocation6], 1024  }
  0x11   :  { %11167 = vsyncadd [#allocation6], 4294966272 }
  0x12   :  { %11168 = dma.done.wait [#allocation9], 256  }
  0x13   :  { %11169 = vsyncadd [#allocation9], 4294967040  ;;  %vm85_vm0 = vcmask 31744   ;;  %v11241_v0 = vld [vmem:[#allocation5] sm:$0xff]  ;;  %s11178_s3 = smov 124   ;;  %vm239_vm1 = vcmask 64512  }
  0x14   :  { %v11243_v1 = vld [vmem:[#allocation2] sm:$0xff]  ;;  %v90_v2 = vsel %vm85_vm0, %v11241_v0, 0  ;;  %s11179_s8 = smov 120   ;;  %s11180_s9 = smov 116  }
  0x15   :  { %v87_v3 = vsel %vm85_vm0, %v11243_v1, 0  ;;  %v107_v4 = vand.u32 4294901760, %v90_v2  ;;  %415 = vrot.lane.b32.xlu1 %v11243_v1, %s11178_s3  ;;  %v11251_v14 = vld [vmem:[#allocation8] sm:$0xff]  ;;  %s11181_s10 = smov 112   ;;  %s11182_s11 = smov 108  }
  0x16   :  { %v109_v5 = vand.u32 4294901760, %v87_v3  ;;  %v11257_v29 = vld [vmem:[#allocation7] sm:$0xff]  ;;  %s11183_s12 = smov 104   ;;  %s11184_s13 = smov 100  }
  0x17   :  { %v134_v6 = vsub.f32 %v90_v2, %v107_v4  ;;  %108 = vmatpush.xpose.msra.mxu0 %v107_v4  ;;  %184 = vmatpush.xpose.msra.mxu3 %v107_v4  ;;  %v282_v30 = vand.u32 4294901760, %v11257_v29  ;;  %s11185_s14 = smov 4   ;;  %s11186_s15 = smov 12  }
  0x18   :  { %v110_v7 = vsub.f32 %v87_v3, %v109_v5  ;;  %595 = vrot.lane.b32.xlu2 %v11257_v29, %s11178_s3  ;;  %s11187_s16 = smov 16   ;;  %s11188_s17 = smov 20  }
  0x19   :  { %161 = vmatpush.xpose.msra.mxu2 %v134_v6  ;;  %v135_v8 = vand.u32 4294901760, %v134_v6  ;;  %v309_v31 = vsub.f32 %v11257_v29, %v282_v30  ;;  %s11189_s18 = smov 24   ;;  %s11190_s19 = smov 28  }
  0x1a   :  { %v111_v9 = vand.u32 4294901760, %v110_v7  ;;  %s11191_s20 = smov [#allocation10]   ;;  %s10877_s26 = sshll.u32 %s12710_s4, 4  ;;  %s10878_s26 = int_to_ptr.hbm [resolvable:$true] %s10877_s26 }
  0x1b   :  { %v136_v10 = vsub.f32 %v134_v6, %v135_v8  ;;  %210 = vmatpush.xpose.msrb.mxu0 %v135_v8  ;;  %v310_v32 = vand.u32 4294901760, %v309_v31  ;;  %s10875_s21 = sshll.u32 %s11191_s20, 4  ;;  %s10876_s21 = int_to_ptr.vmem [resolvable:$true] %s10875_s21 }
  0x1c   :  { %v112_v11 = vsub.f32 %v110_v7, %v111_v9  ;;  %188 = vmatmul.f32.vlgmr.msra.gmra.mxu3 %v111_v9  ;;  %164 = vmatmul.f32.vlgmr.msra.gmra.mxu2 %v110_v7 }
  0x1d   :  { %v137_v12 = vand.u32 4294901760, %v136_v10  ;;  %283 = vmatpush.msrb.mxu2 %v282_v30  ;;  %v311_v33 = vsub.f32 %v309_v31, %v310_v32 }
  0x1e   :  { %v113_v13 = vand.u32 4294901760, %v112_v11 }
  0x1f   :  { %138 = vmatpush.xpose.msra.mxu1 %v137_v12  ;;  %385 = vmatpush.msra.mxu2 %v310_v32  ;;  %v312_v34 = vand.u32 4294901760, %v311_v33 }
  0x20   :  { %114 = vmatmul.f32.vlgmr.msra.gmra.mxu0 %v113_v13  ;;  %756 = vrot.lane.b32.xlu2 %v11241_v0, %s11179_s8 }
  0x21   :  { %336 = vmatpush.msra.mxu0 %v309_v31  ;;  %313 = vmatpush.msrb.mxu3 %v312_v34 }
  0x22   :  { %140 = vmatmul.f32.vlgmr.msra.gmra.mxu1 %v109_v5 }
  0x23   :  { %232 = vmatpush.xpose.msrb.mxu1 %v107_v4  ;;  %407 = vmatpush.msra.mxu3 %v282_v30 }
  0x27   :  { %359 = vmatpush.msra.mxu1 %v282_v30 }
  0x28   :  { %212 = vmatmul.f32.vlgmr.msrb.gmra.mxu0 %v109_v5  ;;  %754 = vrot.lane.b32.xlu2 %v11243_v1, %s11179_s8 }
  0x2a   :  { %234 = vmatmul.f32.vlgmr.msrb.gmra.mxu1 %v109_v5 }
  0x72   :  { %v596_v59 = vpop.permute.xlu2 %595 }
  0x73   :  { %v616_v60 = vand.u32 4294901760, %v596_v59 }
  0x75   :  { %v643_v62 = vsub.f32 %v596_v59, %v616_v60 }
  0x77   :  { %v644_v3 = vand.u32 4294901760, %v643_v62 }
  0x87   :  { %v416_v37 = vpop.permute.xlu1 %415 }
  0x88   :  { %v419_v39 = vsel %vm85_vm0, %v416_v37, 0 }
  0x89   :  { %v440_v40 = vand.u32 4294901760, %v419_v39 }
  0x8b   :  { %v441_v42 = vsub.f32 %v419_v39, %v440_v40 }
  0x8d   :  { %v442_v45 = vand.u32 4294901760, %v441_v42 }
  0x8f   :  { %v443_v48 = vsub.f32 %v441_v42, %v442_v45 }
  0x91   :  { %v444_v55 = vand.u32 4294901760, %v443_v48 }
  0x9d   :  { %v115_v15 = vpop.f32.mrf.mxu0 }
  0x9e   :  { %v116_v16 = vadd.f32 %v115_v15, %v11251_v14 }
  0x9f   :  { %v141_v17 = vpop.f32.mrf.mxu1  ;;  %v165_v18 = vpop.f32.mrf.mxu2 }
  0xa0   :  { %v142_v19 = vadd.f32 %v141_v17, %v116_v16  ;;  %v189_v20 = vpop.f32.mrf.mxu3 }
  0xa2   :  { %v166_v21 = vadd.f32 %v165_v18, %v142_v19 }
  0xa4   :  { %v190_v22 = vadd.f32 %v189_v20, %v166_v21 }
  0xa5   :  { %v213_v23 = vpop.f32.mrf.mxu0 }
  0xa6   :  { %v214_v24 = vadd.f32 %v213_v23, %v190_v22  ;;  %v757_v22 = vpop.permute.xlu2 %756  ;;  %v645_v23 = vsub.f32 %v643_v62, %v644_v3 }
  0xa7   :  { %v235_v25 = vpop.f32.mrf.mxu1 }
  0xa8   :  { %v236_v26 = vadd.f32 %v235_v25, %v214_v24  ;;  %v760_v24 = vsel %vm85_vm0, %v757_v22, 0 }
  0xa9   :  { %v777_v25 = vand.u32 4294901760, %v760_v24 }
  0xaa   :  { %v238_v27 = vmul.f32 0.5, %v236_v26  ;;  %v646_v26 = vand.u32 4294901760, %v645_v23 }
  0xac   :  { %v240_v28 = vsel %vm239_vm1, %v238_v27, -inf }
  0xad   :  { %241 = vmax.xlane.f32.xlu0 %v240_v28 }
  0xae   :  { %v755_v32 = vpop.permute.xlu2 %754 }
  0xc1   :  { %417 = vrot.lane.b32.xlu0 %v11241_v0, %s11178_s3 }
  0xc9   :  { %933 = vrot.lane.b32.xlu0 %v11257_v29, %s11179_s8 }
  0xd1   :  { %1094 = vrot.lane.b32.xlu0 %v11241_v0, %s11180_s9 }
  0xd9   :  { %1092 = vrot.lane.b32.xlu0 %v11243_v1, %s11180_s9 }
  0xe1   :  { %1271 = vrot.lane.b32.xlu0 %v11257_v29, %s11180_s9 }
  0xe9   :  { %1430 = vrot.lane.b32.xlu0 %v11243_v1, %s11181_s10 }
  0xf1   :  { %1609 = vrot.lane.b32.xlu0 %v11257_v29, %s11181_s10 }
  0xf9   :  { %1768 = vrot.lane.b32.xlu0 %v11243_v1, %s11182_s11 }
 0x101   :  { %1947 = vrot.lane.b32.xlu0 %v11257_v29, %s11182_s11 }
 0x109   :  { %2108 = vrot.lane.b32.xlu0 %v11241_v0, %s11183_s12 }
 0x120   :  { %v242_v35 = vpop.xlane.xlu0 %241 }
 0x121   :  { %v243_v36 = vsub.f32 %v238_v27, %v242_v35  ;;  %v804_v27 = vsub.f32 %v760_v24, %v777_v25  ;;  %v758_v35 = vsel %vm85_vm0, %v755_v32, 0 }
 0x122   :  { %v779_v37 = vand.u32 4294901760, %v758_v35 }
 0x123   :  { %v244_v38 = vmul.f32 1.442695, %v243_v36  ;;  %v805_v28 = vand.u32 4294901760, %v804_v27 }
 0x125   :  { %10912 = vpow2.f32 %v244_v38  ;;  %v806_v30 = vsub.f32 %v804_v27, %v805_v28  ;;  %v780_v38 = vsub.f32 %v758_v35, %v779_v37 }
 0x127   :  { %v807_v31 = vand.u32 4294901760, %v806_v30 }
 0x12b   :  { %v11264_v41 = vpop.eup %10912 }
 0x12c   :  { %v265_v43 = vsel %vm239_vm1, %v11264_v41, 0 }
 0x12d   :  { %v284_v44 = vand.u32 4294901760, %v265_v43 }
 0x12f   :  { %315 = vmatmul.f32.vlgmr.msrb.gmra.mxu3 %v284_v44  ;;  %v285_v46 = vsub.f32 %v265_v43, %v284_v44 }
 0x131   :  { %339 = vmatmul.f32.vlgmr.msra.gmra.mxu0 %v285_v46  ;;  %v286_v47 = vand.u32 4294901760, %v285_v46 }
 0x133   :  { %363 = vmatmul.f32.vlgmr.msra.gmra.mxu1 %v286_v47  ;;  %v418_v49 = vpop.permute.xlu0 %417  ;;  %v287_v50 = vsub.f32 %v285_v46, %v286_v47 }
 0x134   :  { %v421_v51 = vsel %vm85_vm0, %v418_v49, 0 }
 0x135   :  { %v438_v52 = vand.u32 4294901760, %v421_v51  ;;  %v288_v53 = vand.u32 4294901760, %v287_v50 }
 0x137   :  { %v465_v54 = vsub.f32 %v421_v51, %v438_v52  ;;  %289 = vmatmul.f32.vlgmr.msrb.gmra.mxu2 %v288_v53  ;;  %409 = vmatmul.f32.vlgmr.msra.gmra.mxu3 %v284_v44 }
 0x138   :  { %439 = vmatpush.xpose.msrb.mxu0 %v438_v52  ;;  %515 = vmatpush.xpose.msrb.mxu3 %v438_v52 }
 0x139   :  { %v466_v56 = vand.u32 4294901760, %v465_v54  ;;  %492 = vmatpush.xpose.msrb.mxu2 %v465_v54 }
 0x13b   :  { %v467_v57 = vsub.f32 %v465_v54, %v466_v56  ;;  %445 = vmatmul.f32.vlgmr.msrb.gmra.mxu0 %v444_v55  ;;  %v934_v50 = vpop.permute.xlu0 %933 }
 0x13c   :  { %541 = vmatpush.xpose.msra.mxu0 %v466_v56  ;;  %647 = vmatpush.msra.mxu3 %v646_v26  ;;  %v954_v51 = vand.u32 4294901760, %v934_v50 }
 0x13d   :  { %v468_v58 = vand.u32 4294901760, %v467_v57 }
 0x13e   :  { %v981_v53 = vsub.f32 %v934_v50, %v954_v51 }
 0x13f   :  { %387 = vmatmul.f32.vlgmr.msra.gmra.mxu2 %v284_v44  ;;  %469 = vmatpush.xpose.msrb.mxu1 %v468_v58 }
 0x140   :  { %519 = vmatmul.f32.vlgmr.msrb.gmra.mxu3 %v442_v45  ;;  %617 = vmatpush.msra.mxu2 %v616_v60  ;;  %v982_v56 = vand.u32 4294901760, %v981_v53 }
 0x141   :  { %670 = vmatpush.msrb.mxu0 %v643_v62  ;;  %741 = vmatpush.msrb.mxu3 %v616_v60 }
 0x142   :  { %471 = vmatmul.f32.vlgmr.msrb.gmra.mxu1 %v440_v40 }
 0x143   :  { %563 = vmatpush.xpose.msra.mxu1 %v438_v52  ;;  %543 = vmatmul.f32.vlgmr.msra.gmra.mxu0 %v440_v40 }
 0x144   :  { %778 = vmatpush.xpose.msra.mxu0 %v777_v25 }
 0x147   :  { %495 = vmatmul.f32.vlgmr.msrb.gmra.mxu2 %v441_v42  ;;  %693 = vmatpush.msrb.mxu1 %v616_v60  ;;  %v781_v42 = vand.u32 4294901760, %v780_v38 }
 0x148   :  { %719 = vmatpush.msrb.mxu2 %v644_v3 }
 0x149   :  { %v782_v45 = vsub.f32 %v780_v38, %v781_v42 }
 0x14a   :  { %565 = vmatmul.f32.vlgmr.msra.gmra.mxu1 %v440_v40 }
 0x14b   :  { %808 = vmatpush.xpose.msra.mxu1 %v807_v31  ;;  %v783_v49 = vand.u32 4294901760, %v782_v45 }
 0x1ae   :  { %v11275_v61 = vpop.f32.mrf.mxu0 }
 0x1af   :  { %12720 = vst [vmem:[#allocation15_spill] sm:$0xff] %v11275_v61 }
 0x1b0   :  { %v11281_v4 = vpop.f32.mrf.mxu1 }
 0x1b1   :  { %12722 = vst [vmem:[#allocation17_spill] sm:$0xff] %v11281_v4 }
 0x1b2   :  { %v11277_v63 = vpop.f32.mrf.mxu3 }
 0x1b3   :  { %12721 = vst [vmem:[#allocation16_spill] sm:$0xff] %v11277_v63 }
 0x1b8   :  { %v446_v6 = vpop.f32.mrf.mxu0 }
 0x1b9   :  { %v447_v8 = vadd.f32 %v446_v6, %v11251_v14 }
 0x1ba   :  { %v11279_v2 = vpop.f32.mrf.mxu2  ;;  %v11285_v7 = vpop.f32.mrf.mxu3 }
 0x1bb   :  { %12724 = vst [vmem:[#allocation19_spill] sm:$0xff] %v11285_v7  ;;  %v11900_v7 = vld [vmem:[#allocation7 + $0x18] sm:$0xff] }
 0x1bf   :  { %v472_v9 = vpop.f32.mrf.mxu1 }
 0x1c0   :  { %v473_v10 = vadd.f32 %v472_v9, %v447_v8  ;;  %v544_v16 = vpop.f32.mrf.mxu0 }
 0x1c2   :  { %v11283_v5 = vpop.f32.mrf.mxu2 }
 0x1c3   :  { %12723 = vst [vmem:[#allocation18_spill] sm:$0xff] %v11283_v5  ;;  %v520_v13 = vpop.f32.mrf.mxu3 }
 0x1c7   :  { %v566_v18 = vpop.f32.mrf.mxu1 }
 0x1ca   :  { %v496_v11 = vpop.f32.mrf.mxu2 }
 0x1cb   :  { %v497_v12 = vadd.f32 %v496_v11, %v473_v10 }
 0x1cd   :  { %v521_v15 = vadd.f32 %v520_v13, %v497_v12 }
 0x1cf   :  { %v545_v17 = vadd.f32 %v544_v16, %v521_v15 }
 0x1d1   :  { %v567_v19 = vadd.f32 %v566_v18, %v545_v17 }
 0x1d3   :  { %v569_v20 = vmul.f32 0.5, %v567_v19  ;;  %v1095_v19 = vpop.permute.xlu0 %1094 }
 0x1d5   :  { %v570_v21 = vsel %vm239_vm1, %v569_v20, -inf }
 0x1d6   :  { %571 = vmax.xlane.f32.xlu1 %v570_v21  ;;  %v1098_v21 = vsel %vm85_vm0, %v1095_v19, 0 }
 0x1d7   :  { %v1115_v22 = vand.u32 4294901760, %v1098_v21 }
 0x1d9   :  { %v1142_v24 = vsub.f32 %v1098_v21, %v1115_v22 }
 0x249   :  { %v572_v33 = vpop.xlane.xlu1 %571 }
 0x24a   :  { %v573_v34 = vsub.f32 %v569_v20, %v572_v33  ;;  %v983_v20 = vsub.f32 %v981_v53, %v982_v56 }
 0x24c   :  { %v574_v36 = vmul.f32 1.442695, %v573_v34  ;;  %v984_v23 = vand.u32 4294901760, %v983_v20 }
 0x24e   :  { %10914 = vpow2.f32 %v574_v36 }
 0x254   :  { %v11291_v39 = vpop.eup %10914 }
 0x255   :  { %v599_v40 = vsel %vm239_vm1, %v11291_v39, 0 }
 0x256   :  { %v618_v43 = vand.u32 4294901760, %v599_v40 }
 0x258   :  { %649 = vmatmul.f32.vlgmr.msra.gmra.mxu3 %v618_v43  ;;  %v619_v44 = vsub.f32 %v599_v40, %v618_v43 }
 0x259   :  { %854 = vmatpush.xpose.msra.mxu3 %v777_v25 }
 0x25a   :  { %673 = vmatmul.f32.vlgmr.msrb.gmra.mxu0 %v619_v44  ;;  %v620_v46 = vand.u32 4294901760, %v619_v44 }
 0x25b   :  { %880 = vmatpush.xpose.msrb.mxu0 %v805_v28  ;;  %v1093_v28 = vpop.permute.xlu0 %1092 }
 0x25c   :  { %697 = vmatmul.f32.vlgmr.msrb.gmra.mxu1 %v620_v46  ;;  %v621_v47 = vsub.f32 %v619_v44, %v620_v46  ;;  %v1096_v32 = vsel %vm85_vm0, %v1093_v28, 0 }
 0x25d   :  { %902 = vmatpush.xpose.msrb.mxu1 %v777_v25  ;;  %v1143_v25 = vand.u32 4294901760, %v1142_v24  ;;  %v1117_v34 = vand.u32 4294901760, %v1096_v32 }
 0x25e   :  { %v622_v48 = vand.u32 4294901760, %v621_v47 }
 0x25f   :  { %v1144_v26 = vsub.f32 %v1142_v24, %v1143_v25  ;;  %v1118_v35 = vsub.f32 %v1096_v32, %v1117_v34 }
 0x260   :  { %623 = vmatmul.f32.vlgmr.msra.gmra.mxu2 %v622_v48  ;;  %743 = vmatmul.f32.vlgmr.msrb.gmra.mxu3 %v618_v43 }
 0x261   :  { %831 = vmatpush.xpose.msra.mxu2 %v804_v27  ;;  %985 = vmatpush.msrb.mxu3 %v984_v23  ;;  %v1145_v27 = vand.u32 4294901760, %v1144_v26 }
 0x262   :  { %784 = vmatmul.f32.vlgmr.msra.gmra.mxu0 %v783_v49 }
 0x263   :  { %1008 = vmatpush.msra.mxu0 %v981_v53 }
 0x264   :  { %810 = vmatmul.f32.vlgmr.msra.gmra.mxu1 %v779_v37 }
 0x265   :  { %1031 = vmatpush.msra.mxu1 %v954_v51 }
 0x268   :  { %721 = vmatmul.f32.vlgmr.msrb.gmra.mxu2 %v618_v43  ;;  %858 = vmatmul.f32.vlgmr.msra.gmra.mxu3 %v781_v42 }
 0x269   :  { %955 = vmatpush.msrb.mxu2 %v954_v51  ;;  %1079 = vmatpush.msra.mxu3 %v954_v51 }
 0x26a   :  { %882 = vmatmul.f32.vlgmr.msrb.gmra.mxu0 %v779_v37 }
 0x26b   :  { %1116 = vmatpush.xpose.msrb.mxu0 %v1115_v22 }
 0x26c   :  { %904 = vmatmul.f32.vlgmr.msrb.gmra.mxu1 %v779_v37 }
 0x26d   :  { %1146 = vmatpush.xpose.msrb.mxu1 %v1145_v27 }
 0x270   :  { %834 = vmatmul.f32.vlgmr.msra.gmra.mxu2 %v780_v38  ;;  %v1119_v38 = vand.u32 4294901760, %v1118_v35 }
 0x271   :  { %1057 = vmatpush.msra.mxu2 %v982_v56 }
 0x272   :  { %v1120_v43 = vsub.f32 %v1118_v35, %v1119_v38 }
 0x274   :  { %v1121_v47 = vand.u32 4294901760, %v1120_v43 }
 0x2d7   :  { %v11301_v52 = vpop.f32.mrf.mxu0 }
 0x2d9   :  { %v11307_v57 = vpop.f32.mrf.mxu1 }
 0x2db   :  { %v11303_v54 = vpop.f32.mrf.mxu3 }
 0x2df   :  { %v785_v59 = vpop.f32.mrf.mxu0 }
 0x2e0   :  { %v786_v62 = vadd.f32 %v785_v59, %v11251_v14 }
 0x2e1   :  { %v811_v3 = vpop.f32.mrf.mxu1 }
 0x2e2   :  { %v812_v6 = vadd.f32 %v811_v3, %v786_v62 }
 0x2e3   :  { %v11305_v55 = vpop.f32.mrf.mxu2  ;;  %v11311_v60 = vpop.f32.mrf.mxu3 }
 0x2e7   :  { %v883_v12 = vpop.f32.mrf.mxu0 }
 0x2e9   :  { %v905_v15 = vpop.f32.mrf.mxu1 }
 0x2eb   :  { %v11309_v58 = vpop.f32.mrf.mxu2  ;;  %v859_v10 = vpop.f32.mrf.mxu3 }
 0x2f3   :  { %v835_v8 = vpop.f32.mrf.mxu2 }
 0x2f4   :  { %v836_v9 = vadd.f32 %v835_v8, %v812_v6 }
 0x2f6   :  { %v860_v11 = vadd.f32 %v859_v10, %v836_v9 }
 0x2f8   :  { %v884_v13 = vadd.f32 %v883_v12, %v860_v11 }
 0x2fa   :  { %v906_v16 = vadd.f32 %v905_v15, %v884_v13  ;;  %v1272_v15 = vpop.permute.xlu0 %1271 }
 0x2fc   :  { %v908_v17 = vmul.f32 0.5, %v906_v16 }
 0x2fe   :  { %v909_v18 = vsel %vm239_vm1, %v908_v17, -inf }
 0x2ff   :  { %910 = vmax.xlane.f32.xlu2 %v909_v18 }
 0x302   :  { %v1431_v28 = vpop.permute.xlu0 %1430 }
 0x372   :  { %v911_v30 = vpop.xlane.xlu2 %910 }
 0x373   :  { %v912_v31 = vsub.f32 %v908_v17, %v911_v30  ;;  %v1292_v17 = vand.u32 4294901760, %v1272_v15  ;;  %v1434_v30 = vsel %vm85_vm0, %v1431_v28, 0 }
 0x374   :  { %v1455_v32 = vand.u32 4294901760, %v1434_v30 }
 0x375   :  { %v913_v33 = vmul.f32 1.442695, %v912_v31  ;;  %v1319_v19 = vsub.f32 %v1272_v15, %v1292_v17 }
 0x377   :  { %10916 = vpow2.f32 %v913_v33  ;;  %v1320_v21 = vand.u32 4294901760, %v1319_v19 }
 0x379   :  { %v1321_v23 = vsub.f32 %v1319_v19, %v1320_v21 }
 0x37d   :  { %v11317_v36 = vpop.eup %10916 }
 0x37e   :  { %v937_v37 = vsel %vm239_vm1, %v11317_v36, 0 }
 0x37f   :  { %v956_v40 = vand.u32 4294901760, %v937_v37 }
 0x381   :  { %987 = vmatmul.f32.vlgmr.msrb.gmra.mxu3 %v956_v40  ;;  %v957_v42 = vsub.f32 %v937_v37, %v956_v40  ;;  %v1456_v37 = vsub.f32 %v1434_v30, %v1455_v32 }
 0x382   :  { %1192 = vmatpush.xpose.msrb.mxu3 %v1115_v22 }
 0x383   :  { %1011 = vmatmul.f32.vlgmr.msra.gmra.mxu0 %v957_v42  ;;  %v958_v44 = vand.u32 4294901760, %v957_v42 }
 0x384   :  { %1218 = vmatpush.xpose.msra.mxu0 %v1143_v25 }
 0x385   :  { %1035 = vmatmul.f32.vlgmr.msra.gmra.mxu1 %v958_v44  ;;  %v959_v45 = vsub.f32 %v957_v42, %v958_v44 }
 0x386   :  { %1240 = vmatpush.xpose.msra.mxu1 %v1115_v22 }
 0x387   :  { %v960_v46 = vand.u32 4294901760, %v959_v45 }
 0x389   :  { %961 = vmatmul.f32.vlgmr.msrb.gmra.mxu2 %v960_v46  ;;  %1081 = vmatmul.f32.vlgmr.msra.gmra.mxu3 %v956_v40 }
 0x38a   :  { %1169 = vmatpush.xpose.msrb.mxu2 %v1142_v24  ;;  %v1322_v24 = vand.u32 4294901760, %v1321_v23 }
 0x38b   :  { %1122 = vmatmul.f32.vlgmr.msrb.gmra.mxu0 %v1121_v47 }
 0x38c   :  { %1346 = vmatpush.msrb.mxu0 %v1319_v19  ;;  %1323 = vmatpush.msra.mxu3 %v1322_v24 }
 0x38d   :  { %1148 = vmatmul.f32.vlgmr.msrb.gmra.mxu1 %v1117_v34 }
 0x38e   :  { %1369 = vmatpush.msrb.mxu1 %v1292_v17 }
 0x391   :  { %1059 = vmatmul.f32.vlgmr.msra.gmra.mxu2 %v956_v40  ;;  %1196 = vmatmul.f32.vlgmr.msrb.gmra.mxu3 %v1119_v38  ;;  %v1457_v40 = vand.u32 4294901760, %v1456_v37 }
 0x392   :  { %1293 = vmatpush.msra.mxu2 %v1292_v17  ;;  %1417 = vmatpush.msrb.mxu3 %v1292_v17 }
 0x393   :  { %1220 = vmatmul.f32.vlgmr.msra.gmra.mxu0 %v1117_v34  ;;  %v1458_v44 = vsub.f32 %v1456_v37, %v1457_v40 }
 0x395   :  { %1242 = vmatmul.f32.vlgmr.msra.gmra.mxu1 %v1117_v34 }
 0x399   :  { %1172 = vmatmul.f32.vlgmr.msrb.gmra.mxu2 %v1118_v35 }
 0x39a   :  { %1395 = vmatpush.msrb.mxu2 %v1320_v21 }
 0x400   :  { %v11325_v48 = vpop.f32.mrf.mxu0 }
 0x402   :  { %v11331_v51 = vpop.f32.mrf.mxu1 }
 0x404   :  { %v11327_v49 = vpop.f32.mrf.mxu3 }
 0x408   :  { %v1123_v56 = vpop.f32.mrf.mxu0 }
 0x409   :  { %v1124_v62 = vadd.f32 %v1123_v56, %v11251_v14  ;;  %v1459_v56 = vand.u32 4294901760, %v1458_v44 }
 0x40a   :  { %v1149_v3 = vpop.f32.mrf.mxu1 }
 0x40b   :  { %v1150_v6 = vadd.f32 %v1149_v3, %v1124_v62 }
 0x40c   :  { %v11329_v50 = vpop.f32.mrf.mxu2  ;;  %v11335_v59 = vpop.f32.mrf.mxu3 }
 0x410   :  { %v1221_v12 = vpop.f32.mrf.mxu0 }
 0x412   :  { %v1243_v16 = vpop.f32.mrf.mxu1 }
 0x414   :  { %v11333_v53 = vpop.f32.mrf.mxu2  ;;  %v1197_v10 = vpop.f32.mrf.mxu3 }
 0x41c   :  { %v1173_v8 = vpop.f32.mrf.mxu2 }
 0x41d   :  { %v1174_v9 = vadd.f32 %v1173_v8, %v1150_v6 }
 0x41f   :  { %v1198_v11 = vadd.f32 %v1197_v10, %v1174_v9 }
 0x421   :  { %v1222_v13 = vadd.f32 %v1221_v12, %v1198_v11 }
 0x423   :  { %v1244_v18 = vadd.f32 %v1243_v16, %v1222_v13 }
 0x425   :  { %v1246_v20 = vmul.f32 0.5, %v1244_v18 }
 0x427   :  { %v1247_v22 = vsel %vm239_vm1, %v1246_v20, -inf }
 0x428   :  { %1248 = vmax.xlane.f32.xlu1 %v1247_v22 }
 0x441   :  { %1432 = vrot.lane.b32.xlu1 %v11241_v0, %s11181_s10 }
 0x49b   :  { %v1249_v25 = vpop.xlane.xlu1 %1248 }
 0x49c   :  { %v1250_v26 = vsub.f32 %v1246_v20, %v1249_v25  ;;  %v1610_v25 = vpop.permute.xlu0 %1609 }
 0x49e   :  { %v1251_v27 = vmul.f32 1.442695, %v1250_v26 }
 0x4a0   :  { %10918 = vpow2.f32 %v1251_v27  ;;  %v1630_v27 = vand.u32 4294901760, %v1610_v25 }
 0x4a6   :  { %v11342_v31 = vpop.eup %10918 }
 0x4a7   :  { %v1275_v33 = vsel %vm239_vm1, %v11342_v31, 0 }
 0x4a8   :  { %v1294_v34 = vand.u32 4294901760, %v1275_v33 }
 0x4aa   :  { %1325 = vmatmul.f32.vlgmr.msra.gmra.mxu3 %v1294_v34  ;;  %v1295_v35 = vsub.f32 %v1275_v33, %v1294_v34 }
 0x4ac   :  { %1349 = vmatmul.f32.vlgmr.msrb.gmra.mxu0 %v1295_v35  ;;  %v1296_v38 = vand.u32 4294901760, %v1295_v35 }
 0x4ae   :  { %1373 = vmatmul.f32.vlgmr.msrb.gmra.mxu1 %v1296_v38  ;;  %v1297_v42 = vsub.f32 %v1295_v35, %v1296_v38 }
 0x4b0   :  { %v1298_v43 = vand.u32 4294901760, %v1297_v42 }
 0x4b2   :  { %1299 = vmatmul.f32.vlgmr.msra.gmra.mxu2 %v1298_v43  ;;  %1419 = vmatmul.f32.vlgmr.msrb.gmra.mxu3 %v1294_v34 }
 0x4b3   :  { %v1433_v45 = vpop.permute.xlu1 %1432 }
 0x4b4   :  { %v1436_v46 = vsel %vm85_vm0, %v1433_v45, 0 }
 0x4b5   :  { %v1453_v47 = vand.u32 4294901760, %v1436_v46 }
 0x4b7   :  { %v1480_v62 = vsub.f32 %v1436_v46, %v1453_v47  ;;  %1454 = vmatpush.xpose.msra.mxu0 %v1453_v47  ;;  %1530 = vmatpush.xpose.msra.mxu3 %v1453_v47 }
 0x4b9   :  { %v1481_v3 = vand.u32 4294901760, %v1480_v62  ;;  %1507 = vmatpush.xpose.msra.mxu2 %v1480_v62 }
 0x4ba   :  { %1397 = vmatmul.f32.vlgmr.msrb.gmra.mxu2 %v1294_v34  ;;  %1460 = vmatmul.f32.vlgmr.msra.gmra.mxu0 %v1459_v56 }
 0x4bb   :  { %v1482_v6 = vsub.f32 %v1480_v62, %v1481_v3  ;;  %1556 = vmatpush.xpose.msrb.mxu0 %v1481_v3  ;;  %1534 = vmatmul.f32.vlgmr.msra.gmra.mxu3 %v1457_v40  ;;  %v1769_v40 = vpop.permute.xlu0 %1768 }
 0x4bc   :  { %v1772_v44 = vsel %vm85_vm0, %v1769_v40, 0 }
 0x4bd   :  { %v1483_v8 = vand.u32 4294901760, %v1482_v6  ;;  %1631 = vmatpush.msrb.mxu2 %v1630_v27  ;;  %v1793_v46 = vand.u32 4294901760, %v1772_v44 }
 0x4bf   :  { %1484 = vmatpush.xpose.msra.mxu1 %v1483_v8  ;;  %v1794_v62 = vsub.f32 %v1772_v44, %v1793_v46 }
 0x4c2   :  { %1486 = vmatmul.f32.vlgmr.msra.gmra.mxu1 %v1455_v32  ;;  %1510 = vmatmul.f32.vlgmr.msra.gmra.mxu2 %v1456_v37 }
 0x4c3   :  { %1578 = vmatpush.xpose.msrb.mxu1 %v1453_v47  ;;  %1558 = vmatmul.f32.vlgmr.msrb.gmra.mxu0 %v1455_v32 }
 0x4c7   :  { %1707 = vmatpush.msra.mxu1 %v1630_v27 }
 0x4ca   :  { %1580 = vmatmul.f32.vlgmr.msrb.gmra.mxu1 %v1455_v32  ;;  %v1657_v32 = vsub.f32 %v1610_v25, %v1630_v27 }
 0x4cc   :  { %v1658_v34 = vand.u32 4294901760, %v1657_v32  ;;  %1684 = vmatpush.msra.mxu0 %v1657_v32 }
 0x4ce   :  { %1733 = vmatpush.msra.mxu2 %v1658_v34  ;;  %v1659_v37 = vsub.f32 %v1657_v32, %v1658_v34 }
 0x4d0   :  { %v1660_v38 = vand.u32 4294901760, %v1659_v37 }
 0x4d2   :  { %1661 = vmatpush.msrb.mxu3 %v1660_v38 }
 0x4d4   :  { %1755 = vmatpush.msra.mxu3 %v1630_v27 }
 0x529   :  { %v11355_v11 = vpop.f32.mrf.mxu0 }
 0x52b   :  { %v11357_v12 = vpop.f32.mrf.mxu1 }
 0x52d   :  { %v11351_v9 = vpop.f32.mrf.mxu3 }
 0x535   :  { %v11353_v10 = vpop.f32.mrf.mxu2  ;;  %v11361_v15 = vpop.f32.mrf.mxu3 }
 0x537   :  { %v1461_v16 = vpop.f32.mrf.mxu0 }
 0x538   :  { %v1462_v17 = vadd.f32 %v1461_v16, %v11251_v14 }
 0x53d   :  { %v11359_v13 = vpop.f32.mrf.mxu2 }
 0x53e   :  { %v1535_v22 = vpop.f32.mrf.mxu3 }
 0x53f   :  { %v1487_v18 = vpop.f32.mrf.mxu1 }
 0x540   :  { %v1488_v19 = vadd.f32 %v1487_v18, %v1462_v17  ;;  %v1559_v24 = vpop.f32.mrf.mxu0  ;;  %v1795_v17 = vand.u32 4294901760, %v1794_v62 }
 0x545   :  { %v1511_v20 = vpop.f32.mrf.mxu2 }
 0x546   :  { %v1512_v21 = vadd.f32 %v1511_v20, %v1488_v19 }
 0x547   :  { %v1581_v28 = vpop.f32.mrf.mxu1 }
 0x548   :  { %v1536_v23 = vadd.f32 %v1535_v22, %v1512_v21  ;;  %v1796_v22 = vsub.f32 %v1794_v62, %v1795_v17 }
 0x54a   :  { %v1560_v26 = vadd.f32 %v1559_v24, %v1536_v23  ;;  %v1797_v27 = vand.u32 4294901760, %v1796_v22 }
 0x54c   :  { %v1582_v30 = vadd.f32 %v1581_v28, %v1560_v26  ;;  %v1948_v28 = vpop.permute.xlu0 %1947 }
 0x54e   :  { %v1584_v33 = vmul.f32 0.5, %v1582_v30  ;;  %v1968_v30 = vand.u32 4294901760, %v1948_v28 }
 0x550   :  { %v1585_v35 = vsel %vm239_vm1, %v1584_v33, -inf }
 0x551   :  { %1586 = vmax.xlane.f32.xlu2 %v1585_v35 }
 0x569   :  { %1770 = vrot.lane.b32.xlu2 %v11241_v0, %s11182_s11 }
 0x571   :  { %2106 = vrot.lane.b32.xlu2 %v11243_v1, %s11183_s12 }
 0x579   :  { %2285 = vrot.lane.b32.xlu2 %v11257_v29, %s11183_s12 }
 0x581   :  { %2446 = vrot.lane.b32.xlu2 %v11241_v0, %s11184_s13 }
 0x589   :  { %2444 = vrot.lane.b32.xlu2 %v11243_v1, %s11184_s13 }
 0x591   :  { %2623 = vrot.lane.b32.xlu2 %v11257_v29, %s11184_s13 }
 0x5c4   :  { %v1587_v42 = vpop.xlane.xlu2 %1586 }
 0x5c5   :  { %v1588_v43 = vsub.f32 %v1584_v33, %v1587_v42  ;;  %v1995_v33 = vsub.f32 %v1948_v28, %v1968_v30 }
 0x5c7   :  { %v1589_v45 = vmul.f32 1.442695, %v1588_v43  ;;  %v1996_v37 = vand.u32 4294901760, %v1995_v33 }
 0x5c9   :  { %10920 = vpow2.f32 %v1589_v45  ;;  %v1997_v40 = vsub.f32 %v1995_v33, %v1996_v37 }
 0x5cb   :  { %v1998_v42 = vand.u32 4294901760, %v1997_v40 }
 0x5cc   :  { %v1771_v47 = vpop.permute.xlu2 %1770 }
 0x5cd   :  { %v1774_v56 = vsel %vm85_vm0, %v1771_v47, 0 }
 0x5ce   :  { %v1791_v3 = vand.u32 4294901760, %v1774_v56 }
 0x5cf   :  { %v11369_v6 = vpop.eup %10920 }
 0x5d0   :  { %v1818_v8 = vsub.f32 %v1774_v56, %v1791_v3  ;;  %v1613_v16 = vsel %vm239_vm1, %v11369_v6, 0  ;;  %1792 = vmatpush.xpose.msrb.mxu0 %v1791_v3 }
 0x5d1   :  { %v1632_v18 = vand.u32 4294901760, %v1613_v16 }
 0x5d2   :  { %v1819_v19 = vand.u32 4294901760, %v1818_v8 }
 0x5d3   :  { %1663 = vmatmul.f32.vlgmr.msrb.gmra.mxu3 %v1632_v18  ;;  %v1633_v20 = vsub.f32 %v1613_v16, %v1632_v18 }
 0x5d4   :  { %v1820_v21 = vsub.f32 %v1818_v8, %v1819_v19  ;;  %1868 = vmatpush.xpose.msrb.mxu3 %v1791_v3 }
 0x5d5   :  { %1687 = vmatmul.f32.vlgmr.msra.gmra.mxu0 %v1633_v20  ;;  %v1634_v23 = vand.u32 4294901760, %v1633_v20 }
 0x5d6   :  { %v1821_v24 = vand.u32 4294901760, %v1820_v21  ;;  %1894 = vmatpush.xpose.msra.mxu0 %v1819_v19 }
 0x5d7   :  { %1711 = vmatmul.f32.vlgmr.msra.gmra.mxu1 %v1634_v23  ;;  %v1635_v25 = vsub.f32 %v1633_v20, %v1634_v23  ;;  %v2109_v23 = vpop.permute.xlu0 %2108 }
 0x5d8   :  { %1822 = vmatpush.xpose.msrb.mxu1 %v1821_v24  ;;  %v2112_v24 = vsel %vm85_vm0, %v2109_v23, 0 }
 0x5d9   :  { %v1636_v26 = vand.u32 4294901760, %v1635_v25  ;;  %v2129_v25 = vand.u32 4294901760, %v2112_v24 }
 0x5db   :  { %1637 = vmatmul.f32.vlgmr.msrb.gmra.mxu2 %v1636_v26  ;;  %1757 = vmatmul.f32.vlgmr.msra.gmra.mxu3 %v1632_v18  ;;  %v2156_v26 = vsub.f32 %v2112_v24, %v2129_v25 }
 0x5dc   :  { %1916 = vmatpush.xpose.msra.mxu1 %v1791_v3  ;;  %1845 = vmatpush.xpose.msrb.mxu2 %v1818_v8 }
 0x5dd   :  { %1798 = vmatmul.f32.vlgmr.msrb.gmra.mxu0 %v1797_v27  ;;  %1999 = vmatpush.msra.mxu3 %v1998_v42  ;;  %v2157_v27 = vand.u32 4294901760, %v2156_v26 }
 0x5de   :  { %2022 = vmatpush.msrb.mxu0 %v1995_v33  ;;  %v2107_v33 = vpop.permute.xlu2 %2106 }
 0x5df   :  { %1824 = vmatmul.f32.vlgmr.msrb.gmra.mxu1 %v1793_v46  ;;  %v2158_v28 = vsub.f32 %v2156_v26, %v2157_v27  ;;  %v2110_v42 = vsel %vm85_vm0, %v2107_v33, 0 }
 0x5e0   :  { %2045 = vmatpush.msrb.mxu1 %v1968_v30 }
 0x5e3   :  { %1735 = vmatmul.f32.vlgmr.msra.gmra.mxu2 %v1632_v18  ;;  %1872 = vmatmul.f32.vlgmr.msrb.gmra.mxu3 %v1795_v17 }
 0x5e4   :  { %1969 = vmatpush.msra.mxu2 %v1968_v30  ;;  %2093 = vmatpush.msrb.mxu3 %v1968_v30  ;;  %v2159_v30 = vand.u32 4294901760, %v2158_v28 }
 0x5e5   :  { %1896 = vmatmul.f32.vlgmr.msra.gmra.mxu0 %v1793_v46 }
 0x5e6   :  { %2130 = vmatpush.xpose.msra.mxu0 %v2129_v25 }
 0x5e7   :  { %1918 = vmatmul.f32.vlgmr.msra.gmra.mxu1 %v1793_v46 }
 0x5e8   :  { %2160 = vmatpush.xpose.msra.mxu1 %v2159_v30 }
 0x5eb   :  { %1848 = vmatmul.f32.vlgmr.msrb.gmra.mxu2 %v1794_v62 }
 0x5ec   :  { %2071 = vmatpush.msrb.mxu2 %v1996_v37 }
 0x652   :  { %v11379_v32 = vpop.f32.mrf.mxu0 }
 0x653   :  { %12725 = vst [vmem:[#allocation20_spill] sm:$0xff] %v11379_v32 }
 0x654   :  { %v11385_v38 = vpop.f32.mrf.mxu1 }
 0x655   :  { %12728 = vst [vmem:[#allocation23_spill] sm:$0xff] %v11385_v38 }
 0x656   :  { %v11381_v34 = vpop.f32.mrf.mxu3 }
 0x657   :  { %12726 = vst [vmem:[#allocation21_spill] sm:$0xff] %v11381_v34 }
 0x65a   :  { %v1799_v44 = vpop.f32.mrf.mxu0 }
 0x65b   :  { %v1800_v46 = vadd.f32 %v1799_v44, %v11251_v14 }
 0x65c   :  { %v1825_v47 = vpop.f32.mrf.mxu1 }
 0x65d   :  { %v1826_v56 = vadd.f32 %v1825_v47, %v1800_v46  ;;  %v2131_v46 = vand.u32 4294901760, %v2110_v42 }
 0x65e   :  { %v11383_v35 = vpop.f32.mrf.mxu2  ;;  %v11389_v45 = vpop.f32.mrf.mxu3 }
 0x65f   :  { %12727 = vst [vmem:[#allocation22_spill] sm:$0xff] %v11383_v35  ;;  %v2132_v47 = vsub.f32 %v2110_v42, %v2131_v46 }
 0x660   :  { %12730 = vst [vmem:[#allocation25_spill] sm:$0xff] %v11389_v45 }
 0x662   :  { %v1897_v17 = vpop.f32.mrf.mxu0 }
 0x664   :  { %v1919_v19 = vpop.f32.mrf.mxu1 }
 0x666   :  { %v11387_v43 = vpop.f32.mrf.mxu2  ;;  %v1873_v8 = vpop.f32.mrf.mxu3 }
 0x667   :  { %12729 = vst [vmem:[#allocation24_spill] sm:$0xff] %v11387_v43 }
 0x66e   :  { %v1849_v62 = vpop.f32.mrf.mxu2 }
 0x66f   :  { %v1850_v3 = vadd.f32 %v1849_v62, %v1826_v56 }
 0x671   :  { %v1874_v16 = vadd.f32 %v1873_v8, %v1850_v3  ;;  %v2133_v3 = vand.u32 4294901760, %v2132_v47 }
 0x673   :  { %v1898_v18 = vadd.f32 %v1897_v17, %v1874_v16  ;;  %v2134_v17 = vsub.f32 %v2132_v47, %v2133_v3 }
 0x675   :  { %v1920_v20 = vadd.f32 %v1919_v19, %v1898_v18 }
 0x677   :  { %v1922_v21 = vmul.f32 0.5, %v1920_v20 }
 0x679   :  { %v1923_v22 = vsel %vm239_vm1, %v1922_v21, -inf }
 0x67a   :  { %1924 = vmax.xlane.f32.xlu1 %v1923_v22  ;;  %v2286_v22 = vpop.permute.xlu2 %2285 }
 0x67b   :  { %v2306_v23 = vand.u32 4294901760, %v2286_v22 }
 0x6ed   :  { %v1925_v37 = vpop.xlane.xlu1 %1924 }
 0x6ee   :  { %v1926_v40 = vsub.f32 %v1922_v21, %v1925_v37  ;;  %v2135_v21 = vand.u32 4294901760, %v2134_v17 }
 0x6f0   :  { %v1927_v44 = vmul.f32 1.442695, %v1926_v40 }
 0x6f2   :  { %10922 = vpow2.f32 %v1927_v44 }
 0x6f8   :  { %v11395_v56 = vpop.eup %10922 }
 0x6f9   :  { %v1951_v62 = vsel %vm239_vm1, %v11395_v56, 0 }
 0x6fa   :  { %v1970_v8 = vand.u32 4294901760, %v1951_v62 }
 0x6fc   :  { %2001 = vmatmul.f32.vlgmr.msra.gmra.mxu3 %v1970_v8  ;;  %v1971_v16 = vsub.f32 %v1951_v62, %v1970_v8 }
 0x6fd   :  { %2206 = vmatpush.xpose.msra.mxu3 %v2129_v25 }
 0x6fe   :  { %2025 = vmatmul.f32.vlgmr.msrb.gmra.mxu0 %v1971_v16  ;;  %v1972_v18 = vand.u32 4294901760, %v1971_v16 }
 0x6ff   :  { %2232 = vmatpush.xpose.msrb.mxu0 %v2157_v27 }
 0x700   :  { %2049 = vmatmul.f32.vlgmr.msrb.gmra.mxu1 %v1972_v18  ;;  %v1973_v19 = vsub.f32 %v1971_v16, %v1972_v18 }
 0x701   :  { %2254 = vmatpush.xpose.msrb.mxu1 %v2129_v25  ;;  %v2333_v25 = vsub.f32 %v2286_v22, %v2306_v23 }
 0x702   :  { %v1974_v20 = vand.u32 4294901760, %v1973_v19  ;;  %v2447_v19 = vpop.permute.xlu2 %2446 }
 0x703   :  { %v2334_v28 = vand.u32 4294901760, %v2333_v25 }
 0x704   :  { %1975 = vmatmul.f32.vlgmr.msra.gmra.mxu2 %v1974_v20  ;;  %2095 = vmatmul.f32.vlgmr.msrb.gmra.mxu3 %v1970_v8 }
 0x705   :  { %2183 = vmatpush.xpose.msra.mxu2 %v2156_v26  ;;  %v2335_v20 = vsub.f32 %v2333_v25, %v2334_v28 }
 0x706   :  { %2136 = vmatmul.f32.vlgmr.msra.gmra.mxu0 %v2135_v21  ;;  %v2450_v21 = vsel %vm85_vm0, %v2447_v19, 0 }
 0x707   :  { %2360 = vmatpush.msra.mxu0 %v2333_v25  ;;  %v2467_v22 = vand.u32 4294901760, %v2450_v21 }
 0x708   :  { %2162 = vmatmul.f32.vlgmr.msra.gmra.mxu1 %v2131_v46 }
 0x709   :  { %2383 = vmatpush.msra.mxu1 %v2306_v23 }
 0x70c   :  { %2073 = vmatmul.f32.vlgmr.msrb.gmra.mxu2 %v1970_v8  ;;  %2210 = vmatmul.f32.vlgmr.msra.gmra.mxu3 %v2133_v3 }
 0x70d   :  { %2307 = vmatpush.msrb.mxu2 %v2306_v23 }
 0x70e   :  { %2234 = vmatmul.f32.vlgmr.msrb.gmra.mxu0 %v2131_v46 }
 0x70f   :  { %2468 = vmatpush.xpose.msrb.mxu0 %v2467_v22 }
 0x710   :  { %2256 = vmatmul.f32.vlgmr.msrb.gmra.mxu1 %v2131_v46 }
 0x714   :  { %2186 = vmatmul.f32.vlgmr.msra.gmra.mxu2 %v2132_v47 }
 0x715   :  { %2409 = vmatpush.msra.mxu2 %v2334_v28 }
 0x77b   :  { %v11405_v24 = vpop.f32.mrf.mxu0 }
 0x77c   :  { %12731 = vst [vmem:[#allocation26_spill] sm:$0xff] %v11405_v24 }
 0x77d   :  { %v11411_v0 = vpop.f32.mrf.mxu1 }
 0x77e   :  { %12734 = vst [vmem:[#allocation29_spill] sm:$0xff] %v11411_v0 }
 0x77f   :  { %v11407_v26 = vpop.f32.mrf.mxu3 }
 0x780   :  { %12732 = vst [vmem:[#allocation27_spill] sm:$0xff] %v11407_v26 }
 0x783   :  { %v2137_v30 = vpop.f32.mrf.mxu0 }
 0x784   :  { %v2138_v33 = vadd.f32 %v2137_v30, %v11251_v14  ;;  %v2336_v14 = vand.u32 4294901760, %v2335_v20  ;;  %v2494_v30 = vsub.f32 %v2450_v21, %v2467_v22 }
 0x785   :  { %v2163_v37 = vpop.f32.mrf.mxu1 }
 0x786   :  { %v2164_v40 = vadd.f32 %v2163_v37, %v2138_v33  ;;  %2337 = vmatpush.msrb.mxu3 %v2336_v14  ;;  %v2495_v33 = vand.u32 4294901760, %v2494_v30 }
 0x787   :  { %v11409_v27 = vpop.f32.mrf.mxu2  ;;  %v11415_v29 = vpop.f32.mrf.mxu3 }
 0x788   :  { %12733 = vst [vmem:[#allocation28_spill] sm:$0xff] %v11409_v27  ;;  %2431 = vmatpush.msra.mxu3 %v2306_v23  ;;  %v2496_v37 = vsub.f32 %v2494_v30, %v2495_v33 }
 0x789   :  { %12736 = vst [vmem:[#allocation31_spill] sm:$0xff] %v11415_v29 }
 0x78b   :  { %v2235_v62 = vpop.f32.mrf.mxu0 }
 0x78d   :  { %v2257_v8 = vpop.f32.mrf.mxu1 }
 0x78f   :  { %v11413_v1 = vpop.f32.mrf.mxu2  ;;  %v2211_v46 = vpop.f32.mrf.mxu3 }
 0x790   :  { %12735 = vst [vmem:[#allocation30_spill] sm:$0xff] %v11413_v1 }
 0x797   :  { %v2187_v42 = vpop.f32.mrf.mxu2 }
 0x798   :  { %v2188_v44 = vadd.f32 %v2187_v42, %v2164_v40  ;;  %v2497_v40 = vand.u32 4294901760, %v2496_v37  ;;  %v2445_v42 = vpop.permute.xlu2 %2444 }
 0x79a   :  { %v2212_v47 = vadd.f32 %v2211_v46, %v2188_v44  ;;  %2498 = vmatpush.xpose.msrb.mxu1 %v2497_v40 }
 0x79c   :  { %v2236_v3 = vadd.f32 %v2235_v62, %v2212_v47  ;;  %v2448_v47 = vsel %vm85_vm0, %v2445_v42, 0 }
 0x79d   :  { %v2469_v25 = vand.u32 4294901760, %v2448_v47 }
 0x79e   :  { %v2258_v16 = vadd.f32 %v2257_v8, %v2236_v3 }
 0x79f   :  { %v2470_v28 = vsub.f32 %v2448_v47, %v2469_v25 }
 0x7a0   :  { %v2260_v17 = vmul.f32 0.5, %v2258_v16  ;;  %v2624_v37 = vpop.permute.xlu2 %2623 }
 0x7a1   :  { %v2471_v16 = vand.u32 4294901760, %v2470_v28  ;;  %v2644_v40 = vand.u32 4294901760, %v2624_v37 }
 0x7a2   :  { %v2261_v18 = vsel %vm239_vm1, %v2260_v17, -inf }
 0x7a3   :  { %2262 = vmax.xlane.f32.xlu0 %v2261_v18  ;;  %v2472_v19 = vsub.f32 %v2470_v28, %v2471_v16 }
 0x7a5   :  { %v2473_v21 = vand.u32 4294901760, %v2472_v19 }
 0x816   :  { %v2263_v44 = vpop.xlane.xlu0 %2262 }
 0x817   :  { %v2264_v46 = vsub.f32 %v2260_v17, %v2263_v44 }
 0x819   :  { %v2265_v62 = vmul.f32 1.442695, %v2264_v46 }
 0x81b   :  { %10924 = vpow2.f32 %v2265_v62 }
 0x821   :  { %v11421_v3 = vpop.eup %10924 }
 0x822   :  { %v2289_v8 = vsel %vm239_vm1, %v11421_v3, 0 }
 0x823   :  { %v2308_v23 = vand.u32 4294901760, %v2289_v8 }
 0x825   :  { %2339 = vmatmul.f32.vlgmr.msrb.gmra.mxu3 %v2308_v23  ;;  %v2309_v18 = vsub.f32 %v2289_v8, %v2308_v23 }
 0x826   :  { %2544 = vmatpush.xpose.msrb.mxu3 %v2467_v22 }
 0x827   :  { %2363 = vmatmul.f32.vlgmr.msra.gmra.mxu0 %v2309_v18  ;;  %v2310_v20 = vand.u32 4294901760, %v2309_v18 }
 0x828   :  { %2570 = vmatpush.xpose.msra.mxu0 %v2495_v33  ;;  %v2671_v33 = vsub.f32 %v2624_v37, %v2644_v40 }
 0x829   :  { %2387 = vmatmul.f32.vlgmr.msra.gmra.mxu1 %v2310_v20  ;;  %v2311_v17 = vsub.f32 %v2309_v18, %v2310_v20 }
 0x82a   :  { %2592 = vmatpush.xpose.msra.mxu1 %v2467_v22  ;;  %v2672_v46 = vand.u32 4294901760, %v2671_v33 }
 0x82b   :  { %v2312_v14 = vand.u32 4294901760, %v2311_v17 }
 0x82c   :  { %v2673_v47 = vsub.f32 %v2671_v33, %v2672_v46 }
 0x82d   :  { %2313 = vmatmul.f32.vlgmr.msrb.gmra.mxu2 %v2312_v14  ;;  %2433 = vmatmul.f32.vlgmr.msra.gmra.mxu3 %v2308_v23 }
 0x82e   :  { %2521 = vmatpush.xpose.msrb.mxu2 %v2494_v30  ;;  %v2674_v62 = vand.u32 4294901760, %v2673_v47 }
 0x82f   :  { %2474 = vmatmul.f32.vlgmr.msrb.gmra.mxu0 %v2473_v21 }
 0x830   :  { %2698 = vmatpush.msrb.mxu0 %v2671_v33  ;;  %2675 = vmatpush.msra.mxu3 %v2674_v62 }
 0x831   :  { %2500 = vmatmul.f32.vlgmr.msrb.gmra.mxu1 %v2469_v25 }
 0x832   :  { %2721 = vmatpush.msrb.mxu1 %v2644_v40 }
 0x835   :  { %2411 = vmatmul.f32.vlgmr.msra.gmra.mxu2 %v2308_v23  ;;  %2548 = vmatmul.f32.vlgmr.msrb.gmra.mxu3 %v2471_v16  ;;  %v11040_v16 = vld [vmem:[#allocation8] sm:$0xff] }
 0x836   :  { %2645 = vmatpush.msra.mxu2 %v2644_v40  ;;  %2769 = vmatpush.msrb.mxu3 %v2644_v40  ;;  %v11438_v40 = vld [vmem:[#allocation5 + $0x8] sm:$0xff] }
 0x837   :  { %2572 = vmatmul.f32.vlgmr.msra.gmra.mxu0 %v2469_v25  ;;  %3121 = vrot.lane.b32.xlu2 %v11438_v40, %s11178_s3 }
 0x839   :  { %2594 = vmatmul.f32.vlgmr.msra.gmra.mxu1 %v2469_v25 }
 0x83d   :  { %2524 = vmatmul.f32.vlgmr.msrb.gmra.mxu2 %v2470_v28 }
 0x83e   :  { %2747 = vmatpush.msrb.mxu2 %v2672_v46 }
 0x8a4   :  { %v11425_v42 = vpop.f32.mrf.mxu0 }
 0x8a5   :  { %12737 = vst [vmem:[#allocation32_spill] sm:$0xff] %v11425_v42 }
 0x8a6   :  { %v11431_v30 = vpop.f32.mrf.mxu1 }
 0x8a7   :  { %12740 = vst [vmem:[#allocation35_spill] sm:$0xff] %v11431_v30 }
 0x8a8   :  { %v11427_v22 = vpop.f32.mrf.mxu3 }
 0x8a9   :  { %12738 = vst [vmem:[#allocation33_spill] sm:$0xff] %v11427_v22 }
 0x8ac   :  { %v2475_v28 = vpop.f32.mrf.mxu0 }
 0x8ad   :  { %v2476_v23 = vadd.f32 %v11040_v16, %v2475_v28  ;;  %v11444_v16 = vld [vmem:[#allocation2 + $0x8] sm:$0xff] }
 0x8ae   :  { %v2501_v18 = vpop.f32.mrf.mxu1 }
 0x8af   :  { %v2502_v19 = vadd.f32 %v2501_v18, %v2476_v23 }
 0x8b0   :  { %v11429_v44 = vpop.f32.mrf.mxu2  ;;  %v11435_v8 = vpop.f32.mrf.mxu3 }
 0x8b1   :  { %12739 = vst [vmem:[#allocation34_spill] sm:$0xff] %v11429_v44 }
 0x8b2   :  { %12742 = vst [vmem:[#allocation37_spill] sm:$0xff] %v11435_v8  ;;  %v2794_v8 = vsel %vm85_vm0, %v11438_v40, 0 }
 0x8b3   :  { %v2811_v28 = vand.u32 4294901760, %v2794_v8 }
 0x8b4   :  { %v2573_v37 = vpop.f32.mrf.mxu0 }
 0x8b5   :  { %2812 = vmatpush.xpose.msra.mxu0 %v2811_v28 }
 0x8b6   :  { %v2595_v33 = vpop.f32.mrf.mxu1 }
 0x8b8   :  { %v11433_v25 = vpop.f32.mrf.mxu2  ;;  %v2549_v21 = vpop.f32.mrf.mxu3 }
 0x8b9   :  { %12741 = vst [vmem:[#allocation36_spill] sm:$0xff] %v11433_v25 }
 0x8c0   :  { %v2525_v20 = vpop.f32.mrf.mxu2 }
 0x8c1   :  { %v2526_v17 = vadd.f32 %v2525_v20, %v2502_v19  ;;  %v2838_v19 = vsub.f32 %v2794_v8, %v2811_v28 }
 0x8c3   :  { %v2550_v14 = vadd.f32 %v2549_v21, %v2526_v17  ;;  %v2839_v17 = vand.u32 4294901760, %v2838_v19 }
 0x8c5   :  { %v2574_v29 = vadd.f32 %v2573_v37, %v2550_v14  ;;  %v2840_v21 = vsub.f32 %v2838_v19, %v2839_v17 }
 0x8c7   :  { %v2596_v46 = vadd.f32 %v2595_v33, %v2574_v29  ;;  %v2791_v29 = vsel %vm85_vm0, %v11444_v16, 0  ;;  %v2841_v37 = vand.u32 4294901760, %v2840_v21 }
 0x8c8   :  { %v2813_v14 = vand.u32 4294901760, %v2791_v29 }
 0x8c9   :  { %v2598_v47 = vmul.f32 0.5, %v2596_v46  ;;  %2842 = vmatpush.xpose.msra.mxu1 %v2841_v37 }
 0x8ca   :  { %v2814_v33 = vsub.f32 %v2791_v29, %v2813_v14 }
 0x8cb   :  { %v2599_v62 = vsel %vm239_vm1, %v2598_v47, -inf }
 0x8cc   :  { %2600 = vmax.xlane.f32.xlu1 %v2599_v62 }
 0x93f   :  { %v2601_v23 = vpop.xlane.xlu1 %2600 }
 0x940   :  { %v2602_v18 = vsub.f32 %v2598_v47, %v2601_v23  ;;  %v2815_v47 = vand.u32 4294901760, %v2814_v33 }
 0x942   :  { %v2603_v20 = vmul.f32 1.442695, %v2602_v18  ;;  %v2816_v18 = vsub.f32 %v2814_v33, %v2815_v47 }
 0x944   :  { %10926 = vpow2.f32 %v2603_v20  ;;  %v2817_v37 = vand.u32 4294901760, %v2816_v18 }
 0x94a   :  { %v11448_v46 = vpop.eup %10926 }
 0x94b   :  { %12743 = vst [vmem:[#allocation38_spill] sm:$0xff] %v11448_v46  ;;  %v2627_v62 = vsel %vm239_vm1, %v11448_v46, 0 }
 0x94c   :  { %v2646_v25 = vand.u32 4294901760, %v2627_v62 }
 0x94e   :  { %2677 = vmatmul.f32.vlgmr.msra.gmra.mxu3 %v2646_v25  ;;  %v2647_v8 = vsub.f32 %v2627_v62, %v2646_v25 }
 0x94f   :  { %2888 = vmatpush.xpose.msra.mxu3 %v2811_v28 }
 0x950   :  { %2701 = vmatmul.f32.vlgmr.msrb.gmra.mxu0 %v2647_v8  ;;  %v2648_v23 = vand.u32 4294901760, %v2647_v8 }
 0x951   :  { %2914 = vmatpush.xpose.msrb.mxu0 %v2839_v17 }
 0x952   :  { %2725 = vmatmul.f32.vlgmr.msrb.gmra.mxu1 %v2648_v23  ;;  %v2649_v20 = vsub.f32 %v2647_v8, %v2648_v23 }
 0x953   :  { %2936 = vmatpush.xpose.msrb.mxu1 %v2811_v28  ;;  %v11460_v28 = vld [vmem:[#allocation8 + $0x8] sm:$0xff] }
 0x954   :  { %v2650_v21 = vand.u32 4294901760, %v2649_v20 }
 0x956   :  { %2651 = vmatmul.f32.vlgmr.msra.gmra.mxu2 %v2650_v21  ;;  %2771 = vmatmul.f32.vlgmr.msrb.gmra.mxu3 %v2646_v25 }
 0x957   :  { %2865 = vmatpush.xpose.msra.mxu2 %v2838_v19 }
 0x958   :  { %2818 = vmatmul.f32.vlgmr.msra.gmra.mxu0 %v2817_v37 }
 0x95a   :  { %2844 = vmatmul.f32.vlgmr.msra.gmra.mxu1 %v2813_v14 }
 0x95e   :  { %2749 = vmatmul.f32.vlgmr.msrb.gmra.mxu2 %v2646_v25  ;;  %2892 = vmatmul.f32.vlgmr.msra.gmra.mxu3 %v2815_v47 }
 0x960   :  { %2916 = vmatmul.f32.vlgmr.msrb.gmra.mxu0 %v2813_v14 }
 0x962   :  { %2938 = vmatmul.f32.vlgmr.msrb.gmra.mxu1 %v2813_v14 }
 0x966   :  { %2868 = vmatmul.f32.vlgmr.msra.gmra.mxu2 %v2814_v33 }
 0x9cd   :  { %v11452_v29 = vpop.f32.mrf.mxu0 }
 0x9ce   :  { %12744 = vst [vmem:[#allocation39_spill] sm:$0xff] %v11452_v29 }
 0x9cf   :  { %v11458_v8 = vpop.f32.mrf.mxu1 }
 0x9d0   :  { %12747 = vst [vmem:[#allocation42_spill] sm:$0xff] %v11458_v8 }
 0x9d1   :  { %v11454_v62 = vpop.f32.mrf.mxu3 }
 0x9d2   :  { %12745 = vst [vmem:[#allocation40_spill] sm:$0xff] %v11454_v62 }
 0x9d5   :  { %v2819_v23 = vpop.f32.mrf.mxu0 }
 0x9d6   :  { %v2820_v25 = vadd.f32 %v2819_v23, %v11460_v28 }
 0x9d7   :  { %v2845_v47 = vpop.f32.mrf.mxu1 }
 0x9d8   :  { %v2846_v14 = vadd.f32 %v2845_v47, %v2820_v25 }
 0x9d9   :  { %v11456_v17 = vpop.f32.mrf.mxu2  ;;  %v11462_v18 = vpop.f32.mrf.mxu3 }
 0x9da   :  { %12746 = vst [vmem:[#allocation41_spill] sm:$0xff] %v11456_v17 }
 0x9db   :  { %12748 = vst [vmem:[#allocation43_spill] sm:$0xff] %v11462_v18  ;;  %v11470_v18 = vld [vmem:[#allocation7 + $0x8] sm:$0xff] }
 0x9dc   :  { %v2985_v23 = vand.u32 4294901760, %v11470_v18  ;;  %3299 = vrot.lane.b32.xlu2 %v11470_v18, %s11178_s3 }
 0x9dd   :  { %v2917_v37 = vpop.f32.mrf.mxu0 }
 0x9de   :  { %2986 = vmatpush.msrb.mxu2 %v2985_v23  ;;  %3062 = vmatpush.msra.mxu1 %v2985_v23 }
 0x9df   :  { %v2939_v29 = vpop.f32.mrf.mxu1 }
 0x9e1   :  { %v11464_v19 = vpop.f32.mrf.mxu2  ;;  %v2893_v20 = vpop.f32.mrf.mxu3 }
 0x9e2   :  { %12749 = vst [vmem:[#allocation44_spill] sm:$0xff] %v11464_v19 }
 0x9e4   :  { %3457 = vrot.lane.b32.xlu2 %v11444_v16, %s11179_s8 }
 0x9e9   :  { %v2869_v33 = vpop.f32.mrf.mxu2 }
 0x9ea   :  { %v2870_v21 = vadd.f32 %v2869_v33, %v2846_v14 }
 0x9ec   :  { %v2894_v30 = vadd.f32 %v2893_v20, %v2870_v21 }
 0x9ee   :  { %v2918_v1 = vadd.f32 %v2917_v37, %v2894_v30  ;;  %v3012_v30 = vsub.f32 %v11470_v18, %v2985_v23 }
 0x9f0   :  { %v2940_v42 = vadd.f32 %v2939_v29, %v2918_v1  ;;  %v3013_v1 = vand.u32 4294901760, %v3012_v30  ;;  %3039 = vmatpush.msra.mxu0 %v3012_v30  ;;  %v3122_v29 = vpop.permute.xlu2 %3121 }
 0x9f1   :  { %v3125_v25 = vsel %vm85_vm0, %v3122_v29, 0 }
 0x9f2   :  { %v2942_v8 = vmul.f32 0.5, %v2940_v42  ;;  %3088 = vmatpush.msra.mxu2 %v3013_v1  ;;  %v3142_v47 = vand.u32 4294901760, %v3125_v25 }
 0x9f4   :  { %v2943_v0 = vsel %vm239_vm1, %v2942_v8, -inf  ;;  %v3169_v14 = vsub.f32 %v3125_v25, %v3142_v47  ;;  %3143 = vmatpush.xpose.msrb.mxu0 %v3142_v47 }
 0x9f5   :  { %2944 = vmax.xlane.f32.xlu1 %v2943_v0  ;;  %v3014_v0 = vsub.f32 %v3012_v30, %v3013_v1 }
 0x9f6   :  { %v3170_v33 = vand.u32 4294901760, %v3169_v14 }
 0x9f7   :  { %v3015_v42 = vand.u32 4294901760, %v3014_v0 }
 0x9f8   :  { %v3171_v20 = vsub.f32 %v3169_v14, %v3170_v33 }
 0x9f9   :  { %3016 = vmatpush.msrb.mxu3 %v3015_v42 }
 0x9fa   :  { %v3172_v21 = vand.u32 4294901760, %v3171_v20 }
 0x9fb   :  { %3110 = vmatpush.msra.mxu3 %v2985_v23 }
 0x9fc   :  { %3173 = vmatpush.xpose.msrb.mxu1 %v3172_v21 }
 0xa0e   :  { %3119 = vrot.lane.b32.xlu1 %v11444_v16, %s11178_s3 }
 0xa16   :  { %3636 = vrot.lane.b32.xlu1 %v11470_v18, %s11179_s8 }
 0xa1e   :  { %3794 = vrot.lane.b32.xlu1 %v11444_v16, %s11180_s9 }
 0xa26   :  { %3973 = vrot.lane.b32.xlu1 %v11470_v18, %s11180_s9 }
 0xa2e   :  { %4133 = vrot.lane.b32.xlu1 %v11438_v40, %s11181_s10 }
 0xa36   :  { %4131 = vrot.lane.b32.xlu1 %v11444_v16, %s11181_s10 }
 0xa3e   :  { %4310 = vrot.lane.b32.xlu1 %v11470_v18, %s11181_s10 }
 0xa46   :  { %4468 = vrot.lane.b32.xlu1 %v11444_v16, %s11182_s11 }
 0xa4e   :  { %4647 = vrot.lane.b32.xlu1 %v11470_v18, %s11182_s11 }
 0xa56   :  { %4805 = vrot.lane.b32.xlu1 %v11444_v16, %s11183_s12 }
 0xa5e   :  { %4984 = vrot.lane.b32.xlu1 %v11470_v18, %s11183_s12 }
 0xa66   :  { %5144 = vrot.lane.b32.xlu1 %v11438_v40, %s11184_s13 }
 0xa68   :  { %v2945_v37 = vpop.xlane.xlu1 %2944 }
 0xa69   :  { %v2946_v30 = vsub.f32 %v2942_v8, %v2945_v37 }
 0xa6b   :  { %v2947_v1 = vmul.f32 1.442695, %v2946_v30 }
 0xa6d   :  { %10928 = vpow2.f32 %v2947_v1 }
 0xa73   :  { %v11489_v23 = vpop.eup %10928 }
 0xa74   :  { %12750 = vst [vmem:[#allocation45_spill] sm:$0xff] %v11489_v23  ;;  %v2968_v0 = vsel %vm239_vm1, %v11489_v23, 0 }
 0xa75   :  { %v2987_v42 = vand.u32 4294901760, %v2968_v0 }
 0xa77   :  { %v2988_v29 = vsub.f32 %v2968_v0, %v2987_v42  ;;  %3018 = vmatmul.f32.vlgmr.msrb.gmra.mxu3 %v2987_v42 }
 0xa78   :  { %3219 = vmatpush.xpose.msrb.mxu3 %v3142_v47 }
 0xa79   :  { %3042 = vmatmul.f32.vlgmr.msra.gmra.mxu0 %v2988_v29  ;;  %v2989_v25 = vand.u32 4294901760, %v2988_v29 }
 0xa7a   :  { %3245 = vmatpush.xpose.msra.mxu0 %v3170_v33 }
 0xa7b   :  { %3066 = vmatmul.f32.vlgmr.msra.gmra.mxu1 %v2989_v25  ;;  %v2990_v8 = vsub.f32 %v2988_v29, %v2989_v25 }
 0xa7c   :  { %3267 = vmatpush.xpose.msra.mxu1 %v3142_v47 }
 0xa7d   :  { %v2991_v20 = vand.u32 4294901760, %v2990_v8 }
 0xa7f   :  { %2992 = vmatmul.f32.vlgmr.msrb.gmra.mxu2 %v2991_v20  ;;  %3112 = vmatmul.f32.vlgmr.msra.gmra.mxu3 %v2987_v42 }
 0xa80   :  { %v3120_v21 = vpop.permute.xlu1 %3119  ;;  %3196 = vmatpush.xpose.msrb.mxu2 %v3169_v14 }
 0xa81   :  { %v3123_v37 = vsel %vm85_vm0, %v3120_v21, 0 }
 0xa82   :  { %v3144_v30 = vand.u32 4294901760, %v3123_v37 }
 0xa84   :  { %v3145_v1 = vsub.f32 %v3123_v37, %v3144_v30  ;;  %3175 = vmatmul.f32.vlgmr.msrb.gmra.mxu1 %v3144_v30 }
 0xa86   :  { %v3146_v33 = vand.u32 4294901760, %v3145_v1 }
 0xa87   :  { %3090 = vmatmul.f32.vlgmr.msra.gmra.mxu2 %v2987_v42 }
 0xa88   :  { %v3147_v0 = vsub.f32 %v3145_v1, %v3146_v33  ;;  %3223 = vmatmul.f32.vlgmr.msrb.gmra.mxu3 %v3146_v33 }
 0xa8a   :  { %v3148_v47 = vand.u32 4294901760, %v3147_v0  ;;  %v3300_v0 = vpop.permute.xlu2 %3299 }
 0xa8b   :  { %v3320_v19 = vand.u32 4294901760, %v3300_v0 }
 0xa8c   :  { %3149 = vmatmul.f32.vlgmr.msrb.gmra.mxu0 %v3148_v47  ;;  %3269 = vmatmul.f32.vlgmr.msra.gmra.mxu1 %v3144_v30 }
 0xa8d   :  { %v3347_v22 = vsub.f32 %v3300_v0, %v3320_v19  ;;  %3321 = vmatpush.msra.mxu2 %v3320_v19  ;;  %3397 = vmatpush.msrb.mxu1 %v3320_v19 }
 0xa8f   :  { %3199 = vmatmul.f32.vlgmr.msrb.gmra.mxu2 %v3145_v1  ;;  %v3348_v26 = vand.u32 4294901760, %v3347_v22  ;;  %3374 = vmatpush.msrb.mxu0 %v3347_v22 }
 0xa91   :  { %3423 = vmatpush.msrb.mxu2 %v3348_v26 }
 0xa94   :  { %3247 = vmatmul.f32.vlgmr.msra.gmra.mxu0 %v3144_v30 }
 0xaf6   :  { %v11506_v14 = vpop.f32.mrf.mxu0 }
 0xaf7   :  { %12751 = vst [vmem:[#allocation46_spill] sm:$0xff] %v11506_v14 }
 0xaf8   :  { %v11512_v25 = vpop.f32.mrf.mxu1 }
 0xaf9   :  { %12754 = vst [vmem:[#allocation49_spill] sm:$0xff] %v11512_v25 }
 0xafa   :  { %v11508_v29 = vpop.f32.mrf.mxu3 }
 0xafb   :  { %12752 = vst [vmem:[#allocation47_spill] sm:$0xff] %v11508_v29 }
 0xb01   :  { %v3176_v30 = vpop.f32.mrf.mxu1 }
 0xb02   :  { %v11510_v42 = vpop.f32.mrf.mxu2  ;;  %v11516_v21 = vpop.f32.mrf.mxu3 }
 0xb03   :  { %12753 = vst [vmem:[#allocation48_spill] sm:$0xff] %v11510_v42 }
 0xb04   :  { %12756 = vst [vmem:[#allocation51_spill] sm:$0xff] %v11516_v21  ;;  %v3349_v21 = vsub.f32 %v3347_v22, %v3348_v26 }
 0xb09   :  { %v3150_v8 = vpop.f32.mrf.mxu0  ;;  %v3270_v27 = vpop.f32.mrf.mxu1 }
 0xb0a   :  { %v11514_v20 = vpop.f32.mrf.mxu2  ;;  %v3151_v37 = vadd.f32 %v3150_v8, %v11460_v28 }
 0xb0b   :  { %12755 = vst [vmem:[#allocation50_spill] sm:$0xff] %v11514_v20  ;;  %v3224_v62 = vpop.f32.mrf.mxu3  ;;  %v3350_v20 = vand.u32 4294901760, %v3349_v21 }
 0xb0c   :  { %v3177_v1 = vadd.f32 %v3176_v30, %v3151_v37 }
 0xb0d   :  { %3351 = vmatpush.msra.mxu3 %v3350_v20 }
 0xb0f   :  { %3445 = vmatpush.msrb.mxu3 %v3320_v19 }
 0xb11   :  { %v3248_v44 = vpop.f32.mrf.mxu0 }
 0xb12   :  { %v3200_v33 = vpop.f32.mrf.mxu2 }
 0xb13   :  { %v3201_v47 = vadd.f32 %v3200_v33, %v3177_v1 }
 0xb15   :  { %v3225_v17 = vadd.f32 %v3224_v62, %v3201_v47 }
 0xb17   :  { %v3249_v24 = vadd.f32 %v3248_v44, %v3225_v17  ;;  %v3458_v17 = vpop.permute.xlu2 %3457 }
 0xb19   :  { %v3271_v46 = vadd.f32 %v3270_v27, %v3249_v24  ;;  %v3461_v24 = vsel %vm85_vm0, %v3458_v17, 0 }
 0xb1a   :  { %v3482_v26 = vand.u32 4294901760, %v3461_v24 }
 0xb1b   :  { %v3273_v8 = vmul.f32 0.5, %v3271_v46 }
 0xb1c   :  { %v3483_v22 = vsub.f32 %v3461_v24, %v3482_v26 }
 0xb1d   :  { %v3274_v37 = vsel %vm239_vm1, %v3273_v8, -inf }
 0xb1e   :  { %3275 = vmax.xlane.f32.xlu0 %v3274_v37  ;;  %v3484_v21 = vand.u32 4294901760, %v3483_v22 }
 0xb20   :  { %v3485_v33 = vsub.f32 %v3483_v22, %v3484_v21 }
 0xb32   :  { %3459 = vrot.lane.b32.xlu0 %v11438_v40, %s11179_s8 }
 0xb3a   :  { %3796 = vrot.lane.b32.xlu0 %v11438_v40, %s11180_s9 }
 0xb91   :  { %v3276_v44 = vpop.xlane.xlu0 %3275 }
 0xb92   :  { %v3277_v62 = vsub.f32 %v3273_v8, %v3276_v44 }
 0xb94   :  { %v3278_v30 = vmul.f32 1.442695, %v3277_v62  ;;  %v3486_v62 = vand.u32 4294901760, %v3485_v33 }
 0xb96   :  { %10930 = vpow2.f32 %v3278_v30 }
 0xb9c   :  { %v11525_v27 = vpop.eup %10930 }
 0xb9d   :  { %v3303_v46 = vsel %vm239_vm1, %v11525_v27, 0 }
 0xb9e   :  { %v3322_v19 = vand.u32 4294901760, %v3303_v46 }
 0xba0   :  { %v3323_v20 = vsub.f32 %v3303_v46, %v3322_v19  ;;  %3353 = vmatmul.f32.vlgmr.msra.gmra.mxu3 %v3322_v19 }
 0xba2   :  { %3377 = vmatmul.f32.vlgmr.msrb.gmra.mxu0 %v3323_v20  ;;  %v3324_v1 = vand.u32 4294901760, %v3323_v20 }
 0xba4   :  { %3401 = vmatmul.f32.vlgmr.msrb.gmra.mxu1 %v3324_v1  ;;  %v3460_v0 = vpop.permute.xlu0 %3459  ;;  %v3325_v47 = vsub.f32 %v3323_v20, %v3324_v1  ;;  %v3637_v20 = vpop.permute.xlu1 %3636 }
 0xba5   :  { %v3463_v8 = vsel %vm85_vm0, %v3460_v0, 0  ;;  %v3657_v1 = vand.u32 4294901760, %v3637_v20 }
 0xba6   :  { %v3480_v37 = vand.u32 4294901760, %v3463_v8  ;;  %v3326_v44 = vand.u32 4294901760, %v3325_v47 }
 0xba7   :  { %v3684_v0 = vsub.f32 %v3637_v20, %v3657_v1 }
 0xba8   :  { %v3507_v17 = vsub.f32 %v3463_v8, %v3480_v37  ;;  %3327 = vmatmul.f32.vlgmr.msra.gmra.mxu2 %v3326_v44  ;;  %3447 = vmatmul.f32.vlgmr.msrb.gmra.mxu3 %v3322_v19 }
 0xba9   :  { %3481 = vmatpush.xpose.msra.mxu0 %v3480_v37  ;;  %3557 = vmatpush.xpose.msra.mxu3 %v3480_v37  ;;  %v3685_v44 = vand.u32 4294901760, %v3684_v0 }
 0xbaa   :  { %v3508_v30 = vand.u32 4294901760, %v3507_v17  ;;  %3534 = vmatpush.xpose.msra.mxu2 %v3507_v17 }
 0xbab   :  { %v3686_v38 = vsub.f32 %v3684_v0, %v3685_v44 }
 0xbac   :  { %v3509_v24 = vsub.f32 %v3507_v17, %v3508_v30  ;;  %3487 = vmatmul.f32.vlgmr.msra.gmra.mxu0 %v3486_v62  ;;  %v3797_v34 = vpop.permute.xlu0 %3796 }
 0xbad   :  { %3583 = vmatpush.xpose.msrb.mxu0 %v3508_v30  ;;  %v3687_v32 = vand.u32 4294901760, %v3686_v38  ;;  %v3800_v35 = vsel %vm85_vm0, %v3797_v34, 0 }
 0xbae   :  { %v3510_v46 = vand.u32 4294901760, %v3509_v24 }
 0xbaf   :  { %3688 = vmatpush.msrb.mxu3 %v3687_v32 }
 0xbb0   :  { %3425 = vmatmul.f32.vlgmr.msrb.gmra.mxu2 %v3322_v19  ;;  %3511 = vmatpush.xpose.msra.mxu1 %v3510_v46 }
 0xbb1   :  { %3561 = vmatmul.f32.vlgmr.msra.gmra.mxu3 %v3484_v21  ;;  %3658 = vmatpush.msrb.mxu2 %v3657_v1 }
 0xbb2   :  { %3711 = vmatpush.msra.mxu0 %v3684_v0  ;;  %3782 = vmatpush.msra.mxu3 %v3657_v1 }
 0xbb3   :  { %3513 = vmatmul.f32.vlgmr.msra.gmra.mxu1 %v3482_v26 }
 0xbb4   :  { %3605 = vmatpush.xpose.msrb.mxu1 %v3480_v37  ;;  %3585 = vmatmul.f32.vlgmr.msrb.gmra.mxu0 %v3482_v26 }
 0xbb8   :  { %3537 = vmatmul.f32.vlgmr.msra.gmra.mxu2 %v3483_v22  ;;  %3734 = vmatpush.msra.mxu1 %v3657_v1 }
 0xbb9   :  { %3760 = vmatpush.msra.mxu2 %v3685_v44 }
 0xbbb   :  { %3607 = vmatmul.f32.vlgmr.msrb.gmra.mxu1 %v3482_v26 }
 0xc1f   :  { %v11530_v33 = vpop.f32.mrf.mxu0 }
 0xc20   :  { %12757 = vst [vmem:[#allocation52_spill] sm:$0xff] %v11530_v33 }
 0xc21   :  { %v11536_v19 = vpop.f32.mrf.mxu1 }
 0xc22   :  { %12760 = vst [vmem:[#allocation55_spill] sm:$0xff] %v11536_v19 }
 0xc23   :  { %v11532_v47 = vpop.f32.mrf.mxu3 }
 0xc24   :  { %12758 = vst [vmem:[#allocation53_spill] sm:$0xff] %v11532_v47 }
 0xc29   :  { %v3488_v22 = vpop.f32.mrf.mxu0 }
 0xc2a   :  { %v3489_v37 = vadd.f32 %v3488_v22, %v11460_v28  ;;  %v3817_v22 = vand.u32 4294901760, %v3800_v35 }
 0xc2b   :  { %v11534_v8 = vpop.f32.mrf.mxu2  ;;  %v11540_v26 = vpop.f32.mrf.mxu3 }
 0xc2c   :  { %12759 = vst [vmem:[#allocation54_spill] sm:$0xff] %v11534_v8  ;;  %3818 = vmatpush.xpose.msrb.mxu0 %v3817_v22 }
 0xc2d   :  { %12762 = vst [vmem:[#allocation57_spill] sm:$0xff] %v11540_v26 }
 0xc30   :  { %v3514_v62 = vpop.f32.mrf.mxu1 }
 0xc31   :  { %v3515_v17 = vadd.f32 %v3514_v62, %v3489_v37  ;;  %v3586_v25 = vpop.f32.mrf.mxu0  ;;  %v3844_v37 = vsub.f32 %v3800_v35, %v3817_v22 }
 0xc33   :  { %v11538_v21 = vpop.f32.mrf.mxu2  ;;  %v3845_v62 = vand.u32 4294901760, %v3844_v37 }
 0xc34   :  { %12761 = vst [vmem:[#allocation56_spill] sm:$0xff] %v11538_v21  ;;  %v3562_v46 = vpop.f32.mrf.mxu3 }
 0xc38   :  { %v3608_v29 = vpop.f32.mrf.mxu1 }
 0xc3b   :  { %v3538_v30 = vpop.f32.mrf.mxu2 }
 0xc3c   :  { %v3539_v24 = vadd.f32 %v3538_v30, %v3515_v17  ;;  %v3846_v17 = vsub.f32 %v3844_v37, %v3845_v62 }
 0xc3e   :  { %v3563_v20 = vadd.f32 %v3562_v46, %v3539_v24  ;;  %v3847_v30 = vand.u32 4294901760, %v3846_v17 }
 0xc40   :  { %v3587_v14 = vadd.f32 %v3586_v25, %v3563_v20  ;;  %3848 = vmatpush.xpose.msrb.mxu1 %v3847_v30  ;;  %v3795_v25 = vpop.permute.xlu1 %3794 }
 0xc42   :  { %v3609_v42 = vadd.f32 %v3608_v29, %v3587_v14 }
 0xc44   :  { %v3611_v45 = vmul.f32 0.5, %v3609_v42  ;;  %v3798_v42 = vsel %vm85_vm0, %v3795_v25, 0 }
 0xc45   :  { %v3819_v38 = vand.u32 4294901760, %v3798_v42 }
 0xc46   :  { %v3612_v43 = vsel %vm239_vm1, %v3611_v45, -inf }
 0xc47   :  { %3613 = vmax.xlane.f32.xlu2 %v3612_v43  ;;  %v3820_v0 = vsub.f32 %v3798_v42, %v3819_v38 }
 0xc48   :  { %v3974_v30 = vpop.permute.xlu1 %3973 }
 0xc49   :  { %v3821_v35 = vand.u32 4294901760, %v3820_v0  ;;  %v3994_v25 = vand.u32 4294901760, %v3974_v30 }
 0xc4b   :  { %v3822_v24 = vsub.f32 %v3820_v0, %v3821_v35 }
 0xc4d   :  { %v3823_v20 = vand.u32 4294901760, %v3822_v24 }
 0xc50   :  { %v4134_v21 = vpop.permute.xlu1 %4133 }
 0xcba   :  { %v3614_v14 = vpop.xlane.xlu2 %3613 }
 0xcbb   :  { %v3615_v29 = vsub.f32 %v3611_v45, %v3614_v14 }
 0xcbd   :  { %v3616_v43 = vmul.f32 1.442695, %v3615_v29 }
 0xcbf   :  { %10932 = vpow2.f32 %v3616_v43 }
 0xcc5   :  { %v11546_v44 = vpop.eup %10932 }
 0xcc6   :  { %v3640_v32 = vsel %vm239_vm1, %v11546_v44, 0 }
 0xcc7   :  { %v3659_v34 = vand.u32 4294901760, %v3640_v32 }
 0xcc9   :  { %v3660_v1 = vsub.f32 %v3640_v32, %v3659_v34  ;;  %3690 = vmatmul.f32.vlgmr.msrb.gmra.mxu3 %v3659_v34 }
 0xcca   :  { %3894 = vmatpush.xpose.msrb.mxu3 %v3817_v22 }
 0xccb   :  { %3714 = vmatmul.f32.vlgmr.msra.gmra.mxu0 %v3660_v1  ;;  %v3661_v46 = vand.u32 4294901760, %v3660_v1 }
 0xccc   :  { %3920 = vmatpush.xpose.msra.mxu0 %v3845_v62  ;;  %v4021_v62 = vsub.f32 %v3974_v30, %v3994_v25 }
 0xccd   :  { %3738 = vmatmul.f32.vlgmr.msra.gmra.mxu1 %v3661_v46  ;;  %v3662_v45 = vsub.f32 %v3660_v1, %v3661_v46 }
 0xcce   :  { %3942 = vmatpush.xpose.msra.mxu1 %v3817_v22  ;;  %v4022_v42 = vand.u32 4294901760, %v4021_v62 }
 0xccf   :  { %v3663_v17 = vand.u32 4294901760, %v3662_v45 }
 0xcd1   :  { %3664 = vmatmul.f32.vlgmr.msrb.gmra.mxu2 %v3663_v17  ;;  %3784 = vmatmul.f32.vlgmr.msra.gmra.mxu3 %v3659_v34 }
 0xcd2   :  { %3871 = vmatpush.xpose.msrb.mxu2 %v3844_v37 }
 0xcd3   :  { %3824 = vmatmul.f32.vlgmr.msrb.gmra.mxu0 %v3823_v20 }
 0xcd4   :  { %4048 = vmatpush.msrb.mxu0 %v4021_v62 }
 0xcd5   :  { %3850 = vmatmul.f32.vlgmr.msrb.gmra.mxu1 %v3819_v38 }
 0xcd6   :  { %4071 = vmatpush.msrb.mxu1 %v3994_v25 }
 0xcd9   :  { %3762 = vmatmul.f32.vlgmr.msra.gmra.mxu2 %v3659_v34  ;;  %3898 = vmatmul.f32.vlgmr.msrb.gmra.mxu3 %v3821_v35 }
 0xcda   :  { %3995 = vmatpush.msra.mxu2 %v3994_v25 }
 0xcdb   :  { %3922 = vmatmul.f32.vlgmr.msra.gmra.mxu0 %v3819_v38 }
 0xcdd   :  { %3944 = vmatmul.f32.vlgmr.msra.gmra.mxu1 %v3819_v38 }
 0xce1   :  { %3874 = vmatmul.f32.vlgmr.msrb.gmra.mxu2 %v3820_v0 }
 0xce2   :  { %4097 = vmatpush.msrb.mxu2 %v4022_v42 }
 0xd48   :  { %v11550_v14 = vpop.f32.mrf.mxu0 }
 0xd49   :  { %12763 = vst [vmem:[#allocation58_spill] sm:$0xff] %v11550_v14 }
 0xd4a   :  { %v11556_v37 = vpop.f32.mrf.mxu1 }
 0xd4b   :  { %12766 = vst [vmem:[#allocation61_spill] sm:$0xff] %v11556_v37 }
 0xd4c   :  { %v11552_v22 = vpop.f32.mrf.mxu3 }
 0xd4d   :  { %12764 = vst [vmem:[#allocation59_spill] sm:$0xff] %v11552_v22 }
 0xd50   :  { %v3825_v38 = vpop.f32.mrf.mxu0 }
 0xd51   :  { %v3826_v32 = vadd.f32 %v3825_v38, %v11460_v28 }
 0xd52   :  { %v3851_v34 = vpop.f32.mrf.mxu1 }
 0xd53   :  { %v3852_v35 = vadd.f32 %v3851_v34, %v3826_v32 }
 0xd54   :  { %v11554_v29 = vpop.f32.mrf.mxu2  ;;  %v11560_v0 = vpop.f32.mrf.mxu3 }
 0xd55   :  { %12765 = vst [vmem:[#allocation60_spill] sm:$0xff] %v11554_v29 }
 0xd56   :  { %12768 = vst [vmem:[#allocation63_spill] sm:$0xff] %v11560_v0  ;;  %v4137_v0 = vsel %vm85_vm0, %v4134_v21, 0 }
 0xd57   :  { %v4154_v38 = vand.u32 4294901760, %v4137_v0 }
 0xd58   :  { %v3923_v20 = vpop.f32.mrf.mxu0 }
 0xd59   :  { %v4181_v32 = vsub.f32 %v4137_v0, %v4154_v38  ;;  %4155 = vmatpush.xpose.msra.mxu0 %v4154_v38 }
 0xd5a   :  { %v3945_v30 = vpop.f32.mrf.mxu1 }
 0xd5b   :  { %v4182_v34 = vand.u32 4294901760, %v4181_v32 }
 0xd5c   :  { %v11558_v43 = vpop.f32.mrf.mxu2  ;;  %v3899_v46 = vpop.f32.mrf.mxu3 }
 0xd5d   :  { %12767 = vst [vmem:[#allocation62_spill] sm:$0xff] %v11558_v43  ;;  %v4023_v43 = vsub.f32 %v4021_v62, %v4022_v42 }
 0xd5f   :  { %v4024_v22 = vand.u32 4294901760, %v4023_v43 }
 0xd61   :  { %4025 = vmatpush.msra.mxu3 %v4024_v22 }
 0xd63   :  { %4119 = vmatpush.msrb.mxu3 %v3994_v25 }
 0xd64   :  { %v3875_v1 = vpop.f32.mrf.mxu2 }
 0xd65   :  { %v3876_v24 = vadd.f32 %v3875_v1, %v3852_v35  ;;  %v4183_v35 = vsub.f32 %v4181_v32, %v4182_v34 }
 0xd67   :  { %v3900_v45 = vadd.f32 %v3899_v46, %v3876_v24  ;;  %v4184_v1 = vand.u32 4294901760, %v4183_v35  ;;  %v4132_v24 = vpop.permute.xlu1 %4131 }
 0xd69   :  { %v3924_v17 = vadd.f32 %v3923_v20, %v3900_v45  ;;  %4185 = vmatpush.xpose.msra.mxu1 %v4184_v1  ;;  %v4135_v45 = vsel %vm85_vm0, %v4132_v24, 0 }
 0xd6a   :  { %v4156_v62 = vand.u32 4294901760, %v4135_v45 }
 0xd6b   :  { %v3946_v26 = vadd.f32 %v3945_v30, %v3924_v17 }
 0xd6c   :  { %v4157_v42 = vsub.f32 %v4135_v45, %v4156_v62 }
 0xd6d   :  { %v3948_v14 = vmul.f32 0.5, %v3946_v26 }
 0xd6e   :  { %v4158_v22 = vand.u32 4294901760, %v4157_v42 }
 0xd6f   :  { %v3949_v37 = vsel %vm239_vm1, %v3948_v14, -inf }
 0xd70   :  { %3950 = vmax.xlane.f32.xlu0 %v3949_v37  ;;  %v4159_v20 = vsub.f32 %v4157_v42, %v4158_v22 }
 0xd72   :  { %v4160_v30 = vand.u32 4294901760, %v4159_v20  ;;  %v4311_v20 = vpop.permute.xlu1 %4310 }
 0xde3   :  { %v3951_v46 = vpop.xlane.xlu0 %3950 }
 0xde4   :  { %v3952_v26 = vsub.f32 %v3948_v14, %v3951_v46 }
 0xde6   :  { %v3953_v37 = vmul.f32 1.442695, %v3952_v26 }
 0xde8   :  { %10934 = vpow2.f32 %v3953_v37 }
 0xdee   :  { %v11566_v43 = vpop.eup %10934 }
 0xdef   :  { %v3977_v21 = vsel %vm239_vm1, %v11566_v43, 0 }
 0xdf0   :  { %v3996_v25 = vand.u32 4294901760, %v3977_v21 }
 0xdf2   :  { %v3997_v0 = vsub.f32 %v3977_v21, %v3996_v25  ;;  %4027 = vmatmul.f32.vlgmr.msra.gmra.mxu3 %v3996_v25 }
 0xdf3   :  { %4231 = vmatpush.xpose.msra.mxu3 %v4154_v38 }
 0xdf4   :  { %4051 = vmatmul.f32.vlgmr.msrb.gmra.mxu0 %v3997_v0  ;;  %v3998_v17 = vand.u32 4294901760, %v3997_v0 }
 0xdf5   :  { %4257 = vmatpush.xpose.msrb.mxu0 %v4182_v34 }
 0xdf6   :  { %4075 = vmatmul.f32.vlgmr.msrb.gmra.mxu1 %v3998_v17  ;;  %v3999_v14 = vsub.f32 %v3997_v0, %v3998_v17 }
 0xdf7   :  { %4279 = vmatpush.xpose.msrb.mxu1 %v4154_v38 }
 0xdf8   :  { %v4000_v35 = vand.u32 4294901760, %v3999_v14  ;;  %v4331_v14 = vand.u32 4294901760, %v4311_v20 }
 0xdfa   :  { %4001 = vmatmul.f32.vlgmr.msra.gmra.mxu2 %v4000_v35  ;;  %4121 = vmatmul.f32.vlgmr.msrb.gmra.mxu3 %v3996_v25 }
 0xdfb   :  { %4208 = vmatpush.xpose.msra.mxu2 %v4181_v32 }
 0xdfc   :  { %4161 = vmatmul.f32.vlgmr.msra.gmra.mxu0 %v4160_v30 }
 0xdfe   :  { %4187 = vmatmul.f32.vlgmr.msra.gmra.mxu1 %v4156_v62 }
 0xdff   :  { %4408 = vmatpush.msra.mxu1 %v4331_v14 }
 0xe02   :  { %4099 = vmatmul.f32.vlgmr.msrb.gmra.mxu2 %v3996_v25  ;;  %4235 = vmatmul.f32.vlgmr.msra.gmra.mxu3 %v4158_v22 }
 0xe03   :  { %4332 = vmatpush.msrb.mxu2 %v4331_v14 }
 0xe04   :  { %4259 = vmatmul.f32.vlgmr.msrb.gmra.mxu0 %v4156_v62 }
 0xe06   :  { %4281 = vmatmul.f32.vlgmr.msrb.gmra.mxu1 %v4156_v62 }
 0xe0a   :  { %4211 = vmatmul.f32.vlgmr.msra.gmra.mxu2 %v4157_v42 }
 0xe71   :  { %v11570_v1 = vpop.f32.mrf.mxu0 }
 0xe72   :  { %12769 = vst [vmem:[#allocation64_spill] sm:$0xff] %v11570_v1 }
 0xe73   :  { %v11576_v46 = vpop.f32.mrf.mxu1 }
 0xe74   :  { %12772 = vst [vmem:[#allocation67_spill] sm:$0xff] %v11576_v46  ;;  %v4358_v46 = vsub.f32 %v4311_v20, %v4331_v14 }
 0xe75   :  { %v11572_v24 = vpop.f32.mrf.mxu3 }
 0xe76   :  { %12770 = vst [vmem:[#allocation65_spill] sm:$0xff] %v11572_v24  ;;  %v4359_v1 = vand.u32 4294901760, %v4358_v46  ;;  %4385 = vmatpush.msra.mxu0 %v4358_v46 }
 0xe78   :  { %4434 = vmatpush.msra.mxu2 %v4359_v1 }
 0xe79   :  { %v4162_v26 = vpop.f32.mrf.mxu0 }
 0xe7a   :  { %v4163_v32 = vadd.f32 %v4162_v26, %v11460_v28 }
 0xe7b   :  { %v4188_v37 = vpop.f32.mrf.mxu1 }
 0xe7c   :  { %v4189_v21 = vadd.f32 %v4188_v37, %v4163_v32  ;;  %v4469_v37 = vpop.permute.xlu1 %4468 }
 0xe7d   :  { %v11574_v34 = vpop.f32.mrf.mxu2  ;;  %v11580_v45 = vpop.f32.mrf.mxu3 }
 0xe7e   :  { %12771 = vst [vmem:[#allocation66_spill] sm:$0xff] %v11574_v34 }
 0xe7f   :  { %12774 = vst [vmem:[#allocation69_spill] sm:$0xff] %v11580_v45  ;;  %v4360_v45 = vsub.f32 %v4358_v46, %v4359_v1 }
 0xe81   :  { %v4260_v0 = vpop.f32.mrf.mxu0  ;;  %v4361_v32 = vand.u32 4294901760, %v4360_v45 }
 0xe83   :  { %v4282_v30 = vpop.f32.mrf.mxu1  ;;  %4362 = vmatpush.msrb.mxu3 %v4361_v32 }
 0xe85   :  { %v11578_v38 = vpop.f32.mrf.mxu2  ;;  %v4236_v42 = vpop.f32.mrf.mxu3  ;;  %4456 = vmatpush.msra.mxu3 %v4331_v14 }
 0xe86   :  { %12773 = vst [vmem:[#allocation68_spill] sm:$0xff] %v11578_v38 }
 0xe8d   :  { %v4212_v25 = vpop.f32.mrf.mxu2 }
 0xe8e   :  { %v4213_v62 = vadd.f32 %v4212_v25, %v4189_v21 }
 0xe90   :  { %v4237_v22 = vadd.f32 %v4236_v42, %v4213_v62  ;;  %v4472_v62 = vsel %vm85_vm0, %v4469_v37, 0 }
 0xe92   :  { %v4261_v17 = vadd.f32 %v4260_v0, %v4237_v22  ;;  %v4493_v22 = vand.u32 4294901760, %v4472_v62 }
 0xe94   :  { %v4283_v35 = vadd.f32 %v4282_v30, %v4261_v17  ;;  %v4494_v46 = vsub.f32 %v4472_v62, %v4493_v22 }
 0xe96   :  { %v4285_v38 = vmul.f32 0.5, %v4283_v35  ;;  %v4495_v35 = vand.u32 4294901760, %v4494_v46 }
 0xe98   :  { %v4286_v26 = vsel %vm239_vm1, %v4285_v38, -inf  ;;  %v4496_v37 = vsub.f32 %v4494_v46, %v4495_v35 }
 0xe99   :  { %4287 = vmax.xlane.f32.xlu2 %v4286_v26 }
 0xeb1   :  { %4470 = vrot.lane.b32.xlu2 %v11438_v40, %s11182_s11 }
 0xf0c   :  { %v4288_v21 = vpop.xlane.xlu2 %4287 }
 0xf0d   :  { %v4289_v25 = vsub.f32 %v4285_v38, %v4288_v21 }
 0xf0f   :  { %v4290_v42 = vmul.f32 1.442695, %v4289_v25 }
 0xf11   :  { %10936 = vpow2.f32 %v4290_v42  ;;  %v4497_v42 = vand.u32 4294901760, %v4496_v37 }
 0xf14   :  { %v4471_v0 = vpop.permute.xlu2 %4470 }
 0xf15   :  { %v4474_v20 = vsel %vm85_vm0, %v4471_v0, 0 }
 0xf16   :  { %v4491_v1 = vand.u32 4294901760, %v4474_v20 }
 0xf17   :  { %v11588_v17 = vpop.eup %10936 }
 0xf18   :  { %12775 = vst [vmem:[#allocation70_spill] sm:$0xff] %v11588_v17  ;;  %v4314_v45 = vsel %vm239_vm1, %v11588_v17, 0  ;;  %v4518_v14 = vsub.f32 %v4474_v20, %v4491_v1  ;;  %4492 = vmatpush.xpose.msrb.mxu0 %v4491_v1 }
 0xf19   :  { %v4333_v30 = vand.u32 4294901760, %v4314_v45 }
 0xf1a   :  { %v4519_v38 = vand.u32 4294901760, %v4518_v14 }
 0xf1b   :  { %v4334_v26 = vsub.f32 %v4314_v45, %v4333_v30  ;;  %4364 = vmatmul.f32.vlgmr.msrb.gmra.mxu3 %v4333_v30 }
 0xf1c   :  { %v4520_v32 = vsub.f32 %v4518_v14, %v4519_v38  ;;  %4568 = vmatpush.xpose.msrb.mxu3 %v4491_v1 }
 0xf1d   :  { %4388 = vmatmul.f32.vlgmr.msra.gmra.mxu0 %v4334_v26  ;;  %v4335_v21 = vand.u32 4294901760, %v4334_v26 }
 0xf1e   :  { %v4521_v25 = vand.u32 4294901760, %v4520_v32  ;;  %4594 = vmatpush.xpose.msra.mxu0 %v4519_v38 }
 0xf1f   :  { %4412 = vmatmul.f32.vlgmr.msra.gmra.mxu1 %v4335_v21  ;;  %v4336_v62 = vsub.f32 %v4334_v26, %v4335_v21 }
 0xf20   :  { %4522 = vmatpush.xpose.msrb.mxu1 %v4521_v25 }
 0xf21   :  { %v4337_v0 = vand.u32 4294901760, %v4336_v62 }
 0xf23   :  { %4338 = vmatmul.f32.vlgmr.msrb.gmra.mxu2 %v4337_v0  ;;  %4458 = vmatmul.f32.vlgmr.msra.gmra.mxu3 %v4333_v30 }
 0xf24   :  { %4616 = vmatpush.xpose.msra.mxu1 %v4491_v1  ;;  %4545 = vmatpush.xpose.msrb.mxu2 %v4518_v14 }
 0xf25   :  { %4498 = vmatmul.f32.vlgmr.msrb.gmra.mxu0 %v4497_v42 }
 0xf27   :  { %4524 = vmatmul.f32.vlgmr.msrb.gmra.mxu1 %v4493_v22 }
 0xf2b   :  { %4436 = vmatmul.f32.vlgmr.msra.gmra.mxu2 %v4333_v30  ;;  %4572 = vmatmul.f32.vlgmr.msrb.gmra.mxu3 %v4495_v35 }
 0xf2d   :  { %4596 = vmatmul.f32.vlgmr.msra.gmra.mxu0 %v4493_v22 }
 0xf2f   :  { %4618 = vmatmul.f32.vlgmr.msra.gmra.mxu1 %v4493_v22  ;;  %v4648_v22 = vpop.permute.xlu1 %4647 }
 0xf30   :  { %v4668_v25 = vand.u32 4294901760, %v4648_v22 }
 0xf32   :  { %v4695_v0 = vsub.f32 %v4648_v22, %v4668_v25  ;;  %4669 = vmatpush.msra.mxu2 %v4668_v25  ;;  %4745 = vmatpush.msrb.mxu1 %v4668_v25 }
 0xf33   :  { %4548 = vmatmul.f32.vlgmr.msrb.gmra.mxu2 %v4494_v46 }
 0xf34   :  { %4722 = vmatpush.msrb.mxu0 %v4695_v0 }
 0xf9a   :  { %v11592_v20 = vpop.f32.mrf.mxu0 }
 0xf9b   :  { %12776 = vst [vmem:[#allocation71_spill] sm:$0xff] %v11592_v20 }
 0xf9c   :  { %v11598_v26 = vpop.f32.mrf.mxu1 }
 0xf9d   :  { %12779 = vst [vmem:[#allocation74_spill] sm:$0xff] %v11598_v26 }
 0xf9e   :  { %v11594_v45 = vpop.f32.mrf.mxu3 }
 0xf9f   :  { %12777 = vst [vmem:[#allocation72_spill] sm:$0xff] %v11594_v45  ;;  %v4696_v45 = vand.u32 4294901760, %v4695_v0 }
 0xfa1   :  { %4771 = vmatpush.msrb.mxu2 %v4696_v45 }
 0xfa2   :  { %v4499_v1 = vpop.f32.mrf.mxu0 }
 0xfa3   :  { %v4500_v14 = vadd.f32 %v4499_v1, %v11460_v28 }
 0xfa4   :  { %v4525_v30 = vpop.f32.mrf.mxu1 }
 0xfa5   :  { %v4526_v35 = vadd.f32 %v4525_v30, %v4500_v14 }
 0xfa6   :  { %v11596_v38 = vpop.f32.mrf.mxu2  ;;  %v11602_v37 = vpop.f32.mrf.mxu3 }
 0xfa7   :  { %12778 = vst [vmem:[#allocation73_spill] sm:$0xff] %v11596_v38 }
 0xfa8   :  { %12781 = vst [vmem:[#allocation76_spill] sm:$0xff] %v11602_v37  ;;  %v4697_v37 = vsub.f32 %v4695_v0, %v4696_v45 }
 0xfaa   :  { %v4597_v20 = vpop.f32.mrf.mxu0  ;;  %v4698_v17 = vand.u32 4294901760, %v4697_v37 }
 0xfac   :  { %4699 = vmatpush.msra.mxu3 %v4698_v17 }
 0xfae   :  { %v11600_v32 = vpop.f32.mrf.mxu2  ;;  %v4573_v62 = vpop.f32.mrf.mxu3  ;;  %4793 = vmatpush.msrb.mxu3 %v4668_v25 }
 0xfaf   :  { %12780 = vst [vmem:[#allocation75_spill] sm:$0xff] %v11600_v32  ;;  %v4619_v32 = vpop.f32.mrf.mxu1 }
 0xfb6   :  { %v4549_v21 = vpop.f32.mrf.mxu2 }
 0xfb7   :  { %v4550_v46 = vadd.f32 %v4549_v21, %v4526_v35 }
 0xfb9   :  { %v4574_v42 = vadd.f32 %v4573_v62, %v4550_v46 }
 0xfbb   :  { %v4598_v26 = vadd.f32 %v4597_v20, %v4574_v42 }
 0xfbd   :  { %v4620_v38 = vadd.f32 %v4619_v32, %v4598_v26  ;;  %v4806_v32 = vpop.permute.xlu1 %4805 }
 0xfbf   :  { %v4622_v1 = vmul.f32 0.5, %v4620_v38  ;;  %v4809_v38 = vsel %vm85_vm0, %v4806_v32, 0 }
 0xfc0   :  { %v4830_v37 = vand.u32 4294901760, %v4809_v38 }
 0xfc1   :  { %v4623_v14 = vsel %vm239_vm1, %v4622_v1, -inf }
 0xfc2   :  { %4624 = vmax.xlane.f32.xlu0 %v4623_v14  ;;  %v4831_v30 = vsub.f32 %v4809_v38, %v4830_v37 }
 0xfd6   :  { %4807 = vrot.lane.b32.xlu0 %v11438_v40, %s11183_s12 }
 0xfde   :  { %5142 = vrot.lane.b32.xlu0 %v11444_v16, %s11184_s13  ;;  %v4832_v16 = vand.u32 4294901760, %v4831_v30 }
 0xfe0   :  { %v4833_v22 = vsub.f32 %v4831_v30, %v4832_v16 }
 0xfe6   :  { %5321 = vrot.lane.b32.xlu0 %v11470_v18, %s11184_s13 }
0x1035   :  { %v4625_v20 = vpop.xlane.xlu0 %4624 }
0x1036   :  { %v4626_v26 = vsub.f32 %v4622_v1, %v4625_v20  ;;  %v4834_v1 = vand.u32 4294901760, %v4833_v22 }
0x1038   :  { %v4627_v45 = vmul.f32 1.442695, %v4626_v26 }
0x103a   :  { %10938 = vpow2.f32 %v4627_v45  ;;  %v4985_v45 = vpop.permute.xlu1 %4984 }
0x103b   :  { %v5005_v38 = vand.u32 4294901760, %v4985_v45 }
0x1040   :  { %v11613_v17 = vpop.eup %10938 }
0x1041   :  { %v4651_v40 = vsel %vm239_vm1, %v11613_v17, 0 }
0x1042   :  { %v4670_v35 = vand.u32 4294901760, %v4651_v40 }
0x1044   :  { %v4671_v21 = vsub.f32 %v4651_v40, %v4670_v35  ;;  %4701 = vmatmul.f32.vlgmr.msra.gmra.mxu3 %v4670_v35 }
0x1046   :  { %4725 = vmatmul.f32.vlgmr.msrb.gmra.mxu0 %v4671_v21  ;;  %v4672_v18 = vand.u32 4294901760, %v4671_v21 }
0x1048   :  { %v4808_v46 = vpop.permute.xlu0 %4807  ;;  %4749 = vmatmul.f32.vlgmr.msrb.gmra.mxu1 %v4672_v18  ;;  %v4673_v25 = vsub.f32 %v4671_v21, %v4672_v18  ;;  %v5032_v21 = vsub.f32 %v4985_v45, %v5005_v38 }
0x1049   :  { %v4811_v62 = vsel %vm85_vm0, %v4808_v46, 0 }
0x104a   :  { %v4828_v42 = vand.u32 4294901760, %v4811_v62  ;;  %v4674_v0 = vand.u32 4294901760, %v4673_v25  ;;  %v5033_v46 = vand.u32 4294901760, %v5032_v21 }
0x104c   :  { %v4855_v14 = vsub.f32 %v4811_v62, %v4828_v42  ;;  %4675 = vmatmul.f32.vlgmr.msra.gmra.mxu2 %v4674_v0  ;;  %4795 = vmatmul.f32.vlgmr.msrb.gmra.mxu3 %v4670_v35 }
0x104d   :  { %4829 = vmatpush.xpose.msra.mxu0 %v4828_v42  ;;  %4905 = vmatpush.xpose.msra.mxu3 %v4828_v42 }
0x104e   :  { %v4856_v20 = vand.u32 4294901760, %v4855_v14  ;;  %4882 = vmatpush.xpose.msra.mxu2 %v4855_v14 }
0x1050   :  { %v4857_v26 = vsub.f32 %v4855_v14, %v4856_v20  ;;  %4835 = vmatmul.f32.vlgmr.msra.gmra.mxu0 %v4834_v1 }
0x1051   :  { %4931 = vmatpush.xpose.msrb.mxu0 %v4856_v20 }
0x1052   :  { %v4858_v32 = vand.u32 4294901760, %v4857_v26 }
0x1054   :  { %4773 = vmatmul.f32.vlgmr.msrb.gmra.mxu2 %v4670_v35  ;;  %4859 = vmatpush.xpose.msra.mxu1 %v4858_v32  ;;  %v5034_v35 = vsub.f32 %v5032_v21, %v5033_v46 }
0x1055   :  { %4909 = vmatmul.f32.vlgmr.msra.gmra.mxu3 %v4832_v16  ;;  %5006 = vmatpush.msrb.mxu2 %v5005_v38 }
0x1056   :  { %5059 = vmatpush.msra.mxu0 %v5032_v21  ;;  %v5035_v25 = vand.u32 4294901760, %v5034_v35 }
0x1057   :  { %4861 = vmatmul.f32.vlgmr.msra.gmra.mxu1 %v4830_v37 }
0x1058   :  { %4953 = vmatpush.xpose.msrb.mxu1 %v4828_v42  ;;  %4933 = vmatmul.f32.vlgmr.msrb.gmra.mxu0 %v4830_v37 }
0x1059   :  { %5036 = vmatpush.msrb.mxu3 %v5035_v25 }
0x105b   :  { %5130 = vmatpush.msra.mxu3 %v5005_v38 }
0x105c   :  { %4885 = vmatmul.f32.vlgmr.msra.gmra.mxu2 %v4831_v30  ;;  %5082 = vmatpush.msra.mxu1 %v5005_v38  ;;  %v5145_v38 = vpop.permute.xlu1 %5144 }
0x105d   :  { %5108 = vmatpush.msra.mxu2 %v5033_v46 }
0x105f   :  { %4955 = vmatmul.f32.vlgmr.msrb.gmra.mxu1 %v4830_v37 }
0x10c3   :  { %v11618_v40 = vpop.f32.mrf.mxu0 }
0x10c4   :  { %12782 = vst [vmem:[#allocation77_spill] sm:$0xff] %v11618_v40 }
0x10c5   :  { %v11624_v16 = vpop.f32.mrf.mxu1 }
0x10c6   :  { %12785 = vst [vmem:[#allocation80_spill] sm:$0xff] %v11624_v16 }
0x10c7   :  { %v11620_v18 = vpop.f32.mrf.mxu3 }
0x10c8   :  { %12783 = vst [vmem:[#allocation78_spill] sm:$0xff] %v11620_v18 }
0x10cd   :  { %v4836_v30 = vpop.f32.mrf.mxu0 }
0x10ce   :  { %v4837_v42 = vadd.f32 %v4836_v30, %v11460_v28 }
0x10cf   :  { %v11622_v22 = vpop.f32.mrf.mxu2  ;;  %v11628_v62 = vpop.f32.mrf.mxu3 }
0x10d0   :  { %12784 = vst [vmem:[#allocation79_spill] sm:$0xff] %v11622_v22 }
0x10d1   :  { %12787 = vst [vmem:[#allocation82_spill] sm:$0xff] %v11628_v62 }
0x10d4   :  { %v4862_v0 = vpop.f32.mrf.mxu1 }
0x10d5   :  { %v4863_v1 = vadd.f32 %v4862_v0, %v4837_v42  ;;  %v4934_v45 = vpop.f32.mrf.mxu0  ;;  %v5143_v0 = vpop.permute.xlu0 %5142 }
0x10d7   :  { %v11626_v37 = vpop.f32.mrf.mxu2 }
0x10d8   :  { %12786 = vst [vmem:[#allocation81_spill] sm:$0xff] %v11626_v37  ;;  %v4910_v26 = vpop.f32.mrf.mxu3  ;;  %v5148_v37 = vsel %vm85_vm0, %v5145_v38, 0 }
0x10d9   :  { %v5165_v62 = vand.u32 4294901760, %v5148_v37 }
0x10db   :  { %v5192_v40 = vsub.f32 %v5148_v37, %v5165_v62  ;;  %5166 = vmatpush.xpose.msrb.mxu0 %v5165_v62 }
0x10dc   :  { %v4956_v46 = vpop.f32.mrf.mxu1 }
0x10dd   :  { %v5193_v28 = vand.u32 4294901760, %v5192_v40 }
0x10df   :  { %v4886_v14 = vpop.f32.mrf.mxu2  ;;  %v5194_v30 = vsub.f32 %v5192_v40, %v5193_v28 }
0x10e0   :  { %v4887_v20 = vadd.f32 %v4886_v14, %v4863_v1 }
0x10e1   :  { %v5195_v42 = vand.u32 4294901760, %v5194_v30 }
0x10e2   :  { %v4911_v32 = vadd.f32 %v4910_v26, %v4887_v20  ;;  %v5146_v20 = vsel %vm85_vm0, %v5143_v0, 0 }
0x10e3   :  { %5196 = vmatpush.xpose.msrb.mxu1 %v5195_v42 }
0x10e4   :  { %v4935_v21 = vadd.f32 %v4934_v45, %v4911_v32 }
0x10e6   :  { %v4957_v16 = vadd.f32 %v4956_v46, %v4935_v21 }
0x10e8   :  { %v4959_v35 = vmul.f32 0.5, %v4957_v16  ;;  %v5167_v16 = vand.u32 4294901760, %v5146_v20 }
0x10ea   :  { %v4960_v25 = vsel %vm239_vm1, %v4959_v35, -inf  ;;  %v5168_v32 = vsub.f32 %v5146_v20, %v5167_v16 }
0x10eb   :  { %4961 = vmax.xlane.f32.xlu2 %v4960_v25 }
0x10ec   :  { %v5169_v46 = vand.u32 4294901760, %v5168_v32 }
0x10ee   :  { %v5170_v38 = vsub.f32 %v5168_v32, %v5169_v46 }
0x10f0   :  { %v5171_v42 = vand.u32 4294901760, %v5170_v38  ;;  %v11041_v38 = vld [vmem:[#allocation8 + $0x8] sm:$0xff] }
0x115e   :  { %v4962_v1 = vpop.xlane.xlu2 %4961 }
0x115f   :  { %v4963_v14 = vsub.f32 %v4959_v35, %v4962_v1  ;;  %v5322_v1 = vpop.permute.xlu0 %5321 }
0x1161   :  { %v4964_v26 = vmul.f32 1.442695, %v4963_v14  ;;  %v5342_v14 = vand.u32 4294901760, %v5322_v1 }
0x1163   :  { %10940 = vpow2.f32 %v4964_v26 }
0x1169   :  { %v11634_v45 = vpop.eup %10940 }
0x116a   :  { %12788 = vst [vmem:[#allocation83_spill] sm:$0xff] %v11634_v45  ;;  %v4988_v21 = vsel %vm239_vm1, %v11634_v45, 0  ;;  %v11685_v45 = vld [vmem:[#allocation7 + $0x10] sm:$0xff] }
0x116b   :  { %v5007_v37 = vand.u32 4294901760, %v4988_v21 }
0x116d   :  { %v5008_v25 = vsub.f32 %v4988_v21, %v5007_v37  ;;  %5038 = vmatmul.f32.vlgmr.msrb.gmra.mxu3 %v5007_v37 }
0x116e   :  { %5242 = vmatpush.xpose.msrb.mxu3 %v5165_v62 }
0x116f   :  { %5062 = vmatmul.f32.vlgmr.msra.gmra.mxu0 %v5008_v25  ;;  %v5009_v30 = vand.u32 4294901760, %v5008_v25 }
0x1170   :  { %5268 = vmatpush.xpose.msra.mxu0 %v5193_v28  ;;  %v5369_v28 = vsub.f32 %v5322_v1, %v5342_v14 }
0x1171   :  { %5086 = vmatmul.f32.vlgmr.msra.gmra.mxu1 %v5009_v30  ;;  %v5010_v35 = vsub.f32 %v5008_v25, %v5009_v30 }
0x1172   :  { %5290 = vmatpush.xpose.msra.mxu1 %v5165_v62  ;;  %v5370_v21 = vand.u32 4294901760, %v5369_v28 }
0x1173   :  { %v5011_v0 = vand.u32 4294901760, %v5010_v35 }
0x1175   :  { %5012 = vmatmul.f32.vlgmr.msrb.gmra.mxu2 %v5011_v0  ;;  %5132 = vmatmul.f32.vlgmr.msra.gmra.mxu3 %v5007_v37 }
0x1176   :  { %5219 = vmatpush.xpose.msrb.mxu2 %v5192_v40 }
0x1177   :  { %5172 = vmatmul.f32.vlgmr.msrb.gmra.mxu0 %v5171_v42 }
0x1178   :  { %5396 = vmatpush.msrb.mxu0 %v5369_v28 }
0x1179   :  { %5198 = vmatmul.f32.vlgmr.msrb.gmra.mxu1 %v5167_v16 }
0x117a   :  { %5419 = vmatpush.msrb.mxu1 %v5342_v14 }
0x117d   :  { %5110 = vmatmul.f32.vlgmr.msra.gmra.mxu2 %v5007_v37  ;;  %5246 = vmatmul.f32.vlgmr.msrb.gmra.mxu3 %v5169_v46  ;;  %v5371_v37 = vsub.f32 %v5369_v28, %v5370_v21 }
0x117e   :  { %5343 = vmatpush.msra.mxu2 %v5342_v14 }
0x117f   :  { %5270 = vmatmul.f32.vlgmr.msra.gmra.mxu0 %v5167_v16  ;;  %v5372_v46 = vand.u32 4294901760, %v5371_v37 }
0x1181   :  { %5292 = vmatmul.f32.vlgmr.msra.gmra.mxu1 %v5167_v16  ;;  %5373 = vmatpush.msra.mxu3 %v5372_v46 }
0x1183   :  { %5467 = vmatpush.msrb.mxu3 %v5342_v14  ;;  %v11651_v14 = vld [vmem:[#allocation5 + $0x10] sm:$0xff] }
0x1184   :  { %5817 = vrot.lane.b32.xlu2 %v11651_v14, %s11178_s3 }
0x1185   :  { %5222 = vmatmul.f32.vlgmr.msrb.gmra.mxu2 %v5168_v32 }
0x1186   :  { %5445 = vmatpush.msrb.mxu2 %v5370_v21 }
0x11ec   :  { %v11638_v20 = vpop.f32.mrf.mxu0 }
0x11ed   :  { %12789 = vst [vmem:[#allocation84_spill] sm:$0xff] %v11638_v20 }
0x11ee   :  { %v11644_v40 = vpop.f32.mrf.mxu1 }
0x11ef   :  { %12792 = vst [vmem:[#allocation87_spill] sm:$0xff] %v11644_v40 }
0x11f0   :  { %v11640_v62 = vpop.f32.mrf.mxu3 }
0x11f1   :  { %12790 = vst [vmem:[#allocation85_spill] sm:$0xff] %v11640_v62 }
0x11f4   :  { %v5173_v32 = vpop.f32.mrf.mxu0 }
0x11f5   :  { %v5174_v30 = vadd.f32 %v11041_v38, %v5173_v32  ;;  %v11655_v32 = vld [vmem:[#allocation2 + $0x10] sm:$0xff] }
0x11f6   :  { %v5199_v35 = vpop.f32.mrf.mxu1 }
0x11f7   :  { %v5200_v42 = vadd.f32 %v5199_v35, %v5174_v30 }
0x11f8   :  { %v11642_v26 = vpop.f32.mrf.mxu2  ;;  %v11648_v25 = vpop.f32.mrf.mxu3 }
0x11f9   :  { %12791 = vst [vmem:[#allocation86_spill] sm:$0xff] %v11642_v26 }
0x11fa   :  { %12794 = vst [vmem:[#allocation89_spill] sm:$0xff] %v11648_v25  ;;  %v5490_v25 = vsel %vm85_vm0, %v11651_v14, 0 }
0x11fb   :  { %v5507_v38 = vand.u32 4294901760, %v5490_v25 }
0x11fc   :  { %v5271_v26 = vpop.f32.mrf.mxu0 }
0x11fd   :  { %5508 = vmatpush.xpose.msra.mxu0 %v5507_v38 }
0x11fe   :  { %v5293_v28 = vpop.f32.mrf.mxu1 }
0x1200   :  { %v11646_v16 = vpop.f32.mrf.mxu2  ;;  %v5247_v20 = vpop.f32.mrf.mxu3 }
0x1201   :  { %12793 = vst [vmem:[#allocation88_spill] sm:$0xff] %v11646_v16 }
0x1208   :  { %v5223_v0 = vpop.f32.mrf.mxu2 }
0x1209   :  { %v5224_v1 = vadd.f32 %v5223_v0, %v5200_v42 }
0x120b   :  { %v5248_v62 = vadd.f32 %v5247_v20, %v5224_v1 }
0x120d   :  { %v5272_v40 = vadd.f32 %v5271_v26, %v5248_v62  ;;  %v5534_v26 = vsub.f32 %v5490_v25, %v5507_v38 }
0x120f   :  { %v5294_v21 = vadd.f32 %v5293_v28, %v5272_v40  ;;  %v5487_v40 = vsel %vm85_vm0, %v11655_v32, 0  ;;  %v5535_v35 = vand.u32 4294901760, %v5534_v26 }
0x1210   :  { %v5509_v0 = vand.u32 4294901760, %v5487_v40 }
0x1211   :  { %v5296_v37 = vmul.f32 0.5, %v5294_v21  ;;  %v5536_v42 = vsub.f32 %v5534_v26, %v5535_v35 }
0x1212   :  { %v5510_v28 = vsub.f32 %v5487_v40, %v5509_v0 }
0x1213   :  { %v5297_v46 = vsel %vm239_vm1, %v5296_v37, -inf  ;;  %v5537_v1 = vand.u32 4294901760, %v5536_v42 }
0x1214   :  { %5298 = vmax.xlane.f32.xlu1 %v5297_v46  ;;  %v5511_v46 = vand.u32 4294901760, %v5510_v28 }
0x1215   :  { %5538 = vmatpush.xpose.msra.mxu1 %v5537_v1 }
0x122d   :  { %5815 = vrot.lane.b32.xlu1 %v11655_v32, %s11178_s3 }
0x1235   :  { %6155 = vrot.lane.b32.xlu1 %v11651_v14, %s11179_s8 }
0x1287   :  { %v5299_v20 = vpop.xlane.xlu1 %5298 }
0x1288   :  { %v5300_v62 = vsub.f32 %v5296_v37, %v5299_v20 }
0x128a   :  { %v5301_v30 = vmul.f32 1.442695, %v5300_v62 }
0x128c   :  { %10942 = vpow2.f32 %v5301_v30  ;;  %v5512_v30 = vsub.f32 %v5510_v28, %v5511_v46 }
0x128e   :  { %v5513_v1 = vand.u32 4294901760, %v5512_v30 }
0x1292   :  { %v11665_v21 = vpop.eup %10942 }
0x1293   :  { %v5325_v25 = vsel %vm239_vm1, %v11665_v21, 0 }
0x1294   :  { %v5344_v37 = vand.u32 4294901760, %v5325_v25 }
0x1296   :  { %v5345_v20 = vsub.f32 %v5325_v25, %v5344_v37  ;;  %5375 = vmatmul.f32.vlgmr.msra.gmra.mxu3 %v5344_v37 }
0x1297   :  { %5584 = vmatpush.xpose.msra.mxu3 %v5507_v38 }
0x1298   :  { %5399 = vmatmul.f32.vlgmr.msrb.gmra.mxu0 %v5345_v20  ;;  %v5346_v62 = vand.u32 4294901760, %v5345_v20 }
0x1299   :  { %5610 = vmatpush.xpose.msrb.mxu0 %v5535_v35 }
0x129a   :  { %5423 = vmatmul.f32.vlgmr.msrb.gmra.mxu1 %v5346_v62  ;;  %v5347_v42 = vsub.f32 %v5345_v20, %v5346_v62 }
0x129b   :  { %5632 = vmatpush.xpose.msrb.mxu1 %v5507_v38  ;;  %v11677_v38 = vld [vmem:[#allocation8] sm:$0xff] }
0x129c   :  { %v5348_v16 = vand.u32 4294901760, %v5347_v42 }
0x129e   :  { %5349 = vmatmul.f32.vlgmr.msra.gmra.mxu2 %v5348_v16  ;;  %5469 = vmatmul.f32.vlgmr.msrb.gmra.mxu3 %v5344_v37 }
0x129f   :  { %5561 = vmatpush.xpose.msra.mxu2 %v5534_v26 }
0x12a0   :  { %5514 = vmatmul.f32.vlgmr.msra.gmra.mxu0 %v5513_v1 }
0x12a2   :  { %5540 = vmatmul.f32.vlgmr.msra.gmra.mxu1 %v5509_v0 }
0x12a6   :  { %5447 = vmatmul.f32.vlgmr.msrb.gmra.mxu2 %v5344_v37  ;;  %5588 = vmatmul.f32.vlgmr.msra.gmra.mxu3 %v5511_v46 }
0x12a8   :  { %5612 = vmatmul.f32.vlgmr.msrb.gmra.mxu0 %v5509_v0 }
0x12aa   :  { %5634 = vmatmul.f32.vlgmr.msrb.gmra.mxu1 %v5509_v0 }
0x12ae   :  { %5564 = vmatmul.f32.vlgmr.msra.gmra.mxu2 %v5510_v28 }
0x1315   :  { %v11669_v40 = vpop.f32.mrf.mxu0 }
0x1316   :  { %12795 = vst [vmem:[#allocation90_spill] sm:$0xff] %v11669_v40 }
0x1317   :  { %v11675_v20 = vpop.f32.mrf.mxu1 }
0x1318   :  { %12798 = vst [vmem:[#allocation93_spill] sm:$0xff] %v11675_v20 }
0x1319   :  { %v11671_v25 = vpop.f32.mrf.mxu3 }
0x131a   :  { %12796 = vst [vmem:[#allocation91_spill] sm:$0xff] %v11671_v25 }
0x131d   :  { %v5515_v16 = vpop.f32.mrf.mxu0 }
0x131e   :  { %v5516_v37 = vadd.f32 %v5515_v16, %v11677_v38 }
0x131f   :  { %v5541_v46 = vpop.f32.mrf.mxu1 }
0x1320   :  { %v5542_v0 = vadd.f32 %v5541_v46, %v5516_v37 }
0x1321   :  { %v11673_v35 = vpop.f32.mrf.mxu2  ;;  %v11679_v62 = vpop.f32.mrf.mxu3 }
0x1322   :  { %12797 = vst [vmem:[#allocation92_spill] sm:$0xff] %v11673_v35 }
0x1323   :  { %12799 = vst [vmem:[#allocation94_spill] sm:$0xff] %v11679_v62  ;;  %v5681_v62 = vand.u32 4294901760, %v11685_v45 }
0x1325   :  { %v5613_v1 = vpop.f32.mrf.mxu0  ;;  %v5708_v16 = vsub.f32 %v11685_v45, %v5681_v62  ;;  %5682 = vmatpush.msrb.mxu2 %v5681_v62  ;;  %5758 = vmatpush.msra.mxu1 %v5681_v62 }
0x1327   :  { %v5635_v25 = vpop.f32.mrf.mxu1  ;;  %v5709_v37 = vand.u32 4294901760, %v5708_v16  ;;  %5735 = vmatpush.msra.mxu0 %v5708_v16 }
0x1329   :  { %v11681_v26 = vpop.f32.mrf.mxu2  ;;  %v5589_v30 = vpop.f32.mrf.mxu3  ;;  %v5710_v46 = vsub.f32 %v5708_v16, %v5709_v37  ;;  %5784 = vmatpush.msra.mxu2 %v5709_v37 }
0x132a   :  { %12800 = vst [vmem:[#allocation95_spill] sm:$0xff] %v11681_v26 }
0x1331   :  { %v5565_v28 = vpop.f32.mrf.mxu2 }
0x1332   :  { %v5566_v42 = vadd.f32 %v5565_v28, %v5542_v0 }
0x1334   :  { %v5590_v40 = vadd.f32 %v5589_v30, %v5566_v42  ;;  %v5816_v42 = vpop.permute.xlu1 %5815 }
0x1335   :  { %v5819_v37 = vsel %vm85_vm0, %v5816_v42, 0 }
0x1336   :  { %v5614_v35 = vadd.f32 %v5613_v1, %v5590_v40  ;;  %v5818_v40 = vpop.permute.xlu2 %5817 }
0x1338   :  { %v5636_v18 = vadd.f32 %v5635_v25, %v5614_v35 }
0x133a   :  { %v5638_v20 = vmul.f32 0.5, %v5636_v18  ;;  %v5711_v18 = vand.u32 4294901760, %v5710_v46 }
0x133c   :  { %v5639_v22 = vsel %vm239_vm1, %v5638_v20, -inf  ;;  %5712 = vmatpush.msrb.mxu3 %v5711_v18 }
0x133d   :  { %5640 = vmax.xlane.f32.xlu0 %v5639_v22  ;;  %v5821_v22 = vsel %vm85_vm0, %v5818_v40, 0 }
0x133e   :  { %v5838_v25 = vand.u32 4294901760, %v5821_v22  ;;  %5806 = vmatpush.msra.mxu3 %v5681_v62  ;;  %v5840_v62 = vand.u32 4294901760, %v5819_v37 }
0x1340   :  { %v5865_v35 = vsub.f32 %v5821_v22, %v5838_v25  ;;  %5839 = vmatpush.xpose.msrb.mxu0 %v5838_v25  ;;  %v5841_v40 = vsub.f32 %v5819_v37, %v5840_v62 }
0x1342   :  { %v5866_v0 = vand.u32 4294901760, %v5865_v35 }
0x1344   :  { %v5867_v28 = vsub.f32 %v5865_v35, %v5866_v0 }
0x1346   :  { %v5868_v30 = vand.u32 4294901760, %v5867_v28  ;;  %v5842_v28 = vand.u32 4294901760, %v5841_v40 }
0x1348   :  { %5869 = vmatpush.xpose.msrb.mxu1 %v5868_v30  ;;  %v5843_v24 = vsub.f32 %v5841_v40, %v5842_v28 }
0x134a   :  { %v5844_v42 = vand.u32 4294901760, %v5843_v24 }
0x1351   :  { %5995 = vrot.lane.b32.xlu0 %v11685_v45, %s11178_s3 }
0x1359   :  { %6153 = vrot.lane.b32.xlu0 %v11655_v32, %s11179_s8 }
0x1361   :  { %6332 = vrot.lane.b32.xlu0 %v11685_v45, %s11179_s8 }
0x1369   :  { %6490 = vrot.lane.b32.xlu0 %v11655_v32, %s11180_s9 }
0x13b0   :  { %v5641_v1 = vpop.xlane.xlu0 %5640 }
0x13b1   :  { %v5642_v16 = vsub.f32 %v5638_v20, %v5641_v1 }
0x13b3   :  { %v5643_v46 = vmul.f32 1.442695, %v5642_v16 }
0x13b5   :  { %10944 = vpow2.f32 %v5643_v46 }
0x13bb   :  { %v11699_v18 = vpop.eup %10944 }
0x13bc   :  { %12801 = vst [vmem:[#allocation96_spill] sm:$0xff] %v11699_v18  ;;  %v5664_v22 = vsel %vm239_vm1, %v11699_v18, 0 }
0x13bd   :  { %v5683_v26 = vand.u32 4294901760, %v5664_v22 }
0x13bf   :  { %v5684_v30 = vsub.f32 %v5664_v22, %v5683_v26  ;;  %5714 = vmatmul.f32.vlgmr.msrb.gmra.mxu3 %v5683_v26 }
0x13c0   :  { %5915 = vmatpush.xpose.msrb.mxu3 %v5838_v25 }
0x13c1   :  { %5738 = vmatmul.f32.vlgmr.msra.gmra.mxu0 %v5684_v30  ;;  %v5685_v34 = vand.u32 4294901760, %v5684_v30 }
0x13c2   :  { %5941 = vmatpush.xpose.msra.mxu0 %v5866_v0 }
0x13c3   :  { %5762 = vmatmul.f32.vlgmr.msra.gmra.mxu1 %v5685_v34  ;;  %v5686_v20 = vsub.f32 %v5684_v30, %v5685_v34  ;;  %v5996_v16 = vpop.permute.xlu0 %5995 }
0x13c4   :  { %5963 = vmatpush.xpose.msra.mxu1 %v5838_v25  ;;  %v6016_v37 = vand.u32 4294901760, %v5996_v16 }
0x13c5   :  { %v5687_v1 = vand.u32 4294901760, %v5686_v20 }
0x13c6   :  { %v6043_v0 = vsub.f32 %v5996_v16, %v6016_v37 }
0x13c7   :  { %5688 = vmatmul.f32.vlgmr.msrb.gmra.mxu2 %v5687_v1  ;;  %5808 = vmatmul.f32.vlgmr.msra.gmra.mxu3 %v5683_v26 }
0x13c8   :  { %5892 = vmatpush.xpose.msrb.mxu2 %v5865_v35  ;;  %v6044_v25 = vand.u32 4294901760, %v6043_v0 }
0x13c9   :  { %5845 = vmatmul.f32.vlgmr.msrb.gmra.mxu0 %v5844_v42 }
0x13ca   :  { %6070 = vmatpush.msrb.mxu0 %v6043_v0 }
0x13cb   :  { %5871 = vmatmul.f32.vlgmr.msrb.gmra.mxu1 %v5840_v62 }
0x13cc   :  { %6093 = vmatpush.msrb.mxu1 %v6016_v37 }
0x13cf   :  { %5786 = vmatmul.f32.vlgmr.msra.gmra.mxu2 %v5683_v26  ;;  %5919 = vmatmul.f32.vlgmr.msrb.gmra.mxu3 %v5842_v28  ;;  %v6045_v26 = vsub.f32 %v6043_v0, %v6044_v25 }
0x13d0   :  { %6017 = vmatpush.msra.mxu2 %v6016_v37 }
0x13d1   :  { %5943 = vmatmul.f32.vlgmr.msra.gmra.mxu0 %v5840_v62  ;;  %v6046_v22 = vand.u32 4294901760, %v6045_v26 }
0x13d3   :  { %5965 = vmatmul.f32.vlgmr.msra.gmra.mxu1 %v5840_v62  ;;  %6047 = vmatpush.msra.mxu3 %v6046_v22 }
0x13d5   :  { %6141 = vmatpush.msrb.mxu3 %v6016_v37  ;;  %v6156_v37 = vpop.permute.xlu1 %6155 }
0x13d7   :  { %5895 = vmatmul.f32.vlgmr.msrb.gmra.mxu2 %v5841_v40 }
0x13d8   :  { %6119 = vmatpush.msrb.mxu2 %v6044_v25 }
0x143e   :  { %v11703_v46 = vpop.f32.mrf.mxu0 }
0x143f   :  { %12802 = vst [vmem:[#allocation97_spill] sm:$0xff] %v11703_v46 }
0x1440   :  { %v11709_v35 = vpop.f32.mrf.mxu1 }
0x1441   :  { %12805 = vst [vmem:[#allocation100_spill] sm:$0xff] %v11709_v35 }
0x1442   :  { %v11705_v34 = vpop.f32.mrf.mxu3 }
0x1443   :  { %12803 = vst [vmem:[#allocation98_spill] sm:$0xff] %v11705_v34 }
0x1446   :  { %v5846_v40 = vpop.f32.mrf.mxu0 }
0x1447   :  { %v5847_v30 = vadd.f32 %v5846_v40, %v11677_v38 }
0x1448   :  { %v5872_v20 = vpop.f32.mrf.mxu1 }
0x1449   :  { %v5873_v42 = vadd.f32 %v5872_v20, %v5847_v30  ;;  %v6154_v20 = vpop.permute.xlu0 %6153 }
0x144a   :  { %v11707_v24 = vpop.f32.mrf.mxu2  ;;  %v11713_v28 = vpop.f32.mrf.mxu3 }
0x144b   :  { %12804 = vst [vmem:[#allocation99_spill] sm:$0xff] %v11707_v24 }
0x144c   :  { %12807 = vst [vmem:[#allocation102_spill] sm:$0xff] %v11713_v28 }
0x144e   :  { %v5944_v24 = vpop.f32.mrf.mxu0 }
0x1450   :  { %v5966_v0 = vpop.f32.mrf.mxu1 }
0x1452   :  { %v11711_v62 = vpop.f32.mrf.mxu2  ;;  %v5920_v46 = vpop.f32.mrf.mxu3 }
0x1453   :  { %12806 = vst [vmem:[#allocation101_spill] sm:$0xff] %v11711_v62 }
0x145a   :  { %v5896_v1 = vpop.f32.mrf.mxu2 }
0x145b   :  { %v5897_v16 = vadd.f32 %v5896_v1, %v5873_v42 }
0x145d   :  { %v5921_v34 = vadd.f32 %v5920_v46, %v5897_v16  ;;  %v6159_v46 = vsel %vm85_vm0, %v6156_v37, 0  ;;  %v6157_v16 = vsel %vm85_vm0, %v6154_v20, 0 }
0x145e   :  { %v6176_v40 = vand.u32 4294901760, %v6159_v46 }
0x145f   :  { %v5945_v35 = vadd.f32 %v5944_v24, %v5921_v34 }
0x1460   :  { %v6203_v34 = vsub.f32 %v6159_v46, %v6176_v40  ;;  %6177 = vmatpush.xpose.msra.mxu0 %v6176_v40 }
0x1461   :  { %v5967_v25 = vadd.f32 %v5966_v0, %v5945_v35 }
0x1462   :  { %v6204_v24 = vand.u32 4294901760, %v6203_v34 }
0x1463   :  { %v5969_v26 = vmul.f32 0.5, %v5967_v25  ;;  %v6178_v25 = vand.u32 4294901760, %v6157_v16 }
0x1464   :  { %v6205_v35 = vsub.f32 %v6203_v34, %v6204_v24 }
0x1465   :  { %v5970_v22 = vsel %vm239_vm1, %v5969_v26, -inf }
0x1466   :  { %5971 = vmax.xlane.f32.xlu2 %v5970_v22  ;;  %v6206_v30 = vand.u32 4294901760, %v6205_v35  ;;  %v6179_v22 = vsub.f32 %v6157_v16, %v6178_v25 }
0x1468   :  { %6207 = vmatpush.xpose.msra.mxu1 %v6206_v30  ;;  %v6180_v62 = vand.u32 4294901760, %v6179_v22 }
0x146a   :  { %v6181_v35 = vsub.f32 %v6179_v22, %v6180_v62 }
0x146c   :  { %v6182_v20 = vand.u32 4294901760, %v6181_v35 }
0x147e   :  { %6492 = vrot.lane.b32.xlu2 %v11651_v14, %s11180_s9 }
0x1486   :  { %6669 = vrot.lane.b32.xlu2 %v11685_v45, %s11180_s9 }
0x148e   :  { %6827 = vrot.lane.b32.xlu2 %v11655_v32, %s11181_s10 }
0x14d9   :  { %v5972_v42 = vpop.xlane.xlu2 %5971 }
0x14da   :  { %v5973_v1 = vsub.f32 %v5969_v26, %v5972_v42 }
0x14dc   :  { %v5974_v0 = vmul.f32 1.442695, %v5973_v1  ;;  %v6333_v1 = vpop.permute.xlu0 %6332 }
0x14dd   :  { %v6353_v16 = vand.u32 4294901760, %v6333_v1 }
0x14de   :  { %10946 = vpow2.f32 %v5974_v0 }
0x14e4   :  { %v11725_v28 = vpop.eup %10946 }
0x14e5   :  { %v5999_v37 = vsel %vm239_vm1, %v11725_v28, 0 }
0x14e6   :  { %v6018_v46 = vand.u32 4294901760, %v5999_v37 }
0x14e8   :  { %v6019_v18 = vsub.f32 %v5999_v37, %v6018_v46  ;;  %6049 = vmatmul.f32.vlgmr.msra.gmra.mxu3 %v6018_v46 }
0x14e9   :  { %6253 = vmatpush.xpose.msra.mxu3 %v6176_v40 }
0x14ea   :  { %6073 = vmatmul.f32.vlgmr.msrb.gmra.mxu0 %v6019_v18  ;;  %v6020_v30 = vand.u32 4294901760, %v6019_v18 }
0x14eb   :  { %6279 = vmatpush.xpose.msrb.mxu0 %v6204_v24  ;;  %v6380_v24 = vsub.f32 %v6333_v1, %v6353_v16 }
0x14ec   :  { %6097 = vmatmul.f32.vlgmr.msrb.gmra.mxu1 %v6020_v30  ;;  %v6021_v26 = vsub.f32 %v6019_v18, %v6020_v30 }
0x14ed   :  { %6301 = vmatpush.xpose.msrb.mxu1 %v6176_v40  ;;  %v6381_v37 = vand.u32 4294901760, %v6380_v24 }
0x14ee   :  { %v6022_v42 = vand.u32 4294901760, %v6021_v26 }
0x14f0   :  { %6023 = vmatmul.f32.vlgmr.msra.gmra.mxu2 %v6022_v42  ;;  %6143 = vmatmul.f32.vlgmr.msrb.gmra.mxu3 %v6018_v46 }
0x14f1   :  { %6230 = vmatpush.xpose.msra.mxu2 %v6203_v34 }
0x14f2   :  { %6183 = vmatmul.f32.vlgmr.msra.gmra.mxu0 %v6182_v20 }
0x14f3   :  { %6407 = vmatpush.msra.mxu0 %v6380_v24 }
0x14f4   :  { %6209 = vmatmul.f32.vlgmr.msra.gmra.mxu1 %v6178_v25 }
0x14f5   :  { %6430 = vmatpush.msra.mxu1 %v6353_v16 }
0x14f8   :  { %6121 = vmatmul.f32.vlgmr.msrb.gmra.mxu2 %v6018_v46  ;;  %6257 = vmatmul.f32.vlgmr.msra.gmra.mxu3 %v6180_v62  ;;  %v6382_v46 = vsub.f32 %v6380_v24, %v6381_v37 }
0x14f9   :  { %6354 = vmatpush.msrb.mxu2 %v6353_v16 }
0x14fa   :  { %6281 = vmatmul.f32.vlgmr.msrb.gmra.mxu0 %v6178_v25  ;;  %v6383_v62 = vand.u32 4294901760, %v6382_v46 }
0x14fc   :  { %6303 = vmatmul.f32.vlgmr.msrb.gmra.mxu1 %v6178_v25  ;;  %6384 = vmatpush.msrb.mxu3 %v6383_v62 }
0x14fe   :  { %6478 = vmatpush.msra.mxu3 %v6353_v16  ;;  %v6493_v16 = vpop.permute.xlu2 %6492 }
0x1500   :  { %6233 = vmatmul.f32.vlgmr.msra.gmra.mxu2 %v6179_v22 }
0x1501   :  { %6456 = vmatpush.msra.mxu2 %v6381_v37 }
0x1567   :  { %v11729_v0 = vpop.f32.mrf.mxu0 }
0x1568   :  { %12808 = vst [vmem:[#allocation103_spill] sm:$0xff] %v11729_v0 }
0x1569   :  { %v11735_v34 = vpop.f32.mrf.mxu1 }
0x156a   :  { %12811 = vst [vmem:[#allocation106_spill] sm:$0xff] %v11735_v34 }
0x156b   :  { %v11731_v18 = vpop.f32.mrf.mxu3 }
0x156c   :  { %12809 = vst [vmem:[#allocation104_spill] sm:$0xff] %v11731_v18 }
0x156f   :  { %v6184_v22 = vpop.f32.mrf.mxu0 }
0x1570   :  { %v6185_v30 = vadd.f32 %v6184_v22, %v11677_v38 }
0x1571   :  { %v6210_v26 = vpop.f32.mrf.mxu1 }
0x1572   :  { %v6211_v20 = vadd.f32 %v6210_v26, %v6185_v30  ;;  %v6491_v26 = vpop.permute.xlu0 %6490 }
0x1573   :  { %v11733_v40 = vpop.f32.mrf.mxu2  ;;  %v11739_v35 = vpop.f32.mrf.mxu3 }
0x1574   :  { %12810 = vst [vmem:[#allocation105_spill] sm:$0xff] %v11733_v40 }
0x1575   :  { %12813 = vst [vmem:[#allocation108_spill] sm:$0xff] %v11739_v35 }
0x1577   :  { %v6282_v40 = vpop.f32.mrf.mxu0 }
0x1579   :  { %v6304_v24 = vpop.f32.mrf.mxu1 }
0x157b   :  { %v11737_v25 = vpop.f32.mrf.mxu2  ;;  %v6258_v0 = vpop.f32.mrf.mxu3 }
0x157c   :  { %12812 = vst [vmem:[#allocation107_spill] sm:$0xff] %v11737_v25 }
0x1583   :  { %v6234_v42 = vpop.f32.mrf.mxu2 }
0x1584   :  { %v6235_v1 = vadd.f32 %v6234_v42, %v6211_v20 }
0x1586   :  { %v6259_v18 = vadd.f32 %v6258_v0, %v6235_v1  ;;  %v6496_v0 = vsel %vm85_vm0, %v6493_v16, 0  ;;  %v6494_v1 = vsel %vm85_vm0, %v6491_v26, 0 }
0x1588   :  { %v6283_v34 = vadd.f32 %v6282_v40, %v6259_v18  ;;  %v6513_v18 = vand.u32 4294901760, %v6496_v0 }
0x158a   :  { %v6305_v37 = vadd.f32 %v6304_v24, %v6283_v34  ;;  %v6540_v40 = vsub.f32 %v6496_v0, %v6513_v18  ;;  %6514 = vmatpush.xpose.msrb.mxu0 %v6513_v18 }
0x158c   :  { %v6307_v46 = vmul.f32 0.5, %v6305_v37  ;;  %v6541_v34 = vand.u32 4294901760, %v6540_v40  ;;  %v6515_v37 = vand.u32 4294901760, %v6494_v1 }
0x158e   :  { %v6308_v62 = vsel %vm239_vm1, %v6307_v46, -inf  ;;  %v6542_v22 = vsub.f32 %v6540_v40, %v6541_v34 }
0x158f   :  { %6309 = vmax.xlane.f32.xlu1 %v6308_v62  ;;  %v6516_v62 = vsub.f32 %v6494_v1, %v6515_v37 }
0x1590   :  { %v6543_v30 = vand.u32 4294901760, %v6542_v22 }
0x1591   :  { %v6517_v25 = vand.u32 4294901760, %v6516_v62 }
0x1592   :  { %6544 = vmatpush.xpose.msrb.mxu1 %v6543_v30 }
0x1593   :  { %v6518_v22 = vsub.f32 %v6516_v62, %v6517_v25 }
0x1595   :  { %v6519_v26 = vand.u32 4294901760, %v6518_v22 }
0x15a8   :  { %6829 = vrot.lane.b32.xlu1 %v11651_v14, %s11181_s10 }
0x15b0   :  { %7166 = vrot.lane.b32.xlu1 %v11651_v14, %s11182_s11 }
0x15b8   :  { %7164 = vrot.lane.b32.xlu1 %v11655_v32, %s11182_s11 }
0x15c0   :  { %7343 = vrot.lane.b32.xlu1 %v11685_v45, %s11182_s11 }
0x15c8   :  { %7503 = vrot.lane.b32.xlu1 %v11651_v14, %s11183_s12 }
0x1602   :  { %v6310_v20 = vpop.xlane.xlu1 %6309 }
0x1603   :  { %v6311_v42 = vsub.f32 %v6307_v46, %v6310_v20 }
0x1605   :  { %v6312_v24 = vmul.f32 1.442695, %v6311_v42  ;;  %v6670_v42 = vpop.permute.xlu2 %6669 }
0x1606   :  { %v6690_v1 = vand.u32 4294901760, %v6670_v42 }
0x1607   :  { %10948 = vpow2.f32 %v6312_v24 }
0x160d   :  { %v11755_v35 = vpop.eup %10948 }
0x160e   :  { %v6336_v16 = vsel %vm239_vm1, %v11755_v35, 0 }
0x160f   :  { %v6355_v0 = vand.u32 4294901760, %v6336_v16 }
0x1611   :  { %v6356_v29 = vsub.f32 %v6336_v16, %v6355_v0  ;;  %6386 = vmatmul.f32.vlgmr.msrb.gmra.mxu3 %v6355_v0 }
0x1612   :  { %6590 = vmatpush.xpose.msrb.mxu3 %v6513_v18 }
0x1613   :  { %6410 = vmatmul.f32.vlgmr.msra.gmra.mxu0 %v6356_v29  ;;  %v6357_v30 = vand.u32 4294901760, %v6356_v29 }
0x1614   :  { %6616 = vmatpush.xpose.msra.mxu0 %v6541_v34  ;;  %v6717_v34 = vsub.f32 %v6670_v42, %v6690_v1 }
0x1615   :  { %6434 = vmatmul.f32.vlgmr.msra.gmra.mxu1 %v6357_v30  ;;  %v6358_v46 = vsub.f32 %v6356_v29, %v6357_v30 }
0x1616   :  { %6638 = vmatpush.xpose.msra.mxu1 %v6513_v18  ;;  %v6718_v16 = vand.u32 4294901760, %v6717_v34 }
0x1617   :  { %v6359_v20 = vand.u32 4294901760, %v6358_v46 }
0x1619   :  { %6360 = vmatmul.f32.vlgmr.msrb.gmra.mxu2 %v6359_v20  ;;  %6480 = vmatmul.f32.vlgmr.msra.gmra.mxu3 %v6355_v0 }
0x161a   :  { %6567 = vmatpush.xpose.msrb.mxu2 %v6540_v40 }
0x161b   :  { %6520 = vmatmul.f32.vlgmr.msrb.gmra.mxu0 %v6519_v26 }
0x161c   :  { %6744 = vmatpush.msrb.mxu0 %v6717_v34 }
0x161d   :  { %6546 = vmatmul.f32.vlgmr.msrb.gmra.mxu1 %v6515_v37 }
0x161e   :  { %6767 = vmatpush.msrb.mxu1 %v6690_v1 }
0x1621   :  { %6458 = vmatmul.f32.vlgmr.msra.gmra.mxu2 %v6355_v0  ;;  %6594 = vmatmul.f32.vlgmr.msrb.gmra.mxu3 %v6517_v25  ;;  %v6719_v0 = vsub.f32 %v6717_v34, %v6718_v16 }
0x1622   :  { %6691 = vmatpush.msra.mxu2 %v6690_v1 }
0x1623   :  { %6618 = vmatmul.f32.vlgmr.msra.gmra.mxu0 %v6515_v37  ;;  %v6720_v25 = vand.u32 4294901760, %v6719_v0 }
0x1625   :  { %6640 = vmatmul.f32.vlgmr.msra.gmra.mxu1 %v6515_v37  ;;  %6721 = vmatpush.msra.mxu3 %v6720_v25 }
0x1627   :  { %6815 = vmatpush.msrb.mxu3 %v6690_v1  ;;  %v6830_v1 = vpop.permute.xlu1 %6829 }
0x1629   :  { %6570 = vmatmul.f32.vlgmr.msrb.gmra.mxu2 %v6516_v62 }
0x162a   :  { %6793 = vmatpush.msrb.mxu2 %v6718_v16 }
0x1690   :  { %v11759_v24 = vpop.f32.mrf.mxu0 }
0x1691   :  { %12814 = vst [vmem:[#allocation109_spill] sm:$0xff] %v11759_v24 }
0x1692   :  { %v11765_v40 = vpop.f32.mrf.mxu1 }
0x1693   :  { %12817 = vst [vmem:[#allocation112_spill] sm:$0xff] %v11765_v40 }
0x1694   :  { %v11761_v29 = vpop.f32.mrf.mxu3 }
0x1695   :  { %12815 = vst [vmem:[#allocation110_spill] sm:$0xff] %v11761_v29 }
0x1698   :  { %v6521_v62 = vpop.f32.mrf.mxu0 }
0x1699   :  { %v6522_v30 = vadd.f32 %v6521_v62, %v11677_v38  ;;  %v6833_v62 = vsel %vm85_vm0, %v6830_v1, 0 }
0x169a   :  { %v6547_v46 = vpop.f32.mrf.mxu1 }
0x169b   :  { %v6548_v26 = vadd.f32 %v6547_v46, %v6522_v30 }
0x169c   :  { %v11763_v18 = vpop.f32.mrf.mxu2  ;;  %v11769_v22 = vpop.f32.mrf.mxu3 }
0x169d   :  { %12816 = vst [vmem:[#allocation111_spill] sm:$0xff] %v11763_v18 }
0x169e   :  { %12819 = vst [vmem:[#allocation114_spill] sm:$0xff] %v11769_v22  ;;  %v6850_v22 = vand.u32 4294901760, %v6833_v62 }
0x16a0   :  { %v6619_v18 = vpop.f32.mrf.mxu0  ;;  %v6877_v30 = vsub.f32 %v6833_v62, %v6850_v22  ;;  %6851 = vmatpush.xpose.msra.mxu0 %v6850_v22 }
0x16a2   :  { %v6641_v34 = vpop.f32.mrf.mxu1  ;;  %v6878_v46 = vand.u32 4294901760, %v6877_v30 }
0x16a4   :  { %v11767_v37 = vpop.f32.mrf.mxu2  ;;  %v6595_v24 = vpop.f32.mrf.mxu3 }
0x16a5   :  { %12818 = vst [vmem:[#allocation113_spill] sm:$0xff] %v11767_v37 }
0x16ac   :  { %v6571_v20 = vpop.f32.mrf.mxu2 }
0x16ad   :  { %v6572_v42 = vadd.f32 %v6571_v20, %v6548_v26  ;;  %v6879_v26 = vsub.f32 %v6877_v30, %v6878_v46 }
0x16af   :  { %v6596_v29 = vadd.f32 %v6595_v24, %v6572_v42  ;;  %v6880_v24 = vand.u32 4294901760, %v6879_v26 }
0x16b1   :  { %v6620_v40 = vadd.f32 %v6619_v18, %v6596_v29  ;;  %6881 = vmatpush.xpose.msra.mxu1 %v6880_v24  ;;  %v6828_v29 = vpop.permute.xlu2 %6827 }
0x16b2   :  { %v6831_v20 = vsel %vm85_vm0, %v6828_v29, 0 }
0x16b3   :  { %v6642_v16 = vadd.f32 %v6641_v34, %v6620_v40  ;;  %v6852_v34 = vand.u32 4294901760, %v6831_v20 }
0x16b5   :  { %v6644_v0 = vmul.f32 0.5, %v6642_v16  ;;  %v6853_v16 = vsub.f32 %v6831_v20, %v6852_v34 }
0x16b7   :  { %v6645_v25 = vsel %vm239_vm1, %v6644_v0, -inf  ;;  %v6854_v37 = vand.u32 4294901760, %v6853_v16 }
0x16b8   :  { %6646 = vmax.xlane.f32.xlu0 %v6645_v25 }
0x16b9   :  { %v6855_v26 = vsub.f32 %v6853_v16, %v6854_v37 }
0x16bb   :  { %v6856_v29 = vand.u32 4294901760, %v6855_v26 }
0x16cc   :  { %7006 = vrot.lane.b32.xlu0 %v11685_v45, %s11181_s10 }
0x172b   :  { %v6647_v18 = vpop.xlane.xlu0 %6646 }
0x172c   :  { %v6648_v40 = vsub.f32 %v6644_v0, %v6647_v18 }
0x172e   :  { %v6649_v42 = vmul.f32 1.442695, %v6648_v40 }
0x1730   :  { %10950 = vpow2.f32 %v6649_v42 }
0x1736   :  { %v11777_v25 = vpop.eup %10950 }
0x1737   :  { %12820 = vst [vmem:[#allocation115_spill] sm:$0xff] %v11777_v25  ;;  %v6673_v1 = vsel %vm239_vm1, %v11777_v25, 0 }
0x1738   :  { %v6692_v62 = vand.u32 4294901760, %v6673_v1 }
0x173a   :  { %v6693_v19 = vsub.f32 %v6673_v1, %v6692_v62  ;;  %6723 = vmatmul.f32.vlgmr.msra.gmra.mxu3 %v6692_v62 }
0x173b   :  { %6927 = vmatpush.xpose.msra.mxu3 %v6850_v22 }
0x173c   :  { %6747 = vmatmul.f32.vlgmr.msrb.gmra.mxu0 %v6693_v19  ;;  %v6694_v24 = vand.u32 4294901760, %v6693_v19 }
0x173d   :  { %6953 = vmatpush.xpose.msrb.mxu0 %v6878_v46 }
0x173e   :  { %6771 = vmatmul.f32.vlgmr.msrb.gmra.mxu1 %v6694_v24  ;;  %v6695_v0 = vsub.f32 %v6693_v19, %v6694_v24  ;;  %v7007_v40 = vpop.permute.xlu0 %7006 }
0x173f   :  { %6975 = vmatpush.xpose.msrb.mxu1 %v6850_v22  ;;  %v7027_v20 = vand.u32 4294901760, %v7007_v40 }
0x1740   :  { %v6696_v18 = vand.u32 4294901760, %v6695_v0 }
0x1741   :  { %v7054_v46 = vsub.f32 %v7007_v40, %v7027_v20 }
0x1742   :  { %6697 = vmatmul.f32.vlgmr.msra.gmra.mxu2 %v6696_v18  ;;  %6817 = vmatmul.f32.vlgmr.msrb.gmra.mxu3 %v6692_v62 }
0x1743   :  { %6904 = vmatpush.xpose.msra.mxu2 %v6877_v30  ;;  %v7055_v1 = vand.u32 4294901760, %v7054_v46 }
0x1744   :  { %6857 = vmatmul.f32.vlgmr.msra.gmra.mxu0 %v6856_v29 }
0x1745   :  { %7081 = vmatpush.msra.mxu0 %v7054_v46 }
0x1746   :  { %6883 = vmatmul.f32.vlgmr.msra.gmra.mxu1 %v6852_v34 }
0x1747   :  { %7104 = vmatpush.msra.mxu1 %v7027_v20 }
0x174a   :  { %6795 = vmatmul.f32.vlgmr.msrb.gmra.mxu2 %v6692_v62  ;;  %6931 = vmatmul.f32.vlgmr.msra.gmra.mxu3 %v6854_v37  ;;  %v7056_v62 = vsub.f32 %v7054_v46, %v7055_v1 }
0x174b   :  { %7028 = vmatpush.msrb.mxu2 %v7027_v20 }
0x174c   :  { %6955 = vmatmul.f32.vlgmr.msrb.gmra.mxu0 %v6852_v34  ;;  %v7057_v37 = vand.u32 4294901760, %v7056_v62 }
0x174e   :  { %6977 = vmatmul.f32.vlgmr.msrb.gmra.mxu1 %v6852_v34  ;;  %7058 = vmatpush.msrb.mxu3 %v7057_v37 }
0x1750   :  { %7152 = vmatpush.msra.mxu3 %v7027_v20  ;;  %v7167_v20 = vpop.permute.xlu1 %7166 }
0x1752   :  { %6907 = vmatmul.f32.vlgmr.msra.gmra.mxu2 %v6853_v16 }
0x1753   :  { %7130 = vmatpush.msra.mxu2 %v7055_v1 }
0x17b9   :  { %v11781_v42 = vpop.f32.mrf.mxu0 }
0x17ba   :  { %12821 = vst [vmem:[#allocation116_spill] sm:$0xff] %v11781_v42 }
0x17bb   :  { %v11787_v30 = vpop.f32.mrf.mxu1 }
0x17bc   :  { %12824 = vst [vmem:[#allocation119_spill] sm:$0xff] %v11787_v30 }
0x17bd   :  { %v11783_v19 = vpop.f32.mrf.mxu3 }
0x17be   :  { %12822 = vst [vmem:[#allocation117_spill] sm:$0xff] %v11783_v19 }
0x17c1   :  { %v6858_v16 = vpop.f32.mrf.mxu0 }
0x17c2   :  { %v6859_v24 = vadd.f32 %v6858_v16, %v11677_v38 }
0x17c3   :  { %v6884_v0 = vpop.f32.mrf.mxu1 }
0x17c4   :  { %v6885_v29 = vadd.f32 %v6884_v0, %v6859_v24  ;;  %v7165_v0 = vpop.permute.xlu1 %7164 }
0x17c5   :  { %v11785_v22 = vpop.f32.mrf.mxu2  ;;  %v11791_v26 = vpop.f32.mrf.mxu3 }
0x17c6   :  { %12823 = vst [vmem:[#allocation118_spill] sm:$0xff] %v11785_v22 }
0x17c7   :  { %12826 = vst [vmem:[#allocation121_spill] sm:$0xff] %v11791_v26 }
0x17c9   :  { %v6956_v22 = vpop.f32.mrf.mxu0 }
0x17cb   :  { %v6978_v46 = vpop.f32.mrf.mxu1 }
0x17cd   :  { %v11789_v34 = vpop.f32.mrf.mxu2  ;;  %v6932_v42 = vpop.f32.mrf.mxu3 }
0x17ce   :  { %12825 = vst [vmem:[#allocation120_spill] sm:$0xff] %v11789_v34 }
0x17d5   :  { %v6908_v18 = vpop.f32.mrf.mxu2 }
0x17d6   :  { %v6909_v40 = vadd.f32 %v6908_v18, %v6885_v29 }
0x17d8   :  { %v6933_v19 = vadd.f32 %v6932_v42, %v6909_v40  ;;  %v7170_v42 = vsel %vm85_vm0, %v7167_v20, 0  ;;  %v7168_v40 = vsel %vm85_vm0, %v7165_v0, 0 }
0x17d9   :  { %v7187_v16 = vand.u32 4294901760, %v7170_v42 }
0x17da   :  { %v6957_v30 = vadd.f32 %v6956_v22, %v6933_v19 }
0x17db   :  { %v7214_v19 = vsub.f32 %v7170_v42, %v7187_v16  ;;  %7188 = vmatpush.xpose.msrb.mxu0 %v7187_v16 }
0x17dc   :  { %v6979_v1 = vadd.f32 %v6978_v46, %v6957_v30 }
0x17dd   :  { %v7215_v22 = vand.u32 4294901760, %v7214_v19 }
0x17de   :  { %v6981_v62 = vmul.f32 0.5, %v6979_v1  ;;  %v7189_v1 = vand.u32 4294901760, %v7168_v40 }
0x17df   :  { %v7216_v30 = vsub.f32 %v7214_v19, %v7215_v22 }
0x17e0   :  { %v6982_v37 = vsel %vm239_vm1, %v6981_v62, -inf }
0x17e1   :  { %6983 = vmax.xlane.f32.xlu2 %v6982_v37  ;;  %v7217_v24 = vand.u32 4294901760, %v7216_v30  ;;  %v7190_v37 = vsub.f32 %v7168_v40, %v7189_v1 }
0x17e3   :  { %7218 = vmatpush.xpose.msrb.mxu1 %v7217_v24  ;;  %v7191_v26 = vand.u32 4294901760, %v7190_v37 }
0x17e5   :  { %v7192_v30 = vsub.f32 %v7190_v37, %v7191_v26 }
0x17e7   :  { %v7193_v0 = vand.u32 4294901760, %v7192_v30 }
0x17f9   :  { %7501 = vrot.lane.b32.xlu2 %v11655_v32, %s11183_s12 }
0x1801   :  { %7680 = vrot.lane.b32.xlu2 %v11685_v45, %s11183_s12 }
0x1809   :  { %7840 = vrot.lane.b32.xlu2 %v11651_v14, %s11184_s13 }
0x1854   :  { %v6984_v29 = vpop.xlane.xlu2 %6983 }
0x1855   :  { %v6985_v18 = vsub.f32 %v6981_v62, %v6984_v29 }
0x1857   :  { %v6986_v46 = vmul.f32 1.442695, %v6985_v18  ;;  %v7344_v18 = vpop.permute.xlu1 %7343 }
0x1858   :  { %v7364_v40 = vand.u32 4294901760, %v7344_v18 }
0x1859   :  { %10952 = vpow2.f32 %v6986_v46 }
0x185f   :  { %v11803_v14 = vpop.eup %10952 }
0x1860   :  { %v7010_v20 = vsel %vm239_vm1, %v11803_v14, 0 }
0x1861   :  { %v7029_v42 = vand.u32 4294901760, %v7010_v20 }
0x1863   :  { %v7030_v34 = vsub.f32 %v7010_v20, %v7029_v42  ;;  %7060 = vmatmul.f32.vlgmr.msrb.gmra.mxu3 %v7029_v42 }
0x1864   :  { %7264 = vmatpush.xpose.msrb.mxu3 %v7187_v16 }
0x1865   :  { %7084 = vmatmul.f32.vlgmr.msra.gmra.mxu0 %v7030_v34  ;;  %v7031_v24 = vand.u32 4294901760, %v7030_v34 }
0x1866   :  { %7290 = vmatpush.xpose.msra.mxu0 %v7215_v22  ;;  %v7391_v22 = vsub.f32 %v7344_v18, %v7364_v40 }
0x1867   :  { %7108 = vmatmul.f32.vlgmr.msra.gmra.mxu1 %v7031_v24  ;;  %v7032_v62 = vsub.f32 %v7030_v34, %v7031_v24 }
0x1868   :  { %7312 = vmatpush.xpose.msra.mxu1 %v7187_v16  ;;  %v7392_v20 = vand.u32 4294901760, %v7391_v22 }
0x1869   :  { %v7033_v29 = vand.u32 4294901760, %v7032_v62 }
0x186b   :  { %7034 = vmatmul.f32.vlgmr.msrb.gmra.mxu2 %v7033_v29  ;;  %7154 = vmatmul.f32.vlgmr.msra.gmra.mxu3 %v7029_v42 }
0x186c   :  { %7241 = vmatpush.xpose.msrb.mxu2 %v7214_v19 }
0x186d   :  { %7194 = vmatmul.f32.vlgmr.msrb.gmra.mxu0 %v7193_v0 }
0x186e   :  { %7418 = vmatpush.msrb.mxu0 %v7391_v22 }
0x186f   :  { %7220 = vmatmul.f32.vlgmr.msrb.gmra.mxu1 %v7189_v1 }
0x1870   :  { %7441 = vmatpush.msrb.mxu1 %v7364_v40 }
0x1873   :  { %7132 = vmatmul.f32.vlgmr.msra.gmra.mxu2 %v7029_v42  ;;  %7268 = vmatmul.f32.vlgmr.msrb.gmra.mxu3 %v7191_v26  ;;  %v7393_v42 = vsub.f32 %v7391_v22, %v7392_v20 }
0x1874   :  { %7365 = vmatpush.msra.mxu2 %v7364_v40 }
0x1875   :  { %7292 = vmatmul.f32.vlgmr.msra.gmra.mxu0 %v7189_v1  ;;  %v7394_v26 = vand.u32 4294901760, %v7393_v42 }
0x1877   :  { %7314 = vmatmul.f32.vlgmr.msra.gmra.mxu1 %v7189_v1  ;;  %7395 = vmatpush.msra.mxu3 %v7394_v26 }
0x1879   :  { %7489 = vmatpush.msrb.mxu3 %v7364_v40  ;;  %v7504_v40 = vpop.permute.xlu1 %7503 }
0x187b   :  { %7244 = vmatmul.f32.vlgmr.msrb.gmra.mxu2 %v7190_v37 }
0x187c   :  { %7467 = vmatpush.msrb.mxu2 %v7392_v20 }
0x18e2   :  { %v11807_v46 = vpop.f32.mrf.mxu0 }
0x18e3   :  { %12827 = vst [vmem:[#allocation122_spill] sm:$0xff] %v11807_v46 }
0x18e4   :  { %v11813_v19 = vpop.f32.mrf.mxu1 }
0x18e5   :  { %12830 = vst [vmem:[#allocation125_spill] sm:$0xff] %v11813_v19 }
0x18e6   :  { %v11809_v34 = vpop.f32.mrf.mxu3 }
0x18e7   :  { %12828 = vst [vmem:[#allocation123_spill] sm:$0xff] %v11809_v34 }
0x18ea   :  { %v7195_v37 = vpop.f32.mrf.mxu0 }
0x18eb   :  { %v7196_v24 = vadd.f32 %v7195_v37, %v11677_v38  ;;  %v7507_v37 = vsel %vm85_vm0, %v7504_v40, 0 }
0x18ec   :  { %v7221_v62 = vpop.f32.mrf.mxu1 }
0x18ed   :  { %v7222_v0 = vadd.f32 %v7221_v62, %v7196_v24 }
0x18ee   :  { %v11811_v16 = vpop.f32.mrf.mxu2  ;;  %v11817_v30 = vpop.f32.mrf.mxu3 }
0x18ef   :  { %12829 = vst [vmem:[#allocation124_spill] sm:$0xff] %v11811_v16 }
0x18f0   :  { %12832 = vst [vmem:[#allocation127_spill] sm:$0xff] %v11817_v30  ;;  %v7524_v30 = vand.u32 4294901760, %v7507_v37 }
0x18f2   :  { %v7293_v16 = vpop.f32.mrf.mxu0  ;;  %v7551_v24 = vsub.f32 %v7507_v37, %v7524_v30  ;;  %7525 = vmatpush.xpose.msra.mxu0 %v7524_v30 }
0x18f4   :  { %v7315_v22 = vpop.f32.mrf.mxu1  ;;  %v7552_v62 = vand.u32 4294901760, %v7551_v24 }
0x18f6   :  { %v11815_v1 = vpop.f32.mrf.mxu2  ;;  %v7269_v46 = vpop.f32.mrf.mxu3 }
0x18f7   :  { %12831 = vst [vmem:[#allocation126_spill] sm:$0xff] %v11815_v1 }
0x18fe   :  { %v7245_v29 = vpop.f32.mrf.mxu2 }
0x18ff   :  { %v7246_v18 = vadd.f32 %v7245_v29, %v7222_v0  ;;  %v7553_v0 = vsub.f32 %v7551_v24, %v7552_v62 }
0x1901   :  { %v7270_v34 = vadd.f32 %v7269_v46, %v7246_v18  ;;  %v7554_v46 = vand.u32 4294901760, %v7553_v0 }
0x1903   :  { %v7294_v19 = vadd.f32 %v7293_v16, %v7270_v34  ;;  %7555 = vmatpush.xpose.msra.mxu1 %v7554_v46  ;;  %v7502_v34 = vpop.permute.xlu2 %7501 }
0x1904   :  { %v7505_v29 = vsel %vm85_vm0, %v7502_v34, 0 }
0x1905   :  { %v7316_v20 = vadd.f32 %v7315_v22, %v7294_v19  ;;  %v7526_v22 = vand.u32 4294901760, %v7505_v29 }
0x1907   :  { %v7318_v42 = vmul.f32 0.5, %v7316_v20  ;;  %v7527_v20 = vsub.f32 %v7505_v29, %v7526_v22 }
0x1909   :  { %v7319_v26 = vsel %vm239_vm1, %v7318_v42, -inf  ;;  %v7528_v37 = vand.u32 4294901760, %v7527_v20 }
0x190a   :  { %7320 = vmax.xlane.f32.xlu0 %v7319_v26 }
0x190b   :  { %v7529_v0 = vsub.f32 %v7527_v20, %v7528_v37 }
0x190d   :  { %v7530_v34 = vand.u32 4294901760, %v7529_v0 }
0x191e   :  { %7838 = vrot.lane.b32.xlu0 %v11655_v32, %s11184_s13 }
0x197d   :  { %v7321_v16 = vpop.xlane.xlu0 %7320 }
0x197e   :  { %v7322_v19 = vsub.f32 %v7318_v42, %v7321_v16 }
0x1980   :  { %v7323_v18 = vmul.f32 1.442695, %v7322_v19  ;;  %v7681_v19 = vpop.permute.xlu2 %7680 }
0x1981   :  { %v7701_v29 = vand.u32 4294901760, %v7681_v19 }
0x1982   :  { %10954 = vpow2.f32 %v7323_v18 }
0x1988   :  { %v11825_v32 = vpop.eup %10954 }
0x1989   :  { %12833 = vst [vmem:[#allocation128_spill] sm:$0xff] %v11825_v32  ;;  %v7347_v26 = vsel %vm239_vm1, %v11825_v32, 0 }
0x198a   :  { %v7366_v40 = vand.u32 4294901760, %v7347_v26 }
0x198c   :  { %v7367_v1 = vsub.f32 %v7347_v26, %v7366_v40  ;;  %7397 = vmatmul.f32.vlgmr.msra.gmra.mxu3 %v7366_v40 }
0x198d   :  { %7601 = vmatpush.xpose.msra.mxu3 %v7524_v30 }
0x198e   :  { %7421 = vmatmul.f32.vlgmr.msrb.gmra.mxu0 %v7367_v1  ;;  %v7368_v46 = vand.u32 4294901760, %v7367_v1 }
0x198f   :  { %7627 = vmatpush.xpose.msrb.mxu0 %v7552_v62  ;;  %v7728_v62 = vsub.f32 %v7681_v19, %v7701_v29 }
0x1990   :  { %7445 = vmatmul.f32.vlgmr.msrb.gmra.mxu1 %v7368_v46  ;;  %v7369_v42 = vsub.f32 %v7367_v1, %v7368_v46 }
0x1991   :  { %7649 = vmatpush.xpose.msrb.mxu1 %v7524_v30  ;;  %v7729_v26 = vand.u32 4294901760, %v7728_v62 }
0x1992   :  { %v7370_v16 = vand.u32 4294901760, %v7369_v42 }
0x1994   :  { %7371 = vmatmul.f32.vlgmr.msra.gmra.mxu2 %v7370_v16  ;;  %7491 = vmatmul.f32.vlgmr.msrb.gmra.mxu3 %v7366_v40 }
0x1995   :  { %7578 = vmatpush.xpose.msra.mxu2 %v7551_v24 }
0x1996   :  { %7531 = vmatmul.f32.vlgmr.msra.gmra.mxu0 %v7530_v34 }
0x1997   :  { %7755 = vmatpush.msra.mxu0 %v7728_v62 }
0x1998   :  { %7557 = vmatmul.f32.vlgmr.msra.gmra.mxu1 %v7526_v22 }
0x1999   :  { %7778 = vmatpush.msra.mxu1 %v7701_v29 }
0x199c   :  { %7469 = vmatmul.f32.vlgmr.msrb.gmra.mxu2 %v7366_v40  ;;  %7605 = vmatmul.f32.vlgmr.msra.gmra.mxu3 %v7528_v37  ;;  %v7730_v40 = vsub.f32 %v7728_v62, %v7729_v26 }
0x199d   :  { %7702 = vmatpush.msrb.mxu2 %v7701_v29 }
0x199e   :  { %7629 = vmatmul.f32.vlgmr.msrb.gmra.mxu0 %v7526_v22  ;;  %v7731_v37 = vand.u32 4294901760, %v7730_v40 }
0x19a0   :  { %7651 = vmatmul.f32.vlgmr.msrb.gmra.mxu1 %v7526_v22  ;;  %7732 = vmatpush.msrb.mxu3 %v7731_v37 }
0x19a2   :  { %7826 = vmatpush.msra.mxu3 %v7701_v29  ;;  %v7841_v29 = vpop.permute.xlu2 %7840 }
0x19a4   :  { %7581 = vmatmul.f32.vlgmr.msra.gmra.mxu2 %v7527_v20 }
0x19a5   :  { %7804 = vmatpush.msra.mxu2 %v7729_v26 }
0x1a0b   :  { %v11829_v18 = vpop.f32.mrf.mxu0 }
0x1a0c   :  { %12834 = vst [vmem:[#allocation129_spill] sm:$0xff] %v11829_v18 }
0x1a0d   :  { %v11835_v24 = vpop.f32.mrf.mxu1 }
0x1a0e   :  { %12837 = vst [vmem:[#allocation132_spill] sm:$0xff] %v11835_v24 }
0x1a0f   :  { %v11831_v1 = vpop.f32.mrf.mxu3 }
0x1a10   :  { %12835 = vst [vmem:[#allocation130_spill] sm:$0xff] %v11831_v1 }
0x1a13   :  { %v7532_v20 = vpop.f32.mrf.mxu0 }
0x1a14   :  { %v7533_v46 = vadd.f32 %v7532_v20, %v11677_v38  ;;  %v7844_v38 = vsel %vm85_vm0, %v7841_v29, 0 }
0x1a15   :  { %v7558_v42 = vpop.f32.mrf.mxu1  ;;  %v7861_v20 = vand.u32 4294901760, %v7844_v38 }
0x1a16   :  { %v7559_v34 = vadd.f32 %v7558_v42, %v7533_v46 }
0x1a17   :  { %v11833_v30 = vpop.f32.mrf.mxu2  ;;  %v11839_v0 = vpop.f32.mrf.mxu3  ;;  %v7888_v46 = vsub.f32 %v7844_v38, %v7861_v20  ;;  %7862 = vmatpush.xpose.msrb.mxu0 %v7861_v20 }
0x1a18   :  { %12836 = vst [vmem:[#allocation131_spill] sm:$0xff] %v11833_v30 }
0x1a19   :  { %12839 = vst [vmem:[#allocation134_spill] sm:$0xff] %v11839_v0  ;;  %v7889_v42 = vand.u32 4294901760, %v7888_v46 }
0x1a1b   :  { %v7630_v30 = vpop.f32.mrf.mxu0 }
0x1a1d   :  { %v7652_v62 = vpop.f32.mrf.mxu1 }
0x1a1f   :  { %v11837_v22 = vpop.f32.mrf.mxu2  ;;  %v7606_v18 = vpop.f32.mrf.mxu3 }
0x1a20   :  { %12838 = vst [vmem:[#allocation133_spill] sm:$0xff] %v11837_v22 }
0x1a27   :  { %v7582_v16 = vpop.f32.mrf.mxu2 }
0x1a28   :  { %v7583_v19 = vadd.f32 %v7582_v16, %v7559_v34  ;;  %v7890_v34 = vsub.f32 %v7888_v46, %v7889_v42 }
0x1a2a   :  { %v7607_v1 = vadd.f32 %v7606_v18, %v7583_v19  ;;  %v7891_v18 = vand.u32 4294901760, %v7890_v34 }
0x1a2c   :  { %v7631_v24 = vadd.f32 %v7630_v30, %v7607_v1  ;;  %7892 = vmatpush.xpose.msrb.mxu1 %v7891_v18  ;;  %v7839_v1 = vpop.permute.xlu0 %7838 }
0x1a2d   :  { %v7842_v16 = vsel %vm85_vm0, %v7839_v1, 0 }
0x1a2e   :  { %v7653_v26 = vadd.f32 %v7652_v62, %v7631_v24  ;;  %v7863_v62 = vand.u32 4294901760, %v7842_v16 }
0x1a30   :  { %v7655_v40 = vmul.f32 0.5, %v7653_v26  ;;  %v7864_v26 = vsub.f32 %v7842_v16, %v7863_v62 }
0x1a32   :  { %v7656_v37 = vsel %vm239_vm1, %v7655_v40, -inf  ;;  %v7865_v38 = vand.u32 4294901760, %v7864_v26 }
0x1a33   :  { %7657 = vmax.xlane.f32.xlu1 %v7656_v37 }
0x1a34   :  { %v7866_v34 = vsub.f32 %v7864_v26, %v7865_v38 }
0x1a36   :  { %v7867_v1 = vand.u32 4294901760, %v7866_v34 }
0x1a4c   :  { %8017 = vrot.lane.b32.xlu1 %v11685_v45, %s11184_s13 }
0x1aa6   :  { %v7658_v30 = vpop.xlane.xlu1 %7657 }
0x1aa7   :  { %v7659_v24 = vsub.f32 %v7655_v40, %v7658_v30 }
0x1aa9   :  { %v7660_v19 = vmul.f32 1.442695, %v7659_v24 }
0x1aab   :  { %10956 = vpow2.f32 %v7660_v19 }
0x1ab1   :  { %v11847_v45 = vpop.eup %10956 }
0x1ab2   :  { %v7684_v37 = vsel %vm239_vm1, %v11847_v45, 0 }
0x1ab3   :  { %v7703_v29 = vand.u32 4294901760, %v7684_v37 }
0x1ab5   :  { %v7704_v0 = vsub.f32 %v7684_v37, %v7703_v29  ;;  %7734 = vmatmul.f32.vlgmr.msrb.gmra.mxu3 %v7703_v29 }
0x1ab6   :  { %7938 = vmatpush.xpose.msrb.mxu3 %v7861_v20 }
0x1ab7   :  { %7758 = vmatmul.f32.vlgmr.msra.gmra.mxu0 %v7704_v0  ;;  %v7705_v18 = vand.u32 4294901760, %v7704_v0 }
0x1ab8   :  { %7964 = vmatpush.xpose.msra.mxu0 %v7889_v42 }
0x1ab9   :  { %7782 = vmatmul.f32.vlgmr.msra.gmra.mxu1 %v7705_v18  ;;  %v7706_v40 = vsub.f32 %v7704_v0, %v7705_v18  ;;  %v11042_v18 = vld [vmem:[#allocation8] sm:$0xff] }
0x1aba   :  { %7986 = vmatpush.xpose.msra.mxu1 %v7861_v20 }
0x1abb   :  { %v7707_v30 = vand.u32 4294901760, %v7706_v40 }
0x1abd   :  { %7708 = vmatmul.f32.vlgmr.msrb.gmra.mxu2 %v7707_v30  ;;  %7828 = vmatmul.f32.vlgmr.msra.gmra.mxu3 %v7703_v29 }
0x1abe   :  { %7915 = vmatpush.xpose.msrb.mxu2 %v7888_v46  ;;  %v8018_v24 = vpop.permute.xlu1 %8017 }
0x1abf   :  { %7868 = vmatmul.f32.vlgmr.msrb.gmra.mxu0 %v7867_v1  ;;  %v8038_v16 = vand.u32 4294901760, %v8018_v24 }
0x1ac1   :  { %7894 = vmatmul.f32.vlgmr.msrb.gmra.mxu1 %v7863_v62  ;;  %v8065_v42 = vsub.f32 %v8018_v24, %v8038_v16 }
0x1ac2   :  { %8115 = vmatpush.msrb.mxu1 %v8038_v16 }
0x1ac3   :  { %v8066_v37 = vand.u32 4294901760, %v8065_v42  ;;  %8092 = vmatpush.msrb.mxu0 %v8065_v42 }
0x1ac5   :  { %7806 = vmatmul.f32.vlgmr.msra.gmra.mxu2 %v7703_v29  ;;  %7942 = vmatmul.f32.vlgmr.msrb.gmra.mxu3 %v7865_v38  ;;  %v8067_v29 = vsub.f32 %v8065_v42, %v8066_v37 }
0x1ac6   :  { %8039 = vmatpush.msra.mxu2 %v8038_v16 }
0x1ac7   :  { %7966 = vmatmul.f32.vlgmr.msra.gmra.mxu0 %v7863_v62  ;;  %v8068_v38 = vand.u32 4294901760, %v8067_v29 }
0x1ac9   :  { %7988 = vmatmul.f32.vlgmr.msra.gmra.mxu1 %v7863_v62  ;;  %8069 = vmatpush.msra.mxu3 %v8068_v38 }
0x1acb   :  { %8163 = vmatpush.msrb.mxu3 %v8038_v16  ;;  %v11864_v16 = vld [vmem:[#allocation5 + $0x18] sm:$0xff] }
0x1acc   :  { %8513 = vrot.lane.b32.xlu1 %v11864_v16, %s11178_s3 }
0x1acd   :  { %7918 = vmatmul.f32.vlgmr.msrb.gmra.mxu2 %v7864_v26 }
0x1ace   :  { %8141 = vmatpush.msrb.mxu2 %v8066_v37 }
0x1b34   :  { %v11851_v19 = vpop.f32.mrf.mxu0 }
0x1b35   :  { %12840 = vst [vmem:[#allocation135_spill] sm:$0xff] %v11851_v19 }
0x1b36   :  { %v11857_v46 = vpop.f32.mrf.mxu1 }
0x1b37   :  { %12843 = vst [vmem:[#allocation138_spill] sm:$0xff] %v11857_v46 }
0x1b38   :  { %v11853_v0 = vpop.f32.mrf.mxu3 }
0x1b39   :  { %12841 = vst [vmem:[#allocation136_spill] sm:$0xff] %v11853_v0 }
0x1b3c   :  { %v7869_v26 = vpop.f32.mrf.mxu0 }
0x1b3d   :  { %v7870_v40 = vadd.f32 %v11042_v18, %v7869_v26  ;;  %v11868_v26 = vld [vmem:[#allocation2 + $0x18] sm:$0xff] }
0x1b3e   :  { %v7895_v1 = vpop.f32.mrf.mxu1 }
0x1b3f   :  { %v7896_v30 = vadd.f32 %v7895_v1, %v7870_v40 }
0x1b40   :  { %v11855_v20 = vpop.f32.mrf.mxu2  ;;  %v11861_v34 = vpop.f32.mrf.mxu3 }
0x1b41   :  { %12842 = vst [vmem:[#allocation137_spill] sm:$0xff] %v11855_v20 }
0x1b42   :  { %12845 = vst [vmem:[#allocation140_spill] sm:$0xff] %v11861_v34  ;;  %v8186_v34 = vsel %vm85_vm0, %v11864_v16, 0 }
0x1b43   :  { %v8203_v18 = vand.u32 4294901760, %v8186_v34 }
0x1b44   :  { %v7967_v20 = vpop.f32.mrf.mxu0 }
0x1b45   :  { %8204 = vmatpush.xpose.msra.mxu0 %v8203_v18 }
0x1b46   :  { %v7989_v42 = vpop.f32.mrf.mxu1 }
0x1b48   :  { %v11859_v62 = vpop.f32.mrf.mxu2  ;;  %v7943_v19 = vpop.f32.mrf.mxu3 }
0x1b49   :  { %12844 = vst [vmem:[#allocation139_spill] sm:$0xff] %v11859_v62 }
0x1b50   :  { %v7919_v24 = vpop.f32.mrf.mxu2 }
0x1b51   :  { %v7920_v22 = vadd.f32 %v7919_v24, %v7896_v30 }
0x1b53   :  { %v7944_v0 = vadd.f32 %v7943_v19, %v7920_v22 }
0x1b55   :  { %v7968_v46 = vadd.f32 %v7967_v20, %v7944_v0  ;;  %v8230_v0 = vsub.f32 %v8186_v34, %v8203_v18  ;;  %v8183_v20 = vsel %vm85_vm0, %v11868_v26, 0 }
0x1b56   :  { %v8205_v30 = vand.u32 4294901760, %v8183_v20 }
0x1b57   :  { %v7990_v37 = vadd.f32 %v7989_v42, %v7968_v46  ;;  %v8231_v40 = vand.u32 4294901760, %v8230_v0 }
0x1b58   :  { %v8206_v42 = vsub.f32 %v8183_v20, %v8205_v30 }
0x1b59   :  { %v7992_v29 = vmul.f32 0.5, %v7990_v37  ;;  %v8232_v1 = vsub.f32 %v8230_v0, %v8231_v40 }
0x1b5b   :  { %v7993_v38 = vsel %vm239_vm1, %v7992_v29, -inf  ;;  %v8233_v24 = vand.u32 4294901760, %v8232_v1 }
0x1b5c   :  { %7994 = vmax.xlane.f32.xlu2 %v7993_v38  ;;  %v8207_v38 = vand.u32 4294901760, %v8206_v42 }
0x1b5d   :  { %8234 = vmatpush.xpose.msra.mxu1 %v8233_v24 }
0x1b74   :  { %8511 = vrot.lane.b32.xlu2 %v11868_v26, %s11178_s3 }
0x1b7c   :  { %8851 = vrot.lane.b32.xlu2 %v11864_v16, %s11179_s8 }
0x1b84   :  { %8849 = vrot.lane.b32.xlu2 %v11868_v26, %s11179_s8 }
0x1b8c   :  { %9028 = vrot.lane.b32.xlu2 %v11900_v7, %s11179_s8 }
0x1b94   :  { %9186 = vrot.lane.b32.xlu2 %v11868_v26, %s11180_s9 }
0x1bcf   :  { %v7995_v22 = vpop.xlane.xlu2 %7994 }
0x1bd0   :  { %v7996_v19 = vsub.f32 %v7992_v29, %v7995_v22 }
0x1bd2   :  { %v7997_v46 = vmul.f32 1.442695, %v7996_v19 }
0x1bd4   :  { %10958 = vpow2.f32 %v7997_v46  ;;  %v8208_v46 = vsub.f32 %v8206_v42, %v8207_v38 }
0x1bd6   :  { %v8209_v24 = vand.u32 4294901760, %v8208_v46 }
0x1bda   :  { %v11878_v37 = vpop.eup %10958 }
0x1bdb   :  { %12846 = vst [vmem:[#allocation141_spill] sm:$0xff] %v11878_v37  ;;  %v8021_v34 = vsel %vm239_vm1, %v11878_v37, 0 }
0x1bdc   :  { %v8040_v29 = vand.u32 4294901760, %v8021_v34 }
0x1bde   :  { %v8041_v22 = vsub.f32 %v8021_v34, %v8040_v29  ;;  %8071 = vmatmul.f32.vlgmr.msra.gmra.mxu3 %v8040_v29 }
0x1bdf   :  { %8280 = vmatpush.xpose.msra.mxu3 %v8203_v18 }
0x1be0   :  { %8095 = vmatmul.f32.vlgmr.msrb.gmra.mxu0 %v8041_v22  ;;  %v8042_v19 = vand.u32 4294901760, %v8041_v22 }
0x1be1   :  { %8306 = vmatpush.xpose.msrb.mxu0 %v8231_v40 }
0x1be2   :  { %8119 = vmatmul.f32.vlgmr.msrb.gmra.mxu1 %v8042_v19  ;;  %v8043_v1 = vsub.f32 %v8041_v22, %v8042_v19 }
0x1be3   :  { %8328 = vmatpush.xpose.msrb.mxu1 %v8203_v18  ;;  %v11892_v18 = vld [vmem:[#allocation8 + $0x8] sm:$0xff] }
0x1be4   :  { %v8044_v20 = vand.u32 4294901760, %v8043_v1 }
0x1be6   :  { %8045 = vmatmul.f32.vlgmr.msra.gmra.mxu2 %v8044_v20  ;;  %8165 = vmatmul.f32.vlgmr.msrb.gmra.mxu3 %v8040_v29 }
0x1be7   :  { %8257 = vmatpush.xpose.msra.mxu2 %v8230_v0 }
0x1be8   :  { %8210 = vmatmul.f32.vlgmr.msra.gmra.mxu0 %v8209_v24 }
0x1bea   :  { %8236 = vmatmul.f32.vlgmr.msra.gmra.mxu1 %v8205_v30 }
0x1bee   :  { %8143 = vmatmul.f32.vlgmr.msrb.gmra.mxu2 %v8040_v29  ;;  %8284 = vmatmul.f32.vlgmr.msra.gmra.mxu3 %v8207_v38 }
0x1bf0   :  { %8308 = vmatmul.f32.vlgmr.msrb.gmra.mxu0 %v8205_v30 }
0x1bf2   :  { %8330 = vmatmul.f32.vlgmr.msrb.gmra.mxu1 %v8205_v30 }
0x1bf6   :  { %8260 = vmatmul.f32.vlgmr.msra.gmra.mxu2 %v8206_v42 }
0x1c5d   :  { %v11884_v34 = vpop.f32.mrf.mxu0 }
0x1c5e   :  { %12847 = vst [vmem:[#allocation142_spill] sm:$0xff] %v11884_v34 }
0x1c5f   :  { %v11890_v22 = vpop.f32.mrf.mxu1 }
0x1c60   :  { %12850 = vst [vmem:[#allocation145_spill] sm:$0xff] %v11890_v22 }
0x1c61   :  { %v11886_v62 = vpop.f32.mrf.mxu3 }
0x1c62   :  { %12848 = vst [vmem:[#allocation143_spill] sm:$0xff] %v11886_v62 }
0x1c65   :  { %v8211_v19 = vpop.f32.mrf.mxu0 }
0x1c66   :  { %v8212_v29 = vadd.f32 %v8211_v19, %v11892_v18 }
0x1c67   :  { %v8237_v38 = vpop.f32.mrf.mxu1 }
0x1c68   :  { %v8238_v30 = vadd.f32 %v8237_v38, %v8212_v29 }
0x1c69   :  { %v11888_v40 = vpop.f32.mrf.mxu2  ;;  %v11894_v46 = vpop.f32.mrf.mxu3 }
0x1c6a   :  { %12849 = vst [vmem:[#allocation144_spill] sm:$0xff] %v11888_v40 }
0x1c6b   :  { %12851 = vst [vmem:[#allocation146_spill] sm:$0xff] %v11894_v46  ;;  %v8377_v46 = vand.u32 4294901760, %v11900_v7 }
0x1c6d   :  { %v8309_v24 = vpop.f32.mrf.mxu0  ;;  %v8404_v19 = vsub.f32 %v11900_v7, %v8377_v46  ;;  %8378 = vmatpush.msrb.mxu2 %v8377_v46  ;;  %8454 = vmatpush.msra.mxu1 %v8377_v46 }
0x1c6f   :  { %v8331_v62 = vpop.f32.mrf.mxu1  ;;  %8431 = vmatpush.msra.mxu0 %v8404_v19 }
0x1c71   :  { %v11896_v0 = vpop.f32.mrf.mxu2  ;;  %v8285_v1 = vpop.f32.mrf.mxu3 }
0x1c72   :  { %12852 = vst [vmem:[#allocation147_spill] sm:$0xff] %v11896_v0 }
0x1c79   :  { %v8261_v42 = vpop.f32.mrf.mxu2 }
0x1c7a   :  { %v8262_v20 = vadd.f32 %v8261_v42, %v8238_v30 }
0x1c7c   :  { %v8286_v34 = vadd.f32 %v8285_v1, %v8262_v20  ;;  %v8512_v20 = vpop.permute.xlu2 %8511 }
0x1c7e   :  { %v8310_v40 = vadd.f32 %v8309_v24, %v8286_v34  ;;  %v8405_v34 = vand.u32 4294901760, %v8404_v19 }
0x1c80   :  { %v8332_v32 = vadd.f32 %v8331_v62, %v8310_v40  ;;  %8480 = vmatpush.msra.mxu2 %v8405_v34  ;;  %v8514_v62 = vpop.permute.xlu1 %8513 }
0x1c81   :  { %v8517_v40 = vsel %vm85_vm0, %v8514_v62, 0 }
0x1c82   :  { %v8334_v22 = vmul.f32 0.5, %v8332_v32  ;;  %v8406_v32 = vsub.f32 %v8404_v19, %v8405_v34  ;;  %v8534_v29 = vand.u32 4294901760, %v8517_v40  ;;  %v8515_v34 = vsel %vm85_vm0, %v8512_v20, 0 }
0x1c83   :  { %v8536_v0 = vand.u32 4294901760, %v8515_v34 }
0x1c84   :  { %v8335_v25 = vsel %vm239_vm1, %v8334_v22, -inf  ;;  %v8561_v38 = vsub.f32 %v8517_v40, %v8534_v29  ;;  %8535 = vmatpush.xpose.msrb.mxu0 %v8534_v29 }
0x1c85   :  { %8336 = vmax.xlane.f32.xlu0 %v8335_v25  ;;  %v8407_v25 = vand.u32 4294901760, %v8406_v32  ;;  %v8537_v33 = vsub.f32 %v8515_v34, %v8536_v0 }
0x1c86   :  { %v8562_v30 = vand.u32 4294901760, %v8561_v38 }
0x1c87   :  { %8408 = vmatpush.msrb.mxu3 %v8407_v25  ;;  %v8538_v25 = vand.u32 4294901760, %v8537_v33 }
0x1c88   :  { %v8563_v42 = vsub.f32 %v8561_v38, %v8562_v30 }
0x1c89   :  { %8502 = vmatpush.msra.mxu3 %v8377_v46 }
0x1c8a   :  { %v8564_v1 = vand.u32 4294901760, %v8563_v42  ;;  %v8539_v42 = vsub.f32 %v8537_v33, %v8538_v25 }
0x1c8c   :  { %8565 = vmatpush.xpose.msrb.mxu1 %v8564_v1  ;;  %v8540_v20 = vand.u32 4294901760, %v8539_v42 }
0x1c99   :  { %8691 = vrot.lane.b32.xlu0 %v11900_v7, %s11178_s3 }
0x1cf8   :  { %v8337_v24 = vpop.xlane.xlu0 %8336 }
0x1cf9   :  { %v8338_v19 = vsub.f32 %v8334_v22, %v8337_v24 }
0x1cfb   :  { %v8339_v32 = vmul.f32 1.442695, %v8338_v19 }
0x1cfd   :  { %10960 = vpow2.f32 %v8339_v32 }
0x1d03   :  { %v11912_v37 = vpop.eup %10960 }
0x1d04   :  { %12853 = vst [vmem:[#allocation148_spill] sm:$0xff] %v11912_v37  ;;  %v8360_v46 = vsel %vm239_vm1, %v11912_v37, 0 }
0x1d05   :  { %v8379_v62 = vand.u32 4294901760, %v8360_v46 }
0x1d07   :  { %v8380_v40 = vsub.f32 %v8360_v46, %v8379_v62  ;;  %8410 = vmatmul.f32.vlgmr.msrb.gmra.mxu3 %v8379_v62 }
0x1d08   :  { %8611 = vmatpush.xpose.msrb.mxu3 %v8534_v29 }
0x1d09   :  { %8434 = vmatmul.f32.vlgmr.msra.gmra.mxu0 %v8380_v40  ;;  %v8381_v1 = vand.u32 4294901760, %v8380_v40 }
0x1d0a   :  { %8637 = vmatpush.xpose.msra.mxu0 %v8562_v30 }
0x1d0b   :  { %8458 = vmatmul.f32.vlgmr.msra.gmra.mxu1 %v8381_v1  ;;  %v8382_v22 = vsub.f32 %v8380_v40, %v8381_v1  ;;  %v8692_v19 = vpop.permute.xlu0 %8691 }
0x1d0c   :  { %8659 = vmatpush.xpose.msra.mxu1 %v8534_v29  ;;  %v8712_v34 = vand.u32 4294901760, %v8692_v19 }
0x1d0d   :  { %v8383_v24 = vand.u32 4294901760, %v8382_v22 }
0x1d0e   :  { %v8739_v46 = vsub.f32 %v8692_v19, %v8712_v34 }
0x1d0f   :  { %8384 = vmatmul.f32.vlgmr.msrb.gmra.mxu2 %v8383_v24  ;;  %8504 = vmatmul.f32.vlgmr.msra.gmra.mxu3 %v8379_v62 }
0x1d10   :  { %8588 = vmatpush.xpose.msrb.mxu2 %v8561_v38  ;;  %v8740_v42 = vand.u32 4294901760, %v8739_v46 }
0x1d11   :  { %8541 = vmatmul.f32.vlgmr.msrb.gmra.mxu0 %v8540_v20 }
0x1d12   :  { %8766 = vmatpush.msrb.mxu0 %v8739_v46  ;;  %v8741_v22 = vsub.f32 %v8739_v46, %v8740_v42 }
0x1d13   :  { %8567 = vmatmul.f32.vlgmr.msrb.gmra.mxu1 %v8536_v0 }
0x1d14   :  { %8789 = vmatpush.msrb.mxu1 %v8712_v34 }
0x1d17   :  { %8482 = vmatmul.f32.vlgmr.msra.gmra.mxu2 %v8379_v62  ;;  %8615 = vmatmul.f32.vlgmr.msrb.gmra.mxu3 %v8538_v25  ;;  %v8742_v25 = vand.u32 4294901760, %v8741_v22 }
0x1d18   :  { %8713 = vmatpush.msra.mxu2 %v8712_v34 }
0x1d19   :  { %8639 = vmatmul.f32.vlgmr.msra.gmra.mxu0 %v8536_v0  ;;  %8743 = vmatpush.msra.mxu3 %v8742_v25 }
0x1d1b   :  { %8661 = vmatmul.f32.vlgmr.msra.gmra.mxu1 %v8536_v0  ;;  %8837 = vmatpush.msrb.mxu3 %v8712_v34 }
0x1d1f   :  { %8591 = vmatmul.f32.vlgmr.msrb.gmra.mxu2 %v8537_v33 }
0x1d20   :  { %8815 = vmatpush.msrb.mxu2 %v8740_v42 }
0x1d86   :  { %v8435_v32 = vpop.f32.mrf.mxu0 }
0x1d88   :  { %v8459_v1 = vpop.f32.mrf.mxu1 }
0x1d8a   :  { %v8411_v30 = vpop.f32.mrf.mxu3 }
0x1d8e   :  { %v8542_v20 = vpop.f32.mrf.mxu0 }
0x1d8f   :  { %v8543_v19 = vadd.f32 %v8542_v20, %v11892_v18 }
0x1d90   :  { %v8568_v47 = vpop.f32.mrf.mxu1 }
0x1d92   :  { %v8385_v29 = vpop.f32.mrf.mxu2  ;;  %v8505_v24 = vpop.f32.mrf.mxu3 }
0x1d93   :  { %v8412_v40 = vadd.f32 %v8411_v30, %v8385_v29  ;;  %v8569_v30 = vadd.f32 %v8568_v47, %v8543_v19  ;;  %v8852_v47 = vpop.permute.xlu2 %8851 }
0x1d95   :  { %v8436_v38 = vadd.f32 %v8435_v32, %v8412_v40 }
0x1d96   :  { %v8640_v46 = vpop.f32.mrf.mxu0 }
0x1d97   :  { %v8460_v62 = vadd.f32 %v8459_v1, %v8436_v38 }
0x1d98   :  { %v8662_v42 = vpop.f32.mrf.mxu1 }
0x1d9a   :  { %v8483_v0 = vpop.f32.mrf.mxu2  ;;  %v8616_v5 = vpop.f32.mrf.mxu3 }
0x1d9b   :  { %v8484_v33 = vadd.f32 %v8483_v0, %v8460_v62 }
0x1d9d   :  { %v11917_v37 = vadd.f32 %v8505_v24, %v8484_v33  ;;  %v8850_v33 = vpop.permute.xlu2 %8849 }
0x1d9e   :  { %v8853_v19 = vsel %vm85_vm0, %v8850_v33, 0 }
0x1d9f   :  { %12854 = vst [vmem:[#allocation149_spill] sm:$0xff] %v11917_v37 }
0x1da2   :  { %v8592_v29 = vpop.f32.mrf.mxu2 }
0x1da3   :  { %v8593_v8 = vadd.f32 %v8592_v29, %v8569_v30  ;;  %v8874_v29 = vand.u32 4294901760, %v8853_v19 }
0x1da5   :  { %v8617_v32 = vadd.f32 %v8616_v5, %v8593_v8  ;;  %v8855_v5 = vsel %vm85_vm0, %v8852_v47, 0  ;;  %v9029_v33 = vpop.permute.xlu2 %9028 }
0x1da6   :  { %v8872_v8 = vand.u32 4294901760, %v8855_v5 }
0x1da7   :  { %v8641_v40 = vadd.f32 %v8640_v46, %v8617_v32  ;;  %v8875_v32 = vsub.f32 %v8853_v19, %v8874_v29 }
0x1da8   :  { %v8899_v22 = vsub.f32 %v8855_v5, %v8872_v8  ;;  %8873 = vmatpush.xpose.msra.mxu0 %v8872_v8 }
0x1da9   :  { %v8663_v1 = vadd.f32 %v8662_v42, %v8641_v40 }
0x1daa   :  { %v8900_v62 = vand.u32 4294901760, %v8899_v22 }
0x1dab   :  { %v8665_v38 = vmul.f32 0.5, %v8663_v1  ;;  %v8876_v1 = vand.u32 4294901760, %v8875_v32 }
0x1dac   :  { %v8901_v25 = vsub.f32 %v8899_v22, %v8900_v62 }
0x1dad   :  { %v8666_v34 = vsel %vm239_vm1, %v8665_v38, -inf  ;;  %v8877_v47 = vsub.f32 %v8875_v32, %v8876_v1 }
0x1dae   :  { %8667 = vmax.xlane.f32.xlu1 %v8666_v34  ;;  %v8902_v0 = vand.u32 4294901760, %v8901_v25 }
0x1daf   :  { %v8878_v25 = vand.u32 4294901760, %v8877_v47 }
0x1db0   :  { %8903 = vmatpush.xpose.msra.mxu1 %v8902_v0 }
0x1dc7   :  { %9188 = vrot.lane.b32.xlu1 %v11864_v16, %s11180_s9 }
0x1dcf   :  { %9365 = vrot.lane.b32.xlu1 %v11900_v7, %s11180_s9 }
0x1dd7   :  { %9523 = vrot.lane.b32.xlu1 %v11868_v26, %s11181_s10 }
0x1e21   :  { %v8668_v20 = vpop.xlane.xlu1 %8667 }
0x1e22   :  { %v8669_v24 = vsub.f32 %v8665_v38, %v8668_v20  ;;  %v9049_v20 = vand.u32 4294901760, %v9029_v33 }
0x1e24   :  { %v8670_v30 = vmul.f32 1.442695, %v8669_v24  ;;  %v9076_v19 = vsub.f32 %v9029_v33, %v9049_v20 }
0x1e26   :  { %10962 = vpow2.f32 %v8670_v30 }
0x1e2c   :  { %v11928_v46 = vpop.eup %10962 }
0x1e2d   :  { %v8695_v40 = vsel %vm239_vm1, %v11928_v46, 0 }
0x1e2e   :  { %v8714_v42 = vand.u32 4294901760, %v8695_v40 }
0x1e30   :  { %v8715_v34 = vsub.f32 %v8695_v40, %v8714_v42  ;;  %8745 = vmatmul.f32.vlgmr.msra.gmra.mxu3 %v8714_v42  ;;  %v9077_v40 = vand.u32 4294901760, %v9076_v19 }
0x1e31   :  { %8949 = vmatpush.xpose.msra.mxu3 %v8872_v8 }
0x1e32   :  { %8769 = vmatmul.f32.vlgmr.msrb.gmra.mxu0 %v8715_v34  ;;  %v8716_v5 = vand.u32 4294901760, %v8715_v34  ;;  %v9078_v47 = vsub.f32 %v9076_v19, %v9077_v40 }
0x1e33   :  { %8975 = vmatpush.xpose.msrb.mxu0 %v8900_v62 }
0x1e34   :  { %8793 = vmatmul.f32.vlgmr.msrb.gmra.mxu1 %v8716_v5  ;;  %v8717_v38 = vsub.f32 %v8715_v34, %v8716_v5 }
0x1e35   :  { %8997 = vmatpush.xpose.msrb.mxu1 %v8872_v8 }
0x1e36   :  { %v8718_v0 = vand.u32 4294901760, %v8717_v38 }
0x1e38   :  { %8719 = vmatmul.f32.vlgmr.msra.gmra.mxu2 %v8718_v0  ;;  %8839 = vmatmul.f32.vlgmr.msrb.gmra.mxu3 %v8714_v42 }
0x1e39   :  { %8926 = vmatpush.xpose.msra.mxu2 %v8899_v22 }
0x1e3a   :  { %8879 = vmatmul.f32.vlgmr.msra.gmra.mxu0 %v8878_v25 }
0x1e3b   :  { %9103 = vmatpush.msra.mxu0 %v9076_v19 }
0x1e3c   :  { %8905 = vmatmul.f32.vlgmr.msra.gmra.mxu1 %v8874_v29 }
0x1e3d   :  { %9126 = vmatpush.msra.mxu1 %v9049_v20 }
0x1e40   :  { %8817 = vmatmul.f32.vlgmr.msrb.gmra.mxu2 %v8714_v42  ;;  %8953 = vmatmul.f32.vlgmr.msra.gmra.mxu3 %v8876_v1  ;;  %v9079_v1 = vand.u32 4294901760, %v9078_v47  ;;  %v9189_v47 = vpop.permute.xlu1 %9188 }
0x1e41   :  { %9050 = vmatpush.msrb.mxu2 %v9049_v20 }
0x1e42   :  { %8977 = vmatmul.f32.vlgmr.msrb.gmra.mxu0 %v8874_v29  ;;  %9080 = vmatpush.msrb.mxu3 %v9079_v1 }
0x1e44   :  { %8999 = vmatmul.f32.vlgmr.msrb.gmra.mxu1 %v8874_v29  ;;  %9174 = vmatpush.msra.mxu3 %v9049_v20 }
0x1e48   :  { %8929 = vmatmul.f32.vlgmr.msra.gmra.mxu2 %v8875_v32 }
0x1e49   :  { %9152 = vmatpush.msra.mxu2 %v9077_v40 }
0x1eaf   :  { %v8770_v24 = vpop.f32.mrf.mxu0 }
0x1eb1   :  { %v8794_v34 = vpop.f32.mrf.mxu1 }
0x1eb3   :  { %v8746_v62 = vpop.f32.mrf.mxu3 }
0x1eb7   :  { %v8880_v5 = vpop.f32.mrf.mxu0 }
0x1eb8   :  { %v8881_v25 = vadd.f32 %v8880_v5, %v11892_v18  ;;  %v9187_v5 = vpop.permute.xlu2 %9186 }
0x1eb9   :  { %v8906_v33 = vpop.f32.mrf.mxu1 }
0x1ebb   :  { %v8720_v8 = vpop.f32.mrf.mxu2  ;;  %v8840_v38 = vpop.f32.mrf.mxu3 }
0x1ebc   :  { %v8747_v30 = vadd.f32 %v8746_v62, %v8720_v8  ;;  %v8907_v62 = vadd.f32 %v8906_v33, %v8881_v25  ;;  %v9190_v33 = vsel %vm85_vm0, %v9187_v5, 0  ;;  %v9366_v5 = vpop.permute.xlu1 %9365 }
0x1ebe   :  { %v8771_v22 = vadd.f32 %v8770_v24, %v8747_v30 }
0x1ebf   :  { %v8978_v19 = vpop.f32.mrf.mxu0 }
0x1ec0   :  { %v8795_v42 = vadd.f32 %v8794_v34, %v8771_v22 }
0x1ec1   :  { %v9000_v40 = vpop.f32.mrf.mxu1 }
0x1ec3   :  { %v8818_v29 = vpop.f32.mrf.mxu2  ;;  %v8954_v4 = vpop.f32.mrf.mxu3 }
0x1ec4   :  { %v8819_v32 = vadd.f32 %v8818_v29, %v8795_v42 }
0x1ec6   :  { %v11933_v0 = vadd.f32 %v8840_v38, %v8819_v32 }
0x1ecb   :  { %v8930_v8 = vpop.f32.mrf.mxu2 }
0x1ecc   :  { %v8931_v37 = vadd.f32 %v8930_v8, %v8907_v62  ;;  %v9211_v8 = vand.u32 4294901760, %v9190_v33 }
0x1ece   :  { %v8955_v24 = vadd.f32 %v8954_v4, %v8931_v37  ;;  %v9192_v4 = vsel %vm85_vm0, %v9189_v47, 0 }
0x1ecf   :  { %v9209_v37 = vand.u32 4294901760, %v9192_v4 }
0x1ed0   :  { %v8979_v30 = vadd.f32 %v8978_v19, %v8955_v24  ;;  %v9212_v24 = vsub.f32 %v9190_v33, %v9211_v8 }
0x1ed1   :  { %v9236_v42 = vsub.f32 %v9192_v4, %v9209_v37  ;;  %9210 = vmatpush.xpose.msrb.mxu0 %v9209_v37 }
0x1ed2   :  { %v9001_v34 = vadd.f32 %v9000_v40, %v8979_v30 }
0x1ed3   :  { %v9237_v1 = vand.u32 4294901760, %v9236_v42 }
0x1ed4   :  { %v9003_v22 = vmul.f32 0.5, %v9001_v34  ;;  %v9213_v34 = vand.u32 4294901760, %v9212_v24 }
0x1ed5   :  { %v9238_v29 = vsub.f32 %v9236_v42, %v9237_v1 }
0x1ed6   :  { %v9004_v20 = vsel %vm239_vm1, %v9003_v22, -inf  ;;  %v9214_v47 = vsub.f32 %v9212_v24, %v9213_v34 }
0x1ed7   :  { %9005 = vmax.xlane.f32.xlu0 %v9004_v20  ;;  %v9239_v32 = vand.u32 4294901760, %v9238_v29 }
0x1ed8   :  { %v9215_v29 = vand.u32 4294901760, %v9214_v47 }
0x1ed9   :  { %9240 = vmatpush.xpose.msrb.mxu1 %v9239_v32 }
0x1eeb   :  { %9525 = vrot.lane.b32.xlu0 %v11864_v16, %s11181_s10 }
0x1ef3   :  { %9702 = vrot.lane.b32.xlu0 %v11900_v7, %s11181_s10 }
0x1efb   :  { %9860 = vrot.lane.b32.xlu0 %v11868_v26, %s11182_s11 }
0x1f4a   :  { %v9006_v38 = vpop.xlane.xlu0 %9005 }
0x1f4b   :  { %v9007_v25 = vsub.f32 %v9003_v22, %v9006_v38  ;;  %v9386_v38 = vand.u32 4294901760, %v9366_v5 }
0x1f4d   :  { %v9008_v62 = vmul.f32 1.442695, %v9007_v25  ;;  %v9413_v33 = vsub.f32 %v9366_v5, %v9386_v38 }
0x1f4f   :  { %10964 = vpow2.f32 %v9008_v62 }
0x1f55   :  { %v11944_v19 = vpop.eup %10964 }
0x1f56   :  { %v9032_v30 = vsel %vm239_vm1, %v11944_v19, 0 }
0x1f57   :  { %v9051_v40 = vand.u32 4294901760, %v9032_v30 }
0x1f59   :  { %v9052_v20 = vsub.f32 %v9032_v30, %v9051_v40  ;;  %9082 = vmatmul.f32.vlgmr.msrb.gmra.mxu3 %v9051_v40  ;;  %v9414_v30 = vand.u32 4294901760, %v9413_v33 }
0x1f5a   :  { %9286 = vmatpush.xpose.msrb.mxu3 %v9209_v37 }
0x1f5b   :  { %9106 = vmatmul.f32.vlgmr.msra.gmra.mxu0 %v9052_v20  ;;  %v9053_v4 = vand.u32 4294901760, %v9052_v20  ;;  %v9415_v47 = vsub.f32 %v9413_v33, %v9414_v30 }
0x1f5c   :  { %9312 = vmatpush.xpose.msra.mxu0 %v9237_v1 }
0x1f5d   :  { %9130 = vmatmul.f32.vlgmr.msra.gmra.mxu1 %v9053_v4  ;;  %v9054_v22 = vsub.f32 %v9052_v20, %v9053_v4 }
0x1f5e   :  { %9334 = vmatpush.xpose.msra.mxu1 %v9209_v37 }
0x1f5f   :  { %v9055_v32 = vand.u32 4294901760, %v9054_v22 }
0x1f61   :  { %9056 = vmatmul.f32.vlgmr.msrb.gmra.mxu2 %v9055_v32  ;;  %9176 = vmatmul.f32.vlgmr.msra.gmra.mxu3 %v9051_v40 }
0x1f62   :  { %9263 = vmatpush.xpose.msrb.mxu2 %v9236_v42 }
0x1f63   :  { %9216 = vmatmul.f32.vlgmr.msrb.gmra.mxu0 %v9215_v29 }
0x1f64   :  { %9440 = vmatpush.msrb.mxu0 %v9413_v33 }
0x1f65   :  { %9242 = vmatmul.f32.vlgmr.msrb.gmra.mxu1 %v9211_v8 }
0x1f66   :  { %9463 = vmatpush.msrb.mxu1 %v9386_v38 }
0x1f69   :  { %9154 = vmatmul.f32.vlgmr.msra.gmra.mxu2 %v9051_v40  ;;  %9290 = vmatmul.f32.vlgmr.msrb.gmra.mxu3 %v9213_v34  ;;  %v9416_v34 = vand.u32 4294901760, %v9415_v47  ;;  %v9526_v47 = vpop.permute.xlu0 %9525 }
0x1f6a   :  { %9387 = vmatpush.msra.mxu2 %v9386_v38 }
0x1f6b   :  { %9314 = vmatmul.f32.vlgmr.msra.gmra.mxu0 %v9211_v8  ;;  %9417 = vmatpush.msra.mxu3 %v9416_v34 }
0x1f6d   :  { %9336 = vmatmul.f32.vlgmr.msra.gmra.mxu1 %v9211_v8  ;;  %9511 = vmatpush.msrb.mxu3 %v9386_v38 }
0x1f71   :  { %9266 = vmatmul.f32.vlgmr.msrb.gmra.mxu2 %v9212_v24 }
0x1f72   :  { %9489 = vmatpush.msrb.mxu2 %v9414_v30 }
0x1fd8   :  { %v9107_v25 = vpop.f32.mrf.mxu0 }
0x1fda   :  { %v9131_v20 = vpop.f32.mrf.mxu1 }
0x1fdc   :  { %v9083_v1 = vpop.f32.mrf.mxu3 }
0x1fe0   :  { %v9217_v4 = vpop.f32.mrf.mxu0 }
0x1fe1   :  { %v9218_v29 = vadd.f32 %v9217_v4, %v11892_v18  ;;  %v9524_v4 = vpop.permute.xlu1 %9523 }
0x1fe2   :  { %v9243_v5 = vpop.f32.mrf.mxu1 }
0x1fe4   :  { %v9057_v37 = vpop.f32.mrf.mxu2  ;;  %v9177_v22 = vpop.f32.mrf.mxu3 }
0x1fe5   :  { %v9084_v62 = vadd.f32 %v9083_v1, %v9057_v37  ;;  %v9244_v1 = vadd.f32 %v9243_v5, %v9218_v29  ;;  %v9527_v5 = vsel %vm85_vm0, %v9524_v4, 0 }
0x1fe7   :  { %v9108_v42 = vadd.f32 %v9107_v25, %v9084_v62 }
0x1fe8   :  { %v9315_v33 = vpop.f32.mrf.mxu0 }
0x1fe9   :  { %v9132_v40 = vadd.f32 %v9131_v20, %v9108_v42 }
0x1fea   :  { %v9337_v30 = vpop.f32.mrf.mxu1 }
0x1fec   :  { %v9155_v8 = vpop.f32.mrf.mxu2  ;;  %v9291_v61 = vpop.f32.mrf.mxu3 }
0x1fed   :  { %v9156_v24 = vadd.f32 %v9155_v8, %v9132_v40 }
0x1fef   :  { %v11949_v32 = vadd.f32 %v9177_v22, %v9156_v24 }
0x1ff1   :  { %12855 = vst [vmem:[#allocation150_spill] sm:$0xff] %v11949_v32 }
0x1ff4   :  { %v9267_v37 = vpop.f32.mrf.mxu2 }
0x1ff5   :  { %v9268_v23 = vadd.f32 %v9267_v37, %v9244_v1  ;;  %v9548_v37 = vand.u32 4294901760, %v9527_v5 }
0x1ff7   :  { %v9292_v25 = vadd.f32 %v9291_v61, %v9268_v23  ;;  %v9529_v61 = vsel %vm85_vm0, %v9526_v47, 0 }
0x1ff8   :  { %v9546_v23 = vand.u32 4294901760, %v9529_v61 }
0x1ff9   :  { %v9316_v62 = vadd.f32 %v9315_v33, %v9292_v25  ;;  %v9549_v25 = vsub.f32 %v9527_v5, %v9548_v37 }
0x1ffa   :  { %v9573_v40 = vsub.f32 %v9529_v61, %v9546_v23  ;;  %9547 = vmatpush.xpose.msra.mxu0 %v9546_v23 }
0x1ffb   :  { %v9338_v20 = vadd.f32 %v9337_v30, %v9316_v62 }
0x1ffc   :  { %v9574_v34 = vand.u32 4294901760, %v9573_v40 }
0x1ffd   :  { %v9340_v42 = vmul.f32 0.5, %v9338_v20  ;;  %v9550_v20 = vand.u32 4294901760, %v9549_v25 }
0x1ffe   :  { %v9575_v8 = vsub.f32 %v9573_v40, %v9574_v34 }
0x1fff   :  { %v9341_v38 = vsel %vm239_vm1, %v9340_v42, -inf  ;;  %v9551_v47 = vsub.f32 %v9549_v25, %v9550_v20 }
0x2000   :  { %9342 = vmax.xlane.f32.xlu2 %v9341_v38  ;;  %v9576_v24 = vand.u32 4294901760, %v9575_v8 }
0x2001   :  { %v9552_v8 = vand.u32 4294901760, %v9551_v47 }
0x2002   :  { %9577 = vmatpush.xpose.msra.mxu1 %v9576_v24 }
0x2018   :  { %9862 = vrot.lane.b32.xlu2 %v11864_v16, %s11182_s11 }
0x2020   :  { %10039 = vrot.lane.b32.xlu2 %v11900_v7, %s11182_s11 }
0x2028   :  { %10197 = vrot.lane.b32.xlu2 %v11868_v26, %s11183_s12 }
0x2073   :  { %v9343_v22 = vpop.xlane.xlu2 %9342 }
0x2074   :  { %v9344_v29 = vsub.f32 %v9340_v42, %v9343_v22 }
0x2076   :  { %v9345_v1 = vmul.f32 1.442695, %v9344_v29 }
0x2078   :  { %10966 = vpow2.f32 %v9345_v1 }
0x207e   :  { %v11960_v33 = vpop.eup %10966 }
0x207f   :  { %v9369_v62 = vsel %vm239_vm1, %v11960_v33, 0 }
0x2080   :  { %v9388_v30 = vand.u32 4294901760, %v9369_v62 }
0x2082   :  { %v9389_v38 = vsub.f32 %v9369_v62, %v9388_v30  ;;  %9419 = vmatmul.f32.vlgmr.msra.gmra.mxu3 %v9388_v30 }
0x2083   :  { %9623 = vmatpush.xpose.msra.mxu3 %v9546_v23 }
0x2084   :  { %9443 = vmatmul.f32.vlgmr.msrb.gmra.mxu0 %v9389_v38  ;;  %v9390_v61 = vand.u32 4294901760, %v9389_v38 }
0x2085   :  { %9649 = vmatpush.xpose.msrb.mxu0 %v9574_v34 }
0x2086   :  { %9467 = vmatmul.f32.vlgmr.msrb.gmra.mxu1 %v9390_v61  ;;  %v9391_v42 = vsub.f32 %v9389_v38, %v9390_v61 }
0x2087   :  { %9671 = vmatpush.xpose.msrb.mxu1 %v9546_v23 }
0x2088   :  { %v9392_v24 = vand.u32 4294901760, %v9391_v42 }
0x208a   :  { %9393 = vmatmul.f32.vlgmr.msra.gmra.mxu2 %v9392_v24  ;;  %9513 = vmatmul.f32.vlgmr.msrb.gmra.mxu3 %v9388_v30 }
0x208b   :  { %9600 = vmatpush.xpose.msra.mxu2 %v9573_v40 }
0x208c   :  { %9553 = vmatmul.f32.vlgmr.msra.gmra.mxu0 %v9552_v8 }
0x208e   :  { %9579 = vmatmul.f32.vlgmr.msra.gmra.mxu1 %v9548_v37 }
0x2092   :  { %9491 = vmatmul.f32.vlgmr.msrb.gmra.mxu2 %v9388_v30  ;;  %9627 = vmatmul.f32.vlgmr.msra.gmra.mxu3 %v9550_v20 }
0x2094   :  { %9651 = vmatmul.f32.vlgmr.msrb.gmra.mxu0 %v9548_v37 }
0x2096   :  { %9673 = vmatmul.f32.vlgmr.msrb.gmra.mxu1 %v9548_v37 }
0x209a   :  { %9603 = vmatmul.f32.vlgmr.msra.gmra.mxu2 %v9549_v25 }
0x2101   :  { %v9444_v4 = vpop.f32.mrf.mxu0 }
0x2103   :  { %v9468_v34 = vpop.f32.mrf.mxu1 }
0x2105   :  { %v9420_v22 = vpop.f32.mrf.mxu3 }
0x2109   :  { %v9554_v47 = vpop.f32.mrf.mxu0 }
0x210a   :  { %v9555_v40 = vadd.f32 %v9554_v47, %v11892_v18  ;;  %v1253_v47 = vsel %vm239_vm1, %v11342_v31, 0.0  ;;  %v9010_v31 = vsel %vm239_vm1, %v11944_v19, 0.0 }
0x210b   :  { %v9580_v30 = vpop.f32.mrf.mxu1 }
0x210c   :  { %v9581_v20 = vadd.f32 %v9580_v30, %v9555_v40  ;;  %v3280_v40 = vsel %vm239_vm1, %v11525_v27, 0.0 }
0x210d   :  { %v9394_v29 = vpop.f32.mrf.mxu2  ;;  %v9514_v61 = vpop.f32.mrf.mxu3 }
0x210e   :  { %v9421_v5 = vadd.f32 %v9420_v22, %v9394_v29 }
0x2110   :  { %v9445_v1 = vadd.f32 %v9444_v4, %v9421_v5 }
0x2111   :  { %v9652_v32 = vpop.f32.mrf.mxu0 }
0x2112   :  { %v9469_v62 = vadd.f32 %v9468_v34, %v9445_v1  ;;  %v9703_v34 = vpop.permute.xlu0 %9702 }
0x2113   :  { %v9674_v22 = vpop.f32.mrf.mxu1  ;;  %v9723_v1 = vand.u32 4294901760, %v9703_v34 }
0x2115   :  { %v9492_v23 = vpop.f32.mrf.mxu2  ;;  %v9628_v25 = vpop.f32.mrf.mxu3  ;;  %9724 = vmatpush.msrb.mxu2 %v9723_v1  ;;  %9800 = vmatpush.msra.mxu1 %v9723_v1 }
0x2116   :  { %v9493_v38 = vadd.f32 %v9492_v23, %v9469_v62  ;;  %v9750_v62 = vsub.f32 %v9703_v34, %v9723_v1 }
0x2118   :  { %v11965_v42 = vadd.f32 %v9514_v61, %v9493_v38  ;;  %9777 = vmatpush.msra.mxu0 %v9750_v62 }
0x211d   :  { %v9604_v8 = vpop.f32.mrf.mxu2 }
0x211e   :  { %v9605_v37 = vadd.f32 %v9604_v8, %v9581_v20 }
0x2120   :  { %v9629_v24 = vadd.f32 %v9628_v25, %v9605_v37  ;;  %v3618_v37 = vsel %vm239_vm1, %v11546_v44, 0.0 }
0x2122   :  { %v9653_v63 = vadd.f32 %v9652_v32, %v9629_v24  ;;  %v9751_v32 = vand.u32 4294901760, %v9750_v62  ;;  %v9861_v24 = vpop.permute.xlu0 %9860 }
0x2123   :  { %v9864_v27 = vsel %vm85_vm0, %v9861_v24, 0 }
0x2124   :  { %v9675_v29 = vadd.f32 %v9674_v22, %v9653_v63  ;;  %v915_v63 = vsel %vm239_vm1, %v11317_v36, 0.0  ;;  %v9752_v23 = vsub.f32 %v9750_v62, %v9751_v32  ;;  %9826 = vmatpush.msra.mxu2 %v9751_v32  ;;  %v9885_v34 = vand.u32 4294901760, %v9864_v27 }
0x2126   :  { %v9677_v4 = vmul.f32 0.5, %v9675_v29  ;;  %v9753_v38 = vand.u32 4294901760, %v9752_v23 }
0x2128   :  { %v9678_v5 = vsel %vm239_vm1, %v9677_v4, -inf  ;;  %9754 = vmatpush.msrb.mxu3 %v9753_v38 }
0x2129   :  { %9679 = vmax.xlane.f32.xlu1 %v9678_v5 }
0x212a   :  { %9848 = vmatpush.msra.mxu3 %v9723_v1  ;;  %v9886_v1 = vsub.f32 %v9864_v27, %v9885_v34 }
0x2142   :  { %10199 = vrot.lane.b32.xlu1 %v11864_v16, %s11183_s12 }
0x214a   :  { %10376 = vrot.lane.b32.xlu1 %v11900_v7, %s11183_s12 }
0x2152   :  { %10534 = vrot.lane.b32.xlu1 %v11868_v26, %s11184_s13  ;;  %v9863_v26 = vpop.permute.xlu2 %9862 }
0x2153   :  { %v9866_v61 = vsel %vm85_vm0, %v9863_v26, 0 }
0x2154   :  { %v9883_v30 = vand.u32 4294901760, %v9866_v61 }
0x2156   :  { %v9910_v20 = vsub.f32 %v9866_v61, %v9883_v30  ;;  %9884 = vmatpush.xpose.msrb.mxu0 %v9883_v30 }
0x2158   :  { %v9911_v36 = vand.u32 4294901760, %v9910_v20 }
0x215a   :  { %v9912_v8 = vsub.f32 %v9910_v20, %v9911_v36 }
0x215c   :  { %v9913_v25 = vand.u32 4294901760, %v9912_v8 }
0x215e   :  { %9914 = vmatpush.xpose.msrb.mxu1 %v9913_v25 }
0x217c   :  { %916 = vadd.xlane.f32.xlu1 %v915_v63  ;;  %v9887_v63 = vand.u32 4294901760, %v9886_v1 }
0x217e   :  { %v9888_v19 = vsub.f32 %v9886_v1, %v9887_v63 }
0x2184   :  { %1254 = vadd.xlane.f32.xlu1 %v1253_v47  ;;  %v9889_v47 = vand.u32 4294901760, %v9888_v19 }
0x218c   :  { %3281 = vadd.xlane.f32.xlu1 %v3280_v40 }
0x2194   :  { %3619 = vadd.xlane.f32.xlu1 %v3618_v37 }
0x219c   :  { %9011 = vadd.xlane.f32.xlu1 %v9010_v31  ;;  %v9680_v22 = vpop.xlane.xlu1 %9679 }
0x219d   :  { %v9681_v29 = vsub.f32 %v9677_v4, %v9680_v22 }
0x219f   :  { %v9682_v5 = vmul.f32 1.442695, %v9681_v29 }
0x21a1   :  { %10968 = vpow2.f32 %v9682_v5 }
0x21a7   :  { %v11986_v62 = vpop.eup %10968 }
0x21a8   :  { %v9706_v44 = vsel %vm239_vm1, %v11986_v62, 0 }
0x21a9   :  { %v9725_v32 = vand.u32 4294901760, %v9706_v44 }
0x21ab   :  { %v9726_v23 = vsub.f32 %v9706_v44, %v9725_v32  ;;  %9756 = vmatmul.f32.vlgmr.msrb.gmra.mxu3 %v9725_v32 }
0x21ac   :  { %9960 = vmatpush.xpose.msrb.mxu3 %v9883_v30 }
0x21ad   :  { %9780 = vmatmul.f32.vlgmr.msra.gmra.mxu0 %v9726_v23  ;;  %v9727_v38 = vand.u32 4294901760, %v9726_v23 }
0x21ae   :  { %9986 = vmatpush.xpose.msra.mxu0 %v9911_v36 }
0x21af   :  { %9804 = vmatmul.f32.vlgmr.msra.gmra.mxu1 %v9727_v38  ;;  %v9728_v4 = vsub.f32 %v9726_v23, %v9727_v38 }
0x21b0   :  { %10008 = vmatpush.xpose.msra.mxu1 %v9883_v30 }
0x21b1   :  { %v9729_v26 = vand.u32 4294901760, %v9728_v4 }
0x21b3   :  { %9730 = vmatmul.f32.vlgmr.msrb.gmra.mxu2 %v9729_v26  ;;  %9850 = vmatmul.f32.vlgmr.msra.gmra.mxu3 %v9725_v32 }
0x21b4   :  { %9937 = vmatpush.xpose.msrb.mxu2 %v9910_v20 }
0x21b5   :  { %9890 = vmatmul.f32.vlgmr.msrb.gmra.mxu0 %v9889_v47 }
0x21b7   :  { %9916 = vmatmul.f32.vlgmr.msrb.gmra.mxu1 %v9885_v34 }
0x21bb   :  { %9828 = vmatmul.f32.vlgmr.msra.gmra.mxu2 %v9725_v32  ;;  %9964 = vmatmul.f32.vlgmr.msrb.gmra.mxu3 %v9887_v63 }
0x21bd   :  { %9988 = vmatmul.f32.vlgmr.msra.gmra.mxu0 %v9885_v34 }
0x21bf   :  { %10010 = vmatmul.f32.vlgmr.msra.gmra.mxu1 %v9885_v34 }
0x21c3   :  { %9940 = vmatmul.f32.vlgmr.msrb.gmra.mxu2 %v9886_v1 }
0x222a   :  { %v9781_v61 = vpop.f32.mrf.mxu0 }
0x222c   :  { %v9805_v36 = vpop.f32.mrf.mxu1 }
0x222e   :  { %v9757_v40 = vpop.f32.mrf.mxu3 }
0x2232   :  { %v9891_v22 = vpop.f32.mrf.mxu0 }
0x2233   :  { %v9892_v20 = vadd.f32 %v9891_v22, %v11892_v18  ;;  %v10200_v18 = vpop.permute.xlu1 %10199 }
0x2234   :  { %v9917_v5 = vpop.f32.mrf.mxu1 }
0x2235   :  { %v9918_v44 = vadd.f32 %v9917_v5, %v9892_v20  ;;  %v3955_v5 = vsel %vm239_vm1, %v11566_v43, 0.0 }
0x2236   :  { %v9731_v8 = vpop.f32.mrf.mxu2  ;;  %v9851_v29 = vpop.f32.mrf.mxu3 }
0x2237   :  { %v9758_v37 = vadd.f32 %v9757_v40, %v9731_v8 }
0x2239   :  { %v9782_v25 = vadd.f32 %v9781_v61, %v9758_v37  ;;  %v10203_v61 = vsel %vm85_vm0, %v10200_v18, 0  ;;  %v576_v37 = vsel %vm239_vm1, %v11291_v39, 0.0  ;;  %v8672_v39 = vsel %vm239_vm1, %v11928_v46, 0.0 }
0x223a   :  { %v9989_v23 = vpop.f32.mrf.mxu0  ;;  %v11999_v40 = vand.u32 4294901760, %v10203_v61 }
0x223b   :  { %v9806_v31 = vadd.f32 %v9805_v36, %v9782_v25 }
0x223c   :  { %v10011_v38 = vpop.f32.mrf.mxu1  ;;  %v12002_v8 = vsub.f32 %v10203_v61, %v11999_v40 }
0x223e   :  { %v9829_v30 = vpop.f32.mrf.mxu2  ;;  %v9965_v1 = vpop.f32.mrf.mxu3  ;;  %v10248_v36 = vand.u32 4294901760, %v12002_v8 }
0x223f   :  { %v9830_v24 = vadd.f32 %v9829_v30, %v9806_v31  ;;  %v10040_v31 = vpop.permute.xlu2 %10039 }
0x2240   :  { %v10249_v25 = vsub.f32 %v12002_v8, %v10248_v36  ;;  %v10060_v30 = vand.u32 4294901760, %v10040_v31 }
0x2241   :  { %v11991_v27 = vadd.f32 %v9851_v29, %v9830_v24 }
0x2242   :  { %v10087_v24 = vsub.f32 %v10040_v31, %v10060_v30  ;;  %10061 = vmatpush.msra.mxu2 %v10060_v30  ;;  %10137 = vmatpush.msrb.mxu1 %v10060_v30 }
0x2244   :  { %v10088_v22 = vand.u32 4294901760, %v10087_v24  ;;  %10114 = vmatpush.msrb.mxu0 %v10087_v24 }
0x2246   :  { %v9941_v32 = vpop.f32.mrf.mxu2  ;;  %10221 = vmatpush.xpose.msra.mxu0 %v11999_v40  ;;  %v10089_v29 = vsub.f32 %v10087_v24, %v10088_v22  ;;  %10163 = vmatpush.msrb.mxu2 %v10088_v22 }
0x2247   :  { %v9942_v34 = vadd.f32 %v9941_v32, %v9918_v44  ;;  %v9347_v44 = vsel %vm239_vm1, %v11960_v33, 0.0  ;;  %v10198_v32 = vpop.permute.xlu2 %10197  ;;  %v4629_v33 = vsel %vm239_vm1, %v11613_v17, 0.0  ;;  %v2267_v17 = vsel %vm239_vm1, %v11421_v3, 0.0 }
0x2248   :  { %v10090_v20 = vand.u32 4294901760, %v10089_v29 }
0x2249   :  { %v9966_v63 = vadd.f32 %v9965_v1, %v9942_v34  ;;  %v6988_v1 = vsel %vm239_vm1, %v11803_v14, 0.0 }
0x224a   :  { %10091 = vmatpush.msra.mxu3 %v10090_v20 }
0x224b   :  { %v9990_v19 = vadd.f32 %v9989_v23, %v9966_v63  ;;  %v10201_v63 = vsel %vm85_vm0, %v10198_v32, 0  ;;  %v10377_v23 = vpop.permute.xlu1 %10376 }
0x224c   :  { %10185 = vmatpush.msrb.mxu3 %v10060_v30 }
0x224d   :  { %v10012_v4 = vadd.f32 %v10011_v38, %v9990_v19  ;;  %v10222_v38 = vand.u32 4294901760, %v10201_v63 }
0x224f   :  { %v10014_v47 = vmul.f32 0.5, %v10012_v4  ;;  %v10223_v4 = vsub.f32 %v10201_v63, %v10222_v38 }
0x2251   :  { %v10015_v26 = vsel %vm239_vm1, %v10014_v47, -inf  ;;  %v10224_v61 = vand.u32 4294901760, %v10223_v4 }
0x2252   :  { %10016 = vmax.xlane.f32.xlu0 %v10015_v26 }
0x2266   :  { %10536 = vrot.lane.b32.xlu0 %v11864_v16, %s11184_s13  ;;  %v1591_v16 = vsel %vm239_vm1, %v11369_v6, 0.0  ;;  %v6314_v6 = vsel %vm239_vm1, %v11755_v35, 0.0  ;;  %v10397_v35 = vand.u32 4294901760, %v10377_v23 }
0x2268   :  { %v10424_v43 = vsub.f32 %v10377_v23, %v10397_v35 }
0x226e   :  { %10713 = vrot.lane.b32.xlu0 %v11900_v7, %s11184_s13  ;;  %v10250_v7 = vand.u32 4294901760, %v10249_v25 }
0x2270   :  { %10251 = vmatpush.xpose.msra.mxu1 %v10250_v7 }
0x2298   :  { %577 = vadd.xlane.f32.xlu0 %v576_v37 }
0x22a0   :  { %1592 = vadd.xlane.f32.xlu0 %v1591_v16  ;;  %v10225_v16 = vsub.f32 %v10223_v4, %v10224_v61 }
0x22a8   :  { %8673 = vadd.xlane.f32.xlu0 %v8672_v39  ;;  %v10226_v39 = vand.u32 4294901760, %v10225_v16 }
0x22b0   :  { %6315 = vadd.xlane.f32.xlu0 %v6314_v6 }
0x22b8   :  { %3956 = vadd.xlane.f32.xlu0 %v3955_v5 }
0x22c0   :  { %9348 = vadd.xlane.f32.xlu0 %v9347_v44 }
0x22c5   :  { %v10017_v46 = vpop.xlane.xlu0 %10016 }
0x22c6   :  { %v10018_v34 = vsub.f32 %v10014_v47, %v10017_v46  ;;  %v10425_v47 = vand.u32 4294901760, %v10424_v43 }
0x22c8   :  { %v10019_v19 = vmul.f32 1.442695, %v10018_v34  ;;  %6989 = vadd.xlane.f32.xlu0 %v6988_v1  ;;  %v10426_v25 = vsub.f32 %v10424_v43, %v10425_v47 }
0x22ca   :  { %10970 = vpow2.f32 %v10019_v19  ;;  %v10427_v24 = vand.u32 4294901760, %v10426_v25 }
0x22d0   :  { %v12024_v26 = vpop.eup %10970  ;;  %4630 = vadd.xlane.f32.xlu0 %v4629_v33 }
0x22d1   :  { %v10043_v14 = vsel %vm239_vm1, %v12024_v26, 0 }
0x22d2   :  { %v10062_v18 = vand.u32 4294901760, %v10043_v14 }
0x22d4   :  { %v10063_v37 = vsub.f32 %v10043_v14, %v10062_v18  ;;  %10093 = vmatmul.f32.vlgmr.msra.gmra.mxu3 %v10062_v18 }
0x22d5   :  { %10297 = vmatpush.xpose.msra.mxu3 %v11999_v40 }
0x22d6   :  { %10117 = vmatmul.f32.vlgmr.msrb.gmra.mxu0 %v10063_v37  ;;  %v10064_v7 = vand.u32 4294901760, %v10063_v37 }
0x22d7   :  { %10323 = vmatpush.xpose.msrb.mxu0 %v10248_v36 }
0x22d8   :  { %10141 = vmatmul.f32.vlgmr.msrb.gmra.mxu1 %v10064_v7  ;;  %2268 = vadd.xlane.f32.xlu0 %v2267_v17  ;;  %v10065_v31 = vsub.f32 %v10063_v37, %v10064_v7  ;;  %v10537_v30 = vpop.permute.xlu0 %10536 }
0x22d9   :  { %10345 = vmatpush.xpose.msrb.mxu1 %v11999_v40  ;;  %v10540_v22 = vsel %vm85_vm0, %v10537_v30, 0 }
0x22da   :  { %v10066_v29 = vand.u32 4294901760, %v10065_v31  ;;  %v12033_v20 = vand.u32 4294901760, %v10540_v22 }
0x22dc   :  { %10067 = vmatmul.f32.vlgmr.msra.gmra.mxu2 %v10066_v29  ;;  %10187 = vmatmul.f32.vlgmr.msrb.gmra.mxu3 %v10062_v18  ;;  %v12036_v6 = vsub.f32 %v10540_v22, %v12033_v20 }
0x22dd   :  { %10274 = vmatpush.xpose.msra.mxu2 %v12002_v8  ;;  %10428 = vmatpush.msrb.mxu3 %v10427_v24 }
0x22de   :  { %10227 = vmatmul.f32.vlgmr.msra.gmra.mxu0 %v10226_v39  ;;  %v10585_v3 = vand.u32 4294901760, %v12036_v6 }
0x22df   :  { %10451 = vmatpush.msra.mxu0 %v10424_v43 }
0x22e0   :  { %10253 = vmatmul.f32.vlgmr.msra.gmra.mxu1 %v10222_v38  ;;  %v10586_v40 = vsub.f32 %v12036_v6, %v10585_v3  ;;  %v12044_v8 = vpop.permute.xlu0 %10713 }
0x22e1   :  { %10474 = vmatpush.msra.mxu1 %v10397_v35 }
0x22e2   :  { %v10587_v36 = vand.u32 4294901760, %v10586_v40 }
0x22e4   :  { %10165 = vmatmul.f32.vlgmr.msrb.gmra.mxu2 %v10062_v18  ;;  %10301 = vmatmul.f32.vlgmr.msra.gmra.mxu3 %v10224_v61 }
0x22e5   :  { %10398 = vmatpush.msrb.mxu2 %v10397_v35  ;;  %10522 = vmatpush.msra.mxu3 %v10397_v35 }
0x22e6   :  { %10325 = vmatmul.f32.vlgmr.msrb.gmra.mxu0 %v10222_v38 }
0x22e7   :  { %10558 = vmatpush.xpose.msrb.mxu0 %v12033_v20 }
0x22e8   :  { %10347 = vmatmul.f32.vlgmr.msrb.gmra.mxu1 %v10222_v38 }
0x22e9   :  { %10588 = vmatpush.xpose.msrb.mxu1 %v10587_v36 }
0x22ec   :  { %10277 = vmatmul.f32.vlgmr.msra.gmra.mxu2 %v10223_v4 }
0x22ed   :  { %10500 = vmatpush.msra.mxu2 %v10425_v47 }
0x230b   :  { %v12046_v5 = vpop.xlane.xlu0 %577 }
0x230c   :  { %vm584_vm11 = vweird.f32 %v12046_v5 }
0x2313   :  { %v12048_v44 = vpop.xlane.xlu0 %1592 }
0x231b   :  { %v8674_v32 = vpop.xlane.xlu0 %8673 }
0x231c   :  { %10972 = vrcp.f32 %v8674_v32  ;;  %v8686_v19 = vand.u32 2147483648, %v8674_v32  ;;  %v8684_v35 = vand.u32 2147483647, %v8674_v32  ;;  %vm8680_vm3 = vweird.f32 %v8674_v32 }
0x231e   :  { %v8687_v43 = vor.u32 1.1754944e-38, %v8686_v19  ;;  %vm8685_vm5 = vcmp.eq.f32.partialorder %v8684_v35, 8.507059e+37 }
0x2322   :  { %v10973_v46 = vpop.eup %10972 }
0x2323   :  { %v8676_v34 = vmul.f32 %v10973_v46, %v8674_v32  ;;  %v12050_v1 = vpop.xlane.xlu0 %6315  ;;  %vm8681_vm2 = vweird.f32 %v10973_v46 }
0x2324   :  { %vm8682_vm4 = vmor %vm8680_vm3, %vm8681_vm2 }
0x2325   :  { %v8677_v63 = vsub.f32 1.0, %v8676_v34 }
0x2327   :  { %v8678_v23 = vmul.f32 %v10973_v46, %v8677_v63 }
0x2329   :  { %v8679_v38 = vadd.f32 %v10973_v46, %v8678_v23 }
0x232b   :  { %v12052_v4 = vpop.xlane.xlu0 %3956  ;;  %v8683_v33 = vsel %vm8682_vm4, %v10973_v46, %v8679_v38  ;;  %v12060_v38 = vld [vmem:[#allocation8 + $0x8] sm:$0xff] }
0x232c   :  { %v8688_v47 = vsel %vm8685_vm5, %v8687_v43, %v8683_v33 }
0x232d   :  { %v12055_v14 = vmul.f32 %v11933_v0, %v8688_v47 }
0x2333   :  { %v9349_v18 = vpop.xlane.xlu0 %9348 }
0x2334   :  { %10974 = vrcp.f32 %v9349_v18  ;;  %v9361_v7 = vand.u32 2147483648, %v9349_v18  ;;  %v9359_v17 = vand.u32 2147483647, %v9349_v18  ;;  %vm9355_vm7 = vweird.f32 %v9349_v18 }
0x2335   :  { %10976 = vrcp.f32 %v12046_v5 }
0x2336   :  { %v9362_v30 = vor.u32 1.1754944e-38, %v9361_v7  ;;  %vm9360_vm9 = vcmp.eq.f32.partialorder %v9359_v17, 8.507059e+37 }
0x233a   :  { %v10975_v61 = vpop.eup %10974 }
0x233b   :  { %v9351_v37 = vmul.f32 %v10975_v61, %v9349_v18  ;;  %vm9356_vm6 = vweird.f32 %v10975_v61 }
0x233c   :  { %vm9357_vm8 = vmor %vm9355_vm7, %vm9356_vm6 }
0x233d   :  { %v9352_v25 = vsub.f32 1.0, %v9351_v37 }
0x233f   :  { %v9353_v16 = vmul.f32 %v10975_v61, %v9352_v25 }
0x2341   :  { %v9354_v31 = vadd.f32 %v10975_v61, %v9353_v16  ;;  %v12065_v16 = vpop.permute.xlu1 %10534 }
0x2343   :  { %v9358_v24 = vsel %vm9357_vm8, %v10975_v61, %v9354_v31 }
0x2344   :  { %v9363_v22 = vsel %vm9360_vm9, %v9362_v30, %v9358_v24 }
0x2345   :  { %v12058_v39 = vmul.f32 %v11965_v42, %v9363_v22 }
0x2353   :  { %v10118_v0 = vpop.f32.mrf.mxu0 }
0x2355   :  { %v10142_v32 = vpop.f32.mrf.mxu1 }
0x2357   :  { %v10094_v29 = vpop.f32.mrf.mxu3 }
0x235b   :  { %v10228_v19 = vpop.f32.mrf.mxu0 }
0x235c   :  { %v10229_v43 = vadd.f32 %v12060_v38, %v10228_v19 }
0x235d   :  { %v10254_v47 = vpop.f32.mrf.mxu1 }
0x235e   :  { %v10255_v42 = vadd.f32 %v10254_v47, %v10229_v43 }
0x235f   :  { %v10068_v40 = vpop.f32.mrf.mxu2  ;;  %v10188_v35 = vpop.f32.mrf.mxu3 }
0x2360   :  { %v10095_v36 = vadd.f32 %v10094_v29, %v10068_v40  ;;  %v10977_v29 = vpop.eup %10976  ;;  %v246_v40 = vsel %vm239_vm1, %v11264_v41, 0.0  ;;  %v989_v41 = vadd.f32 %v11327_v49, %v11329_v50 }
0x2361   :  { %vm585_vm10 = vweird.f32 %v10977_v29 }
0x2362   :  { %v10119_v46 = vadd.f32 %v10118_v0, %v10095_v36  ;;  %v917_v0 = vpop.xlane.xlu1 %916  ;;  %v580_v36 = vmul.f32 %v10977_v29, %v12046_v5  ;;  %vm586_vm12 = vmor %vm584_vm11, %vm585_vm10 }
0x2363   :  { %v10326_v7 = vpop.f32.mrf.mxu0  ;;  %10978 = vrcp.f32 %v917_v0  ;;  %vm923_vm15 = vweird.f32 %v917_v0 }
0x2364   :  { %v10143_v34 = vadd.f32 %v10142_v32, %v10119_v46  ;;  %v581_v46 = vsub.f32 1.0, %v580_v36 }
0x2365   :  { %v10348_v31 = vpop.f32.mrf.mxu1 }
0x2366   :  { %v582_v19 = vmul.f32 %v10977_v29, %v581_v46 }
0x2367   :  { %v10166_v63 = vpop.f32.mrf.mxu2  ;;  %v10302_v37 = vpop.f32.mrf.mxu3 }
0x2368   :  { %v10167_v23 = vadd.f32 %v10166_v63, %v10143_v34  ;;  %v651_v63 = vadd.f32 %v11303_v54, %v11305_v55  ;;  %v583_v47 = vadd.f32 %v10977_v29, %v582_v19  ;;  %v588_v54 = vand.u32 2147483647, %v12046_v5 }
0x2369   :  { %v10979_v34 = vpop.eup %10978 }
0x236a   :  { %v12063_v33 = vadd.f32 %v10188_v35, %v10167_v23  ;;  %v1255_v32 = vpop.xlane.xlu1 %1254  ;;  %v919_v23 = vmul.f32 %v10979_v34, %v917_v0  ;;  %v675_v35 = vadd.f32 %v11301_v52, %v651_v63  ;;  %vm589_vm13 = vcmp.eq.f32.partialorder %v588_v54, 8.507059e+37 }
0x236b   :  { %10980 = vrcp.f32 %v1255_v32  ;;  %vm924_vm14 = vweird.f32 %v10979_v34  ;;  %vm1261_vm5 = vweird.f32 %v1255_v32 }
0x236c   :  { %v920_v43 = vsub.f32 1.0, %v919_v23  ;;  %vm925_vm2 = vmor %vm923_vm15, %vm924_vm14  ;;  %vm1090_vm14 = vcmask 97344  }
0x236f   :  { %v10278_v18 = vpop.f32.mrf.mxu2 }
0x2370   :  { %v10279_v61 = vadd.f32 %v10278_v18, %v10255_v42  ;;  %v590_v18 = vand.u32 2147483648, %v12046_v5  ;;  %v1327_v5 = vadd.f32 %v11351_v9, %v11353_v10  ;;  %v1267_v9 = vand.u32 2147483648, %v1255_v32 }
0x2371   :  { %v10981_v42 = vpop.eup %10980 }
0x2372   :  { %v10303_v25 = vadd.f32 %v10302_v37, %v10279_v61  ;;  %v699_v61 = vadd.f32 %v11307_v57, %v675_v35  ;;  %v921_v37 = vmul.f32 %v10979_v34, %v920_v43  ;;  %v1257_v52 = vmul.f32 %v10981_v42, %v1255_v32 }
0x2373   :  { %v1351_v46 = vadd.f32 %v11355_v11, %v1327_v5  ;;  %vm1262_vm4 = vweird.f32 %v10981_v42  ;;  %v1268_v35 = vor.u32 1.1754944e-38, %v1267_v9 }
0x2374   :  { %v10327_v17 = vadd.f32 %v10326_v7, %v10303_v25  ;;  %v723_v55 = vadd.f32 %v11309_v58, %v699_v61  ;;  %v587_v25 = vsel %vm586_vm12, %v10977_v29, %v583_v47  ;;  %v1013_v7 = vadd.f32 %v11325_v48, %v989_v41  ;;  %vm1263_vm6 = vmor %vm1261_vm5, %vm1262_vm4  ;;  %v12856_v61 = vld [vmem:[#allocation16_spill] sm:$0xff] }
0x2375   :  { %v1258_v50 = vsub.f32 1.0, %v1257_v52  ;;  %v1375_v10 = vadd.f32 %v11357_v12, %v1351_v46  ;;  %v5976_v12 = vsel %vm239_vm1, %v11725_v28, 0.0  ;;  %v7662_v47 = vsel %vm239_vm1, %v11847_v45, 0.0 }
0x2376   :  { %v10349_v30 = vadd.f32 %v10348_v31, %v10327_v17  ;;  %v591_v17 = vor.u32 1.1754944e-38, %v590_v18  ;;  %v745_v49 = vadd.f32 %v11311_v60, %v723_v55  ;;  %v1037_v57 = vadd.f32 %v11331_v51, %v1013_v7  ;;  %v12857_v7 = vld [vmem:[#allocation15_spill] sm:$0xff] }
0x2377   :  { %v1259_v29 = vmul.f32 %v10981_v42, %v1258_v50  ;;  %v1399_v19 = vadd.f32 %v11359_v13, %v1375_v10  ;;  %v10021_v13 = vsel %vm239_vm1, %v12024_v26, 0.0  ;;  %v10538_v28 = vsel %vm85_vm0, %v12065_v16, 0  ;;  %v12858_v50 = vld [vmem:[#allocation45_spill] sm:$0xff] }
0x2378   :  { %v12067_v24 = vmul.f32 0.5, %v10349_v30  ;;  %v592_v31 = vsel %vm589_vm13, %v591_v17, %v587_v25  ;;  %v922_v30 = vadd.f32 %v10979_v34, %v921_v37  ;;  %v1061_v48 = vadd.f32 %v11333_v53, %v1037_v57 }
0x2379   :  { %v747_v58 = vmul.f32 %v745_v49, %v592_v31  ;;  %v1260_v23 = vadd.f32 %v10981_v42, %v1259_v29  ;;  %v1265_v53 = vand.u32 2147483647, %v1255_v32  ;;  %v1421_v43 = vadd.f32 %v11361_v15, %v1399_v19  ;;  %v12107_v15 = vpop.xlane.xlu1 %3281 }
0x237a   :  { %v10352_v22 = vsel %vm239_vm1, %v12067_v24, -inf  ;;  %v926_v60 = vsel %vm925_vm2, %v10979_v34, %v922_v30  ;;  %v1083_v63 = vadd.f32 %v11335_v59, %v1061_v48  ;;  %v1929_v32 = vsel %vm239_vm1, %v11395_v56, 0.0 }
0x237b   :  { %10353 = vmax.xlane.f32.xlu2 %v10352_v22  ;;  %v929_v22 = vand.u32 2147483648, %v917_v0  ;;  %v1264_v34 = vsel %vm1263_vm6, %v10981_v42, %v1260_v23  ;;  %vm1266_vm7 = vcmp.eq.f32.partialorder %v1265_v53, 8.507059e+37  ;;  %10982 = vrcp.f32 %v12107_v15  ;;  %v12862_v53 = vld [vmem:[#allocation53_spill] sm:$0xff] }
0x237c   :  { %v1269_v11 = vsel %vm1266_vm7, %v1268_v35, %v1264_v34  ;;  %v12114_v56 = vand.u32 4294901760, %v12044_v8  ;;  %v12116_v26 = vand.u32 4294901760, %v10538_v28  ;;  %v5303_v45 = vsel %vm239_vm1, %v11665_v21, 0.0  ;;  %v12863_v35 = vld [vmem:[#allocation141_spill] sm:$0xff] }
0x237d   :  { %v930_v36 = vor.u32 1.1754944e-38, %v929_v22  ;;  %v1423_v59 = vmul.f32 %v1421_v43, %v1269_v11  ;;  %v317_v54 = vadd.f32 %v12856_v61, %v11279_v2  ;;  %v2949_v30 = vsel %vm239_vm1, %v12858_v50, 0.0  ;;  %v12866_v50 = vld [vmem:[#allocation55_spill] sm:$0xff] }
0x237e   :  { %v12127_v55 = vsub.f32 %v10538_v28, %v12116_v26  ;;  %v7999_v11 = vsel %vm239_vm1, %v12863_v35, 0.0  ;;  %v12864_v28 = vld [vmem:[#allocation52_spill] sm:$0xff]  ;;  %vm752_vm13 = vcmask 64544   ;;  %vm3288_vm15 = vweird.f32 %v12107_v15 }
0x237f   :  { %v341_v21 = vadd.f32 %v12857_v7, %v317_v54 }
0x2381   :  { %v12129_v37 = vpop.eup %10982  ;;  %v12131_v52 = vpop.xlane.xlu1 %3619 }
0x2382   :  { %v3284_v57 = vmul.f32 %v12129_v37, %v12107_v15  ;;  %vm3289_vm12 = vweird.f32 %v12129_v37  ;;  %vm3626_vm6 = vweird.f32 %v12131_v52 }
0x2383   :  { %247 = vadd.xlane.f32.xlu2 %v246_v40  ;;  %v927_v40 = vand.u32 2147483647, %v917_v0  ;;  %vm12194_vm2 = vmor %vm3288_vm15, %vm3289_vm12 }
0x2384   :  { %v3285_v23 = vsub.f32 1.0, %v3284_v57  ;;  %v12867_v57 = vld [vmem:[#allocation60_spill] sm:$0xff] }
0x2385   :  { %vm928_vm3 = vcmp.eq.f32.partialorder %v927_v40, 8.507059e+37 }
0x2386   :  { %v931_v51 = vsel %vm928_vm3, %v930_v36, %v926_v60  ;;  %vm1428_vm3 = vcmask 130144  }
0x2387   :  { %v1085_v0 = vmul.f32 %v1083_v63, %v931_v51  ;;  %v12860_v51 = vld [vmem:[#allocation18_spill] sm:$0xff] }
0x239b   :  { %749 = vrot.lane.b32.xlu2 %v747_v58, %s11185_s14  ;;  %v12859_v58 = vld [vmem:[#allocation17_spill] sm:$0xff] }
0x239c   :  { %v365_v40 = vadd.f32 %v12859_v58, %v341_v21  ;;  %v12869_v58 = vld [vmem:[#allocation96_spill] sm:$0xff] }
0x239e   :  { %v389_v63 = vadd.f32 %v12860_v51, %v365_v40  ;;  %v5645_v40 = vsel %vm239_vm1, %v12869_v58, 0.0 }
0x23a3   :  { %1087 = vrot.lane.b32.xlu2 %v1085_v0, %s11174_s24  ;;  %v12861_v0 = vld [vmem:[#allocation54_spill] sm:$0xff] }
0x23a4   :  { %v3355_v19 = vadd.f32 %v12862_v53, %v12861_v0 }
0x23ab   :  { %1425 = vrot.lane.b32.xlu2 %v1423_v59, %s11186_s15 }
0x23d4   :  { %5977 = vadd.xlane.f32.xlu2 %v5976_v12 }
0x23dc   :  { %1930 = vadd.xlane.f32.xlu2 %v1929_v32 }
0x23e4   :  { %10022 = vadd.xlane.f32.xlu2 %v10021_v13 }
0x23ec   :  { %7663 = vadd.xlane.f32.xlu2 %v7662_v47  ;;  %v3286_v47 = vmul.f32 %v12129_v37, %v3285_v23 }
0x23ee   :  { %v10354_v42 = vpop.xlane.xlu2 %10353 }
0x23ef   :  { %v10355_v41 = vsub.f32 %v12067_v24, %v10354_v42  ;;  %v12124_v24 = vsub.f32 %v12044_v8, %v12114_v56  ;;  %v10561_v8 = vand.u32 4294901760, %v12127_v55 }
0x23f1   :  { %v10356_v18 = vmul.f32 1.442695, %v10355_v41  ;;  %v10762_v17 = vand.u32 4294901760, %v12124_v24  ;;  %v10562_v36 = vsub.f32 %v12127_v55, %v10561_v8 }
0x23f3   :  { %10984 = vpow2.f32 %v10356_v18  ;;  %v10763_v48 = vsub.f32 %v12124_v24, %v10762_v17  ;;  %v10563_v13 = vand.u32 4294901760, %v10562_v36  ;;  %v3379_v18 = vadd.f32 %v12864_v28, %v3355_v19 }
0x23f4   :  { %5304 = vadd.xlane.f32.xlu2 %v5303_v45 }
0x23f5   :  { %v10764_v59 = vand.u32 4294901760, %v10763_v48  ;;  %v3292_v48 = vand.u32 2147483647, %v12107_v15 }
0x23f6   :  { %v248_v16 = vpop.xlane.xlu2 %247 }
0x23f7   :  { %10986 = vrcp.f32 %v248_v16  ;;  %v260_v34 = vand.u32 2147483648, %v248_v16  ;;  %v258_v32 = vand.u32 2147483647, %v248_v16  ;;  %vm254_vm9 = vweird.f32 %v248_v16 }
0x23f8   :  { %10988 = vrcp.f32 %v12131_v52  ;;  %vm3293_vm4 = vcmp.eq.f32.partialorder %v3292_v48, 8.507059e+37  ;;  %v12886_v48 = vld [vmem:[#allocation69_spill] sm:$0xff] }
0x23f9   :  { %v10985_v25 = vpop.eup %10984  ;;  %10990 = vrcp.f32 %v12052_v4  ;;  %v261_v45 = vor.u32 1.1754944e-38, %v260_v34  ;;  %vm259_vm11 = vcmp.eq.f32.partialorder %v258_v32, 8.507059e+37 }
0x23fa   :  { %v10380_v2 = vsel %vm239_vm1, %v10985_v25, 0  ;;  %v10358_v31 = vsel %vm239_vm1, %v10985_v25, 0.0  ;;  %10992 = vrcp.f32 %v12048_v44 }
0x23fb   :  { %v12139_v49 = vand.u32 4294901760, %v10380_v2  ;;  %10359 = vadd.xlane.f32.xlu0 %v10358_v31  ;;  %10994 = vrcp.f32 %v12050_v1 }
0x23fc   :  { %2950 = vadd.xlane.f32.xlu2 %v2949_v30  ;;  %v3403_v30 = vadd.f32 %v12866_v50, %v3379_v18  ;;  %v12879_v18 = vld [vmem:[#allocation64_spill] sm:$0xff] }
0x23fd   :  { %v10987_v22 = vpop.eup %10986  ;;  %v10400_v5 = vsub.f32 %v10380_v2, %v12139_v49  ;;  %10430 = vmatmul.f32.vlgmr.msrb.gmra.mxu3 %v12139_v49  ;;  %v3287_v2 = vadd.f32 %v12129_v37, %v3286_v47  ;;  %v12884_v50 = vld [vmem:[#allocation68_spill] sm:$0xff] }
0x23fe   :  { %v250_v29 = vmul.f32 %v10987_v22, %v248_v16  ;;  %v750_v60 = vpop.permute.xlu2 %749  ;;  %10634 = vmatpush.xpose.msrb.mxu3 %v12033_v20  ;;  %v12158_v10 = vpop.eup %10988  ;;  %vm255_vm8 = vweird.f32 %v10987_v22 }
0x23ff   :  { %10454 = vmatmul.f32.vlgmr.msra.gmra.mxu0 %v10400_v5  ;;  %v10401_v46 = vand.u32 4294901760, %v10400_v5  ;;  %v3622_v42 = vmul.f32 %v12158_v10, %v12131_v52  ;;  %vm256_vm10 = vmor %vm254_vm9, %vm255_vm8  ;;  %v12176_v31 = vpop.eup %10990  ;;  %vm3627_vm5 = vweird.f32 %v12158_v10 }
0x2400   :  { %v251_v9 = vsub.f32 1.0, %v250_v29  ;;  %10660 = vmatpush.xpose.msra.mxu0 %v10585_v3  ;;  %v12870_v29 = vld [vmem:[#allocation56_spill] sm:$0xff]  ;;  %vm3628_vm7 = vmor %vm3626_vm6, %vm3627_vm5  ;;  %vm3964_vm9 = vweird.f32 %v12176_v31 }
0x2401   :  { %10478 = vmatmul.f32.vlgmr.msra.gmra.mxu1 %v10401_v46  ;;  %v10402_v43 = vsub.f32 %v10400_v5, %v10401_v46  ;;  %v3623_v16 = vsub.f32 1.0, %v3622_v42  ;;  %v3427_v36 = vadd.f32 %v12870_v29, %v3403_v30  ;;  %v12887_v46 = vld [vmem:[#allocation23_spill] sm:$0xff] }
0x2402   :  { %v252_v12 = vmul.f32 %v10987_v22, %v251_v9  ;;  %10682 = vmatpush.xpose.msra.mxu1 %v12033_v20  ;;  %v12865_v20 = vld [vmem:[#allocation19_spill] sm:$0xff] }
0x2403   :  { %8000 = vadd.xlane.f32.xlu0 %v7999_v11  ;;  %v10403_v3 = vand.u32 4294901760, %v10402_v43  ;;  %v411_v61 = vadd.f32 %v12865_v20, %v389_v63  ;;  %v3624_v51 = vmul.f32 %v12158_v10, %v3623_v16  ;;  %v3291_v63 = vsel %vm12194_vm2, %v12129_v37, %v3287_v2  ;;  %v12874_v37 = vld [vmem:[#allocation57_spill] sm:$0xff]  ;;  %v12880_v20 = vld [vmem:[#allocation63_spill] sm:$0xff] }
0x2404   :  { %v253_v41 = vadd.f32 %v10987_v22, %v252_v12  ;;  %v3449_v19 = vadd.f32 %v12874_v37, %v3427_v36  ;;  %v3632_v43 = vand.u32 2147483648, %v12131_v52  ;;  %v12882_v16 = vld [vmem:[#allocation21_spill] sm:$0xff]  ;;  %vm1599_vm2 = vweird.f32 %v12048_v44 }
0x2405   :  { %10404 = vmatmul.f32.vlgmr.msrb.gmra.mxu2 %v10403_v3  ;;  %10524 = vmatmul.f32.vlgmr.msra.gmra.mxu3 %v12139_v49  ;;  %v3625_v35 = vadd.f32 %v12158_v10, %v3624_v51  ;;  %v12878_v3 = vld [vmem:[#allocation62_spill] sm:$0xff] }
0x2406   :  { %v257_v54 = vsel %vm256_vm10, %v10987_v22, %v253_v41  ;;  %v1088_v25 = vpop.permute.xlu2 %1087  ;;  %10611 = vmatpush.xpose.msrb.mxu2 %v12036_v6  ;;  %10765 = vmatpush.msra.mxu3 %v10764_v59  ;;  %v12868_v22 = vld [vmem:[#allocation59_spill] sm:$0xff]  ;;  %v3294_v6 = vand.u32 2147483648, %v12107_v15  ;;  %v3959_v15 = vmul.f32 %v12176_v31, %v12052_v4  ;;  %v12877_v59 = vld [vmem:[#allocation65_spill] sm:$0xff]  ;;  %vm3963_vm10 = vweird.f32 %v12052_v4 }
0x2407   :  { %v262_v7 = vsel %vm259_vm11, %v261_v45, %v257_v54  ;;  %10564 = vmatmul.f32.vlgmr.msrb.gmra.mxu0 %v10563_v13  ;;  %v3692_v5 = vadd.f32 %v12868_v22, %v12867_v57  ;;  %v3630_v13 = vand.u32 2147483647, %v12131_v52  ;;  %v3629_v28 = vsel %vm3628_vm7, %v12158_v10, %v3625_v35  ;;  %vm3965_vm11 = vmor %vm3963_vm10, %vm3964_vm9  ;;  %v12890_v35 = vld [vmem:[#allocation105_spill] sm:$0xff] }
0x2408   :  { %v413_v21 = vmul.f32 %v411_v61, %v262_v7  ;;  %10788 = vmatpush.msrb.mxu0 %v12124_v24  ;;  %v3295_v9 = vor.u32 1.1754944e-38, %v3294_v6  ;;  %v3960_v34 = vsub.f32 1.0, %v3959_v15  ;;  %v12881_v7 = vld [vmem:[#allocation22_spill] sm:$0xff]  ;;  %v3967_v24 = vand.u32 2147483647, %v12052_v4  ;;  %v12885_v6 = vld [vmem:[#allocation20_spill] sm:$0xff] }
0x2409   :  { %10590 = vmatmul.f32.vlgmr.msrb.gmra.mxu1 %v12116_v26  ;;  %vm3631_vm8 = vcmp.eq.f32.partialorder %v3630_v13, 8.507059e+37  ;;  %v1665_v10 = vadd.f32 %v12882_v16, %v12881_v7  ;;  %v1603_v15 = vand.u32 2147483647, %v12048_v44  ;;  %v12897_v16 = vld [vmem:[#allocation109_spill] sm:$0xff] }
0x240a   :  { %414 = vst.msk [vmem:[#allocation10] sm:$0xff] %vm85_vm0, %v413_v21  ;;  %10811 = vmatpush.msrb.mxu1 %v12114_v56  ;;  %v3296_v53 = vsel %vm3293_vm4, %v3295_v9, %v3291_v63  ;;  %v3961_v41 = vmul.f32 %v12176_v31, %v3960_v34  ;;  %v3969_v21 = vand.u32 2147483648, %v12052_v4  ;;  %vm3968_vm12 = vcmp.eq.f32.partialorder %v3967_v24, 8.507059e+37 }
0x240b   :  { %753 = vst.msk [vmem:[#allocation10] sm:$0xff] %vm752_vm13, %v750_v60  ;;  %5646 = vadd.xlane.f32.xlu0 %v5645_v40  ;;  %v12873_v60 = vld [vmem:[#allocation58_spill] sm:$0xff]  ;;  %v3451_v32 = vmul.f32 %v3449_v19, %v3296_v53  ;;  %v1689_v58 = vadd.f32 %v12885_v6, %v1665_v10  ;;  %v1605_v4 = vand.u32 2147483648, %v12048_v44  ;;  %vm1604_vm5 = vcmp.eq.f32.partialorder %v1603_v15, 8.507059e+37  ;;  %v12889_v53 = vld [vmem:[#allocation25_spill] sm:$0xff] }
0x240c   :  { %1091 = vst.msk [vmem:[#allocation10] sm:$0xff] %vm1090_vm14, %v1088_v25  ;;  %v3716_v23 = vadd.f32 %v12873_v60, %v3692_v5  ;;  %v3962_v25 = vadd.f32 %v12176_v31, %v3961_v41  ;;  %v3970_v5 = vor.u32 1.1754944e-38, %v3969_v21  ;;  %v12894_v41 = vld [vmem:[#allocation111_spill] sm:$0xff]  ;;  %v12898_v21 = vld [vmem:[#allocation108_spill] sm:$0xff] }
0x240d   :  { %10502 = vmatmul.f32.vlgmr.msra.gmra.mxu2 %v12139_v49  ;;  %10638 = vmatmul.f32.vlgmr.msrb.gmra.mxu3 %v10561_v8  ;;  %v10993_v49 = vpop.eup %10992  ;;  %v12875_v8 = vld [vmem:[#allocation61_spill] sm:$0xff]  ;;  %v1713_v51 = vadd.f32 %v12887_v46, %v1689_v58  ;;  %v1606_v9 = vor.u32 1.1754944e-38, %v1605_v4  ;;  %v6326_v58 = vand.u32 2147483647, %v12050_v1 }
0x240e   :  { %v1426_v0 = vpop.permute.xlu2 %1425  ;;  %10735 = vmatpush.msra.mxu2 %v12114_v56  ;;  %10859 = vmatpush.msrb.mxu3 %v12114_v56  ;;  %v3740_v11 = vadd.f32 %v12875_v8, %v3716_v23  ;;  %v12876_v56 = vld [vmem:[#allocation66_spill] sm:$0xff]  ;;  %v1595_v42 = vmul.f32 %v10993_v49, %v12048_v44  ;;  %v3966_v22 = vsel %vm3965_vm11, %v12176_v31, %v3962_v25  ;;  %vm1600_vm15 = vweird.f32 %v10993_v49  ;;  %v12888_v31 = vld [vmem:[#allocation24_spill] sm:$0xff]  ;;  %v10995_v44 = vpop.eup %10994 }
0x240f   :  { %1429 = vst.msk [vmem:[#allocation10] sm:$0xff] %vm1428_vm3, %v1426_v0  ;;  %10662 = vmatmul.f32.vlgmr.msra.gmra.mxu0 %v12116_v26  ;;  %v4029_v12 = vadd.f32 %v12877_v59, %v12876_v56  ;;  %v3971_v40 = vsel %vm3968_vm12, %v3970_v5, %v3966_v22  ;;  %vm1601_vm4 = vmor %vm1599_vm2, %vm1600_vm15  ;;  %v1737_v60 = vadd.f32 %v12888_v31, %v1713_v51  ;;  %v12891_v8 = vld [vmem:[#allocation104_spill] sm:$0xff]  ;;  %vm6323_vm10 = vweird.f32 %v10995_v44  ;;  %v12901_v31 = vld [vmem:[#allocation114_spill] sm:$0xff] }
0x2410   :  { %v3764_v47 = vadd.f32 %v12878_v3, %v3740_v11  ;;  %v1596_v54 = vsub.f32 1.0, %v1595_v42  ;;  %v6051_v11 = vadd.f32 %v12891_v8, %v12890_v35  ;;  %v12893_v3 = vld [vmem:[#allocation106_spill] sm:$0xff]  ;;  %v12899_v22 = vld [vmem:[#allocation112_spill] sm:$0xff]  ;;  %vm6322_vm11 = vweird.f32 %v12050_v1 }
0x2411   :  { %10684 = vmatmul.f32.vlgmr.msra.gmra.mxu1 %v12116_v26  ;;  %v3633_v26 = vor.u32 1.1754944e-38, %v3632_v43  ;;  %v4053_v45 = vadd.f32 %v12879_v18, %v4029_v12  ;;  %v1759_v37 = vadd.f32 %v12889_v53, %v1737_v60  ;;  %v6318_v43 = vmul.f32 %v10995_v44, %v12050_v1  ;;  %v12264_v18 = vpop.xlane.xlu0 %6989  ;;  %vm6324_vm12 = vmor %vm6322_vm11, %vm6323_vm10 }
0x2412   :  { %v3786_v61 = vadd.f32 %v12880_v20, %v3764_v47  ;;  %v1597_v57 = vmul.f32 %v10993_v49, %v1596_v54  ;;  %vm6327_vm15 = vcmp.eq.f32.partialorder %v6326_v58, 8.507059e+37  ;;  %v12910_v58 = vld [vmem:[#allocation97_spill] sm:$0xff] }
0x2413   :  { %v3634_v52 = vsel %vm3631_vm8, %v3633_v26, %v3629_v28  ;;  %v6319_v13 = vsub.f32 1.0, %v6318_v43  ;;  %v12895_v28 = vld [vmem:[#allocation110_spill] sm:$0xff] }
0x2414   :  { %3453 = vrot.lane.b32.xlu2 %v3451_v32, %s11185_s14  ;;  %v1598_v36 = vadd.f32 %v10993_v49, %v1597_v57  ;;  %v6388_v26 = vadd.f32 %v12895_v28, %v12894_v41 }
0x2415   :  { %10614 = vmatmul.f32.vlgmr.msrb.gmra.mxu2 %v12127_v55  ;;  %v12883_v55 = vld [vmem:[#allocation67_spill] sm:$0xff]  ;;  %v6320_v54 = vmul.f32 %v10995_v44, %v6319_v13  ;;  %v12904_v13 = vld [vmem:[#allocation46_spill] sm:$0xff] }
0x2416   :  { %10837 = vmatpush.msrb.mxu2 %v10762_v17  ;;  %v4077_v2 = vadd.f32 %v12883_v55, %v4053_v45  ;;  %v3788_v17 = vmul.f32 %v3786_v61, %v3634_v52  ;;  %v1602_v23 = vsel %vm1601_vm4, %v10993_v49, %v1598_v36  ;;  %v12892_v49 = vld [vmem:[#allocation103_spill] sm:$0xff]  ;;  %v6412_v10 = vadd.f32 %v12897_v16, %v6388_v26  ;;  %v12905_v26 = vld [vmem:[#allocation49_spill] sm:$0xff] }
0x2417   :  { %v1607_v0 = vsel %vm1604_vm5, %v1606_v9, %v1602_v23  ;;  %v6075_v56 = vadd.f32 %v12892_v49, %v6051_v11  ;;  %v12896_v45 = vld [vmem:[#allocation107_spill] sm:$0xff] }
0x2418   :  { %v4101_v30 = vadd.f32 %v12884_v50, %v4077_v2  ;;  %v1761_v19 = vmul.f32 %v1759_v37, %v1607_v0  ;;  %v6321_v50 = vadd.f32 %v10995_v44, %v6320_v54  ;;  %v6436_v5 = vadd.f32 %v12899_v22, %v6412_v10 }
0x2419   :  { %v6099_v47 = vadd.f32 %v12893_v3, %v6075_v56  ;;  %v12902_v56 = vld [vmem:[#allocation48_spill] sm:$0xff] }
0x241a   :  { %v4123_v29 = vadd.f32 %v12886_v48, %v4101_v30  ;;  %v6328_v30 = vand.u32 2147483648, %v12050_v1  ;;  %v6325_v36 = vsel %vm6324_vm12, %v10995_v44, %v6321_v50  ;;  %v12908_v50 = vld [vmem:[#allocation99_spill] sm:$0xff] }
0x241b   :  { %v6123_v52 = vadd.f32 %v12896_v45, %v6099_v47 }
0x241c   :  { %3790 = vrot.lane.b32.xlu2 %v3788_v17, %s11174_s24  ;;  %v4125_v63 = vmul.f32 %v4123_v29, %v3971_v40  ;;  %v12900_v40 = vld [vmem:[#allocation113_spill] sm:$0xff]  ;;  %v12274_v29 = vpop.xlane.xlu0 %4630  ;;  %v6329_v4 = vor.u32 1.1754944e-38, %v6328_v30  ;;  %v12909_v30 = vld [vmem:[#allocation98_spill] sm:$0xff] }
0x241d   :  { %v6145_v55 = vadd.f32 %v12898_v21, %v6123_v52  ;;  %v6460_v48 = vadd.f32 %v12900_v40, %v6436_v5 }
0x241f   :  { %v6482_v60 = vadd.f32 %v12901_v31, %v6460_v48 }
0x2424   :  { %4127 = vrot.lane.b32.xlu2 %v4125_v63, %s11186_s15  ;;  %v6330_v63 = vsel %vm6327_vm15, %v6329_v4, %v6325_v36  ;;  %vm1766_vm15 = vcmask 162944  }
0x2425   :  { %v6484_v9 = vmul.f32 %v6482_v60, %v6330_v63  ;;  %v12911_v63 = vld [vmem:[#allocation100_spill] sm:$0xff] }
0x242c   :  { %1763 = vrot.lane.b32.xlu2 %v1761_v19, %s11187_s16  ;;  %v12281_v19 = vpop.xlane.xlu0 %2268 }
0x2447   :  { %v5978_v34 = vpop.xlane.xlu2 %5977 }
0x2448   :  { %10996 = vrcp.f32 %v5978_v34  ;;  %v5990_v61 = vand.u32 2147483648, %v5978_v34  ;;  %v5988_v25 = vand.u32 2147483647, %v5978_v34  ;;  %vm5984_vm7 = vweird.f32 %v5978_v34 }
0x244a   :  { %v5991_v2 = vor.u32 1.1754944e-38, %v5990_v61  ;;  %vm5989_vm9 = vcmp.eq.f32.partialorder %v5988_v25, 8.507059e+37 }
0x244e   :  { %v10997_v59 = vpop.eup %10996 }
0x244f   :  { %v5980_v12 = vmul.f32 %v10997_v59, %v5978_v34  ;;  %v12259_v32 = vpop.xlane.xlu2 %1930  ;;  %vm5985_vm6 = vweird.f32 %v10997_v59 }
0x2450   :  { %vm5986_vm8 = vmor %vm5984_vm7, %vm5985_vm6 }
0x2451   :  { %v5981_v42 = vsub.f32 1.0, %v5980_v12 }
0x2453   :  { %v5982_v20 = vmul.f32 %v10997_v59, %v5981_v42 }
0x2455   :  { %v5983_v7 = vadd.f32 %v10997_v59, %v5982_v20  ;;  %v12906_v20 = vld [vmem:[#allocation50_spill] sm:$0xff] }
0x2457   :  { %v10023_v24 = vpop.xlane.xlu2 %10022  ;;  %v5987_v17 = vsel %vm5986_vm8, %v10997_v59, %v5983_v7  ;;  %v12903_v59 = vld [vmem:[#allocation47_spill] sm:$0xff] }
0x2458   :  { %10998 = vrcp.f32 %v10023_v24  ;;  %v5992_v57 = vsel %vm5989_vm9, %v5991_v2, %v5987_v17  ;;  %v10035_v0 = vand.u32 2147483648, %v10023_v24  ;;  %v10033_v53 = vand.u32 2147483647, %v10023_v24 }
0x2459   :  { %v6147_v6 = vmul.f32 %v6145_v55, %v5992_v57  ;;  %vm10029_vm4 = vweird.f32 %v10023_v24  ;;  %v3020_v12 = vadd.f32 %v12903_v59, %v12902_v56  ;;  %v12907_v55 = vld [vmem:[#allocation51_spill] sm:$0xff]  ;;  %v5716_v57 = vadd.f32 %v12909_v30, %v12908_v50 }
0x245a   :  { %v10036_v34 = vor.u32 1.1754944e-38, %v10035_v0  ;;  %vm10034_vm6 = vcmp.eq.f32.partialorder %v10033_v53, 8.507059e+37 }
0x245b   :  { %6149 = vrot.lane.b32.xlu0 %v6147_v6, %s11185_s14  ;;  %v3044_v3 = vadd.f32 %v12904_v13, %v3020_v12  ;;  %v5740_v40 = vadd.f32 %v12910_v58, %v5716_v57 }
0x245d   :  { %v3068_v45 = vadd.f32 %v12905_v26, %v3044_v3  ;;  %v5764_v31 = vadd.f32 %v12911_v63, %v5740_v40  ;;  %v9684_v63 = vsel %vm239_vm1, %v11986_v62, 0.0  ;;  %v9012_v62 = vpop.xlane.xlu1 %9011 }
0x245e   :  { %v10999_v46 = vpop.eup %10998 }
0x245f   :  { %v10025_v51 = vmul.f32 %v10999_v46, %v10023_v24  ;;  %v12277_v15 = vpop.xlane.xlu2 %7663  ;;  %vm10030_vm2 = vweird.f32 %v10999_v46  ;;  %v3092_v61 = vadd.f32 %v12906_v20, %v3068_v45 }
0x2460   :  { %vm10031_vm5 = vmor %vm10029_vm4, %vm10030_vm2 }
0x2461   :  { %v10026_v23 = vsub.f32 1.0, %v10025_v51  ;;  %v3114_v2 = vadd.f32 %v12907_v55, %v3092_v61 }
0x2463   :  { %v10027_v1 = vmul.f32 %v10999_v46, %v10026_v23  ;;  %6486 = vrot.lane.b32.xlu0 %v6484_v9, %s11174_s24 }
0x2465   :  { %v10028_v37 = vadd.f32 %v10999_v46, %v10027_v1 }
0x2467   :  { %v12283_v44 = vpop.xlane.xlu2 %5304  ;;  %v10032_v35 = vsel %vm10031_vm5, %v10999_v46, %v10028_v37  ;;  %v12912_v37 = vld [vmem:[#allocation101_spill] sm:$0xff] }
0x2468   :  { %v10037_v8 = vsel %vm10034_vm6, %v10036_v34, %v10032_v35  ;;  %v5788_v34 = vadd.f32 %v12912_v37, %v5764_v31  ;;  %v12916_v31 = vld [vmem:[#allocation128_spill] sm:$0xff] }
0x2469   :  { %v12286_v11 = vmul.f32 %v12063_v33, %v10037_v8 }
0x246e   :  { %v12288_v43 = vpop.xlane.xlu0 %10359 }
0x246f   :  { %v2951_v49 = vpop.xlane.xlu2 %2950  ;;  %vm10366_vm6 = vweird.f32 %v12288_v43 }
0x2470   :  { %11000 = vrcp.f32 %v2951_v49  ;;  %v2963_v52 = vand.u32 2147483648, %v2951_v49  ;;  %v2961_v25 = vand.u32 2147483647, %v2951_v49  ;;  %vm2957_vm8 = vweird.f32 %v2951_v49 }
0x2471   :  { %11002 = vrcp.f32 %v12288_v43 }
0x2472   :  { %v2964_v10 = vor.u32 1.1754944e-38, %v2963_v52  ;;  %vm2962_vm10 = vcmp.eq.f32.partialorder %v2961_v25, 8.507059e+37  ;;  %v10370_v52 = vand.u32 2147483647, %v12288_v43 }
0x2476   :  { %v11001_v47 = vpop.eup %11000  ;;  %v12293_v42 = vpop.xlane.xlu0 %8000 }
0x2477   :  { %v2953_v41 = vmul.f32 %v11001_v47, %v2951_v49  ;;  %v3454_v28 = vpop.permute.xlu2 %3453  ;;  %vm2958_vm7 = vweird.f32 %v11001_v47  ;;  %v12298_v16 = vpop.eup %11002 }
0x2478   :  { %vm2959_vm9 = vmor %vm2957_vm8, %vm2958_vm7  ;;  %v10362_v5 = vmul.f32 %v12298_v16, %v12288_v43  ;;  %vm10367_vm2 = vweird.f32 %v12298_v16  ;;  %vm10371_vm8 = vcmp.eq.f32.partialorder %v10370_v52, 8.507059e+37  ;;  %v12920_v52 = vld [vmem:[#allocation124_spill] sm:$0xff] }
0x2479   :  { %v2954_v33 = vsub.f32 1.0, %v2953_v41  ;;  %vm10368_vm7 = vmor %vm10366_vm6, %vm10367_vm2 }
0x247a   :  { %v10363_v36 = vsub.f32 1.0, %v10362_v5 }
0x247b   :  { %v2955_v54 = vmul.f32 %v11001_v47, %v2954_v33 }
0x247c   :  { %v10455_v46 = vpop.f32.mrf.mxu0  ;;  %v10364_v1 = vmul.f32 %v12298_v16, %v10363_v36  ;;  %v12914_v36 = vld [vmem:[#allocation115_spill] sm:$0xff] }
0x247d   :  { %v2956_v7 = vadd.f32 %v11001_v47, %v2955_v54 }
0x247e   :  { %v5647_v21 = vpop.xlane.xlu0 %5646  ;;  %v10479_v35 = vpop.f32.mrf.mxu1  ;;  %v10365_v13 = vadd.f32 %v12298_v16, %v10364_v1 }
0x247f   :  { %v2960_v24 = vsel %vm2959_vm9, %v11001_v47, %v2956_v7  ;;  %11004 = vrcp.f32 %v5647_v21  ;;  %v3791_v17 = vpop.permute.xlu2 %3790  ;;  %v5659_v0 = vand.u32 2147483648, %v5647_v21  ;;  %v5657_v49 = vand.u32 2147483647, %v5647_v21  ;;  %v12913_v47 = vld [vmem:[#allocation102_spill] sm:$0xff] }
0x2480   :  { %v2965_v22 = vsel %vm2962_vm10, %v2964_v10, %v2960_v24  ;;  %v10431_v23 = vpop.f32.mrf.mxu3  ;;  %vm5653_vm12 = vweird.f32 %v5647_v21  ;;  %v5810_v41 = vadd.f32 %v12913_v47, %v5788_v34  ;;  %v10369_v54 = vsel %vm10368_vm7, %v12298_v16, %v10365_v13  ;;  %v12919_v34 = vld [vmem:[#allocation148_spill] sm:$0xff] }
0x2481   :  { %v3116_v6 = vmul.f32 %v3114_v2, %v2965_v22  ;;  %v5660_v12 = vor.u32 1.1754944e-38, %v5659_v0  ;;  %vm5658_vm5 = vcmp.eq.f32.partialorder %v5657_v49, 8.507059e+37  ;;  %v12918_v0 = vld [vmem:[#allocation38_spill] sm:$0xff]  ;;  %11006 = vrcp.f32 %v9012_v62 }
0x2482   :  { %11008 = vrcp.f32 %v12264_v18  ;;  %vm9018_vm10 = vweird.f32 %v9012_v62  ;;  %v9022_v47 = vand.u32 2147483647, %v9012_v62 }
0x2483   :  { %3118 = vst.msk [vmem:[#allocation10 + $0x8] sm:$0xff] %vm85_vm0, %v3116_v6 }
0x2484   :  { %3456 = vst.msk [vmem:[#allocation10 + $0x8] sm:$0xff] %vm752_vm13, %v3454_v28  ;;  %v10372_v28 = vand.u32 2147483648, %v12288_v43  ;;  %v10565_v10 = vpop.f32.mrf.mxu0 }
0x2485   :  { %v11005_v48 = vpop.eup %11004  ;;  %3793 = vst.msk [vmem:[#allocation10 + $0x8] sm:$0xff] %vm1090_vm14, %v3791_v17  ;;  %v10566_v55 = vadd.f32 %v12060_v38, %v10565_v10  ;;  %v12923_v10 = vld [vmem:[#allocation122_spill] sm:$0xff] }
0x2486   :  { %v5649_v4 = vmul.f32 %v11005_v48, %v5647_v21  ;;  %vm5654_vm11 = vweird.f32 %v11005_v48  ;;  %v10373_v7 = vor.u32 1.1754944e-38, %v10372_v28  ;;  %v10591_v24 = vpop.f32.mrf.mxu1 }
0x2487   :  { %v4128_v51 = vpop.permute.xlu2 %4127  ;;  %vm5655_vm4 = vmor %vm5653_vm12, %vm5654_vm11  ;;  %v10592_v50 = vadd.f32 %v10591_v24, %v10566_v55  ;;  %vm9023_vm12 = vcmp.eq.f32.partialorder %v9022_v47, 8.507059e+37 }
0x2488   :  { %v5650_v60 = vsub.f32 1.0, %v5649_v4  ;;  %4130 = vst.msk [vmem:[#allocation10 + $0x8] sm:$0xff] %vm1428_vm3, %v4128_v51  ;;  %v10405_v9 = vpop.f32.mrf.mxu2  ;;  %v10525_v21 = vpop.f32.mrf.mxu3  ;;  %v10374_v17 = vsel %vm10371_vm8, %v10373_v7, %v10369_v54  ;;  %v6651_v4 = vsel %vm239_vm1, %v12914_v36, 0.0  ;;  %v12922_v54 = vld [vmem:[#allocation150_spill] sm:$0xff] }
0x2489   :  { %v10432_v53 = vadd.f32 %v10431_v23, %v10405_v9  ;;  %v12917_v23 = vld [vmem:[#allocation83_spill] sm:$0xff] }
0x248a   :  { %v5651_v8 = vmul.f32 %v11005_v48, %v5650_v60  ;;  %v7325_v60 = vsel %vm239_vm1, %v12916_v31, 0.0  ;;  %v4966_v9 = vsel %vm239_vm1, %v12917_v23, 0.0  ;;  %v12931_v31 = vld [vmem:[#allocation33_spill] sm:$0xff] }
0x248b   :  { %v10456_v56 = vadd.f32 %v10455_v46, %v10432_v53  ;;  %v12915_v46 = vld [vmem:[#allocation70_spill] sm:$0xff]  ;;  %v2605_v53 = vsel %vm239_vm1, %v12918_v0, 0.0 }
0x248c   :  { %v5652_v59 = vadd.f32 %v11005_v48, %v5651_v8  ;;  %v10663_v16 = vpop.f32.mrf.mxu0  ;;  %v4292_v51 = vsel %vm239_vm1, %v12915_v46, 0.0  ;;  %v11007_v8 = vpop.eup %11006 }
0x248d   :  { %v10480_v3 = vadd.f32 %v10479_v35, %v10456_v56  ;;  %v8341_v35 = vsel %vm239_vm1, %v12919_v34, 0.0  ;;  %v9014_v49 = vmul.f32 %v11007_v8, %v9012_v62  ;;  %vm9019_vm9 = vweird.f32 %v11007_v8  ;;  %v11009_v13 = vpop.eup %11008  ;;  %v12936_v34 = vld [vmem:[#allocation41_spill] sm:$0xff] }
0x248e   :  { %v5656_v26 = vsel %vm5655_vm4, %v11005_v48, %v5652_v59  ;;  %v10685_v58 = vpop.f32.mrf.mxu1  ;;  %vm9020_vm11 = vmor %vm9018_vm10, %vm9019_vm9  ;;  %vm6997_vm2 = vweird.f32 %v11009_v13  ;;  %vm6996_vm4 = vweird.f32 %v12264_v18 }
0x248f   :  { %v5661_v45 = vsel %vm5658_vm5, %v5660_v12, %v5656_v26  ;;  %v1764_v33 = vpop.permute.xlu2 %1763  ;;  %v9015_v56 = vsub.f32 1.0, %v9014_v49  ;;  %vm6998_vm5 = vmor %vm6996_vm4, %vm6997_vm2  ;;  %v12938_v49 = vld [vmem:[#allocation29_spill] sm:$0xff] }
0x2490   :  { %1767 = vst.msk [vmem:[#allocation10] sm:$0xff] %vm1766_vm15, %v1764_v33  ;;  %v10503_v20 = vpop.f32.mrf.mxu2  ;;  %v5812_v61 = vmul.f32 %v5810_v41, %v5661_v45  ;;  %v10639_v22 = vpop.f32.mrf.mxu3  ;;  %v6992_v41 = vmul.f32 %v11009_v13, %v12264_v18 }
0x2491   :  { %v10504_v25 = vadd.f32 %v10503_v20, %v10480_v3  ;;  %v9016_v59 = vmul.f32 %v11007_v8, %v9015_v56  ;;  %v9024_v3 = vand.u32 2147483648, %v9012_v62  ;;  %v12921_v20 = vld [vmem:[#allocation123_spill] sm:$0xff] }
0x2492   :  { %5814 = vst.msk [vmem:[#allocation10 + $0x10] sm:$0xff] %vm85_vm0, %v5812_v61  ;;  %v6993_v33 = vsub.f32 1.0, %v6992_v41  ;;  %v7062_v61 = vadd.f32 %v12921_v20, %v12920_v52  ;;  %v12941_v41 = vld [vmem:[#allocation79_spill] sm:$0xff]  ;;  %v12944_v20 = vld [vmem:[#allocation30_spill] sm:$0xff] }
0x2493   :  { %v10526_v2 = vadd.f32 %v10525_v21, %v10504_v25  ;;  %v9017_v12 = vadd.f32 %v11007_v8, %v9016_v59  ;;  %v9025_v26 = vor.u32 1.1754944e-38, %v9024_v3  ;;  %v12939_v59 = vld [vmem:[#allocation32_spill] sm:$0xff]  ;;  %v12940_v3 = vld [vmem:[#allocation71_spill] sm:$0xff] }
0x2494   :  { %v6994_v7 = vmul.f32 %v11009_v13, %v6993_v33  ;;  %v7086_v21 = vadd.f32 %v12923_v10, %v7062_v61  ;;  %v12946_v10 = vld [vmem:[#allocation86_spill] sm:$0xff] }
0x2495   :  { %v12323_v43 = vmul.f32 %v10526_v2, %v10374_v17  ;;  %v9021_v28 = vsel %vm9020_vm11, %v11007_v8, %v9017_v12  ;;  %v7002_v2 = vand.u32 2147483648, %v12264_v18  ;;  %v7000_v17 = vand.u32 2147483647, %v12264_v18  ;;  %v12927_v18 = vld [vmem:[#allocation28_spill] sm:$0xff] }
0x2496   :  { %v9026_v45 = vsel %vm9023_vm12, %v9025_v26, %v9021_v28  ;;  %v6995_v55 = vadd.f32 %v11009_v13, %v6994_v7  ;;  %v12942_v28 = vld [vmem:[#allocation78_spill] sm:$0xff] }
0x2497   :  { %v9180_v25 = vmul.f32 %v12922_v54, %v9026_v45  ;;  %vm7001_vm6 = vcmp.eq.f32.partialorder %v7000_v17, 8.507059e+37  ;;  %v4703_v26 = vadd.f32 %v12942_v28, %v12941_v41  ;;  %v12943_v45 = vld [vmem:[#allocation116_spill] sm:$0xff]  ;;  %v12961_v41 = vld [vmem:[#allocation81_spill] sm:$0xff] }
0x2498   :  { %v10615_v30 = vpop.f32.mrf.mxu2 }
0x2499   :  { %v10616_v57 = vadd.f32 %v10615_v30, %v10592_v50  ;;  %v12925_v50 = vld [vmem:[#allocation126_spill] sm:$0xff] }
0x249b   :  { %v10640_v5 = vadd.f32 %v10639_v22, %v10616_v57  ;;  %v6999_v57 = vsel %vm6998_vm5, %v11009_v13, %v6995_v55  ;;  %v7003_v22 = vor.u32 1.1754944e-38, %v7002_v2 }
0x249d   :  { %v10664_v6 = vadd.f32 %v10663_v16, %v10640_v5  ;;  %v7004_v5 = vsel %vm7001_vm6, %v7003_v22, %v6999_v57  ;;  %v12926_v16 = vld [vmem:[#allocation127_spill] sm:$0xff]  ;;  %v12950_v22 = vld [vmem:[#allocation77_spill] sm:$0xff] }
0x249f   :  { %v10686_v40 = vadd.f32 %v10685_v58, %v10664_v6 }
0x24a1   :  { %v12325_v48 = vmul.f32 0.5, %v10686_v40 }
0x24a3   :  { %v10689_v38 = vsel %vm239_vm1, %v12325_v48, -inf }
0x24a4   :  { %10690 = vmax.xlane.f32.xlu1 %v10689_v38 }
0x24ac   :  { %6652 = vadd.xlane.f32.xlu1 %v6651_v4  ;;  %v12928_v4 = vld [vmem:[#allocation27_spill] sm:$0xff] }
0x24ad   :  { %v2003_v46 = vadd.f32 %v12928_v4, %v12927_v18 }
0x24b4   :  { %4293 = vadd.xlane.f32.xlu1 %v4292_v51  ;;  %v12929_v51 = vld [vmem:[#allocation26_spill] sm:$0xff] }
0x24bc   :  { %9685 = vadd.xlane.f32.xlu1 %v9684_v63  ;;  %v2027_v63 = vadd.f32 %v12929_v51, %v2003_v46  ;;  %v12954_v51 = vld [vmem:[#allocation42_spill] sm:$0xff] }
0x24be   :  { %v2051_v56 = vadd.f32 %v12938_v49, %v2027_v63  ;;  %v12960_v49 = vld [vmem:[#allocation130_spill] sm:$0xff] }
0x24c0   :  { %v2075_v61 = vadd.f32 %v12944_v20, %v2051_v56  ;;  %v12964_v20 = vld [vmem:[#allocation91_spill] sm:$0xff] }
0x24c4   :  { %7326 = vadd.xlane.f32.xlu1 %v7325_v60 }
0x24cc   :  { %4967 = vadd.xlane.f32.xlu1 %v4966_v9  ;;  %v12932_v9 = vld [vmem:[#allocation73_spill] sm:$0xff] }
0x24cd   :  { %v6150_v1 = vpop.permute.xlu0 %6149 }
0x24ce   :  { %6152 = vst.msk [vmem:[#allocation10 + $0x10] sm:$0xff] %vm752_vm13, %v6150_v1  ;;  %v12933_v1 = vld [vmem:[#allocation72_spill] sm:$0xff] }
0x24cf   :  { %v4366_v0 = vadd.f32 %v12933_v1, %v12932_v9  ;;  %v12957_v1 = vld [vmem:[#allocation120_spill] sm:$0xff] }
0x24d1   :  { %v4390_v47 = vadd.f32 %v12940_v3, %v4366_v0 }
0x24d4   :  { %2606 = vadd.xlane.f32.xlu1 %v2605_v53  ;;  %v12934_v53 = vld [vmem:[#allocation118_spill] sm:$0xff] }
0x24d5   :  { %v6487_v37 = vpop.permute.xlu0 %6486 }
0x24d6   :  { %6489 = vst.msk [vmem:[#allocation10 + $0x10] sm:$0xff] %vm1090_vm14, %v6487_v37  ;;  %v12935_v37 = vld [vmem:[#allocation117_spill] sm:$0xff] }
0x24d7   :  { %v6725_v62 = vadd.f32 %v12935_v37, %v12934_v53 }
0x24d9   :  { %v6749_v33 = vadd.f32 %v12943_v45, %v6725_v62 }
0x24dc   :  { %8342 = vadd.xlane.f32.xlu1 %v8341_v35  ;;  %v12937_v35 = vld [vmem:[#allocation40_spill] sm:$0xff] }
0x24dd   :  { %v2679_v8 = vadd.f32 %v12937_v35, %v12936_v34  ;;  %v12958_v34 = vld [vmem:[#allocation80_spill] sm:$0xff] }
0x24f5   :  { %8845 = vrot.lane.b32.xlu1 %v12055_v14, %s11185_s14  ;;  %v12924_v14 = vld [vmem:[#allocation125_spill] sm:$0xff] }
0x24f6   :  { %v7110_v24 = vadd.f32 %v12924_v14, %v7086_v21  ;;  %v12947_v21 = vld [vmem:[#allocation85_spill] sm:$0xff]  ;;  %v12948_v14 = vld [vmem:[#allocation35_spill] sm:$0xff] }
0x24f7   :  { %v5040_v55 = vadd.f32 %v12947_v21, %v12946_v10 }
0x24f8   :  { %v7134_v30 = vadd.f32 %v12925_v50, %v7110_v24 }
0x24fa   :  { %v7156_v6 = vadd.f32 %v12926_v16, %v7134_v30  ;;  %v12949_v30 = vld [vmem:[#allocation74_spill] sm:$0xff]  ;;  %v12951_v16 = vld [vmem:[#allocation119_spill] sm:$0xff] }
0x24fb   :  { %v4414_v57 = vadd.f32 %v12949_v30, %v4390_v47  ;;  %v12970_v30 = vld [vmem:[#allocation129_spill] sm:$0xff] }
0x24fc   :  { %v7158_v58 = vmul.f32 %v7156_v6, %v7004_v5  ;;  %v4727_v5 = vadd.f32 %v12950_v22, %v4703_v26  ;;  %v6773_v6 = vadd.f32 %v12951_v16, %v6749_v33  ;;  %v12962_v26 = vld [vmem:[#allocation87_spill] sm:$0xff]  ;;  %v12963_v33 = vld [vmem:[#allocation92_spill] sm:$0xff] }
0x24fd   :  { %9182 = vrot.lane.b32.xlu1 %v9180_v25, %s11174_s24  ;;  %v12945_v25 = vld [vmem:[#allocation39_spill] sm:$0xff] }
0x24fe   :  { %v2703_v7 = vadd.f32 %v12945_v25, %v2679_v8  ;;  %v6797_v0 = vadd.f32 %v12957_v1, %v6773_v6  ;;  %v4751_v35 = vadd.f32 %v12958_v34, %v4727_v5  ;;  %v12959_v8 = vld [vmem:[#allocation131_spill] sm:$0xff]  ;;  %v12965_v25 = vld [vmem:[#allocation137_spill] sm:$0xff]  ;;  %v12971_v5 = vld [vmem:[#allocation44_spill] sm:$0xff] }
0x24ff   :  { %v7399_v56 = vadd.f32 %v12960_v49, %v12959_v8  ;;  %v12972_v6 = vld [vmem:[#allocation88_spill] sm:$0xff]  ;;  %v12978_v49 = vld [vmem:[#allocation89_spill] sm:$0xff] }
0x2500   :  { %v2727_v63 = vadd.f32 %v12954_v51, %v2703_v7  ;;  %v4775_v28 = vadd.f32 %v12961_v41, %v4751_v35  ;;  %v12966_v7 = vld [vmem:[#allocation136_spill] sm:$0xff]  ;;  %v12980_v41 = vld [vmem:[#allocation133_spill] sm:$0xff] }
0x2501   :  { %v7736_v10 = vadd.f32 %v12966_v7, %v12965_v25  ;;  %v12977_v34 = vld [vmem:[#allocation132_spill] sm:$0xff] }
0x2502   :  { %v12447_v16 = vadd.f32 %v12971_v5, %v2727_v63 }
0x2505   :  { %9519 = vrot.lane.b32.xlu1 %v12058_v39, %s11186_s15  ;;  %v12930_v39 = vld [vmem:[#allocation34_spill] sm:$0xff] }
0x2506   :  { %v2341_v60 = vadd.f32 %v12931_v31, %v12930_v39  ;;  %v12955_v39 = vld [vmem:[#allocation75_spill] sm:$0xff] }
0x2507   :  { %v4438_v31 = vadd.f32 %v12955_v39, %v4414_v57  ;;  %v7423_v57 = vadd.f32 %v12970_v30, %v7399_v56  ;;  %v12974_v39 = vld [vmem:[#allocation90_spill] sm:$0xff] }
0x2508   :  { %v2365_v12 = vadd.f32 %v12939_v59, %v2341_v60  ;;  %v12956_v60 = vld [vmem:[#allocation84_spill] sm:$0xff] }
0x2509   :  { %v5064_v9 = vadd.f32 %v12956_v60, %v5040_v55  ;;  %v7447_v35 = vadd.f32 %v12977_v34, %v7423_v57 }
0x250a   :  { %v2389_v24 = vadd.f32 %v12948_v14, %v2365_v12 }
0x250b   :  { %v5088_v45 = vadd.f32 %v12962_v26, %v5064_v9  ;;  %v12975_v9 = vld [vmem:[#allocation135_spill] sm:$0xff] }
0x250c   :  { %v7760_v1 = vadd.f32 %v12975_v9, %v7736_v10 }
0x250d   :  { %7160 = vrot.lane.b32.xlu1 %v7158_v58, %s11187_s16 }
0x2517   :  { %v10691_v40 = vpop.xlane.xlu1 %10690 }
0x2518   :  { %v10692_v38 = vsub.f32 %v12325_v48, %v10691_v40  ;;  %v12952_v40 = vld [vmem:[#allocation31_spill] sm:$0xff] }
0x251a   :  { %v10693_v36 = vmul.f32 1.442695, %v10692_v38  ;;  %v12408_v38 = vadd.f32 %v12952_v40, %v2075_v61  ;;  %v5377_v61 = vadd.f32 %v12964_v20, %v12963_v33  ;;  %v5112_v40 = vadd.f32 %v12972_v6, %v5088_v45  ;;  %v12983_v20 = vld [vmem:[#allocation138_spill] sm:$0xff] }
0x251c   :  { %11010 = vpow2.f32 %v10693_v36  ;;  %v12953_v36 = vld [vmem:[#allocation36_spill] sm:$0xff]  ;;  %v5401_v60 = vadd.f32 %v12974_v39, %v5377_v61  ;;  %v12465_v56 = vadd.f32 %v12978_v49, %v5112_v40  ;;  %v7784_v61 = vadd.f32 %v12983_v20, %v7760_v1  ;;  %v12987_v40 = vld [vmem:[#allocation134_spill] sm:$0xff] }
0x251d   :  { %v12411_v18 = vadd.f32 %v12953_v36, %v2389_v24 }
0x251f   :  { %v12369_v23 = vpop.xlane.xlu1 %6652 }
0x2520   :  { %11012 = vrcp.f32 %v12369_v23  ;;  %v6665_v37 = vand.u32 2147483648, %v12369_v23  ;;  %v6663_v12 = vand.u32 2147483647, %v12369_v23  ;;  %vm6659_vm8 = vweird.f32 %v12369_v23 }
0x2521   :  { %11014 = vrcp.f32 %v12259_v32 }
0x2522   :  { %v12376_v48 = vpop.eup %11010  ;;  %vm6664_vm10 = vcmp.eq.f32.partialorder %v6663_v12, 8.507059e+37 }
0x2523   :  { %v10717_v13 = vsel %vm239_vm1, %v12376_v48, 0  ;;  %v10695_v33 = vsel %vm239_vm1, %v12376_v48, 0.0  ;;  %vm1937_vm1 = vweird.f32 %v12259_v32 }
0x2524   :  { %v12389_v52 = vand.u32 4294901760, %v10717_v13 }
0x2526   :  { %v11013_v54 = vpop.eup %11012  ;;  %v10737_v2 = vsub.f32 %v10717_v13, %v12389_v52  ;;  %10767 = vmatmul.f32.vlgmr.msra.gmra.mxu3 %v12389_v52 }
0x2527   :  { %v6655_v17 = vmul.f32 %v11013_v54, %v12369_v23  ;;  %v12399_v50 = vpop.xlane.xlu1 %4293  ;;  %v12405_v58 = vpop.eup %11014  ;;  %vm6660_vm7 = vweird.f32 %v11013_v54  ;;  %v12969_v23 = vld [vmem:[#allocation121_spill] sm:$0xff] }
0x2528   :  { %11016 = vrcp.f32 %v12399_v50  ;;  %10791 = vmatmul.f32.vlgmr.msrb.gmra.mxu0 %v10737_v2  ;;  %v10738_v46 = vand.u32 4294901760, %v10737_v2  ;;  %v1933_v59 = vmul.f32 %v12405_v58, %v12259_v32  ;;  %vm12433_vm9 = vmor %vm6659_vm8, %vm6660_vm7  ;;  %v6819_v55 = vadd.f32 %v12969_v23, %v6797_v0  ;;  %v12984_v23 = vld [vmem:[#allocation139_spill] sm:$0xff] }
0x2529   :  { %v6656_v4 = vsub.f32 1.0, %v6655_v17  ;;  %11018 = vrcp.f32 %v12274_v29  ;;  %v4306_v63 = vand.u32 2147483648, %v12399_v50  ;;  %v4304_v8 = vand.u32 2147483647, %v12399_v50 }
0x252a   :  { %10815 = vmatmul.f32.vlgmr.msrb.gmra.mxu1 %v10738_v46  ;;  %v10739_v62 = vsub.f32 %v10737_v2, %v10738_v46  ;;  %v6666_v2 = vor.u32 1.1754944e-38, %v6665_v37  ;;  %v1934_v22 = vsub.f32 1.0, %v1933_v59  ;;  %v12973_v46 = vld [vmem:[#allocation76_spill] sm:$0xff]  ;;  %v12976_v37 = vld [vmem:[#allocation82_spill] sm:$0xff]  ;;  %vm4300_vm12 = vweird.f32 %v12399_v50 }
0x252b   :  { %v6657_v53 = vmul.f32 %v11013_v54, %v6656_v4  ;;  %v4460_v51 = vadd.f32 %v12973_v46, %v4438_v31  ;;  %vm1938_vm4 = vweird.f32 %v12405_v58  ;;  %vm4305_vm5 = vcmp.eq.f32.partialorder %v4304_v8, 8.507059e+37 }
0x252c   :  { %v10740_v3 = vand.u32 4294901760, %v10739_v62  ;;  %v12458_v62 = vadd.f32 %v12976_v37, %v4775_v28  ;;  %v1935_v31 = vmul.f32 %v12405_v58, %v1934_v22  ;;  %v7471_v28 = vadd.f32 %v12980_v41, %v7447_v35  ;;  %vm12500_vm6 = vmor %vm1937_vm1, %vm1938_vm4 }
0x252d   :  { %v6658_v13 = vadd.f32 %v11013_v54, %v6657_v53  ;;  %v7676_v22 = vand.u32 2147483648, %v12277_v15 }
0x252e   :  { %v11017_v47 = vpop.eup %11016  ;;  %10861 = vmatmul.f32.vlgmr.msrb.gmra.mxu3 %v12389_v52  ;;  %10741 = vmatmul.f32.vlgmr.msra.gmra.mxu2 %v10740_v3  ;;  %v1936_v21 = vadd.f32 %v12405_v58, %v1935_v31 }
0x252f   :  { %v4296_v14 = vmul.f32 %v11017_v47, %v12399_v50  ;;  %v12440_v24 = vpop.xlane.xlu1 %9685  ;;  %v6662_v17 = vsel %vm12433_vm9, %v11013_v54, %v6658_v13  ;;  %v12453_v0 = vpop.eup %11018  ;;  %vm4301_vm11 = vweird.f32 %v11017_v47  ;;  %v12979_v13 = vld [vmem:[#allocation93_spill] sm:$0xff]  ;;  %v4307_v50 = vor.u32 1.1754944e-38, %v4306_v63 }
0x2530   :  { %11020 = vrcp.f32 %v12440_v24  ;;  %v6667_v4 = vsel %vm6664_vm10, %v6666_v2, %v6662_v17  ;;  %v12470_v3 = vadd.f32 %v12979_v13, %v5401_v60  ;;  %v4633_v26 = vmul.f32 %v12453_v0, %v12274_v29  ;;  %vm12476_vm2 = vmor %vm4300_vm12, %vm4301_vm11 }
0x2531   :  { %v4297_v36 = vsub.f32 1.0, %v4296_v14  ;;  %v6821_v54 = vmul.f32 %v6819_v55, %v6667_v4  ;;  %11022 = vrcp.f32 %v12277_v15  ;;  %v7808_v55 = vadd.f32 %v12984_v23, %v7784_v61 }
0x2532   :  { %11024 = vrcp.f32 %v12281_v19  ;;  %v1943_v2 = vand.u32 2147483648, %v12259_v32  ;;  %v4634_v17 = vsub.f32 1.0, %v4633_v26  ;;  %v9698_v6 = vand.u32 2147483648, %v12440_v24 }
0x2533   :  { %v4298_v53 = vmul.f32 %v11017_v47, %v4297_v36  ;;  %6823 = vrot.lane.b32.xlu0 %v6821_v54, %s11186_s15  ;;  %v12507_v36 = vadd.f32 %v12987_v40, %v7471_v28  ;;  %v1940_v46 = vsel %vm12500_vm6, %v12405_v58, %v1936_v21  ;;  %vm9692_vm8 = vweird.f32 %v12440_v24 }
0x2534   :  { %v1944_v60 = vor.u32 1.1754944e-38, %v1943_v2  ;;  %v4635_v54 = vmul.f32 %v12453_v0, %v4634_v17  ;;  %v9699_v37 = vor.u32 1.1754944e-38, %v9698_v6  ;;  %vm4637_vm12 = vweird.f32 %v12274_v29 }
0x2535   :  { %v4299_v59 = vadd.f32 %v11017_v47, %v4298_v53  ;;  %v4641_v53 = vand.u32 2147483647, %v12274_v29  ;;  %vm2275_vm6 = vweird.f32 %v12281_v19  ;;  %v2281_v2 = vand.u32 2147483648, %v12281_v19 }
0x2536   :  { %v11021_v12 = vpop.eup %11020  ;;  %10839 = vmatmul.f32.vlgmr.msrb.gmra.mxu2 %v12389_v52  ;;  %v4636_v41 = vadd.f32 %v12453_v0, %v4635_v54  ;;  %v7674_v40 = vand.u32 2147483647, %v12277_v15 }
0x2537   :  { %v9688_v25 = vmul.f32 %v11021_v12, %v12440_v24  ;;  %v12485_v7 = vpop.xlane.xlu1 %7326  ;;  %10696 = vadd.xlane.f32.xlu1 %v10695_v33  ;;  %v4303_v10 = vsel %vm12476_vm2, %v11017_v47, %v4299_v59  ;;  %v12492_v48 = vpop.eup %11022  ;;  %v1941_v47 = vand.u32 2147483647, %v12259_v32  ;;  %vm9693_vm7 = vweird.f32 %v11021_v12 }
0x2538   :  { %11026 = vrcp.f32 %v12485_v7  ;;  %v4308_v14 = vsel %vm4305_vm5, %v4307_v50, %v4303_v10  ;;  %v12498_v57 = vpop.eup %11024  ;;  %v7666_v4 = vmul.f32 %v12492_v48, %v12277_v15  ;;  %v9696_v32 = vand.u32 2147483647, %v12440_v24  ;;  %vm9694_vm10 = vmor %vm9692_vm8, %vm9693_vm7 }
0x2539   :  { %v9689_v52 = vsub.f32 1.0, %v9688_v25  ;;  %v4462_v30 = vmul.f32 %v4460_v51, %v4308_v14  ;;  %11028 = vrcp.f32 %v12283_v44  ;;  %v12988_v51 = vld [vmem:[#allocation140_spill] sm:$0xff]  ;;  %v2271_v63 = vmul.f32 %v12498_v57, %v12281_v19 }
0x253a   :  { %v12517_v39 = vadd.f32 %v12988_v51, %v7808_v55  ;;  %vm1942_vm9 = vcmp.eq.f32.partialorder %v1941_v47, 8.507059e+37  ;;  %v4643_v24 = vand.u32 2147483648, %v12274_v29  ;;  %v7667_v8 = vsub.f32 1.0, %v7666_v4 }
0x253b   :  { %v9690_v5 = vmul.f32 %v11021_v12, %v9689_v52  ;;  %4464 = vrot.lane.b32.xlu0 %v4462_v30, %s11187_s16  ;;  %v1945_v31 = vsel %vm1942_vm9, %v1944_v60, %v1940_v46  ;;  %vm9697_vm11 = vcmp.eq.f32.partialorder %v9696_v32, 8.507059e+37  ;;  %vm4638_vm2 = vweird.f32 %v12453_v0 }
0x253c   :  { %v2272_v28 = vsub.f32 1.0, %v2271_v63  ;;  %v2099_v26 = vmul.f32 %v12408_v38, %v1945_v31  ;;  %vm12537_vm4 = vcmp.eq.f32.partialorder %v4641_v53, 8.507059e+37  ;;  %v7339_v20 = vand.u32 2147483648, %v12485_v7  ;;  %vm12552_vm1 = vmor %vm4637_vm12, %vm4638_vm2 }
0x253d   :  { %v9691_v9 = vadd.f32 %v11021_v12, %v9690_v5  ;;  %v4644_v61 = vor.u32 1.1754944e-38, %v4643_v24  ;;  %v7668_v50 = vmul.f32 %v12492_v48, %v7667_v8  ;;  %v7337_v10 = vand.u32 2147483647, %v12485_v7 }
0x253e   :  { %v11027_v1 = vpop.eup %11026  ;;  %v2279_v38 = vand.u32 2147483647, %v12281_v19  ;;  %vm7333_vm7 = vweird.f32 %v12485_v7  ;;  %v2273_v55 = vmul.f32 %v12498_v57, %v2272_v28  ;;  %vm7671_vm8 = vweird.f32 %v12492_v48 }
0x253f   :  { %v7329_v58 = vmul.f32 %v11027_v1, %v12485_v7  ;;  %v12526_v34 = vpop.xlane.xlu1 %4967  ;;  %v9695_v35 = vsel %vm9694_vm10, %v11021_v12, %v9691_v9  ;;  %v12530_v49 = vpop.eup %11028  ;;  %vm7334_vm5 = vweird.f32 %v11027_v1  ;;  %v4640_v29 = vsel %vm12552_vm1, %v12453_v0, %v4636_v41 }
0x2540   :  { %11030 = vrcp.f32 %v12526_v34  ;;  %v9700_v13 = vsel %vm9697_vm11, %v9699_v37, %v9695_v35  ;;  %v5307_v25 = vmul.f32 %v12530_v49, %v12283_v44  ;;  %vm7335_vm9 = vmor %vm7333_vm7, %vm7334_vm5  ;;  %v7340_v52 = vor.u32 1.1754944e-38, %v7339_v20 }
0x2541   :  { %v7330_v59 = vsub.f32 1.0, %v7329_v58  ;;  %v9854_v12 = vmul.f32 %v11991_v27, %v9700_v13  ;;  %11032 = vrcp.f32 %v12293_v42  ;;  %v7669_v47 = vadd.f32 %v12492_v48, %v7668_v50 }
0x2542   :  { %v5308_v30 = vsub.f32 1.0, %v5307_v25  ;;  %vm7338_vm10 = vcmp.eq.f32.partialorder %v7337_v10, 8.507059e+37  ;;  %vm2276_vm11 = vweird.f32 %v12498_v57  ;;  %v2274_v6 = vadd.f32 %v12498_v57, %v2273_v55 }
0x2543   :  { %v7331_v33 = vmul.f32 %v11027_v1, %v7330_v59  ;;  %9856 = vrot.lane.b32.xlu2 %v9854_v12, %s11187_s16  ;;  %2101 = vrot.lane.b32.xlu0 %v2099_v26, %s11188_s17  ;;  %vm7670_vm12 = vweird.f32 %v12277_v15  ;;  %v4980_v51 = vand.u32 2147483648, %v12526_v34  ;;  %v4645_v60 = vsel %vm12537_vm4, %v4644_v61, %v4640_v29  ;;  %vm12605_vm4 = vmor %vm2275_vm6, %vm2276_vm11  ;;  %v13006_v29 = vld [vmem:[#allocation144_spill] sm:$0xff] }
0x2544   :  { %vm12580_vm2 = vmor %vm7670_vm12, %vm7671_vm8  ;;  %vm12587_vm1 = vcmp.eq.f32.partialorder %v2279_v38, 8.507059e+37  ;;  %v5309_v15 = vmul.f32 %v12530_v49, %v5308_v30  ;;  %v2282_v63 = vor.u32 1.1754944e-38, %v2281_v2  ;;  %v7677_v37 = vor.u32 1.1754944e-38, %v7676_v22  ;;  %v13008_v22 = vld [vmem:[#allocation94_spill] sm:$0xff] }
0x2545   :  { %v7332_v21 = vadd.f32 %v11027_v1, %v7331_v33  ;;  %vm4974_vm7 = vweird.f32 %v12526_v34  ;;  %vm7675_vm8 = vcmp.eq.f32.partialorder %v7674_v40, 8.507059e+37  ;;  %v4799_v19 = vmul.f32 %v12458_v62, %v4645_v60  ;;  %v13009_v40 = vld [vmem:[#allocation142_spill] sm:$0xff] }
0x2546   :  { %v11031_v23 = vpop.eup %11030  ;;  %v2278_v35 = vsel %vm12605_vm4, %v12498_v57, %v2274_v6  ;;  %v4981_v31 = vor.u32 1.1754944e-38, %v4980_v51  ;;  %v5310_v13 = vadd.f32 %v12530_v49, %v5309_v15  ;;  %vm5311_vm11 = vweird.f32 %v12283_v44 }
0x2547   :  { %v4970_v14 = vmul.f32 %v11031_v23, %v12526_v34  ;;  %v12568_v17 = vpop.xlane.xlu1 %2606  ;;  %v7336_v7 = vsel %vm7335_vm9, %v11027_v1, %v7332_v21  ;;  %vm4975_vm5 = vweird.f32 %v11031_v23  ;;  %v7673_v1 = vsel %vm12580_vm2, %v12492_v48, %v7669_v47  ;;  %v12599_v54 = vpop.eup %11032  ;;  %v13005_v21 = vld [vmem:[#allocation43_spill] sm:$0xff] }
0x2548   :  { %11034 = vrcp.f32 %v12568_v17  ;;  %v7341_v0 = vsel %vm7338_vm10, %v7340_v52, %v7336_v7  ;;  %vm5312_vm9 = vweird.f32 %v12530_v49  ;;  %vm12612_vm10 = vmor %vm4974_vm7, %vm4975_vm5  ;;  %v7678_v59 = vsel %vm7675_vm8, %v7677_v37, %v7673_v1  ;;  %v13010_v1 = vld [vmem:[#allocation145_spill] sm:$0xff] }
0x2549   :  { %v4971_v5 = vsub.f32 1.0, %v4970_v14  ;;  %v7495_v4 = vmul.f32 %v12507_v36, %v7341_v0  ;;  %v4978_v36 = vand.u32 2147483647, %v12526_v34  ;;  %v8003_v41 = vmul.f32 %v12599_v54, %v12293_v42  ;;  %vm12638_vm12 = vmor %vm5311_vm11, %vm5312_vm9 }
0x254a   :  { %v5317_v62 = vand.u32 2147483648, %v12283_v44  ;;  %v5315_v12 = vand.u32 2147483647, %v12283_v44  ;;  %v2619_v26 = vand.u32 2147483648, %v12568_v17  ;;  %v7832_v33 = vmul.f32 %v12517_v39, %v7678_v59  ;;  %v13003_v44 = vld [vmem:[#allocation37_spill] sm:$0xff] }
0x254b   :  { %v4972_v46 = vmul.f32 %v11031_v23, %v4971_v5  ;;  %7497 = vrot.lane.b32.xlu2 %v7495_v4, %s11188_s17  ;;  %10193 = vrot.lane.b32.xlu0 %v12286_v11, %s11188_s17  ;;  %vm4979_vm6 = vcmp.eq.f32.partialorder %v4978_v36, 8.507059e+37  ;;  %v2617_v50 = vand.u32 2147483647, %v12568_v17  ;;  %v2283_v25 = vsel %vm12587_vm1, %v2282_v63, %v2278_v35 }
0x254c   :  { %v2435_v10 = vadd.f32 %v13003_v44, %v12411_v18  ;;  %v8004_v39 = vsub.f32 1.0, %v8003_v41  ;;  %v5314_v38 = vsel %vm12638_vm12, %v12530_v49, %v5310_v13  ;;  %v5318_v55 = vor.u32 1.1754944e-38, %v5317_v62 }
0x254d   :  { %v4973_v58 = vadd.f32 %v11031_v23, %v4972_v46  ;;  %vm2613_vm5 = vweird.f32 %v12568_v17  ;;  %vm5316_vm1 = vcmp.eq.f32.partialorder %v5315_v12, 8.507059e+37  ;;  %v2620_v14 = vor.u32 1.1754944e-38, %v2619_v26 }
0x254e   :  { %v11035_v11 = vpop.eup %11034  ;;  %v2437_v7 = vmul.f32 %v2435_v10, %v2283_v25  ;;  %vm2618_vm7 = vcmp.eq.f32.partialorder %v2617_v50, 8.507059e+37  ;;  %v5319_v30 = vsel %vm5316_vm1, %v5318_v55, %v5314_v38  ;;  %v8005_v5 = vmul.f32 %v12599_v54, %v8004_v39 }
0x254f   :  { %v2609_v24 = vmul.f32 %v11035_v11, %v12568_v17  ;;  %v12621_v8 = vpop.xlane.xlu1 %8342  ;;  %v4977_v34 = vsel %vm12612_vm10, %v11031_v23, %v4973_v58  ;;  %vm2614_vm2 = vweird.f32 %v11035_v11  ;;  %v2773_v23 = vadd.f32 %v13005_v21, %v12447_v16 }
0x2550   :  { %11036 = vrcp.f32 %v12621_v8  ;;  %4801 = vrot.lane.b32.xlu1 %v4799_v19, %s11188_s17  ;;  %v4982_v28 = vsel %vm4979_vm6, %v4981_v31, %v4977_v34  ;;  %vm2615_vm4 = vmor %vm2613_vm5, %vm2614_vm2  ;;  %v8355_v32 = vand.u32 2147483648, %v12621_v8  ;;  %v8353_v60 = vand.u32 2147483647, %v12621_v8  ;;  %v13013_v34 = vld [vmem:[#allocation146_spill] sm:$0xff] }
0x2551   :  { %v2610_v57 = vsub.f32 1.0, %v2609_v24  ;;  %v5136_v45 = vmul.f32 %v12465_v56, %v4982_v28  ;;  %v13004_v56 = vld [vmem:[#allocation95_spill] sm:$0xff]  ;;  %v8006_v9 = vadd.f32 %v12599_v54, %v8005_v5  ;;  %vm8008_vm9 = vweird.f32 %v12599_v54  ;;  %v13012_v24 = vld [vmem:[#allocation149_spill] sm:$0xff] }
0x2552   :  { %v5449_v27 = vadd.f32 %v13004_v56, %v12470_v3  ;;  %v13007_v3 = vld [vmem:[#allocation143_spill] sm:$0xff]  ;;  %v8013_v15 = vand.u32 2147483648, %v12293_v42  ;;  %vm8349_vm10 = vweird.f32 %v12621_v8  ;;  %vm8007_vm6 = vweird.f32 %v12293_v42 }
0x2553   :  { %v2611_v61 = vmul.f32 %v11035_v11, %v2610_v57  ;;  %5138 = vrot.lane.b32.xlu2 %v5136_v45, %s11189_s18  ;;  %7834 = vrot.lane.b32.xlu0 %v7832_v33, %s11189_s18  ;;  %v8073_v52 = vadd.f32 %v13007_v3, %v13006_v29  ;;  %v8011_v63 = vand.u32 2147483647, %v12293_v42  ;;  %v8356_v37 = vor.u32 1.1754944e-38, %v8355_v32  ;;  %vm8009_vm12 = vmor %vm8007_vm6, %vm8008_vm9 }
0x2554   :  { %v5471_v16 = vadd.f32 %v13008_v22, %v5449_v27  ;;  %vm8354_vm2 = vcmp.eq.f32.partialorder %v8353_v60, 8.507059e+37  ;;  %v8010_v35 = vsel %vm8009_vm12, %v12599_v54, %v8006_v9  ;;  %v8014_v31 = vor.u32 1.1754944e-38, %v8013_v15 }
0x2555   :  { %v2612_v2 = vadd.f32 %v11035_v11, %v2611_v61  ;;  %v8097_v4 = vadd.f32 %v13009_v40, %v8073_v52  ;;  %vm8012_vm5 = vcmp.eq.f32.partialorder %v8011_v63, 8.507059e+37  ;;  %vm2442_vm1 = vcmask 228544  }
0x2556   :  { %v11037_v18 = vpop.eup %11036  ;;  %v5473_v46 = vmul.f32 %v5471_v16, %v5319_v30  ;;  %v8015_v42 = vsel %vm8012_vm5, %v8014_v31, %v8010_v35 }
0x2557   :  { %v8345_v47 = vmul.f32 %v11037_v18, %v12621_v8  ;;  %v2616_v49 = vsel %vm2615_vm4, %v11035_v11, %v2612_v2  ;;  %vm8350_vm8 = vweird.f32 %v11037_v18  ;;  %v8121_v53 = vadd.f32 %v13010_v1, %v8097_v4  ;;  %v13011_v11 = vld [vmem:[#allocation147_spill] sm:$0xff] }
0x2558   :  { %2439 = vrot.lane.b32.xlu1 %v2437_v7, %s11189_s18  ;;  %v2621_v17 = vsel %vm2618_vm7, %v2620_v14, %v2616_v49  ;;  %vm8351_vm11 = vmor %vm8349_vm10, %vm8350_vm8  ;;  %vm2780_vm4 = vcmask 261344  }
0x2559   :  { %v8346_v0 = vsub.f32 1.0, %v8345_v47  ;;  %v2775_v6 = vmul.f32 %v2773_v23, %v2621_v17  ;;  %v8145_v48 = vadd.f32 %v13011_v11, %v8121_v53 }
0x255b   :  { %v8347_v51 = vmul.f32 %v11037_v18, %v8346_v0  ;;  %2777 = vrot.lane.b32.xlu2 %v2775_v6, %s11190_s19  ;;  %5475 = vrot.lane.b32.xlu0 %v5473_v46, %s11190_s19  ;;  %v8167_v59 = vadd.f32 %v13013_v34, %v8145_v48 }
0x255d   :  { %v8348_v36 = vadd.f32 %v11037_v18, %v8347_v51  ;;  %v8169_v13 = vmul.f32 %v8167_v59, %v8015_v42 }
0x255f   :  { %v8352_v58 = vsel %vm8351_vm11, %v11037_v18, %v8348_v36 }
0x2560   :  { %v8357_v19 = vsel %vm8354_vm2, %v8356_v37, %v8352_v58  ;;  %10530 = vrot.lane.b32.xlu1 %v12323_v43, %s11189_s18 }
0x2561   :  { %v8508_v8 = vmul.f32 %v13012_v24, %v8357_v19 }
0x2563   :  { %8510 = vst.msk [vmem:[#allocation10 + $0x18] sm:$0xff] %vm85_vm0, %v8508_v8  ;;  %vm2104_vm0 = vcmask 195744  }
0x2567   :  { %v8846_v41 = vpop.permute.xlu1 %8845 }
0x2568   :  { %8848 = vst.msk [vmem:[#allocation10 + $0x18] sm:$0xff] %vm752_vm13, %v8846_v41  ;;  %8171 = vrot.lane.b32.xlu1 %v8169_v13, %s11190_s19 }
0x256f   :  { %v9183_v62 = vpop.permute.xlu1 %9182 }
0x2570   :  { %9185 = vst.msk [vmem:[#allocation10 + $0x18] sm:$0xff] %vm1090_vm14, %v9183_v62 }
0x2577   :  { %v9520_v43 = vpop.permute.xlu1 %9519 }
0x2578   :  { %9522 = vst.msk [vmem:[#allocation10 + $0x18] sm:$0xff] %vm1428_vm3, %v9520_v43 }
0x257f   :  { %v7161_v57 = vpop.permute.xlu1 %7160 }
0x259d   :  { %v9857_v54 = vpop.permute.xlu2 %9856 }
0x259e   :  { %9859 = vst.msk [vmem:[#allocation10 + $0x18] sm:$0xff] %vm1766_vm15, %v9857_v54 }
0x25a5   :  { %v6824_v28 = vpop.permute.xlu0 %6823  ;;  %v7498_v12 = vpop.permute.xlu2 %7497 }
0x25a6   :  { %6826 = vst.msk [vmem:[#allocation10 + $0x10] sm:$0xff] %vm1428_vm3, %v6824_v28  ;;  %v10792_v44 = vpop.f32.mrf.mxu0 }
0x25a7   :  { %7163 = vst.msk [vmem:[#allocation10 + $0x10] sm:$0xff] %vm1766_vm15, %v7161_v57  ;;  %v10816_v38 = vpop.f32.mrf.mxu1 }
0x25a8   :  { %7500 = vst.msk [vmem:[#allocation10 + $0x10] sm:$0xff] %vm2104_vm0, %v7498_v12 }
0x25a9   :  { %v10768_v20 = vpop.f32.mrf.mxu3 }
0x25aa   :  { %v10697_v26 = vpop.xlane.xlu1 %10696 }
0x25ab   :  { %11038 = vrcp.f32 %v10697_v26  ;;  %v10709_v21 = vand.u32 2147483648, %v10697_v26  ;;  %vm10703_vm14 = vweird.f32 %v10697_v26  ;;  %v10707_v55 = vand.u32 2147483647, %v10697_v26 }
0x25ad   :  { %v4465_v45 = vpop.permute.xlu0 %4464  ;;  %v10710_v52 = vor.u32 1.1754944e-38, %v10709_v21  ;;  %v5139_v22 = vpop.permute.xlu2 %5138 }
0x25ae   :  { %4467 = vst.msk [vmem:[#allocation10 + $0x8] sm:$0xff] %vm1766_vm15, %v4465_v45  ;;  %vm10708_vm15 = vcmp.eq.f32.partialorder %v10707_v55, 8.507059e+37 }
0x25b1   :  { %v11039_v33 = vpop.eup %11038  ;;  %v10742_v50 = vpop.f32.mrf.mxu2 }
0x25b2   :  { %v10699_v61 = vmul.f32 %v11039_v33, %v10697_v26  ;;  %v10769_v25 = vadd.f32 %v10768_v20, %v10742_v50  ;;  %vm10704_vm13 = vweird.f32 %v11039_v33  ;;  %v10862_v14 = vpop.f32.mrf.mxu3 }
0x25b3   :  { %vm10705_vm3 = vmor %vm10703_vm14, %vm10704_vm13 }
0x25b4   :  { %v10700_v10 = vsub.f32 1.0, %v10699_v61  ;;  %v10793_v56 = vadd.f32 %v10792_v44, %v10769_v25 }
0x25b5   :  { %v2102_v39 = vpop.permute.xlu0 %2101  ;;  %v2778_v0 = vpop.permute.xlu2 %2777 }
0x25b6   :  { %v10701_v27 = vmul.f32 %v11039_v33, %v10700_v10  ;;  %2105 = vst.msk [vmem:[#allocation10] sm:$0xff] %vm2104_vm0, %v2102_v39  ;;  %v10817_v2 = vadd.f32 %v10816_v38, %v10793_v56 }
0x25b8   :  { %v10702_v23 = vadd.f32 %v11039_v33, %v10701_v27 }
0x25b9   :  { %v10840_v18 = vpop.f32.mrf.mxu2 }
0x25ba   :  { %v10706_v29 = vsel %vm10705_vm3, %v11039_v33, %v10702_v23  ;;  %v10841_v3 = vadd.f32 %v10840_v18, %v10817_v2 }
0x25bb   :  { %v10711_v47 = vsel %vm10708_vm15, %v10710_v52, %v10706_v29 }
0x25bc   :  { %v10863_v7 = vadd.f32 %v10862_v14, %v10841_v3 }
0x25bd   :  { %v10194_v49 = vpop.permute.xlu0 %10193 }
0x25be   :  { %v10865_v30 = vmul.f32 %v10863_v7, %v10711_v47  ;;  %10196 = vst.msk [vmem:[#allocation10 + $0x18] sm:$0xff] %vm2104_vm0, %v10194_v49 }
0x25c0   :  { %10867 = vrot.lane.b32.xlu2 %v10865_v30, %s11190_s19 }
0x25c2   :  { %v4802_v16 = vpop.permute.xlu1 %4801 }
0x25c3   :  { %4804 = vst.msk [vmem:[#allocation10 + $0x8] sm:$0xff] %vm2104_vm0, %v4802_v16 }
0x25c4   :  { %5141 = vst.msk [vmem:[#allocation10 + $0x8] sm:$0xff] %vm2442_vm1, %v5139_v22 }
0x25c5   :  { %v7835_v5 = vpop.permute.xlu0 %7834 }
0x25c6   :  { %7837 = vst.msk [vmem:[#allocation10 + $0x10] sm:$0xff] %vm2442_vm1, %v7835_v5 }
0x25ca   :  { %v2440_v17 = vpop.permute.xlu1 %2439 }
0x25cb   :  { %2443 = vst.msk [vmem:[#allocation10] sm:$0xff] %vm2442_vm1, %v2440_v17 }
0x25cc   :  { %2781 = vst.msk [vmem:[#allocation10] sm:$0xff] %vm2780_vm4, %v2778_v0 }
0x25cd   :  { %v5476_v6 = vpop.permute.xlu0 %5475 }
0x25ce   :  { %5478 = vst.msk [vmem:[#allocation10 + $0x8] sm:$0xff] %vm2780_vm4, %v5476_v6 }
0x25d2   :  { %v10531_v40 = vpop.permute.xlu1 %10530 }
0x25d3   :  { %10533 = vst.msk [vmem:[#allocation10 + $0x18] sm:$0xff] %vm2442_vm1, %v10531_v40 }
0x25da   :  { %v8172_v4 = vpop.permute.xlu1 %8171 }
0x25db   :  { %8174 = vst.msk [vmem:[#allocation10 + $0x10] sm:$0xff] %vm2780_vm4, %v8172_v4 }
0x261a   :  { %v10868_v32 = vpop.permute.xlu2 %10867 }
0x261b   :  { %10870 = vst.msk [vmem:[#allocation10 + $0x18] sm:$0xff] %vm2780_vm4, %v10868_v32 }
0x261c   :  { %10883 = dma.vmem_to_hbm [thread:$0]  %s10876_s21, 512, %s10878_s26, [#allocation4], %s11173_s23, %s11173_s23, %s11174_s24  }
0x261d   :  { %11170 = dma.done.wait [#allocation4], 512  }
0x261e   :  { %11171 = vsyncadd [#allocation4], 4294966784 }
0x261f   :  { %10888 = vsyncpa [#allocation3], 1 }
0x2620   :  { %10889 = vsyncpa [#allocation6], 1 }
0x2621   :  { %10890 = vsyncpa [#allocation9], 1 }
0x2622   :  { %10891 = vsyncpa [#allocation4], 1 }

</bundles_post_ra>
